<compile_context>
chip_gen: v7x
topology: tpu7x:2x2x1
jax: 0.10.0
libtpu: 0.0.40
codegen_flags: <defaults>
</compile_context>

<pallas_src>
import functools
import math

import jax
import jax.numpy as jnp
from jax.experimental import pallas as pl
from jax.experimental.pallas import tpu as pltpu

C_CLASSES = 3
P_POOL = 7
IN_FEATURES = 256 * P_POOL * P_POOL   # 12544
HIDDEN = 1024
HEAD_PAD = 128                        # combined head output padded to one lane width


def _round_up(x, m):
    return ((x + m - 1) // m) * m


def _pick_tk(k_dim, max_tk):
    """Largest multiple of 128 <= max_tk that divides k_dim (fallback: full K).

    NOTE: relies on IN_FEATURES (12544) having 128-multiple divisors; the
    fallback to full K would blow VMEM for a huge non-divisible K (not
    reachable with this module's fixed feature size).
    """
    best = None
    t = 128
    while t <= min(k_dim, max_tk):
        if k_dim % t == 0:
            best = t
        t += 128
    return best if best is not None else k_dim


@functools.lru_cache(maxsize=1)
def _hw_config():
    """Host-side, one-time TPU-generation detection -> tiling / dtype policy."""
    kind = ""
    try:
        kind = jax.devices()[0].device_kind.lower()
    except Exception:
        pass
    vmem_bytes = None
    try:
        vmem_bytes = int(pltpu.get_tpu_info().vmem_capacity_bytes)
    except Exception:
        vmem_bytes = None

    is_v7 = ("v7" in kind) or ("tpu7" in kind)
    known_big_vmem = any(t in kind for t in ("v5", "v6")) or (
        vmem_bytes is not None and vmem_bytes >= 100 * (1 << 20))

    if known_big_vmem and not is_v7:
        # v5e / v6e: 128 MiB physical VMEM, int-capable weight path.
        return dict(quantize_w1=True, max_tk=6272,
                    vmem_limit_bytes=72 * (1 << 20), is_v7x=False)
    # v7x (64 MiB VMEM) or unknown: conservative tiling, bf16 weights.
    return dict(quantize_w1=False, max_tk=1792,
                vmem_limit_bytes=32 * (1 << 20), is_v7x=is_v7)


# ---------------------------------------------------------------------------
# Fused kernel: grid = (M tiles, K tiles), K innermost reduction.
#   k == 0      : acc = broadcast(b1 / s1)                     (b1 folded in)
#   k-loop body : acc += x_tile(bf16) @ w1_tile(->bf16)        (f32 accumulate)
#   k == last   : h1 = relu(acc*s1); h2 = relu(h1@w2+b2); out = h2@Whead+bhead
# ---------------------------------------------------------------------------
def _box_head_kernel(x_ref, w1_ref, s1_ref, b1p_ref, w2_ref, b2_ref,
                     wh_ref, bh_ref, out_ref, acc_ref):
    k = pl.program_id(1)

    @pl.when(k == 0)
    def _():
        acc_ref[...] = jnp.broadcast_to(b1p_ref[...], acc_ref.shape)

    acc_ref[...] += jnp.dot(x_ref[...].astype(jnp.bfloat16),
                            w1_ref[...].astype(jnp.bfloat16),
                            preferred_element_type=jnp.float32)

    @pl.when(k == pl.num_programs(1) - 1)
    def _():
        h1 = jnp.maximum(acc_ref[...] * s1_ref[...], 0.0)
        h2 = jnp.maximum(
            jnp.dot(h1.astype(jnp.bfloat16), w2_ref[...],
                    preferred_element_type=jnp.float32) + b2_ref[...], 0.0)
        out_ref[...] = (jnp.dot(h2.astype(jnp.bfloat16), wh_ref[...],
                                preferred_element_type=jnp.float32)
                        + bh_ref[...])


def _fused_box_head(x, w1, s1, b1p, w2, b2, wh, bh, *,
                    tm, tk, vmem_limit_bytes, m_semantics):
    n, k_dim = x.shape
    mt = pl.cdiv(n, tm)
    kt = k_dim // tk          # tk divides k_dim by construction
    return pl.pallas_call(
        _box_head_kernel,
        out_shape=jax.ShapeDtypeStruct((n, HEAD_PAD), jnp.float32),
        grid_spec=pltpu.PrefetchScalarGridSpec(
            num_scalar_prefetch=0,
            grid=(mt, kt),
            in_specs=[
                pl.BlockSpec((tm, tk), lambda m, k: (m, k)),            # x tile (bf16/f32)
                pl.BlockSpec((tk, HIDDEN), lambda m, k: (k, 0)),        # w1 tile (int8/bf16)
                pl.BlockSpec((1, HIDDEN), lambda m, k: (0, 0)),         # s1 (resident)
                pl.BlockSpec((1, HIDDEN), lambda m, k: (0, 0)),         # b1/s1 (resident)
                pl.BlockSpec((HIDDEN, HIDDEN), lambda m, k: (0, 0)),    # w2 bf16 (resident)
                pl.BlockSpec((1, HIDDEN), lambda m, k: (0, 0)),         # b2 (resident)
                pl.BlockSpec((HIDDEN, HEAD_PAD), lambda m, k: (0, 0)),  # packed head W (bf16)
                pl.BlockSpec((1, HEAD_PAD), lambda m, k: (0, 0)),       # packed head b
            ],
            out_specs=pl.BlockSpec((tm, HEAD_PAD), lambda m, k: (m, 0)),
            scratch_shapes=[pltpu.VMEM((tm, HIDDEN), jnp.float32)],
        ),
        compiler_params=pltpu.CompilerParams(
            dimension_semantics=(m_semantics, "arbitrary"),
            vmem_limit_bytes=vmem_limit_bytes,
        ),
    )(x, w1, s1, b1p, w2, b2, wh, bh)


# ---------------------------------------------------------------------------
# Parameter construction (synthetic, matches torch nn.Linear init ranges) and
# one-time kernel-ready packing (bf16 / int8 streaming formats, packed head).
# ---------------------------------------------------------------------------
def init_params(key, classes=C_CLASSES, p=P_POOL):
    in_f = 256 * p * p
    ks = jax.random.split(key, 8)

    def lin(kw, kb, fan_in, fan_out):
        bound = 1.0 / math.sqrt(fan_in)
        w = jax.random.uniform(kw, (fan_in, fan_out), jnp.float32, -bound, bound)
        b = jax.random.uniform(kb, (1, fan_out), jnp.float32, -bound, bound)
        return w, b

    w1, b1 = lin(ks[0], ks[1], in_f, HIDDEN)
    w2, b2 = lin(ks[2], ks[3], HIDDEN, HIDDEN)
    wc, bc = lin(ks[4], ks[5], HIDDEN, classes + 1)
    wr, br = lin(ks[6], ks[7], HIDDEN, 4 * classes)
    return dict(w1=w1, b1=b1, w2=w2, b2=b2, wc=wc, bc=bc, wr=wr, br=br)


def prepare_params(params, classes=C_CLASSES, quantize_w1=None):
    """One-time prep: narrow streaming weights + combined lane-padded head."""
    if quantize_w1 is None:
        quantize_w1 = _hw_config()["quantize_w1"]
    n_cls = classes + 1
    n_reg = 4 * classes
    assert n_cls + n_reg <= HEAD_PAD

    w1 = params["w1"]
    if quantize_w1:
        # Per-output-channel symmetric int8 (storage/DMA compression only;
        # the kernel upcasts to bf16 post-DMA and accumulates in f32).
        s1 = jnp.maximum(jnp.max(jnp.abs(w1), axis=0, keepdims=True), 1e-8) / 127.0
        w1_k = jnp.clip(jnp.round(w1 / s1), -127.0, 127.0).astype(jnp.int8)
    else:
        s1 = jnp.ones((1, HIDDEN), jnp.float32)
        w1_k = w1.astype(jnp.bfloat16)
    b1p = (params["b1"] / s1).astype(jnp.float32)   # b1 folded into acc init

    wh = jnp.zeros((HIDDEN, HEAD_PAD), jnp.float32)
    wh = wh.at[:, :n_cls].set(params["wc"])
    wh = wh.at[:, n_cls:n_cls + n_reg].set(params["wr"])
    bh = jnp.zeros((1, HEAD_PAD), jnp.float32)
    bh = bh.at[:, :n_cls].set(params["bc"])
    bh = bh.at[:, n_cls:n_cls + n_reg].set(params["br"])

    return dict(w1=w1_k, s1=s1.astype(jnp.float32), b1p=b1p,
                w2=params["w2"].astype(jnp.bfloat16), b2=params["b2"],
                wh=wh.astype(jnp.bfloat16), bh=bh)


@functools.partial(jax.jit, static_argnames=("classes",))
def box_head_forward(feature_vectors, prepped, classes=C_CLASSES):
    cfg = _hw_config()
    n, k_dim = feature_vectors.shape
    n_cls = classes + 1
    n_reg = 4 * classes

    # Row tile aligned to the dtype's native sublane packing (f32:8, bf16:16).
    itemsize = jnp.dtype(feature_vectors.dtype).itemsize
    row_align = 8 * max(1, 4 // itemsize)
    tm = min(128, _round_up(n, row_align))
    tk = _pick_tk(k_dim, max_tk=cfg["max_tk"])

    # On v7x an M-axis megacore split duplicates w1 streaming across both
    # TensorCores; keep M on one core while the kernel is weight-DMA-bound.
    m_sem = "arbitrary" if (cfg["is_v7x"] and n < HIDDEN) else "parallel"

    out = _fused_box_head(feature_vectors, prepped["w1"], prepped["s1"],
                          prepped["b1p"], prepped["w2"], prepped["b2"],
                          prepped["wh"], prepped["bh"],
                          tm=tm, tk=tk,
                          vmem_limit_bytes=cfg["vmem_limit_bytes"],
                          m_semantics=m_sem)
    class_logits = out[:, :n_cls]
    box_preds = out[:, n_cls:n_cls + n_reg]
    return class_logits, box_preds


def box_head_reference(x, prepped, classes=C_CLASSES):
    """Pure-JAX mirror of the kernel's numerics (same narrow formats)."""
    xb = x.astype(jnp.bfloat16)
    acc = prepped["b1p"] + jnp.dot(xb, prepped["w1"].astype(jnp.bfloat16),
                                   preferred_element_type=jnp.float32)
    h1 = jnp.maximum(acc * prepped["s1"], 0.0)
    h2 = jnp.maximum(
        jnp.dot(h1.astype(jnp.bfloat16), prepped["w2"],
                preferred_element_type=jnp.float32) + prepped["b2"], 0.0)
    out = jnp.dot(h2.astype(jnp.bfloat16), prepped["wh"],
                  preferred_element_type=jnp.float32) + prepped["bh"]
    n_cls = classes + 1
    n_reg = 4 * classes
    return out[:, :n_cls], out[:, n_cls:n_cls + n_reg]


# TODO(synk): non-forward helpers (MultiScaleRoiAlign / roi_align, NMS,
# create_ground_truth*, compute_loss, postprocess_detections*) are not part of
# forward() and are not implemented here.


if __name__ == "__main__":
    key = jax.random.PRNGKey(0)
    k_x, k_p = jax.random.split(key)

    N = 16  # number of ROI feature vectors (small batch)
    # Upstream feature extractor / ROIAlign is assumed to emit bf16 features;
    # stream them straight into the kernel (half the x HBM bytes).
    feature_vectors = jax.random.normal(
        k_x, (N, IN_FEATURES), jnp.float32).astype(jnp.bfloat16)

    params = init_params(k_p)
    prepped = prepare_params(params)

    class_logits, box_preds = box_head_forward(feature_vectors, prepped)
    jax.block_until_ready((class_logits, box_preds))

    ref_logits, ref_boxes = box_head_reference(feature_vectors, prepped)

    assert class_logits.shape == (N, C_CLASSES + 1)
    assert box_preds.shape == (N, 4 * C_CLASSES)
    assert jnp.allclose(class_logits, ref_logits, atol=5e-3, rtol=5e-3), float(
        jnp.max(jnp.abs(class_logits - ref_logits)))
    assert jnp.allclose(box_preds, ref_boxes, atol=5e-3, rtol=5e-3), float(
        jnp.max(jnp.abs(box_preds - ref_boxes)))

    print("KERNEL_OK")
</pallas_src>

<mosaic_0001>
module attributes {stable_mosaic.version = 11 : i64} {
  func.func @_box_head_kernel(%arg0: i32, %arg1: i32, %arg2: memref<16x1792xbf16, #tpu.memory_space<vmem>>, %arg3: memref<1792x1024xbf16, #tpu.memory_space<vmem>>, %arg4: memref<1x1024xf32, #tpu.memory_space<vmem>>, %arg5: memref<1x1024xf32, #tpu.memory_space<vmem>>, %arg6: memref<1024x1024xbf16, #tpu.memory_space<vmem>>, %arg7: memref<1x1024xf32, #tpu.memory_space<vmem>>, %arg8: memref<1024x128xbf16, #tpu.memory_space<vmem>>, %arg9: memref<1x128xf32, #tpu.memory_space<vmem>>, %arg10: memref<16x128xf32, #tpu.memory_space<vmem>>, %arg11: memref<16x1024xf32, #tpu.memory_space<vmem>>) attributes {dimension_semantics = [#tpu.dimension_semantics<parallel>, #tpu.dimension_semantics<arbitrary>], iteration_bounds = array<i64: 1, 7>, scalar_prefetch = 0 : i64, scratch_operands = 1 : i64, tpu.core_type = #tpu.core_type<tc>, window_params = [{transform_indices = @transform_0, window_bounds = array<i64: 16, 1792>}, {transform_indices = @transform_1, window_bounds = array<i64: 1792, 1024>}, {pipeline_mode = #tpu.pipeline_mode<synchronous>, transform_indices = @transform_2, window_bounds = array<i64: 1, 1024>}, {pipeline_mode = #tpu.pipeline_mode<synchronous>, transform_indices = @transform_3, window_bounds = array<i64: 1, 1024>}, {pipeline_mode = #tpu.pipeline_mode<synchronous>, transform_indices = @transform_4, window_bounds = array<i64: 1024, 1024>}, {pipeline_mode = #tpu.pipeline_mode<synchronous>, transform_indices = @transform_5, window_bounds = array<i64: 1, 1024>}, {pipeline_mode = #tpu.pipeline_mode<synchronous>, transform_indices = @transform_6, window_bounds = array<i64: 1024, 128>}, {pipeline_mode = #tpu.pipeline_mode<synchronous>, transform_indices = @transform_7, window_bounds = array<i64: 1, 128>}, {transform_indices = @transform_8, window_bounds = array<i64: 16, 128>}]} {
    %c0_i32 = arith.constant 0 : i32
    %0 = arith.cmpi eq, %arg1, %c0_i32 : i32
    %1 = arith.extui %0 : i1 to i32
    %c0_i32_0 = arith.constant 0 : i32
    %2 = arith.cmpi ne, %1, %c0_i32_0 : i32
    scf.if %2 {
      %c0_9 = arith.constant 0 : index
      %c0_10 = arith.constant 0 : index
      %12 = vector.load %arg5[%c0_9, %c0_10] : memref<1x1024xf32, #tpu.memory_space<vmem>>, vector<1x1024xf32>
      %13 = vector.shape_cast %12 : vector<1x1024xf32> to vector<1x1024xf32>
      %14 = vector.broadcast %13 : vector<1x1024xf32> to vector<16x1024xf32>
      %c0_11 = arith.constant 0 : index
      %c0_12 = arith.constant 0 : index
      %15 = vector.load %arg11[%c0_11, %c0_12] : memref<16x1024xf32, #tpu.memory_space<vmem>>, vector<16x1024xf32>
      tpu.vector_store %arg11[%c0_11, %c0_12], %14 {strides = array<i32>} : memref<16x1024xf32, #tpu.memory_space<vmem>>, vector<16x1024xf32>,
    } else {
    }
    %c0 = arith.constant 0 : index
    %c0_1 = arith.constant 0 : index
    %3 = vector.load %arg11[%c0, %c0_1] : memref<16x1024xf32, #tpu.memory_space<vmem>>, vector<16x1024xf32>
    %c0_2 = arith.constant 0 : index
    %c0_3 = arith.constant 0 : index
    %4 = vector.load %arg2[%c0_2, %c0_3] : memref<16x1792xbf16, #tpu.memory_space<vmem>>, vector<16x1792xbf16>
    %c0_4 = arith.constant 0 : index
    %c0_5 = arith.constant 0 : index
    %5 = vector.load %arg3[%c0_4, %c0_5] : memref<1792x1024xbf16, #tpu.memory_space<vmem>>, vector<1792x1024xbf16>
    %cst = arith.constant dense<0.000000e+00> : vector<16x1024xf32>
    %6 = tpu.matmul %4, %5, %cst {dimension_numbers = #tpu.dot_dimension_numbers<[1], [0], [0], [1], [0, 0, 1, 1], [], []>} : vector<16x1792xbf16>, vector<1792x1024xbf16>, vector<16x1024xf32> -> vector<16x1024xf32>
    %7 = arith.addf %3, %6 : vector<16x1024xf32>
    %c0_6 = arith.constant 0 : index
    %c0_7 = arith.constant 0 : index
    %8 = vector.load %arg11[%c0_6, %c0_7] : memref<16x1024xf32, #tpu.memory_space<vmem>>, vector<16x1024xf32>
    tpu.vector_store %arg11[%c0_6, %c0_7], %7 {strides = array<i32>} : memref<16x1024xf32, #tpu.memory_space<vmem>>, vector<16x1024xf32>,
    %c6_i32 = arith.constant 6 : i32
    %9 = arith.cmpi eq, %arg1, %c6_i32 : i32
    %10 = arith.extui %9 : i1 to i32
    %c0_i32_8 = arith.constant 0 : i32
    %11 = arith.cmpi ne, %10, %c0_i32_8 : i32
    scf.if %11 {
      %c0_9 = arith.constant 0 : index
      %c0_10 = arith.constant 0 : index
      %12 = vector.load %arg11[%c0_9, %c0_10] : memref<16x1024xf32, #tpu.memory_space<vmem>>, vector<16x1024xf32>
      %c0_11 = arith.constant 0 : index
      %c0_12 = arith.constant 0 : index
      %13 = vector.load %arg4[%c0_11, %c0_12] : memref<1x1024xf32, #tpu.memory_space<vmem>>, vector<1x1024xf32>
      %14 = vector.broadcast %13 : vector<1x1024xf32> to vector<16x1024xf32>
      %15 = arith.mulf %12, %14 : vector<16x1024xf32>
      %cst_13 = arith.constant 0.000000e+00 : f32
      %16 = vector.broadcast %cst_13 : f32 to vector<16x1024xf32>
      %17 = arith.maximumf %15, %16 : vector<16x1024xf32>
      %18 = arith.truncf %17 : vector<16x1024xf32> to vector<16x1024xbf16>
      %c0_14 = arith.constant 0 : index
      %c0_15 = arith.constant 0 : index
      %19 = vector.load %arg6[%c0_14, %c0_15] : memref<1024x1024xbf16, #tpu.memory_space<vmem>>, vector<1024x1024xbf16>
      %cst_16 = arith.constant dense<0.000000e+00> : vector<16x1024xf32>
      %20 = tpu.matmul %18, %19, %cst_16 {dimension_numbers = #tpu.dot_dimension_numbers<[1], [0], [0], [1], [0, 0, 1, 1], [], []>} : vector<16x1024xbf16>, vector<1024x1024xbf16>, vector<16x1024xf32> -> vector<16x1024xf32>
      %c0_17 = arith.constant 0 : index
      %c0_18 = arith.constant 0 : index
      %21 = vector.load %arg7[%c0_17, %c0_18] : memref<1x1024xf32, #tpu.memory_space<vmem>>, vector<1x1024xf32>
      %22 = vector.broadcast %21 : vector<1x1024xf32> to vector<16x1024xf32>
      %23 = arith.addf %20, %22 : vector<16x1024xf32>
      %cst_19 = arith.constant 0.000000e+00 : f32
      %24 = vector.broadcast %cst_19 : f32 to vector<16x1024xf32>
      %25 = arith.maximumf %23, %24 : vector<16x1024xf32>
      %26 = arith.truncf %25 : vector<16x1024xf32> to vector<16x1024xbf16>
      %c0_20 = arith.constant 0 : index
      %c0_21 = arith.constant 0 : index
      %27 = vector.load %arg8[%c0_20, %c0_21] : memref<1024x128xbf16, #tpu.memory_space<vmem>>, vector<1024x128xbf16>
      %cst_22 = arith.constant dense<0.000000e+00> : vector<16x128xf32>
      %28 = tpu.matmul %26, %27, %cst_22 {dimension_numbers = #tpu.dot_dimension_numbers<[1], [0], [0], [1], [0, 0, 1, 1], [], []>} : vector<16x1024xbf16>, vector<1024x128xbf16>, vector<16x128xf32> -> vector<16x128xf32>
      %c0_23 = arith.constant 0 : index
      %c0_24 = arith.constant 0 : index
      %29 = vector.load %arg9[%c0_23, %c0_24] : memref<1x128xf32, #tpu.memory_space<vmem>>, vector<1x128xf32>
      %30 = vector.broadcast %29 : vector<1x128xf32> to vector<16x128xf32>
      %31 = arith.addf %28, %30 : vector<16x128xf32>
      %c0_25 = arith.constant 0 : index
      %c0_26 = arith.constant 0 : index
      %32 = vector.load %arg10[%c0_25, %c0_26] : memref<16x128xf32, #tpu.memory_space<vmem>>, vector<16x128xf32>
      tpu.vector_store %arg10[%c0_25, %c0_26], %31 {strides = array<i32>} : memref<16x128xf32, #tpu.memory_space<vmem>>, vector<16x128xf32>,
    } else {
    }
    return
  }
  func.func @transform_0(%arg0: i32, %arg1: i32) -> (i32, i32) {
    %c0_i32 = arith.constant 0 : i32
    return %arg0, %arg1 : i32, i32
  }
  func.func @transform_1(%arg0: i32, %arg1: i32) -> (i32, i32) {
    %c0_i32 = arith.constant 0 : i32
    %c0_i32_0 = arith.constant 0 : i32
    return %arg1, %c0_i32 : i32, i32
  }
  func.func @transform_2(%arg0: i32, %arg1: i32) -> (i32, i32) {
    %c0_i32 = arith.constant 0 : i32
    %c0_i32_0 = arith.constant 0 : i32
    %c0_i32_1 = arith.constant 0 : i32
    return %c0_i32, %c0_i32_0 : i32, i32
  }
  func.func @transform_3(%arg0: i32, %arg1: i32) -> (i32, i32) {
    %c0_i32 = arith.constant 0 : i32
    %c0_i32_0 = arith.constant 0 : i32
    %c0_i32_1 = arith.constant 0 : i32
    return %c0_i32, %c0_i32_0 : i32, i32
  }
  func.func @transform_4(%arg0: i32, %arg1: i32) -> (i32, i32) {
    %c0_i32 = arith.constant 0 : i32
    %c0_i32_0 = arith.constant 0 : i32
    %c0_i32_1 = arith.constant 0 : i32
    return %c0_i32, %c0_i32_0 : i32, i32
  }
  func.func @transform_5(%arg0: i32, %arg1: i32) -> (i32, i32) {
    %c0_i32 = arith.constant 0 : i32
    %c0_i32_0 = arith.constant 0 : i32
    %c0_i32_1 = arith.constant 0 : i32
    return %c0_i32, %c0_i32_0 : i32, i32
  }
  func.func @transform_6(%arg0: i32, %arg1: i32) -> (i32, i32) {
    %c0_i32 = arith.constant 0 : i32
    %c0_i32_0 = arith.constant 0 : i32
    %c0_i32_1 = arith.constant 0 : i32
    return %c0_i32, %c0_i32_0 : i32, i32
  }
  func.func @transform_7(%arg0: i32, %arg1: i32) -> (i32, i32) {
    %c0_i32 = arith.constant 0 : i32
    %c0_i32_0 = arith.constant 0 : i32
    %c0_i32_1 = arith.constant 0 : i32
    return %c0_i32, %c0_i32_0 : i32, i32
  }
  func.func @transform_8(%arg0: i32, %arg1: i32) -> (i32, i32) {
    %c0_i32 = arith.constant 0 : i32
    %c0_i32_0 = arith.constant 0 : i32
    return %arg0, %c0_i32 : i32, i32
  }
}

</mosaic_0001>

<bundles_post_ra>
// kernel: box_head_forward.1
= control target key start
LH: loop header
LB: loop body
LE: loop exit
PB: predicated region body
PF: predicated region fallthrough
CT: control target
= control target key end

     0   :  { %s15760_s0 = inlined_call_operand.hbm [shape: bf16[16,12544], index: 0, kind: input, shape index: {}]   ;;  %s15761_s1 = inlined_call_operand.hbm [shape: bf16[12544,1024], index: 1, kind: input, shape index: {}]   ;;  %s15762_s2 = inlined_call_operand.hbm [shape: f32[1,1024], index: 2, kind: input, shape index: {}]   ;;  %s15763_s3 = inlined_call_operand.hbm [shape: f32[1,1024], index: 3, kind: input, shape index: {}]   ;;  %s15764_s4 = inlined_call_operand.hbm [shape: bf16[1024,1024], index: 4, kind: input, shape index: {}]   ;;  %s15765_s5 = inlined_call_operand.hbm [shape: f32[1,1024], index: 5, kind: input, shape index: {}]   ;;  %s15766_s6 = inlined_call_operand.hbm [shape: bf16[1024,128], index: 6, kind: input, shape index: {}]   ;;  %s15767_s7 = inlined_call_operand.hbm [shape: f32[1,128], index: 7, kind: input, shape index: {}]   ;;  %s15768_s8 = inlined_call_operand.vmem [shape: f32[16,128], index: 8, kind: output, shape index: {}]  }
   0x1   :  { %15775 = sst [smem:[#allocation22_spill]] %s15760_s0 }
   0x2   :  { %15776 = sst [smem:[#allocation23_spill]] %s15762_s2 }
   0x3   :  { %15777 = sst [smem:[#allocation24_spill]] %s15763_s3 }
   0x4   :  { %15778 = sst [smem:[#allocation25_spill]] %s15764_s4 }
   0x5   :  { %15779 = sst [smem:[#allocation26_spill]] %s15765_s5 }
   0x6   :  { %15780 = sst [smem:[#allocation27_spill]] %s15766_s6 }
   0x7   :  { %13 = vsyncpa [#allocation4], 0 }
   0x8   :  { %15 = vsyncpa [#allocation4 + $0x1], 0 }
   0x9   :  { %16 = vsyncpa [#allocation6], 0 }
   0xa   :  { %18 = vsyncpa [#allocation6 + $0x1], 0 }
   0xb   :  { %19 = vsyncpa [#allocation9], 0 }
   0xc   :  { %20 = vsyncpa [#allocation12], 0 }
   0xd   :  { %21 = vsyncpa [#allocation15], 0  ;;  %s14367_s27 = smov 0   ;;  %s14369_s28 = smov 0  }
   0xe   :  { %s14371_s29 = smov 0   ;;  %s14373_s30 = smov 0  }
   0xf   :  { %s14375_s9 = smov 0   ;;  %s14377_s10 = smov 0  }
  0x10 LB: > { %s15772_s11 = sadd.s32 4294967295, %s14305_s10   ;;  %p12012_p0 = scmp.ge.s32.totalorder %s14305_s10, 1  ;;  %s14305_s10 = sphi %s14377_s10, %s27_s10   ;;  %s14301_s9 = sphi %s14375_s9, %s15803_s9   ;;  %s14297_s30 = sphi %s14373_s30, %s15802_s30   ;;  %s14293_s29 = sphi %s14371_s29, %s15801_s29   ;;  %s14289_s28 = sphi %s14369_s28, %s15800_s28   ;;  %s14285_s27 = sphi %s14367_s27, %s15799_s27  }
  0x11   : > { %p14401_p1 = scmp.eq.s32.totalorder %s15772_s11, 0  ;;  %p250_p2 = scmp.lt.s32.totalorder %s14305_s10, 8 }
  0x12   : > { %s14307_s14 = smov [#allocation7]   ;;  %s14308_s16 = smov [#allocation8]  }
  0x13   : > { %s15781_s12 = scalar_select %p14401_p1, 1, 0 }
  0x14   : > { %p14406_p3 = pnand %p12012_p0, %p250_p2  ;;  %s263_s15 = sshll.u32 %s14307_s14, 4  ;;  %s264_s15 = int_to_ptr.vmem [resolvable:$true] %s263_s15 }
  0x15   : > { %s274_s17 = sshll.u32 %s14308_s16, 4  ;;  %s14309_s19 = smov [#allocation11]   ;;  %s14418_s17 = int_to_ptr.vmem [resolvable:$true] %s274_s17 }
  0x16   : > { %s15782_s13 = scalar_select %p14406_p3, 1, 0 }
  0x17   : > { %p13807_p4 = pneg %p14406_p3  ;;  %s298_s20 = sshll.u32 %s14309_s19, 4  ;;  %s14420_s20 = int_to_ptr.vmem [resolvable:$true] %s298_s20 }
  0x18   : > { %s15784_s2 = sld [smem:[#allocation23_spill]] }
  0x19   : > { %p14414_p5 = pnand %p13807_p4, %p14401_p1 }
  0x1b   : > { %p14430_p7 = pneg %p14414_p5 }
  0x1e   : > { %s14007_s23 = scalar_lea.hbm %s15784_s2, 128 }
  0x1f   : > { %p14008_p6 = scmp.ne.s32.totalorder %s15784_s2, %s14007_s23  ;;  %p14014_p10 = scmp.lt.u32.totalorder %s14007_s23, %s15784_s2 }
  0x21   : > { %p14010_p8 = pnand %p14430_p7, %p14008_p6 }
  0x23   : > { %p14011_p9 = pneg %p14010_p8 }
  0x25   : > { %p14016_p11 = pnand %p14014_p10, %p14011_p9 }
  0x27   : > { %14019 = shalt.err (!%p14016_p11)
}
  0x28   : > { %s14020_s19 = scalar_lea.vmem %s264_s15, 128  ;;  %p14028_p2 = scmp.lt.s32.totalorder %s264_s15, %s264_s15 }
  0x29   : > { %p14021_p12 = scmp.ne.s32.totalorder %s264_s15, %s14020_s19  ;;  %p14029_p4 = scmp.lt.s32.totalorder %s14020_s19, %s14020_s19 }
  0x2b   : > { %p14023_p13 = pnand %p14021_p12, %p14430_p7  ;;  %p14030_p3 = por %p14029_p4, %p14028_p2 }
  0x2d   : > { %p14024_p0 = pneg %p14023_p13 }
  0x2f   : > { %p14031_p1 = pnand %p14030_p3, %p14024_p0 }
  0x31   : > { %14034 = shalt.err (!%p14031_p1)
}
  0x32   : > { %13810 = dma.hbm_to_vmem [thread:$0]  (!%p14414_p5), %s15784_s2, 128, %s264_s15, [#allocation6]  }
  0x33   : > { %s15786_s3 = sld [smem:[#allocation24_spill]] }
  0x39   : > { %s14035_s25 = scalar_lea.hbm %s15786_s3, 128 }
  0x3a   : > { %p14036_p6 = scmp.ne.s32.totalorder %s15786_s3, %s14035_s25  ;;  %p14042_p1 = scmp.lt.u32.totalorder %s14035_s25, %s15786_s3 }
  0x3c   : > { %p14038_p8 = pnand %p14036_p6, %p14430_p7 }
  0x3e   : > { %p14039_p9 = pneg %p14038_p8 }
  0x40   : > { %p14044_p3 = pnand %p14042_p1, %p14039_p9 }
  0x42   : > { %14047 = shalt.err (!%p14044_p3)
}
  0x43   : > { %s14048_s15 = scalar_lea.vmem %s14418_s17, 128  ;;  %p14056_p13 = scmp.lt.s32.totalorder %s14418_s17, %s14418_s17 }
  0x44   : > { %p14049_p10 = scmp.ne.s32.totalorder %s14418_s17, %s14048_s15  ;;  %p14057_p0 = scmp.lt.s32.totalorder %s14048_s15, %s14048_s15 }
  0x46   : > { %p14051_p11 = pnand %p14049_p10, %p14430_p7  ;;  %p14058_p2 = por %p14057_p0, %p14056_p13 }
  0x48   : > { %p14052_p12 = pneg %p14051_p11 }
  0x4a   : > { %p14059_p4 = pnand %p14058_p2, %p14052_p12 }
  0x4c   : > { %14062 = shalt.err (!%p14059_p4)
}
  0x4d   : > { %13813 = dma.hbm_to_vmem [thread:$0]  (!%p14414_p5), %s15786_s3, 128, %s14418_s17, [#allocation9]  }
  0x4e   : > { %s15787_s5 = sld [smem:[#allocation26_spill]] }
  0x54   : > { %s14063_s24 = scalar_lea.hbm %s15787_s5, 128 }
  0x55   : > { %p14064_p6 = scmp.ne.s32.totalorder %s15787_s5, %s14063_s24  ;;  %p14070_p1 = scmp.lt.u32.totalorder %s14063_s24, %s15787_s5 }
  0x57   : > { %p14066_p8 = pnand %p14064_p6, %p14430_p7 }
  0x59   : > { %p14067_p9 = pneg %p14066_p8 }
  0x5b   : > { %p14072_p3 = pnand %p14070_p1, %p14067_p9 }
  0x5d   : > { %14075 = shalt.err (!%p14072_p3)
}
  0x5e   : > { %s14076_s17 = scalar_lea.vmem %s14420_s20, 128  ;;  %p14084_p13 = scmp.lt.s32.totalorder %s14420_s20, %s14420_s20 }
  0x5f   : > { %p14077_p10 = scmp.ne.s32.totalorder %s14420_s20, %s14076_s17  ;;  %p14085_p0 = scmp.lt.s32.totalorder %s14076_s17, %s14076_s17 }
  0x61   : > { %p14079_p11 = pnand %p14077_p10, %p14430_p7  ;;  %p14086_p2 = por %p14085_p0, %p14084_p13 }
  0x63   : > { %p14080_p12 = pneg %p14079_p11 }
  0x65   : > { %p14087_p4 = pnand %p14086_p2, %p14080_p12 }
  0x67   : > { %14090 = shalt.err (!%p14087_p4)
}
  0x68   : > { %13819 = dma.hbm_to_vmem [thread:$0]  (!%p14414_p5), %s15787_s5, 128, %s14420_s20, [#allocation12]  }
  0x69   : > { %s14310_s21 = smov [#allocation10]   ;;  %s15788_s4 = sld [smem:[#allocation25_spill]] }
  0x6a   : > { %s284_s22 = sshll.u32 %s14310_s21, 4  ;;  %s285_s22 = int_to_ptr.vmem [resolvable:$true] %s284_s22 }
  0x6f   : > { %s14091_s25 = scalar_lea.hbm %s15788_s4, 65536 }
  0x70   : > { %p14092_p6 = scmp.ne.s32.totalorder %s15788_s4, %s14091_s25  ;;  %p14098_p1 = scmp.lt.u32.totalorder %s14091_s25, %s15788_s4 }
  0x72   : > { %p14094_p8 = pnand %p14092_p6, %p14430_p7 }
  0x74   : > { %p14095_p9 = pneg %p14094_p8 }
  0x76   : > { %p14100_p3 = pnand %p14098_p1, %p14095_p9 }
  0x78   : > { %14103 = shalt.err (!%p14100_p3)
}
  0x79   : > { %s14104_s20 = scalar_lea.vmem %s285_s22, 65536  ;;  %p14112_p13 = scmp.lt.s32.totalorder %s285_s22, %s285_s22 }
  0x7a   : > { %p14105_p10 = scmp.ne.s32.totalorder %s285_s22, %s14104_s20  ;;  %p14113_p0 = scmp.lt.s32.totalorder %s14104_s20, %s14104_s20 }
  0x7c   : > { %p14107_p11 = pnand %p14105_p10, %p14430_p7  ;;  %p14114_p2 = por %p14113_p0, %p14112_p13 }
  0x7e   : > { %p14108_p12 = pneg %p14107_p11 }
  0x80   : > { %p14115_p4 = pnand %p14114_p2, %p14108_p12 }
  0x82   : > { %14118 = shalt.err (!%p14115_p4)
}
  0x83   : > { %s15773_s15 = smov 512   ;;  %s15774_s11 = smov 32  }
  0x84   : > { %13816 = dma.hbm_to_vmem [thread:$0]  (!%p14414_p5), %s15788_s4, 65536, %s285_s22, [#allocation9], %s15773_s15, %s15773_s15, %s15774_s11  }
  0x85   : > { %s14313_s24 = smov [#allocation13]   ;;  %s15789_s6 = sld [smem:[#allocation27_spill]] }
  0x86   : > { %s308_s25 = sshll.u32 %s14313_s24, 4  ;;  %s309_s25 = int_to_ptr.vmem [resolvable:$true] %s308_s25 }
  0x8b   : > { %s14119_s19 = scalar_lea.hbm %s15789_s6, 8192 }
  0x8c   : > { %p14120_p6 = scmp.ne.s32.totalorder %s15789_s6, %s14119_s19  ;;  %p14126_p1 = scmp.lt.u32.totalorder %s14119_s19, %s15789_s6 }
  0x8e   : > { %p14122_p8 = pnand %p14120_p6, %p14430_p7 }
  0x90   : > { %p14123_p9 = pneg %p14122_p8 }
  0x92   : > { %p14128_p3 = pnand %p14126_p1, %p14123_p9 }
  0x94   : > { %14131 = shalt.err (!%p14128_p3)
}
  0x95   : > { %s14132_s22 = scalar_lea.vmem %s309_s25, 8192  ;;  %p14140_p13 = scmp.lt.s32.totalorder %s309_s25, %s309_s25 }
  0x96   : > { %p14133_p10 = scmp.ne.s32.totalorder %s309_s25, %s14132_s22  ;;  %p14141_p0 = scmp.lt.s32.totalorder %s14132_s22, %s14132_s22 }
  0x98   : > { %p14135_p11 = pnand %p14133_p10, %p14430_p7  ;;  %p14142_p2 = por %p14141_p0, %p14140_p13 }
  0x9a   : > { %p14136_p12 = pneg %p14135_p11 }
  0x9c   : > { %p14143_p4 = pnand %p14142_p2, %p14136_p12 }
  0x9e   : > { %14146 = shalt.err (!%p14143_p4)
}
  0x9f   : > { %s14314_s21 = smov 64   ;;  %s14315_s23 = smov 4  }
  0xa0   : > { %13822 = dma.hbm_to_vmem [thread:$0]  (!%p14414_p5), %s15789_s6, 8192, %s309_s25, [#allocation12], %s14314_s21, %s14314_s21, %s14315_s23  }
  0xa1   : > { %s14316_s24 = smov [#allocation14]   ;;  %s14147_s17 = scalar_lea.hbm %s15767_s7, 16 }
  0xa2   : > { %s322_s14 = sshll.u32 %s14316_s24, 4  ;;  %p14148_p6 = scmp.ne.s32.totalorder %s15767_s7, %s14147_s17  ;;  %s323_s14 = int_to_ptr.vmem [resolvable:$true] %s322_s14 }
  0xa3   : > { %p14154_p1 = scmp.lt.u32.totalorder %s14147_s17, %s15767_s7 }
  0xa4   : > { %p14150_p8 = pnand %p14148_p6, %p14430_p7 }
  0xa6   : > { %p14151_p9 = pneg %p14150_p8 }
  0xa8   : > { %p14156_p3 = pnand %p14154_p1, %p14151_p9 }
  0xaa   : > { %14159 = shalt.err (!%p14156_p3)
}
  0xab   : > { %s14160_s25 = scalar_lea.vmem %s323_s14, 16  ;;  %s14167_s21 = scalar_lea.vmem %s323_s14, 32 }
  0xac   : > { %p14161_p10 = scmp.ne.s32.totalorder %s323_s14, %s14160_s25  ;;  %p14168_p13 = scmp.lt.s32.totalorder %s323_s14, %s323_s14 }
  0xad   : > { %p14169_p0 = scmp.lt.s32.totalorder %s14167_s21, %s14160_s25 }
  0xae   : > { %p14163_p11 = pnand %p14161_p10, %p14430_p7 }
  0xaf   : > { %p14170_p2 = por %p14169_p0, %p14168_p13 }
  0xb0   : > { %p14164_p12 = pneg %p14163_p11 }
  0xb2   : > { %p14171_p4 = pnand %p14170_p2, %p14164_p12 }
  0xb4   : > { %14174 = shalt.err (!%p14171_p4)
}
  0xb5   : > { %13825 = dma.hbm_to_vmem [thread:$0]  (!%p14414_p5), %s15767_s7, 16, %s323_s14, [#allocation15]  }
  0xb6   : > { %s36_s26 = sadd.s32 1, %s14301_s9  ;;  %s48_s15 = sadd.s32 1, %s14293_s29 }
  0xb7   : > { %p37_p7 = scmp.ge.s32.totalorder %s36_s26, 7  ;;  %p55_p6 = scmp.ne.s32.totalorder %s14293_s29, %s14289_s28 }
  0xb8   : > { %p56_p8 = scmp.eq.s32.totalorder %s14305_s10, 0  ;;  %p61_p9 = scmp.ne.s32.totalorder %s14289_s28, %s14285_s27 }
  0xb9   : > { %s15805_s26 = smov (%p37_p7, %s36_s26), 0  ;;  %p15790_p3 = scmp.ne.s32.totalorder %s15781_s12, 0 }
  0xba   : > { %p57_p1 = por %p56_p8, %p55_p6  ;;  %s44_s11 = ssub.s32 %s14301_s9, %s15805_s26 }
  0xbb   : > { %p14560_p10 = por %p15790_p3, %p61_p9  ;;  %p13839_p11 = scmp.lt.s32.totalorder %s14305_s10, 7 }
  0xbc   : > { %p46_p12 = scmp.eq.s32.totalorder %s44_s11, 0  ;;  %s14568_s3 = sand.u32 1, %s14293_s29  }
  0xbd   : > { %s13775_s24 = smul.u32 112, %s14568_s3  ;;  %p14575_p5 = pnand %p13839_p11, %p57_p1 }
  0xbe   : > { %s14572_s14 = scalar_select %p46_p12, %s14293_s29, %s48_s15  }
  0xbf   : > { %s13523_s27 = smul.u32 896, %s14301_s9  ;;  %s337_s16 = scalar_lea.vmem [#allocation3], %s13775_s24 }
  0xc0   : > { %s347_s19 = sshll.u32 %s337_s16, 4  ;;  %s15793_s0 = sld [smem:[#allocation22_spill]]  ;;  %s14584_s19 = int_to_ptr.vmem [resolvable:$true] %s347_s19 }
  0xc1   : > { %s334_s21 = scalar_lea.sflag [#allocation4], %s14568_s3  ;;  %p14177_p0 = pneg %p14575_p5 }
  0xc6   : > { %s14582_s25 = scalar_lea.hbm %s15793_s0, %s13523_s27  ;;  %s14180_s11 = scalar_lea.hbm %s15793_s0, 12544 }
  0xc7   : > { %s14175_s23 = scalar_lea.hbm %s14582_s25, 1792  ;;  %p14181_p7 = scmp.lt.u32.totalorder %s14582_s25, %s15793_s0 }
  0xc8   : > { %p14176_p13 = scmp.ne.s32.totalorder %s14582_s25, %s14175_s23  ;;  %p14182_p6 = scmp.lt.u32.totalorder %s14180_s11, %s14175_s23 }
  0xc9   : > { %p14184_p9 = scmp.lt.u32.totalorder %s14175_s23, %s14582_s25 }
  0xca   : > { %p14178_p2 = pnand %p14177_p0, %p14176_p13  ;;  %p14183_p8 = por %p14182_p6, %p14181_p7 }
  0xcc   : > { %p14179_p4 = pneg %p14178_p2  ;;  %p14185_p1 = por %p14184_p9, %p14183_p8 }
  0xce   : > { %p14186_p3 = pnand %p14185_p1, %p14179_p4 }
  0xd0   : > { %14189 = shalt.err (!%p14186_p3)
}
  0xd1   : > { %s14190_s16 = scalar_lea.vmem %s14584_s19, 1792  ;;  %s14317_s20 = smov [#allocation3]  }
  0xd2   : > { %p14191_p11 = scmp.ne.s32.totalorder %s14584_s19, %s14190_s16  ;;  %s14195_s22 = sshll.u32 %s14317_s20, 4  ;;  %s14196_s22 = int_to_ptr.vmem [resolvable:$false] %s14195_s22 }
  0xd3   : > { %s14197_s2 = scalar_lea.vmem %s14196_s22, 3584  ;;  %p14198_p2 = scmp.lt.s32.totalorder %s14584_s19, %s14196_s22 }
  0xd4   : > { %p14193_p12 = pnand %p14191_p11, %p14177_p0  ;;  %p14199_p7 = scmp.lt.s32.totalorder %s14197_s2, %s14190_s16 }
  0xd6   : > { %p14194_p13 = pneg %p14193_p12  ;;  %p14200_p6 = por %p14199_p7, %p14198_p2 }
  0xd8   : > { %p14201_p8 = pnand %p14200_p6, %p14194_p13 }
  0xda   : > { %14204 = shalt.err (!%p14201_p8)
}
  0xdb   : > { %s14318_s23 = smov 6272   ;;  %s14319_s15 = smov 896  }
  0xdc   : > { %s14320_s11 = smov 56   ;;  %s357_s24 = sand.u32 1, %s14305_s10  }
  0xdd   : > { %13829 = dma.hbm_to_vmem [thread:$0]  (!%p14575_p5), %s14582_s25, 1792, %s14584_s19, %s334_s21, %s14318_s23, %s14319_s15, %s14320_s11  }
  0xde   : > { %s13776_s27 = smul.u32 7168, %s14568_s3  ;;  %s14624_s5 = scalar_lea.sflag [#allocation6], %s357_s24 }
  0xdf   : > { %s13526_s16 = smul.u32 114688, %s14301_s9  ;;  %s14210_s25 = scalar_lea.hbm %s15761_s1, 802816 }
  0xe0   : > { %s361_s0 = scalar_lea.vmem [#allocation5], %s13776_s27 }
  0xe1   : > { %s14620_s2 = scalar_lea.hbm %s15761_s1, %s13526_s16  ;;  %s369_s4 = sshll.u32 %s361_s0, 4  ;;  %s14622_s4 = int_to_ptr.vmem [resolvable:$true] %s369_s4 }
  0xe2   : > { %s14205_s6 = scalar_lea.hbm %s14620_s2, 114688  ;;  %p14211_p3 = scmp.lt.u32.totalorder %s14620_s2, %s15761_s1 }
  0xe3   : > { %p14206_p4 = scmp.ne.s32.totalorder %s14620_s2, %s14205_s6  ;;  %p14212_p11 = scmp.lt.u32.totalorder %s14210_s25, %s14205_s6 }
  0xe4   : > { %p14214_p13 = scmp.lt.u32.totalorder %s14205_s6, %s14620_s2 }
  0xe5   : > { %p14208_p9 = pnand %p14206_p4, %p14177_p0  ;;  %p14213_p12 = por %p14212_p11, %p14211_p3 }
  0xe7   : > { %p14209_p1 = pneg %p14208_p9  ;;  %p14215_p2 = por %p14214_p13, %p14213_p12 }
  0xe9   : > { %p14216_p7 = pnand %p14215_p2, %p14209_p1 }
  0xeb   : > { %14219 = shalt.err (!%p14216_p7)
}
  0xec   : > { %s14220_s0 = scalar_lea.vmem %s14622_s4, 114688  ;;  %s14321_s15 = smov [#allocation5]  }
  0xed   : > { %p14221_p6 = scmp.ne.s32.totalorder %s14622_s4, %s14220_s0  ;;  %s14225_s11 = sshll.u32 %s14321_s15, 4  ;;  %s14226_s11 = int_to_ptr.vmem [resolvable:$false] %s14225_s11 }
  0xee   : > { %s14227_s24 = scalar_lea.vmem %s14226_s11, 229376  ;;  %p14228_p9 = scmp.lt.s32.totalorder %s14622_s4, %s14226_s11 }
  0xef   : > { %p14223_p8 = pnand %p14221_p6, %p14177_p0  ;;  %p14229_p3 = scmp.lt.s32.totalorder %s14227_s24, %s14220_s0 }
  0xf1   : > { %p14224_p4 = pneg %p14223_p8  ;;  %p14230_p11 = por %p14229_p3, %p14228_p9 }
  0xf3   : > { %p14231_p12 = pnand %p14230_p11, %p14224_p4 }
  0xf5   : > { %14234 = shalt.err (!%p14231_p12)
}
  0xf6   : > { %s15794_s6 = smov 32   ;;  %s15795_s27 = smov 512  }
  0xf7   : > { %13832 = dma.hbm_to_vmem [thread:$0]  (!%p14575_p5), %s14620_s2, 114688, %s14622_s4, %s14624_s5, %s15795_s27, %s15795_s27, %s15794_s6  }
  0xf8   : > { %p15796_p0 = scmp.ne.s32.totalorder %s15782_s13, 0 }
  0xf9   : > { %s383_s16 = sand.u32 (!%p15796_p0), 1, %s14289_s28  }
  0xfa   : > { %381 = sbr.rel (%p15796_p0) target bundleno = 2343 (0x927), region = 52  ;;  %s384_s22 = scalar_lea.sflag (!%p15796_p0), [#allocation4], %s383_s16 }
  0xfb   : > { %s13777_s20 = smul.u32 (!%p15796_p0), 112, %s383_s16 }
  0xfd   : > { %s14656_s3 = scalar_lea.vmem (!%p15796_p0), [#allocation3], %s13777_s20 }
 0x101   : > { %14260 = dma.done.wait (%p14560_p10), %s384_s22, 1792  }
 0x102   : > { %14262 = vsyncadd (%p14560_p10), %s384_s22, 4294965504  ;;  %s15797_s17 = sadd.s32 4294967295, %s14305_s10   ;;  %s13778_s4 = smul.u32 7168, %s383_s16 }
 0x103   : > { %s392_s19 = sand.u32 1, %s15797_s17  }
 0x104   : > { %s393_s5 = scalar_lea.sflag [#allocation6], %s392_s19  ;;  %s14664_s13 = scalar_lea.vmem [#allocation5], %s13778_s4 }
 0x105   : > { %14264 = dma.done.wait (%p14560_p10), %s393_s5, 114688  }
 0x106   : > { %14266 = vsyncadd (%p14560_p10), %s393_s5, 4294852608  ;;  %p15798_p5 = scmp.ne.s32.totalorder %s15781_s12, 0 }
 0x108   : > { %14268 = dma.done.wait (%p15798_p5), [#allocation6], 128  }
 0x109   : > { %14270 = vsyncadd (%p15798_p5), [#allocation6], 4294967168 }
 0x10a   : > { %14272 = dma.done.wait (%p15798_p5), [#allocation9], 65664  }
 0x10b   : > { %14274 = vsyncadd (%p15798_p5), [#allocation9], 4294901632 }
 0x10c   : > { %14276 = dma.done.wait (%p15798_p5), [#allocation12], 8320  }
 0x10d   : > { %14278 = vsyncadd (%p15798_p5), [#allocation12], 4294958976 }
 0x10e   : > { %14280 = dma.done.wait (%p15798_p5), [#allocation15], 16  }
 0x10f   : > { %14282 = vsyncadd (%p15798_p5), [#allocation15], 4294967280  ;;  %p12030_p10 = scmp.ne.s32.totalorder %s14297_s30, 0 }
 0x110   : > { %v474_v0 = vlaneseq (!%p12030_p10)  ;;  %v472_v2 = vld [vmem:[#allocation8] sm:$0xff] (!%p12030_p10) }
 0x111   : > { %471 = sbr.rel (%p12030_p10) target bundleno = 288 (0x120), region = 88 }
 0x112   : > { %v475_v1 = vshrl.u32 (!%p12030_p10), %v474_v0, 7 }
 0x114   : > { %v476_v3 = vsub.s32 (!%p12030_p10), 0, %v475_v1  ;;  %v480_v4 = vsub.s32 (!%p12030_p10), 1, %v475_v1  ;;  %v484_v5 = vsub.s32 (!%p12030_p10), 2, %v475_v1  ;;  %v488_v6 = vsub.s32 (!%p12030_p10), 3, %v475_v1 }
 0x115   : > { %v492_v7 = vsub.s32 (!%p12030_p10), 4, %v475_v1  ;;  %v496_v8 = vsub.s32 (!%p12030_p10), 5, %v475_v1  ;;  %v500_v9 = vsub.s32 (!%p12030_p10), 6, %v475_v1  ;;  %v504_v10 = vsub.s32 (!%p12030_p10), 7, %v475_v1 }
 0x116   : > { %v477_v11 = vrot.slane (!%p12030_p10), %v472_v2, %v476_v3  ;;  %v481_v12 = vrot.slane (!%p12030_p10), %v472_v2, %v480_v4  ;;  %v485_v13 = vrot.slane (!%p12030_p10), %v472_v2, %v484_v5  ;;  %v489_v14 = vrot.slane (!%p12030_p10), %v472_v2, %v488_v6 }
 0x117   : > { %v493_v15 = vrot.slane (!%p12030_p10), %v472_v2, %v492_v7  ;;  %v497_v16 = vrot.slane (!%p12030_p10), %v472_v2, %v496_v8  ;;  %v501_v17 = vrot.slane (!%p12030_p10), %v472_v2, %v500_v9  ;;  %v505_v18 = vrot.slane (!%p12030_p10), %v472_v2, %v504_v10 }
 0x118   : > { %514 = vst [vmem:[#allocation2] sm:$0xff] %v477_v11  ;;  %522 = vst [vmem:[#allocation2 + $0x40] sm:$0xff] %v477_v11 }
 0x119   : > { %515 = vst [vmem:[#allocation2 + $0x8] sm:$0xff] %v481_v12  ;;  %523 = vst [vmem:[#allocation2 + $0x48] sm:$0xff] %v481_v12 }
 0x11a   : > { %516 = vst [vmem:[#allocation2 + $0x10] sm:$0xff] %v485_v13  ;;  %524 = vst [vmem:[#allocation2 + $0x50] sm:$0xff] %v485_v13 }
 0x11b   : > { %517 = vst [vmem:[#allocation2 + $0x18] sm:$0xff] %v489_v14  ;;  %525 = vst [vmem:[#allocation2 + $0x58] sm:$0xff] %v489_v14 }
 0x11c   : > { %518 = vst [vmem:[#allocation2 + $0x20] sm:$0xff] %v493_v15  ;;  %526 = vst [vmem:[#allocation2 + $0x60] sm:$0xff] %v493_v15 }
 0x11d   : > { %519 = vst [vmem:[#allocation2 + $0x28] sm:$0xff] %v497_v16  ;;  %527 = vst [vmem:[#allocation2 + $0x68] sm:$0xff] %v497_v16 }
 0x11e   : > { %520 = vst [vmem:[#allocation2 + $0x30] sm:$0xff] %v501_v17  ;;  %528 = vst [vmem:[#allocation2 + $0x70] sm:$0xff] %v501_v17 }
 0x11f   : > { %521 = vst [vmem:[#allocation2 + $0x38] sm:$0xff] %v505_v18  ;;  %529 = vst [vmem:[#allocation2 + $0x78] sm:$0xff] %v505_v18 }
 0x120 PF: > { %v560_v19 = vld [vmem:[%s14664_s13] sm:$0xff]  ;;  %v561_v21 = vld [vmem:[%s14664_s13 + $0x8] sm:$0xff]  ;;  %p12941_p1 = scmp.ne.s32.totalorder %s14297_s30, 6 }
 0x121   : > { %v564_v20 = vld [vmem:[%s14664_s13 + $0x20] sm:$0xff]  ;;  %v565_v23 = vld [vmem:[%s14664_s13 + $0x28] sm:$0xff] }
 0x122   : > { %v12046_v22 = vcombine.high %v560_v19, %v564_v20  ;;  %v12045_v24 = vcombine.low %v560_v19, %v564_v20  ;;  %v568_v25 = vld [vmem:[%s14664_s13 + $0x40] sm:$0xff]  ;;  %v12048_v27 = vcombine.high %v561_v21, %v565_v23  ;;  %v12047_v28 = vcombine.low %v561_v21, %v565_v23  ;;  %v569_v30 = vld [vmem:[%s14664_s13 + $0x48] sm:$0xff] }
 0x123   : > { %v572_v26 = vld [vmem:[%s14664_s13 + $0x60] sm:$0xff]  ;;  %v573_v31 = vld [vmem:[%s14664_s13 + $0x68] sm:$0xff] }
 0x124   : > { %v12054_v29 = vcombine.high %v568_v25, %v572_v26  ;;  %v576_v32 = vld [vmem:[%s14664_s13 + $0x80] sm:$0xff]  ;;  %6006 = vmatprep.subr.bf16.mxu0 %v12046_v22  ;;  %v12056_v33 = vcombine.high %v569_v30, %v573_v31  ;;  %v577_v35 = vld [vmem:[%s14664_s13 + $0x88] sm:$0xff]  ;;  %6307 = vmatprep.subr.bf16.mxu1 %v12048_v27  ;;  %v12053_v37 = vcombine.low %v568_v25, %v572_v26 }
 0x125   : > { %v580_v34 = vld [vmem:[%s14664_s13 + $0xa0] sm:$0xff]  ;;  %v581_v36 = vld [vmem:[%s14664_s13 + $0xa8] sm:$0xff]  ;;  %6007 = vmatpush1.bf16.msra.mxu0 %v12045_v24  ;;  %6308 = vmatpush1.bf16.msra.mxu1 %v12047_v28  ;;  %v12055_v38 = vcombine.low %v569_v30, %v573_v31 }
 0x126   : > { %6008 = vmatprep.subr.bf16.mxu0 %v12054_v29  ;;  %v12062_v39 = vcombine.high %v576_v32, %v580_v34  ;;  %6309 = vmatprep.subr.bf16.mxu1 %v12056_v33  ;;  %v12064_v40 = vcombine.high %v577_v35, %v581_v36  ;;  %v584_v41 = vld [vmem:[%s14664_s13 + $0xc0] sm:$0xff]  ;;  %v585_v43 = vld [vmem:[%s14664_s13 + $0xc8] sm:$0xff]  ;;  %v12061_v45 = vcombine.low %v576_v32, %v580_v34 }
 0x127   : > { %v588_v42 = vld [vmem:[%s14664_s13 + $0xe0] sm:$0xff]  ;;  %v589_v44 = vld [vmem:[%s14664_s13 + $0xe8] sm:$0xff]  ;;  %v12063_v46 = vcombine.low %v577_v35, %v581_v36 }
 0x128   : > { %v12070_v47 = vcombine.high %v584_v41, %v588_v42  ;;  %v12072_v48 = vcombine.high %v585_v43, %v589_v44  ;;  %v592_v49 = vld [vmem:[%s14664_s13 + $0x100] sm:$0xff]  ;;  %v593_v51 = vld [vmem:[%s14664_s13 + $0x108] sm:$0xff]  ;;  %v12069_v53 = vcombine.low %v584_v41, %v588_v42  ;;  %v12071_v54 = vcombine.low %v585_v43, %v589_v44 }
 0x129   : > { %6009 = vmatpush1.bf16.msra.mxu0 %v12053_v37  ;;  %6310 = vmatpush1.bf16.msra.mxu1 %v12055_v38  ;;  %v596_v50 = vld [vmem:[%s14664_s13 + $0x120] sm:$0xff]  ;;  %v597_v52 = vld [vmem:[%s14664_s13 + $0x128] sm:$0xff] }
 0x12a   : > { %6010 = vmatprep.subr.bf16.mxu0 %v12062_v39  ;;  %6311 = vmatprep.subr.bf16.mxu1 %v12064_v40  ;;  %v12078_v55 = vcombine.high %v592_v49, %v596_v50  ;;  %v12080_v56 = vcombine.high %v593_v51, %v597_v52  ;;  %v600_v57 = vld [vmem:[%s14664_s13 + $0x140] sm:$0xff]  ;;  %v601_v59 = vld [vmem:[%s14664_s13 + $0x148] sm:$0xff]  ;;  %v12077_v61 = vcombine.low %v592_v49, %v596_v50 }
 0x12b   : > { %v604_v58 = vld [vmem:[%s14664_s13 + $0x160] sm:$0xff]  ;;  %v605_v60 = vld [vmem:[%s14664_s13 + $0x168] sm:$0xff]  ;;  %v12079_v62 = vcombine.low %v593_v51, %v597_v52 }
 0x12c   : > { %v12086_v63 = vcombine.high %v600_v57, %v604_v58  ;;  %v12088_v0 = vcombine.high %v601_v59, %v605_v60  ;;  %v608_v1 = vld [vmem:[%s14664_s13 + $0x180] sm:$0xff]  ;;  %v609_v3 = vld [vmem:[%s14664_s13 + $0x188] sm:$0xff]  ;;  %v12085_v5 = vcombine.low %v600_v57, %v604_v58  ;;  %v12087_v6 = vcombine.low %v601_v59, %v605_v60 }
 0x12d   : > { %6011 = vmatpush1.bf16.msra.mxu0 %v12061_v45  ;;  %6312 = vmatpush1.bf16.msra.mxu1 %v12063_v46  ;;  %v612_v2 = vld [vmem:[%s14664_s13 + $0x1a0] sm:$0xff]  ;;  %v613_v4 = vld [vmem:[%s14664_s13 + $0x1a8] sm:$0xff] }
 0x12e   : > { %6012 = vmatprep.subr.bf16.mxu0 %v12070_v47  ;;  %6313 = vmatprep.subr.bf16.mxu1 %v12072_v48  ;;  %v12094_v7 = vcombine.high %v608_v1, %v612_v2  ;;  %v12096_v8 = vcombine.high %v609_v3, %v613_v4  ;;  %v616_v9 = vld [vmem:[%s14664_s13 + $0x1c0] sm:$0xff]  ;;  %v617_v12 = vld [vmem:[%s14664_s13 + $0x1c8] sm:$0xff]  ;;  %v12093_v14 = vcombine.low %v608_v1, %v612_v2 }
 0x12f   : > { %v620_v10 = vld [vmem:[%s14664_s13 + $0x1e0] sm:$0xff]  ;;  %v621_v13 = vld [vmem:[%s14664_s13 + $0x1e8] sm:$0xff]  ;;  %v12095_v15 = vcombine.low %v609_v3, %v613_v4 }
 0x130   : > { %v13907_v11 = vld [vmem:[%s14656_s3 + $0x4] ss:$56 sps:$4 sm:$0xff]   ;;  %v12102_v16 = vcombine.high %v616_v9, %v620_v10  ;;  %v12104_v17 = vcombine.high %v617_v12, %v621_v13  ;;  %v12101_v22 = vcombine.low %v616_v9, %v620_v10  ;;  %v12103_v23 = vcombine.low %v617_v12, %v621_v13 }
 0x131   : > { %6013 = vmatpush1.bf16.msra.mxu0 %v12069_v53  ;;  %6314 = vmatpush1.bf16.msra.mxu1 %v12071_v54  ;;  %v624_v18 = vld [vmem:[%s14664_s13 + $0x200] sm:$0xff]  ;;  %v625_v20 = vld [vmem:[%s14664_s13 + $0x208] sm:$0xff] }
 0x132   : > { %6014 = vmatprep.subr.bf16.mxu0 %v12078_v55  ;;  %6315 = vmatprep.subr.bf16.mxu1 %v12080_v56  ;;  %v628_v19 = vld [vmem:[%s14664_s13 + $0x220] sm:$0xff]  ;;  %v629_v21 = vld [vmem:[%s14664_s13 + $0x228] sm:$0xff] }
 0x133   : > { %6038 = vmatprep.mubr.bf16.mxu0 %v13907_v11  ;;  %6339 = vmatprep.mubr.bf16.mxu1 %v13907_v11  ;;  %v12110_v24 = vcombine.high %v624_v18, %v628_v19  ;;  %v12112_v25 = vcombine.high %v625_v20, %v629_v21  ;;  %v632_v26 = vld [vmem:[%s14664_s13 + $0x240] sm:$0xff]  ;;  %v633_v28 = vld [vmem:[%s14664_s13 + $0x248] sm:$0xff]  ;;  %v12109_v30 = vcombine.low %v624_v18, %v628_v19 }
 0x134   : > { %v636_v27 = vld [vmem:[%s14664_s13 + $0x260] sm:$0xff]  ;;  %v637_v29 = vld [vmem:[%s14664_s13 + $0x268] sm:$0xff]  ;;  %v12111_v31 = vcombine.low %v625_v20, %v629_v21 }
 0x135   : > { %6015 = vmatpush1.bf16.msra.mxu0 %v12077_v61  ;;  %6316 = vmatpush1.bf16.msra.mxu1 %v12079_v62  ;;  %v12118_v32 = vcombine.high %v632_v26, %v636_v27  ;;  %v12120_v33 = vcombine.high %v633_v28, %v637_v29  ;;  %v640_v34 = vld [vmem:[%s14664_s13 + $0x280] sm:$0xff]  ;;  %v641_v36 = vld [vmem:[%s14664_s13 + $0x288] sm:$0xff]  ;;  %v12117_v38 = vcombine.low %v632_v26, %v636_v27 }
 0x136   : > { %6016 = vmatprep.subr.bf16.mxu0 %v12086_v63  ;;  %6317 = vmatprep.subr.bf16.mxu1 %v12088_v0  ;;  %v644_v35 = vld [vmem:[%s14664_s13 + $0x2a0] sm:$0xff]  ;;  %v645_v37 = vld [vmem:[%s14664_s13 + $0x2a8] sm:$0xff]  ;;  %v12119_v39 = vcombine.low %v633_v28, %v637_v29 }
 0x137   : > { %v12126_v40 = vcombine.high %v640_v34, %v644_v35  ;;  %v12128_v41 = vcombine.high %v641_v36, %v645_v37  ;;  %v648_v42 = vld [vmem:[%s14664_s13 + $0x2c0] sm:$0xff]  ;;  %v649_v44 = vld [vmem:[%s14664_s13 + $0x2c8] sm:$0xff]  ;;  %v12125_v46 = vcombine.low %v640_v34, %v644_v35  ;;  %v12127_v47 = vcombine.low %v641_v36, %v645_v37 }
 0x138   : > { %v652_v43 = vld [vmem:[%s14664_s13 + $0x2e0] sm:$0xff]  ;;  %v653_v45 = vld [vmem:[%s14664_s13 + $0x2e8] sm:$0xff] }
 0x139   : > { %6017 = vmatpush1.bf16.msra.mxu0 %v12085_v5  ;;  %6318 = vmatpush1.bf16.msra.mxu1 %v12087_v6  ;;  %v12134_v48 = vcombine.high %v648_v42, %v652_v43  ;;  %v12136_v49 = vcombine.high %v649_v44, %v653_v45  ;;  %v656_v50 = vld [vmem:[%s14664_s13 + $0x300] sm:$0xff]  ;;  %v657_v52 = vld [vmem:[%s14664_s13 + $0x308] sm:$0xff]  ;;  %v12133_v54 = vcombine.low %v648_v42, %v652_v43 }
 0x13a   : > { %6018 = vmatprep.subr.bf16.mxu0 %v12094_v7  ;;  %6319 = vmatprep.subr.bf16.mxu1 %v12096_v8  ;;  %v660_v51 = vld [vmem:[%s14664_s13 + $0x320] sm:$0xff]  ;;  %v661_v53 = vld [vmem:[%s14664_s13 + $0x328] sm:$0xff]  ;;  %v12135_v55 = vcombine.low %v649_v44, %v653_v45 }
 0x13b   : > { %v12142_v56 = vcombine.high %v656_v50, %v660_v51  ;;  %v12144_v57 = vcombine.high %v657_v52, %v661_v53  ;;  %v664_v58 = vld [vmem:[%s14664_s13 + $0x340] sm:$0xff]  ;;  %v665_v60 = vld [vmem:[%s14664_s13 + $0x348] sm:$0xff]  ;;  %v12141_v62 = vcombine.low %v656_v50, %v660_v51  ;;  %v12143_v63 = vcombine.low %v657_v52, %v661_v53 }
 0x13c   : > { %v668_v59 = vld [vmem:[%s14664_s13 + $0x360] sm:$0xff]  ;;  %v669_v61 = vld [vmem:[%s14664_s13 + $0x368] sm:$0xff] }
 0x13d   : > { %6019 = vmatpush1.bf16.msra.mxu0 %v12093_v14  ;;  %6320 = vmatpush1.bf16.msra.mxu1 %v12095_v15  ;;  %v12150_v0 = vcombine.high %v664_v58, %v668_v59  ;;  %v12152_v1 = vcombine.high %v665_v60, %v669_v61  ;;  %v672_v2 = vld [vmem:[%s14664_s13 + $0x380] sm:$0xff]  ;;  %v673_v4 = vld [vmem:[%s14664_s13 + $0x388] sm:$0xff]  ;;  %v12149_v6 = vcombine.low %v664_v58, %v668_v59 }
 0x13e   : > { %6020 = vmatprep.subr.bf16.mxu0 %v12102_v16  ;;  %6321 = vmatprep.subr.bf16.mxu1 %v12104_v17  ;;  %v676_v3 = vld [vmem:[%s14664_s13 + $0x3a0] sm:$0xff]  ;;  %v677_v5 = vld [vmem:[%s14664_s13 + $0x3a8] sm:$0xff]  ;;  %v12151_v7 = vcombine.low %v665_v60, %v669_v61 }
 0x13f   : > { %v12158_v8 = vcombine.high %v672_v2, %v676_v3  ;;  %v12160_v9 = vcombine.high %v673_v4, %v677_v5  ;;  %v680_v10 = vld [vmem:[%s14664_s13 + $0x3c0] sm:$0xff]  ;;  %v681_v12 = vld [vmem:[%s14664_s13 + $0x3c8] sm:$0xff]  ;;  %v12157_v14 = vcombine.low %v672_v2, %v676_v3  ;;  %v12159_v15 = vcombine.low %v673_v4, %v677_v5 }
 0x140   : > { %v684_v11 = vld [vmem:[%s14664_s13 + $0x3e0] sm:$0xff]  ;;  %v685_v13 = vld [vmem:[%s14664_s13 + $0x3e8] sm:$0xff] }
 0x141   : > { %6021 = vmatpush1.bf16.msra.mxu0 %v12101_v22  ;;  %6322 = vmatpush1.bf16.msra.mxu1 %v12103_v23  ;;  %v12166_v16 = vcombine.high %v680_v10, %v684_v11  ;;  %v12168_v17 = vcombine.high %v681_v12, %v685_v13  ;;  %v688_v18 = vld [vmem:[%s14664_s13 + $0x400] sm:$0xff]  ;;  %v689_v20 = vld [vmem:[%s14664_s13 + $0x408] sm:$0xff]  ;;  %v12165_v22 = vcombine.low %v680_v10, %v684_v11 }
 0x142   : > { %6022 = vmatprep.subr.bf16.mxu0 %v12110_v24  ;;  %6323 = vmatprep.subr.bf16.mxu1 %v12112_v25  ;;  %v692_v19 = vld [vmem:[%s14664_s13 + $0x420] sm:$0xff]  ;;  %v693_v21 = vld [vmem:[%s14664_s13 + $0x428] sm:$0xff]  ;;  %v12167_v23 = vcombine.low %v681_v12, %v685_v13 }
 0x143   : > { %v12174_v24 = vcombine.high %v688_v18, %v692_v19  ;;  %v12176_v25 = vcombine.high %v689_v20, %v693_v21  ;;  %v696_v26 = vld [vmem:[%s14664_s13 + $0x440] sm:$0xff]  ;;  %v697_v29 = vld [vmem:[%s14664_s13 + $0x448] sm:$0xff] }
 0x144   : > { %v700_v27 = vld [vmem:[%s14664_s13 + $0x460] sm:$0xff] }
 0x145   : > { %6023 = vmatpush1.bf16.msra.mxu0 %v12109_v30  ;;  %6324 = vmatpush1.bf16.msra.mxu1 %v12111_v31  ;;  %v13909_v28 = vld [vmem:[%s14656_s3] ss:$56 sps:$4 sm:$0xff]   ;;  %v12173_v31 = vcombine.low %v688_v18, %v692_v19  ;;  %v13910_v37 = vld [vmem:[%s14656_s3 + $0xc] ss:$56 sps:$4 sm:$0xff]  }
 0x146   : > { %6024 = vmatprep.subr.bf16.mxu0 %v12118_v32  ;;  %6325 = vmatprep.subr.bf16.mxu1 %v12120_v33  ;;  %v701_v30 = vld [vmem:[%s14664_s13 + $0x468] sm:$0xff]  ;;  %v12175_v32 = vcombine.low %v689_v20, %v693_v21  ;;  %v12182_v33 = vcombine.high %v696_v26, %v700_v27  ;;  %v704_v34 = vld [vmem:[%s14664_s13 + $0x480] sm:$0xff] }
 0x147   : > { %v12184_v35 = vcombine.high %v697_v29, %v701_v30  ;;  %v708_v36 = vld [vmem:[%s14664_s13 + $0x4a0] sm:$0xff] }
 0x148   : > { %v12190_v42 = vcombine.high %v704_v34, %v708_v36  ;;  %v712_v43 = vld [vmem:[%s14664_s13 + $0x4c0] sm:$0xff] }
 0x149   : > { %6025 = vmatpush1.bf16.msra.mxu0 %v12117_v38  ;;  %6326 = vmatpush1.bf16.msra.mxu1 %v12119_v39  ;;  %v705_v38 = vld [vmem:[%s14664_s13 + $0x488] sm:$0xff]  ;;  %v716_v44 = vld [vmem:[%s14664_s13 + $0x4e0] sm:$0xff] }
 0x14a   : > { %6026 = vmatprep.subr.bf16.mxu0 %v12126_v40  ;;  %6327 = vmatprep.subr.bf16.mxu1 %v12128_v41  ;;  %v709_v39 = vld [vmem:[%s14664_s13 + $0x4a8] sm:$0xff]  ;;  %v12181_v40 = vcombine.low %v696_v26, %v700_v27  ;;  %v12183_v41 = vcombine.low %v697_v29, %v701_v30  ;;  %v12198_v50 = vcombine.high %v712_v43, %v716_v44  ;;  %v720_v52 = vld [vmem:[%s14664_s13 + $0x500] sm:$0xff] }
 0x14b   : > { %v12192_v45 = vcombine.high %v705_v38, %v709_v39  ;;  %v724_v53 = vld [vmem:[%s14664_s13 + $0x520] sm:$0xff]  ;;  %v761_v30 = vld [vmem:[%s14664_s13 + $0x648] sm:$0xff] }
 0x14c   : > { %v12206_v58 = vcombine.high %v720_v52, %v724_v53  ;;  %v728_v60 = vld [vmem:[%s14664_s13 + $0x540] sm:$0xff] }
 0x14d   : > { %6027 = vmatpush1.bf16.msra.mxu0 %v12125_v46  ;;  %6328 = vmatpush1.bf16.msra.mxu1 %v12127_v47  ;;  %v713_v46 = vld [vmem:[%s14664_s13 + $0x4c8] sm:$0xff]  ;;  %v732_v61 = vld [vmem:[%s14664_s13 + $0x560] sm:$0xff] }
 0x14e   : > { %6028 = vmatprep.subr.bf16.mxu0 %v12134_v48  ;;  %6329 = vmatprep.subr.bf16.mxu1 %v12136_v49  ;;  %v717_v47 = vld [vmem:[%s14664_s13 + $0x4e8] sm:$0xff]  ;;  %v12189_v48 = vcombine.low %v704_v34, %v708_v36  ;;  %v12191_v49 = vcombine.low %v705_v38, %v709_v39  ;;  %v12214_v2 = vcombine.high %v728_v60, %v732_v61  ;;  %v736_v4 = vld [vmem:[%s14664_s13 + $0x580] sm:$0xff] }
 0x14f   : > { %v12200_v51 = vcombine.high %v713_v46, %v717_v47  ;;  %v740_v5 = vld [vmem:[%s14664_s13 + $0x5a0] sm:$0xff]  ;;  %v769_v38 = vld [vmem:[%s14664_s13 + $0x688] sm:$0xff] }
 0x150   : > { %v12222_v10 = vcombine.high %v736_v4, %v740_v5  ;;  %v744_v12 = vld [vmem:[%s14664_s13 + $0x5c0] sm:$0xff]  ;;  %v773_v39 = vld [vmem:[%s14664_s13 + $0x6a8] sm:$0xff] }
 0x151   : > { %6029 = vmatpush1.bf16.msra.mxu0 %v12133_v54  ;;  %6330 = vmatpush1.bf16.msra.mxu1 %v12135_v55  ;;  %v721_v54 = vld [vmem:[%s14664_s13 + $0x508] sm:$0xff]  ;;  %v748_v13 = vld [vmem:[%s14664_s13 + $0x5e0] sm:$0xff] }
 0x152   : > { %6030 = vmatprep.subr.bf16.mxu0 %v12142_v56  ;;  %6331 = vmatprep.subr.bf16.mxu1 %v12144_v57  ;;  %v725_v55 = vld [vmem:[%s14664_s13 + $0x528] sm:$0xff]  ;;  %v12197_v56 = vcombine.low %v712_v43, %v716_v44  ;;  %v12199_v57 = vcombine.low %v713_v46, %v717_v47  ;;  %v12230_v18 = vcombine.high %v744_v12, %v748_v13  ;;  %v752_v20 = vld [vmem:[%s14664_s13 + $0x600] sm:$0xff] }
 0x153   : > { %v12208_v59 = vcombine.high %v721_v54, %v725_v55  ;;  %v756_v21 = vld [vmem:[%s14664_s13 + $0x620] sm:$0xff]  ;;  %v12256_v43 = vcombine.high %v769_v38, %v773_v39  ;;  %v777_v46 = vld [vmem:[%s14664_s13 + $0x6c8] sm:$0xff] }
 0x154   : > { %v12238_v26 = vcombine.high %v752_v20, %v756_v21  ;;  %v764_v29 = vld [vmem:[%s14664_s13 + $0x660] sm:$0xff]  ;;  %v781_v47 = vld [vmem:[%s14664_s13 + $0x6e8] sm:$0xff] }
 0x155   : > { %6031 = vmatpush1.bf16.msra.mxu0 %v12141_v62  ;;  %6332 = vmatpush1.bf16.msra.mxu1 %v12143_v63  ;;  %v729_v62 = vld [vmem:[%s14664_s13 + $0x548] sm:$0xff]  ;;  %v768_v36 = vld [vmem:[%s14664_s13 + $0x680] sm:$0xff] }
 0x156   : > { %6032 = vmatprep.subr.bf16.mxu0 %v12150_v0  ;;  %6333 = vmatprep.subr.bf16.mxu1 %v12152_v1  ;;  %v733_v63 = vld [vmem:[%s14664_s13 + $0x568] sm:$0xff]  ;;  %v12205_v0 = vcombine.low %v720_v52, %v724_v53  ;;  %v12207_v1 = vcombine.low %v721_v54, %v725_v55  ;;  %v776_v44 = vld [vmem:[%s14664_s13 + $0x6c0] sm:$0xff] }
 0x157   : > { %v12216_v3 = vcombine.high %v729_v62, %v733_v63  ;;  %v784_v52 = vld [vmem:[%s14664_s13 + $0x700] sm:$0xff]  ;;  %v785_v54 = vld [vmem:[%s14664_s13 + $0x708] sm:$0xff] }
 0x158   : > { %v788_v53 = vld [vmem:[%s14664_s13 + $0x720] sm:$0xff]  ;;  %v789_v55 = vld [vmem:[%s14664_s13 + $0x728] sm:$0xff] }
 0x159   : > { %6033 = vmatpush1.bf16.msra.mxu0 %v12149_v6  ;;  %6334 = vmatpush1.bf16.msra.mxu1 %v12151_v7  ;;  %v737_v6 = vld [vmem:[%s14664_s13 + $0x588] sm:$0xff] }
 0x15a   : > { %6034 = vmatprep.subr.bf16.mxu0 %v12158_v8  ;;  %6335 = vmatprep.subr.bf16.mxu1 %v12160_v9  ;;  %v741_v7 = vld [vmem:[%s14664_s13 + $0x5a8] sm:$0xff]  ;;  %v12213_v8 = vcombine.low %v728_v60, %v732_v61  ;;  %v12215_v9 = vcombine.low %v729_v62, %v733_v63  ;;  %v792_v60 = vld [vmem:[%s14664_s13 + $0x740] sm:$0xff] }
 0x15b   : > { %v12224_v11 = vcombine.high %v737_v6, %v741_v7  ;;  %v796_v61 = vld [vmem:[%s14664_s13 + $0x760] sm:$0xff]  ;;  %v793_v62 = vld [vmem:[%s14664_s13 + $0x748] sm:$0xff] }
 0x15c   : > { %v797_v63 = vld [vmem:[%s14664_s13 + $0x768] sm:$0xff] }
 0x15d   : > { %6035 = vmatpush1.bf16.msra.mxu0 %v12157_v14  ;;  %6336 = vmatpush1.bf16.msra.mxu1 %v12159_v15  ;;  %v745_v14 = vld [vmem:[%s14664_s13 + $0x5c8] sm:$0xff] }
 0x15e   : > { %6036 = vmatprep.subr.bf16.mxu0 %v12166_v16  ;;  %6337 = vmatprep.subr.bf16.mxu1 %v12168_v17  ;;  %v749_v15 = vld [vmem:[%s14664_s13 + $0x5e8] sm:$0xff]  ;;  %v12221_v16 = vcombine.low %v736_v4, %v740_v5  ;;  %v12223_v17 = vcombine.low %v737_v6, %v741_v7  ;;  %v800_v4 = vld [vmem:[%s14664_s13 + $0x780] sm:$0xff] }
 0x15f   : > { %v12232_v19 = vcombine.high %v745_v14, %v749_v15  ;;  %v804_v5 = vld [vmem:[%s14664_s13 + $0x7a0] sm:$0xff]  ;;  %v801_v6 = vld [vmem:[%s14664_s13 + $0x788] sm:$0xff] }
 0x160   : > { %v805_v7 = vld [vmem:[%s14664_s13 + $0x7a8] sm:$0xff] }
 0x161   : > { %6037 = vmatpush1.bf16.msra.mxu0 %v12165_v22  ;;  %6338 = vmatpush1.bf16.msra.mxu1 %v12167_v23  ;;  %v753_v22 = vld [vmem:[%s14664_s13 + $0x608] sm:$0xff] }
 0x162   : > { %6049 = vmatprep.subr.bf16.mxu0 %v12174_v24  ;;  %6350 = vmatprep.subr.bf16.mxu1 %v12176_v25  ;;  %v757_v23 = vld [vmem:[%s14664_s13 + $0x628] sm:$0xff]  ;;  %v12229_v24 = vcombine.low %v744_v12, %v748_v13  ;;  %v12231_v25 = vcombine.low %v745_v14, %v749_v15  ;;  %v808_v12 = vld [vmem:[%s14664_s13 + $0x7c0] sm:$0xff] }
 0x163   : > { %v12240_v27 = vcombine.high %v753_v22, %v757_v23  ;;  %v812_v13 = vld [vmem:[%s14664_s13 + $0x7e0] sm:$0xff]  ;;  %v809_v14 = vld [vmem:[%s14664_s13 + $0x7c8] sm:$0xff] }
 0x164   : > { %6039 = vmatmul.mubr.bf16.vlgmr.msra.gmra.mrb[0].mxu0 %v13909_v28  ;;  %6340 = vmatmul.mubr.bf16.vlgmr.msra.gmra.mrb[0].mxu1 %v13909_v28  ;;  %v760_v28 = vld [vmem:[%s14664_s13 + $0x640] sm:$0xff]  ;;  %v813_v15 = vld [vmem:[%s14664_s13 + $0x7e8] sm:$0xff] }
 0x165   : > { %6050 = vmatpush1.bf16.msra.mxu0 %v12173_v31  ;;  %6351 = vmatpush1.bf16.msra.mxu1 %v12175_v32  ;;  %v765_v31 = vld [vmem:[%s14664_s13 + $0x668] sm:$0xff]  ;;  %v12237_v32 = vcombine.low %v752_v20, %v756_v21  ;;  %v12246_v34 = vcombine.high %v760_v28, %v764_v29  ;;  %v816_v20 = vld [vmem:[%s14664_s13 + $0x800] sm:$0xff] }
 0x166   : > { %6051 = vmatprep.subr.bf16.mxu0 %v12182_v33  ;;  %6352 = vmatprep.subr.bf16.mxu1 %v12184_v35  ;;  %v12239_v33 = vcombine.low %v753_v22, %v757_v23  ;;  %v12248_v35 = vcombine.high %v761_v30, %v765_v31  ;;  %v820_v21 = vld [vmem:[%s14664_s13 + $0x820] sm:$0xff]  ;;  %v817_v22 = vld [vmem:[%s14664_s13 + $0x808] sm:$0xff] }
 0x167   : > { %6081 = vmatprep.mubr.bf16.mxu0 %v13910_v37  ;;  %6382 = vmatprep.mubr.bf16.mxu1 %v13910_v37  ;;  %v772_v37 = vld [vmem:[%s14664_s13 + $0x6a0] sm:$0xff]  ;;  %v821_v23 = vld [vmem:[%s14664_s13 + $0x828] sm:$0xff] }
 0x169   : > { %6052 = vmatpush1.bf16.msra.mxu0 %v12181_v40  ;;  %6353 = vmatpush1.bf16.msra.mxu1 %v12183_v41  ;;  %v12245_v40 = vcombine.low %v760_v28, %v764_v29  ;;  %v12247_v41 = vcombine.low %v761_v30, %v765_v31  ;;  %v824_v28 = vld [vmem:[%s14664_s13 + $0x840] sm:$0xff]  ;;  %v825_v31 = vld [vmem:[%s14664_s13 + $0x848] sm:$0xff] }
 0x16a   : > { %6053 = vmatprep.subr.bf16.mxu0 %v12190_v42  ;;  %6354 = vmatprep.subr.bf16.mxu1 %v12192_v45  ;;  %v12254_v42 = vcombine.high %v768_v36, %v772_v37  ;;  %v780_v45 = vld [vmem:[%s14664_s13 + $0x6e0] sm:$0xff] }
 0x16b   : > { %v828_v29 = vld [vmem:[%s14664_s13 + $0x860] sm:$0xff] }
 0x16c   : > { %v13912_v30 = vld [vmem:[%s14656_s3 + $0x8] ss:$56 sps:$4 sm:$0xff]  }
 0x16d   : > { %6054 = vmatpush1.bf16.msra.mxu0 %v12189_v48  ;;  %6355 = vmatpush1.bf16.msra.mxu1 %v12191_v49  ;;  %v12253_v48 = vcombine.low %v768_v36, %v772_v37  ;;  %v12255_v49 = vcombine.low %v769_v38, %v773_v39  ;;  %v832_v37 = vld [vmem:[%s14664_s13 + $0x880] sm:$0xff] }
 0x16e   : > { %6055 = vmatprep.subr.bf16.mxu0 %v12198_v50  ;;  %6356 = vmatprep.subr.bf16.mxu1 %v12200_v51  ;;  %v12262_v50 = vcombine.high %v776_v44, %v780_v45  ;;  %v12264_v51 = vcombine.high %v777_v46, %v781_v47  ;;  %v836_v38 = vld [vmem:[%s14664_s13 + $0x8a0] sm:$0xff] }
 0x16f   : > { %v13913_v39 = vld [vmem:[%s14656_s3 + $0x14] ss:$56 sps:$4 sm:$0xff]  }
 0x171   : > { %6056 = vmatpush1.bf16.msra.mxu0 %v12197_v56  ;;  %6357 = vmatpush1.bf16.msra.mxu1 %v12199_v57  ;;  %v12261_v56 = vcombine.low %v776_v44, %v780_v45  ;;  %v12263_v57 = vcombine.low %v777_v46, %v781_v47  ;;  %v12318_v44 = vcombine.high %v832_v37, %v836_v38  ;;  %v840_v46 = vld [vmem:[%s14664_s13 + $0x8c0] sm:$0xff] }
 0x172   : > { %6057 = vmatprep.subr.bf16.mxu0 %v12206_v58  ;;  %6358 = vmatprep.subr.bf16.mxu1 %v12208_v59  ;;  %v12270_v58 = vcombine.high %v784_v52, %v788_v53  ;;  %v12272_v59 = vcombine.high %v785_v54, %v789_v55  ;;  %v844_v47 = vld [vmem:[%s14664_s13 + $0x8e0] sm:$0xff] }
 0x175   : > { %6058 = vmatpush1.bf16.msra.mxu0 %v12205_v0  ;;  %6359 = vmatpush1.bf16.msra.mxu1 %v12207_v1  ;;  %v12269_v0 = vcombine.low %v784_v52, %v788_v53  ;;  %v12271_v1 = vcombine.low %v785_v54, %v789_v55  ;;  %v12326_v52 = vcombine.high %v840_v46, %v844_v47  ;;  %v848_v54 = vld [vmem:[%s14664_s13 + $0x900] sm:$0xff] }
 0x176   : > { %6059 = vmatprep.subr.bf16.mxu0 %v12214_v2  ;;  %6360 = vmatprep.subr.bf16.mxu1 %v12216_v3  ;;  %v12278_v2 = vcombine.high %v792_v60, %v796_v61  ;;  %v12280_v3 = vcombine.high %v793_v62, %v797_v63  ;;  %v852_v55 = vld [vmem:[%s14664_s13 + $0x920] sm:$0xff] }
 0x179   : > { %6060 = vmatpush1.bf16.msra.mxu0 %v12213_v8  ;;  %6361 = vmatpush1.bf16.msra.mxu1 %v12215_v9  ;;  %v12277_v8 = vcombine.low %v792_v60, %v796_v61  ;;  %v12279_v9 = vcombine.low %v793_v62, %v797_v63  ;;  %v12334_v60 = vcombine.high %v848_v54, %v852_v55  ;;  %v856_v62 = vld [vmem:[%s14664_s13 + $0x940] sm:$0xff] }
 0x17a   : > { %6061 = vmatprep.subr.bf16.mxu0 %v12222_v10  ;;  %6362 = vmatprep.subr.bf16.mxu1 %v12224_v11  ;;  %v12286_v10 = vcombine.high %v800_v4, %v804_v5  ;;  %v12288_v11 = vcombine.high %v801_v6, %v805_v7  ;;  %v860_v63 = vld [vmem:[%s14664_s13 + $0x960] sm:$0xff] }
 0x17d   : > { %6062 = vmatpush1.bf16.msra.mxu0 %v12221_v16  ;;  %6363 = vmatpush1.bf16.msra.mxu1 %v12223_v17  ;;  %v12285_v16 = vcombine.low %v800_v4, %v804_v5  ;;  %v12287_v17 = vcombine.low %v801_v6, %v805_v7  ;;  %v12342_v4 = vcombine.high %v856_v62, %v860_v63  ;;  %v864_v6 = vld [vmem:[%s14664_s13 + $0x980] sm:$0xff] }
 0x17e   : > { %6063 = vmatprep.subr.bf16.mxu0 %v12230_v18  ;;  %6364 = vmatprep.subr.bf16.mxu1 %v12232_v19  ;;  %v12294_v18 = vcombine.high %v808_v12, %v812_v13  ;;  %v12296_v19 = vcombine.high %v809_v14, %v813_v15  ;;  %v868_v7 = vld [vmem:[%s14664_s13 + $0x9a0] sm:$0xff] }
 0x181   : > { %6064 = vmatpush1.bf16.msra.mxu0 %v12229_v24  ;;  %6365 = vmatpush1.bf16.msra.mxu1 %v12231_v25  ;;  %v12293_v24 = vcombine.low %v808_v12, %v812_v13  ;;  %v12295_v25 = vcombine.low %v809_v14, %v813_v15  ;;  %v12350_v12 = vcombine.high %v864_v6, %v868_v7  ;;  %v872_v14 = vld [vmem:[%s14664_s13 + $0x9c0] sm:$0xff] }
 0x182   : > { %6065 = vmatprep.subr.bf16.mxu0 %v12238_v26  ;;  %6366 = vmatprep.subr.bf16.mxu1 %v12240_v27  ;;  %v12302_v26 = vcombine.high %v816_v20, %v820_v21  ;;  %v12304_v27 = vcombine.high %v817_v22, %v821_v23  ;;  %v876_v15 = vld [vmem:[%s14664_s13 + $0x9e0] sm:$0xff] }
 0x185   : > { %6066 = vmatpush1.bf16.msra.mxu0 %v12237_v32  ;;  %6367 = vmatpush1.bf16.msra.mxu1 %v12239_v33  ;;  %v829_v32 = vld [vmem:[%s14664_s13 + $0x868] sm:$0xff]  ;;  %v12301_v33 = vcombine.low %v816_v20, %v820_v21  ;;  %v12358_v20 = vcombine.high %v872_v14, %v876_v15 }
 0x186   : > { %6067 = vmatprep.subr.bf16.mxu0 %v12246_v34  ;;  %6368 = vmatprep.subr.bf16.mxu1 %v12248_v35  ;;  %v12303_v34 = vcombine.low %v817_v22, %v821_v23  ;;  %v12310_v35 = vcombine.high %v824_v28, %v828_v29  ;;  %v12312_v36 = vcombine.high %v825_v31, %v829_v32  ;;  %v880_v22 = vld [vmem:[%s14664_s13 + $0xa00] sm:$0xff] }
 0x187   : > { %v884_v23 = vld [vmem:[%s14664_s13 + $0xa20] sm:$0xff] }
 0x189   : > { %6068 = vmatpush1.bf16.msra.mxu0 %v12245_v40  ;;  %6369 = vmatpush1.bf16.msra.mxu1 %v12247_v41  ;;  %v833_v40 = vld [vmem:[%s14664_s13 + $0x888] sm:$0xff] }
 0x18a   : > { %6069 = vmatprep.subr.bf16.mxu0 %v12254_v42  ;;  %6370 = vmatprep.subr.bf16.mxu1 %v12256_v43  ;;  %v837_v41 = vld [vmem:[%s14664_s13 + $0x8a8] sm:$0xff]  ;;  %v12309_v42 = vcombine.low %v824_v28, %v828_v29  ;;  %v12311_v43 = vcombine.low %v825_v31, %v829_v32  ;;  %v12366_v28 = vcombine.high %v880_v22, %v884_v23  ;;  %v892_v31 = vld [vmem:[%s14664_s13 + $0xa60] sm:$0xff] }
 0x18b   : > { %v12320_v45 = vcombine.high %v833_v40, %v837_v41  ;;  %v889_v32 = vld [vmem:[%s14664_s13 + $0xa48] sm:$0xff] }
 0x18d   : > { %6070 = vmatpush1.bf16.msra.mxu0 %v12253_v48  ;;  %6371 = vmatpush1.bf16.msra.mxu1 %v12255_v49  ;;  %v841_v48 = vld [vmem:[%s14664_s13 + $0x8c8] sm:$0xff] }
 0x18e   : > { %6071 = vmatprep.subr.bf16.mxu0 %v12262_v50  ;;  %6372 = vmatprep.subr.bf16.mxu1 %v12264_v51  ;;  %v845_v49 = vld [vmem:[%s14664_s13 + $0x8e8] sm:$0xff]  ;;  %v12317_v50 = vcombine.low %v832_v37, %v836_v38  ;;  %v12319_v51 = vcombine.low %v833_v40, %v837_v41  ;;  %v896_v38 = vld [vmem:[%s14664_s13 + $0xa80] sm:$0xff] }
 0x18f   : > { %v12328_v53 = vcombine.high %v841_v48, %v845_v49  ;;  %v897_v40 = vld [vmem:[%s14664_s13 + $0xa88] sm:$0xff] }
 0x190   : > { %v901_v41 = vld [vmem:[%s14664_s13 + $0xaa8] sm:$0xff] }
 0x191   : > { %6072 = vmatpush1.bf16.msra.mxu0 %v12261_v56  ;;  %6373 = vmatpush1.bf16.msra.mxu1 %v12263_v57  ;;  %v849_v56 = vld [vmem:[%s14664_s13 + $0x908] sm:$0xff] }
 0x192   : > { %6073 = vmatprep.subr.bf16.mxu0 %v12270_v58  ;;  %6374 = vmatprep.subr.bf16.mxu1 %v12272_v59  ;;  %v853_v57 = vld [vmem:[%s14664_s13 + $0x928] sm:$0xff]  ;;  %v12325_v58 = vcombine.low %v840_v46, %v844_v47  ;;  %v12327_v59 = vcombine.low %v841_v48, %v845_v49  ;;  %v904_v46 = vld [vmem:[%s14664_s13 + $0xac0] sm:$0xff] }
 0x193   : > { %v12336_v61 = vcombine.high %v849_v56, %v853_v57  ;;  %v908_v47 = vld [vmem:[%s14664_s13 + $0xae0] sm:$0xff]  ;;  %v905_v48 = vld [vmem:[%s14664_s13 + $0xac8] sm:$0xff] }
 0x194   : > { %v909_v49 = vld [vmem:[%s14664_s13 + $0xae8] sm:$0xff] }
 0x195   : > { %6074 = vmatpush1.bf16.msra.mxu0 %v12269_v0  ;;  %6375 = vmatpush1.bf16.msra.mxu1 %v12271_v1  ;;  %v857_v0 = vld [vmem:[%s14664_s13 + $0x948] sm:$0xff] }
 0x196   : > { %6075 = vmatprep.subr.bf16.mxu0 %v12278_v2  ;;  %6376 = vmatprep.subr.bf16.mxu1 %v12280_v3  ;;  %v861_v1 = vld [vmem:[%s14664_s13 + $0x968] sm:$0xff]  ;;  %v12333_v2 = vcombine.low %v848_v54, %v852_v55  ;;  %v12335_v3 = vcombine.low %v849_v56, %v853_v57  ;;  %v912_v54 = vld [vmem:[%s14664_s13 + $0xb00] sm:$0xff] }
 0x197   : > { %v12344_v5 = vcombine.high %v857_v0, %v861_v1  ;;  %v916_v55 = vld [vmem:[%s14664_s13 + $0xb20] sm:$0xff]  ;;  %v913_v56 = vld [vmem:[%s14664_s13 + $0xb08] sm:$0xff] }
 0x198   : > { %v917_v57 = vld [vmem:[%s14664_s13 + $0xb28] sm:$0xff] }
 0x199   : > { %6076 = vmatpush1.bf16.msra.mxu0 %v12277_v8  ;;  %6377 = vmatpush1.bf16.msra.mxu1 %v12279_v9  ;;  %v865_v8 = vld [vmem:[%s14664_s13 + $0x988] sm:$0xff] }
 0x19a   : > { %6077 = vmatprep.subr.bf16.mxu0 %v12286_v10  ;;  %6378 = vmatprep.subr.bf16.mxu1 %v12288_v11  ;;  %v869_v9 = vld [vmem:[%s14664_s13 + $0x9a8] sm:$0xff]  ;;  %v12341_v10 = vcombine.low %v856_v62, %v860_v63  ;;  %v12343_v11 = vcombine.low %v857_v0, %v861_v1  ;;  %v920_v62 = vld [vmem:[%s14664_s13 + $0xb40] sm:$0xff] }
 0x19b   : > { %v12352_v13 = vcombine.high %v865_v8, %v869_v9  ;;  %v924_v63 = vld [vmem:[%s14664_s13 + $0xb60] sm:$0xff]  ;;  %v921_v0 = vld [vmem:[%s14664_s13 + $0xb48] sm:$0xff] }
 0x19c   : > { %v925_v1 = vld [vmem:[%s14664_s13 + $0xb68] sm:$0xff] }
 0x19d   : > { %6078 = vmatpush1.bf16.msra.mxu0 %v12285_v16  ;;  %6379 = vmatpush1.bf16.msra.mxu1 %v12287_v17  ;;  %v873_v16 = vld [vmem:[%s14664_s13 + $0x9c8] sm:$0xff] }
 0x19e   : > { %6079 = vmatprep.subr.bf16.mxu0 %v12294_v18  ;;  %6380 = vmatprep.subr.bf16.mxu1 %v12296_v19  ;;  %v877_v17 = vld [vmem:[%s14664_s13 + $0x9e8] sm:$0xff]  ;;  %v12349_v18 = vcombine.low %v864_v6, %v868_v7  ;;  %v12351_v19 = vcombine.low %v865_v8, %v869_v9  ;;  %v928_v6 = vld [vmem:[%s14664_s13 + $0xb80] sm:$0xff] }
 0x19f   : > { %v12360_v21 = vcombine.high %v873_v16, %v877_v17  ;;  %v932_v7 = vld [vmem:[%s14664_s13 + $0xba0] sm:$0xff]  ;;  %v929_v8 = vld [vmem:[%s14664_s13 + $0xb88] sm:$0xff] }
 0x1a0   : > { %v933_v9 = vld [vmem:[%s14664_s13 + $0xba8] sm:$0xff] }
 0x1a1   : > { %6080 = vmatpush1.bf16.msra.mxu0 %v12293_v24  ;;  %6381 = vmatpush1.bf16.msra.mxu1 %v12295_v25  ;;  %v881_v24 = vld [vmem:[%s14664_s13 + $0xa08] sm:$0xff] }
 0x1a2   : > { %6092 = vmatprep.subr.bf16.mxu0 %v12302_v26  ;;  %6393 = vmatprep.subr.bf16.mxu1 %v12304_v27  ;;  %v885_v25 = vld [vmem:[%s14664_s13 + $0xa28] sm:$0xff]  ;;  %v12357_v26 = vcombine.low %v872_v14, %v876_v15  ;;  %v12359_v27 = vcombine.low %v873_v16, %v877_v17  ;;  %v936_v14 = vld [vmem:[%s14664_s13 + $0xbc0] sm:$0xff] }
 0x1a3   : > { %v12368_v29 = vcombine.high %v881_v24, %v885_v25  ;;  %v940_v15 = vld [vmem:[%s14664_s13 + $0xbe0] sm:$0xff]  ;;  %v937_v16 = vld [vmem:[%s14664_s13 + $0xbc8] sm:$0xff] }
 0x1a4   : > { %6082 = vmatmul.mubr.bf16.vlgmr.msra.gmra.mrb[0].mxu0 %v13912_v30  ;;  %6383 = vmatmul.mubr.bf16.vlgmr.msra.gmra.mrb[0].mxu1 %v13912_v30  ;;  %v888_v30 = vld [vmem:[%s14664_s13 + $0xa40] sm:$0xff]  ;;  %v941_v17 = vld [vmem:[%s14664_s13 + $0xbe8] sm:$0xff] }
 0x1a5   : > { %6093 = vmatpush1.bf16.msra.mxu0 %v12301_v33  ;;  %6394 = vmatpush1.bf16.msra.mxu1 %v12303_v34  ;;  %v893_v33 = vld [vmem:[%s14664_s13 + $0xa68] sm:$0xff]  ;;  %v12365_v34 = vcombine.low %v880_v22, %v884_v23  ;;  %v944_v22 = vld [vmem:[%s14664_s13 + $0xc00] sm:$0xff] }
 0x1a6   : > { %6094 = vmatprep.subr.bf16.mxu0 %v12310_v35  ;;  %6395 = vmatprep.subr.bf16.mxu1 %v12312_v36  ;;  %v12367_v35 = vcombine.low %v881_v24, %v885_v25  ;;  %v12374_v36 = vcombine.high %v888_v30, %v892_v31  ;;  %v12376_v37 = vcombine.high %v889_v32, %v893_v33  ;;  %v948_v23 = vld [vmem:[%s14664_s13 + $0xc20] sm:$0xff]  ;;  %v945_v24 = vld [vmem:[%s14664_s13 + $0xc08] sm:$0xff] }
 0x1a7   : > { %6124 = vmatprep.mubr.bf16.mxu0 %v13913_v39  ;;  %6425 = vmatprep.mubr.bf16.mxu1 %v13913_v39  ;;  %v900_v39 = vld [vmem:[%s14664_s13 + $0xaa0] sm:$0xff]  ;;  %v949_v25 = vld [vmem:[%s14664_s13 + $0xc28] sm:$0xff] }
 0x1a9   : > { %6095 = vmatpush1.bf16.msra.mxu0 %v12309_v42  ;;  %6396 = vmatpush1.bf16.msra.mxu1 %v12311_v43  ;;  %v12373_v42 = vcombine.low %v888_v30, %v892_v31  ;;  %v12375_v43 = vcombine.low %v889_v32, %v893_v33  ;;  %v952_v30 = vld [vmem:[%s14664_s13 + $0xc40] sm:$0xff]  ;;  %v953_v33 = vld [vmem:[%s14664_s13 + $0xc48] sm:$0xff] }
 0x1aa   : > { %6096 = vmatprep.subr.bf16.mxu0 %v12318_v44  ;;  %6397 = vmatprep.subr.bf16.mxu1 %v12320_v45  ;;  %v12382_v44 = vcombine.high %v896_v38, %v900_v39  ;;  %v12384_v45 = vcombine.high %v897_v40, %v901_v41  ;;  %v956_v31 = vld [vmem:[%s14664_s13 + $0xc60] sm:$0xff] }
 0x1ab   : > { %v13915_v32 = vld [vmem:[%s14656_s3 + $0x10] ss:$56 sps:$4 sm:$0xff]  }
 0x1ad   : > { %6097 = vmatpush1.bf16.msra.mxu0 %v12317_v50  ;;  %6398 = vmatpush1.bf16.msra.mxu1 %v12319_v51  ;;  %v12381_v50 = vcombine.low %v896_v38, %v900_v39  ;;  %v12383_v51 = vcombine.low %v897_v40, %v901_v41  ;;  %v960_v39 = vld [vmem:[%s14664_s13 + $0xc80] sm:$0xff] }
 0x1ae   : > { %6098 = vmatprep.subr.bf16.mxu0 %v12326_v52  ;;  %6399 = vmatprep.subr.bf16.mxu1 %v12328_v53  ;;  %v12390_v52 = vcombine.high %v904_v46, %v908_v47  ;;  %v12392_v53 = vcombine.high %v905_v48, %v909_v49  ;;  %v964_v40 = vld [vmem:[%s14664_s13 + $0xca0] sm:$0xff] }
 0x1af   : > { %v13916_v41 = vld [vmem:[%s14656_s3 + $0x1c] ss:$56 sps:$4 sm:$0xff]  }
 0x1b1   : > { %6099 = vmatpush1.bf16.msra.mxu0 %v12325_v58  ;;  %6400 = vmatpush1.bf16.msra.mxu1 %v12327_v59  ;;  %v12389_v58 = vcombine.low %v904_v46, %v908_v47  ;;  %v12391_v59 = vcombine.low %v905_v48, %v909_v49  ;;  %v12446_v46 = vcombine.high %v960_v39, %v964_v40  ;;  %v968_v48 = vld [vmem:[%s14664_s13 + $0xcc0] sm:$0xff] }
 0x1b2   : > { %6100 = vmatprep.subr.bf16.mxu0 %v12334_v60  ;;  %6401 = vmatprep.subr.bf16.mxu1 %v12336_v61  ;;  %v12398_v60 = vcombine.high %v912_v54, %v916_v55  ;;  %v12400_v61 = vcombine.high %v913_v56, %v917_v57  ;;  %v972_v49 = vld [vmem:[%s14664_s13 + $0xce0] sm:$0xff] }
 0x1b5   : > { %6101 = vmatpush1.bf16.msra.mxu0 %v12333_v2  ;;  %6402 = vmatpush1.bf16.msra.mxu1 %v12335_v3  ;;  %v12397_v2 = vcombine.low %v912_v54, %v916_v55  ;;  %v12399_v3 = vcombine.low %v913_v56, %v917_v57  ;;  %v12454_v54 = vcombine.high %v968_v48, %v972_v49  ;;  %v976_v56 = vld [vmem:[%s14664_s13 + $0xd00] sm:$0xff] }
 0x1b6   : > { %6102 = vmatprep.subr.bf16.mxu0 %v12342_v4  ;;  %6403 = vmatprep.subr.bf16.mxu1 %v12344_v5  ;;  %v12406_v4 = vcombine.high %v920_v62, %v924_v63  ;;  %v12408_v5 = vcombine.high %v921_v0, %v925_v1  ;;  %v980_v57 = vld [vmem:[%s14664_s13 + $0xd20] sm:$0xff] }
 0x1b9   : > { %6103 = vmatpush1.bf16.msra.mxu0 %v12341_v10  ;;  %6404 = vmatpush1.bf16.msra.mxu1 %v12343_v11  ;;  %v12405_v10 = vcombine.low %v920_v62, %v924_v63  ;;  %v12407_v11 = vcombine.low %v921_v0, %v925_v1  ;;  %v12462_v62 = vcombine.high %v976_v56, %v980_v57  ;;  %v984_v0 = vld [vmem:[%s14664_s13 + $0xd40] sm:$0xff] }
 0x1ba   : > { %6104 = vmatprep.subr.bf16.mxu0 %v12350_v12  ;;  %6405 = vmatprep.subr.bf16.mxu1 %v12352_v13  ;;  %v12414_v12 = vcombine.high %v928_v6, %v932_v7  ;;  %v12416_v13 = vcombine.high %v929_v8, %v933_v9  ;;  %v988_v1 = vld [vmem:[%s14664_s13 + $0xd60] sm:$0xff] }
 0x1bd   : > { %6105 = vmatpush1.bf16.msra.mxu0 %v12349_v18  ;;  %6406 = vmatpush1.bf16.msra.mxu1 %v12351_v19  ;;  %v12413_v18 = vcombine.low %v928_v6, %v932_v7  ;;  %v12415_v19 = vcombine.low %v929_v8, %v933_v9  ;;  %v12470_v6 = vcombine.high %v984_v0, %v988_v1  ;;  %v992_v8 = vld [vmem:[%s14664_s13 + $0xd80] sm:$0xff] }
 0x1be   : > { %6106 = vmatprep.subr.bf16.mxu0 %v12358_v20  ;;  %6407 = vmatprep.subr.bf16.mxu1 %v12360_v21  ;;  %v12422_v20 = vcombine.high %v936_v14, %v940_v15  ;;  %v12424_v21 = vcombine.high %v937_v16, %v941_v17  ;;  %v996_v9 = vld [vmem:[%s14664_s13 + $0xda0] sm:$0xff] }
 0x1c1   : > { %6107 = vmatpush1.bf16.msra.mxu0 %v12357_v26  ;;  %6408 = vmatpush1.bf16.msra.mxu1 %v12359_v27  ;;  %v12421_v26 = vcombine.low %v936_v14, %v940_v15  ;;  %v12423_v27 = vcombine.low %v937_v16, %v941_v17  ;;  %v12478_v14 = vcombine.high %v992_v8, %v996_v9  ;;  %v1000_v16 = vld [vmem:[%s14664_s13 + $0xdc0] sm:$0xff] }
 0x1c2   : > { %6108 = vmatprep.subr.bf16.mxu0 %v12366_v28  ;;  %6409 = vmatprep.subr.bf16.mxu1 %v12368_v29  ;;  %v12430_v28 = vcombine.high %v944_v22, %v948_v23  ;;  %v12432_v29 = vcombine.high %v945_v24, %v949_v25  ;;  %v1004_v17 = vld [vmem:[%s14664_s13 + $0xde0] sm:$0xff] }
 0x1c5   : > { %6109 = vmatpush1.bf16.msra.mxu0 %v12365_v34  ;;  %6410 = vmatpush1.bf16.msra.mxu1 %v12367_v35  ;;  %v957_v34 = vld [vmem:[%s14664_s13 + $0xc68] sm:$0xff]  ;;  %v12429_v35 = vcombine.low %v944_v22, %v948_v23  ;;  %v12486_v22 = vcombine.high %v1000_v16, %v1004_v17 }
 0x1c6   : > { %6110 = vmatprep.subr.bf16.mxu0 %v12374_v36  ;;  %6411 = vmatprep.subr.bf16.mxu1 %v12376_v37  ;;  %v12431_v36 = vcombine.low %v945_v24, %v949_v25  ;;  %v12438_v37 = vcombine.high %v952_v30, %v956_v31  ;;  %v12440_v38 = vcombine.high %v953_v33, %v957_v34  ;;  %v1008_v24 = vld [vmem:[%s14664_s13 + $0xe00] sm:$0xff] }
 0x1c7   : > { %v1012_v25 = vld [vmem:[%s14664_s13 + $0xe20] sm:$0xff] }
 0x1c9   : > { %6111 = vmatpush1.bf16.msra.mxu0 %v12373_v42  ;;  %6412 = vmatpush1.bf16.msra.mxu1 %v12375_v43  ;;  %v961_v42 = vld [vmem:[%s14664_s13 + $0xc88] sm:$0xff] }
 0x1ca   : > { %6112 = vmatprep.subr.bf16.mxu0 %v12382_v44  ;;  %6413 = vmatprep.subr.bf16.mxu1 %v12384_v45  ;;  %v965_v43 = vld [vmem:[%s14664_s13 + $0xca8] sm:$0xff]  ;;  %v12437_v44 = vcombine.low %v952_v30, %v956_v31  ;;  %v12439_v45 = vcombine.low %v953_v33, %v957_v34  ;;  %v12494_v30 = vcombine.high %v1008_v24, %v1012_v25  ;;  %v1020_v33 = vld [vmem:[%s14664_s13 + $0xe60] sm:$0xff] }
 0x1cb   : > { %v12448_v47 = vcombine.high %v961_v42, %v965_v43  ;;  %v1017_v34 = vld [vmem:[%s14664_s13 + $0xe48] sm:$0xff] }
 0x1cd   : > { %6113 = vmatpush1.bf16.msra.mxu0 %v12381_v50  ;;  %6414 = vmatpush1.bf16.msra.mxu1 %v12383_v51  ;;  %v969_v50 = vld [vmem:[%s14664_s13 + $0xcc8] sm:$0xff] }
 0x1ce   : > { %6114 = vmatprep.subr.bf16.mxu0 %v12390_v52  ;;  %6415 = vmatprep.subr.bf16.mxu1 %v12392_v53  ;;  %v973_v51 = vld [vmem:[%s14664_s13 + $0xce8] sm:$0xff]  ;;  %v12445_v52 = vcombine.low %v960_v39, %v964_v40  ;;  %v12447_v53 = vcombine.low %v961_v42, %v965_v43  ;;  %v1024_v40 = vld [vmem:[%s14664_s13 + $0xe80] sm:$0xff] }
 0x1cf   : > { %v12456_v55 = vcombine.high %v969_v50, %v973_v51  ;;  %v1025_v42 = vld [vmem:[%s14664_s13 + $0xe88] sm:$0xff] }
 0x1d0   : > { %v1029_v43 = vld [vmem:[%s14664_s13 + $0xea8] sm:$0xff] }
 0x1d1   : > { %6115 = vmatpush1.bf16.msra.mxu0 %v12389_v58  ;;  %6416 = vmatpush1.bf16.msra.mxu1 %v12391_v59  ;;  %v977_v58 = vld [vmem:[%s14664_s13 + $0xd08] sm:$0xff] }
 0x1d2   : > { %6116 = vmatprep.subr.bf16.mxu0 %v12398_v60  ;;  %6417 = vmatprep.subr.bf16.mxu1 %v12400_v61  ;;  %v981_v59 = vld [vmem:[%s14664_s13 + $0xd28] sm:$0xff]  ;;  %v12453_v60 = vcombine.low %v968_v48, %v972_v49  ;;  %v12455_v61 = vcombine.low %v969_v50, %v973_v51  ;;  %v1032_v48 = vld [vmem:[%s14664_s13 + $0xec0] sm:$0xff] }
 0x1d3   : > { %v12464_v63 = vcombine.high %v977_v58, %v981_v59  ;;  %v1036_v49 = vld [vmem:[%s14664_s13 + $0xee0] sm:$0xff]  ;;  %v1033_v50 = vld [vmem:[%s14664_s13 + $0xec8] sm:$0xff] }
 0x1d4   : > { %v1037_v51 = vld [vmem:[%s14664_s13 + $0xee8] sm:$0xff] }
 0x1d5   : > { %6117 = vmatpush1.bf16.msra.mxu0 %v12397_v2  ;;  %6418 = vmatpush1.bf16.msra.mxu1 %v12399_v3  ;;  %v985_v2 = vld [vmem:[%s14664_s13 + $0xd48] sm:$0xff] }
 0x1d6   : > { %6118 = vmatprep.subr.bf16.mxu0 %v12406_v4  ;;  %6419 = vmatprep.subr.bf16.mxu1 %v12408_v5  ;;  %v989_v3 = vld [vmem:[%s14664_s13 + $0xd68] sm:$0xff]  ;;  %v12461_v4 = vcombine.low %v976_v56, %v980_v57  ;;  %v12463_v5 = vcombine.low %v977_v58, %v981_v59  ;;  %v1040_v56 = vld [vmem:[%s14664_s13 + $0xf00] sm:$0xff] }
 0x1d7   : > { %v12472_v7 = vcombine.high %v985_v2, %v989_v3  ;;  %v1044_v57 = vld [vmem:[%s14664_s13 + $0xf20] sm:$0xff]  ;;  %v1041_v58 = vld [vmem:[%s14664_s13 + $0xf08] sm:$0xff] }
 0x1d8   : > { %v1045_v59 = vld [vmem:[%s14664_s13 + $0xf28] sm:$0xff] }
 0x1d9   : > { %6119 = vmatpush1.bf16.msra.mxu0 %v12405_v10  ;;  %6420 = vmatpush1.bf16.msra.mxu1 %v12407_v11  ;;  %v993_v10 = vld [vmem:[%s14664_s13 + $0xd88] sm:$0xff] }
 0x1da   : > { %6120 = vmatprep.subr.bf16.mxu0 %v12414_v12  ;;  %6421 = vmatprep.subr.bf16.mxu1 %v12416_v13  ;;  %v997_v11 = vld [vmem:[%s14664_s13 + $0xda8] sm:$0xff]  ;;  %v12469_v12 = vcombine.low %v984_v0, %v988_v1  ;;  %v12471_v13 = vcombine.low %v985_v2, %v989_v3  ;;  %v1048_v0 = vld [vmem:[%s14664_s13 + $0xf40] sm:$0xff] }
 0x1db   : > { %v12480_v15 = vcombine.high %v993_v10, %v997_v11  ;;  %v1052_v1 = vld [vmem:[%s14664_s13 + $0xf60] sm:$0xff]  ;;  %v1049_v2 = vld [vmem:[%s14664_s13 + $0xf48] sm:$0xff] }
 0x1dc   : > { %v1053_v3 = vld [vmem:[%s14664_s13 + $0xf68] sm:$0xff] }
 0x1dd   : > { %6121 = vmatpush1.bf16.msra.mxu0 %v12413_v18  ;;  %6422 = vmatpush1.bf16.msra.mxu1 %v12415_v19  ;;  %v1001_v18 = vld [vmem:[%s14664_s13 + $0xdc8] sm:$0xff] }
 0x1de   : > { %6122 = vmatprep.subr.bf16.mxu0 %v12422_v20  ;;  %6423 = vmatprep.subr.bf16.mxu1 %v12424_v21  ;;  %v1005_v19 = vld [vmem:[%s14664_s13 + $0xde8] sm:$0xff]  ;;  %v12477_v20 = vcombine.low %v992_v8, %v996_v9  ;;  %v12479_v21 = vcombine.low %v993_v10, %v997_v11  ;;  %v1056_v8 = vld [vmem:[%s14664_s13 + $0xf80] sm:$0xff] }
 0x1df   : > { %v12488_v23 = vcombine.high %v1001_v18, %v1005_v19  ;;  %v1060_v9 = vld [vmem:[%s14664_s13 + $0xfa0] sm:$0xff]  ;;  %v1057_v10 = vld [vmem:[%s14664_s13 + $0xf88] sm:$0xff] }
 0x1e0   : > { %v1061_v11 = vld [vmem:[%s14664_s13 + $0xfa8] sm:$0xff] }
 0x1e1   : > { %6123 = vmatpush1.bf16.msra.mxu0 %v12421_v26  ;;  %6424 = vmatpush1.bf16.msra.mxu1 %v12423_v27  ;;  %v1009_v26 = vld [vmem:[%s14664_s13 + $0xe08] sm:$0xff] }
 0x1e2   : > { %6135 = vmatprep.subr.bf16.mxu0 %v12430_v28  ;;  %6436 = vmatprep.subr.bf16.mxu1 %v12432_v29  ;;  %v1013_v27 = vld [vmem:[%s14664_s13 + $0xe28] sm:$0xff]  ;;  %v12485_v28 = vcombine.low %v1000_v16, %v1004_v17  ;;  %v12487_v29 = vcombine.low %v1001_v18, %v1005_v19  ;;  %v1064_v16 = vld [vmem:[%s14664_s13 + $0xfc0] sm:$0xff] }
 0x1e3   : > { %v12496_v31 = vcombine.high %v1009_v26, %v1013_v27  ;;  %v1068_v17 = vld [vmem:[%s14664_s13 + $0xfe0] sm:$0xff]  ;;  %v1065_v18 = vld [vmem:[%s14664_s13 + $0xfc8] sm:$0xff] }
 0x1e4   : > { %6125 = vmatmul.mubr.bf16.vlgmr.msra.gmra.mrb[0].mxu0 %v13915_v32  ;;  %6426 = vmatmul.mubr.bf16.vlgmr.msra.gmra.mrb[0].mxu1 %v13915_v32  ;;  %v1016_v32 = vld [vmem:[%s14664_s13 + $0xe40] sm:$0xff]  ;;  %v1069_v19 = vld [vmem:[%s14664_s13 + $0xfe8] sm:$0xff] }
 0x1e5   : > { %6136 = vmatpush1.bf16.msra.mxu0 %v12429_v35  ;;  %6437 = vmatpush1.bf16.msra.mxu1 %v12431_v36  ;;  %v1021_v35 = vld [vmem:[%s14664_s13 + $0xe68] sm:$0xff]  ;;  %v12493_v36 = vcombine.low %v1008_v24, %v1012_v25  ;;  %v1072_v24 = vld [vmem:[%s14664_s13 + $0x1000] sm:$0xff] }
 0x1e6   : > { %6137 = vmatprep.subr.bf16.mxu0 %v12438_v37  ;;  %6438 = vmatprep.subr.bf16.mxu1 %v12440_v38  ;;  %v12495_v37 = vcombine.low %v1009_v26, %v1013_v27  ;;  %v12502_v38 = vcombine.high %v1016_v32, %v1020_v33  ;;  %v12504_v39 = vcombine.high %v1017_v34, %v1021_v35  ;;  %v1076_v25 = vld [vmem:[%s14664_s13 + $0x1020] sm:$0xff]  ;;  %v1073_v26 = vld [vmem:[%s14664_s13 + $0x1008] sm:$0xff] }
 0x1e7   : > { %6167 = vmatprep.mubr.bf16.mxu0 %v13916_v41  ;;  %6468 = vmatprep.mubr.bf16.mxu1 %v13916_v41  ;;  %v1028_v41 = vld [vmem:[%s14664_s13 + $0xea0] sm:$0xff]  ;;  %v1077_v27 = vld [vmem:[%s14664_s13 + $0x1028] sm:$0xff] }
 0x1e9   : > { %6138 = vmatpush1.bf16.msra.mxu0 %v12437_v44  ;;  %6439 = vmatpush1.bf16.msra.mxu1 %v12439_v45  ;;  %v12501_v44 = vcombine.low %v1016_v32, %v1020_v33  ;;  %v12503_v45 = vcombine.low %v1017_v34, %v1021_v35  ;;  %v1080_v32 = vld [vmem:[%s14664_s13 + $0x1040] sm:$0xff]  ;;  %v1081_v35 = vld [vmem:[%s14664_s13 + $0x1048] sm:$0xff] }
 0x1ea   : > { %6139 = vmatprep.subr.bf16.mxu0 %v12446_v46  ;;  %6440 = vmatprep.subr.bf16.mxu1 %v12448_v47  ;;  %v12510_v46 = vcombine.high %v1024_v40, %v1028_v41  ;;  %v12512_v47 = vcombine.high %v1025_v42, %v1029_v43  ;;  %v1084_v33 = vld [vmem:[%s14664_s13 + $0x1060] sm:$0xff] }
 0x1eb   : > { %v13918_v34 = vld [vmem:[%s14656_s3 + $0x18] ss:$56 sps:$4 sm:$0xff]  }
 0x1ed   : > { %6140 = vmatpush1.bf16.msra.mxu0 %v12445_v52  ;;  %6441 = vmatpush1.bf16.msra.mxu1 %v12447_v53  ;;  %v12509_v52 = vcombine.low %v1024_v40, %v1028_v41  ;;  %v12511_v53 = vcombine.low %v1025_v42, %v1029_v43  ;;  %v1088_v41 = vld [vmem:[%s14664_s13 + $0x1080] sm:$0xff] }
 0x1ee   : > { %6141 = vmatprep.subr.bf16.mxu0 %v12454_v54  ;;  %6442 = vmatprep.subr.bf16.mxu1 %v12456_v55  ;;  %v12518_v54 = vcombine.high %v1032_v48, %v1036_v49  ;;  %v12520_v55 = vcombine.high %v1033_v50, %v1037_v51  ;;  %v1092_v42 = vld [vmem:[%s14664_s13 + $0x10a0] sm:$0xff] }
 0x1ef   : > { %v13919_v43 = vld [vmem:[%s14656_s3 + $0x24] ss:$56 sps:$4 sm:$0xff]  }
 0x1f1   : > { %6142 = vmatpush1.bf16.msra.mxu0 %v12453_v60  ;;  %6443 = vmatpush1.bf16.msra.mxu1 %v12455_v61  ;;  %v12517_v60 = vcombine.low %v1032_v48, %v1036_v49  ;;  %v12519_v61 = vcombine.low %v1033_v50, %v1037_v51  ;;  %v12574_v48 = vcombine.high %v1088_v41, %v1092_v42  ;;  %v1096_v50 = vld [vmem:[%s14664_s13 + $0x10c0] sm:$0xff] }
 0x1f2   : > { %6143 = vmatprep.subr.bf16.mxu0 %v12462_v62  ;;  %6444 = vmatprep.subr.bf16.mxu1 %v12464_v63  ;;  %v12526_v62 = vcombine.high %v1040_v56, %v1044_v57  ;;  %v12528_v63 = vcombine.high %v1041_v58, %v1045_v59  ;;  %v1100_v51 = vld [vmem:[%s14664_s13 + $0x10e0] sm:$0xff] }
 0x1f5   : > { %6144 = vmatpush1.bf16.msra.mxu0 %v12461_v4  ;;  %6445 = vmatpush1.bf16.msra.mxu1 %v12463_v5  ;;  %v12525_v4 = vcombine.low %v1040_v56, %v1044_v57  ;;  %v12527_v5 = vcombine.low %v1041_v58, %v1045_v59  ;;  %v12582_v56 = vcombine.high %v1096_v50, %v1100_v51  ;;  %v1104_v58 = vld [vmem:[%s14664_s13 + $0x1100] sm:$0xff] }
 0x1f6   : > { %6145 = vmatprep.subr.bf16.mxu0 %v12470_v6  ;;  %6446 = vmatprep.subr.bf16.mxu1 %v12472_v7  ;;  %v12534_v6 = vcombine.high %v1048_v0, %v1052_v1  ;;  %v12536_v7 = vcombine.high %v1049_v2, %v1053_v3  ;;  %v1108_v59 = vld [vmem:[%s14664_s13 + $0x1120] sm:$0xff] }
 0x1f9   : > { %6146 = vmatpush1.bf16.msra.mxu0 %v12469_v12  ;;  %6447 = vmatpush1.bf16.msra.mxu1 %v12471_v13  ;;  %v12533_v12 = vcombine.low %v1048_v0, %v1052_v1  ;;  %v12535_v13 = vcombine.low %v1049_v2, %v1053_v3  ;;  %v12590_v0 = vcombine.high %v1104_v58, %v1108_v59  ;;  %v1112_v2 = vld [vmem:[%s14664_s13 + $0x1140] sm:$0xff] }
 0x1fa   : > { %6147 = vmatprep.subr.bf16.mxu0 %v12478_v14  ;;  %6448 = vmatprep.subr.bf16.mxu1 %v12480_v15  ;;  %v12542_v14 = vcombine.high %v1056_v8, %v1060_v9  ;;  %v12544_v15 = vcombine.high %v1057_v10, %v1061_v11  ;;  %v1116_v3 = vld [vmem:[%s14664_s13 + $0x1160] sm:$0xff] }
 0x1fd   : > { %6148 = vmatpush1.bf16.msra.mxu0 %v12477_v20  ;;  %6449 = vmatpush1.bf16.msra.mxu1 %v12479_v21  ;;  %v12541_v20 = vcombine.low %v1056_v8, %v1060_v9  ;;  %v12543_v21 = vcombine.low %v1057_v10, %v1061_v11  ;;  %v12598_v8 = vcombine.high %v1112_v2, %v1116_v3  ;;  %v1120_v10 = vld [vmem:[%s14664_s13 + $0x1180] sm:$0xff] }
 0x1fe   : > { %6149 = vmatprep.subr.bf16.mxu0 %v12486_v22  ;;  %6450 = vmatprep.subr.bf16.mxu1 %v12488_v23  ;;  %v12550_v22 = vcombine.high %v1064_v16, %v1068_v17  ;;  %v12552_v23 = vcombine.high %v1065_v18, %v1069_v19  ;;  %v1124_v11 = vld [vmem:[%s14664_s13 + $0x11a0] sm:$0xff] }
 0x201   : > { %6150 = vmatpush1.bf16.msra.mxu0 %v12485_v28  ;;  %6451 = vmatpush1.bf16.msra.mxu1 %v12487_v29  ;;  %v12549_v28 = vcombine.low %v1064_v16, %v1068_v17  ;;  %v12551_v29 = vcombine.low %v1065_v18, %v1069_v19  ;;  %v12606_v16 = vcombine.high %v1120_v10, %v1124_v11  ;;  %v1128_v18 = vld [vmem:[%s14664_s13 + $0x11c0] sm:$0xff] }
 0x202   : > { %6151 = vmatprep.subr.bf16.mxu0 %v12494_v30  ;;  %6452 = vmatprep.subr.bf16.mxu1 %v12496_v31  ;;  %v12558_v30 = vcombine.high %v1072_v24, %v1076_v25  ;;  %v12560_v31 = vcombine.high %v1073_v26, %v1077_v27  ;;  %v1132_v19 = vld [vmem:[%s14664_s13 + $0x11e0] sm:$0xff] }
 0x205   : > { %6152 = vmatpush1.bf16.msra.mxu0 %v12493_v36  ;;  %6453 = vmatpush1.bf16.msra.mxu1 %v12495_v37  ;;  %v1085_v36 = vld [vmem:[%s14664_s13 + $0x1068] sm:$0xff]  ;;  %v12557_v37 = vcombine.low %v1072_v24, %v1076_v25  ;;  %v12614_v24 = vcombine.high %v1128_v18, %v1132_v19 }
 0x206   : > { %6153 = vmatprep.subr.bf16.mxu0 %v12502_v38  ;;  %6454 = vmatprep.subr.bf16.mxu1 %v12504_v39  ;;  %v12559_v38 = vcombine.low %v1073_v26, %v1077_v27  ;;  %v12566_v39 = vcombine.high %v1080_v32, %v1084_v33  ;;  %v12568_v40 = vcombine.high %v1081_v35, %v1085_v36  ;;  %v1136_v26 = vld [vmem:[%s14664_s13 + $0x1200] sm:$0xff] }
 0x207   : > { %v1140_v27 = vld [vmem:[%s14664_s13 + $0x1220] sm:$0xff] }
 0x209   : > { %6154 = vmatpush1.bf16.msra.mxu0 %v12501_v44  ;;  %6455 = vmatpush1.bf16.msra.mxu1 %v12503_v45  ;;  %v1089_v44 = vld [vmem:[%s14664_s13 + $0x1088] sm:$0xff] }
 0x20a   : > { %6155 = vmatprep.subr.bf16.mxu0 %v12510_v46  ;;  %6456 = vmatprep.subr.bf16.mxu1 %v12512_v47  ;;  %v1093_v45 = vld [vmem:[%s14664_s13 + $0x10a8] sm:$0xff]  ;;  %v12565_v46 = vcombine.low %v1080_v32, %v1084_v33  ;;  %v12567_v47 = vcombine.low %v1081_v35, %v1085_v36  ;;  %v12622_v32 = vcombine.high %v1136_v26, %v1140_v27  ;;  %v1148_v35 = vld [vmem:[%s14664_s13 + $0x1260] sm:$0xff] }
 0x20b   : > { %v12576_v49 = vcombine.high %v1089_v44, %v1093_v45  ;;  %v1145_v36 = vld [vmem:[%s14664_s13 + $0x1248] sm:$0xff] }
 0x20d   : > { %6156 = vmatpush1.bf16.msra.mxu0 %v12509_v52  ;;  %6457 = vmatpush1.bf16.msra.mxu1 %v12511_v53  ;;  %v1097_v52 = vld [vmem:[%s14664_s13 + $0x10c8] sm:$0xff] }
 0x20e   : > { %6157 = vmatprep.subr.bf16.mxu0 %v12518_v54  ;;  %6458 = vmatprep.subr.bf16.mxu1 %v12520_v55  ;;  %v1101_v53 = vld [vmem:[%s14664_s13 + $0x10e8] sm:$0xff]  ;;  %v12573_v54 = vcombine.low %v1088_v41, %v1092_v42  ;;  %v12575_v55 = vcombine.low %v1089_v44, %v1093_v45  ;;  %v1152_v42 = vld [vmem:[%s14664_s13 + $0x1280] sm:$0xff] }
 0x20f   : > { %v12584_v57 = vcombine.high %v1097_v52, %v1101_v53  ;;  %v1153_v44 = vld [vmem:[%s14664_s13 + $0x1288] sm:$0xff] }
 0x210   : > { %v1157_v45 = vld [vmem:[%s14664_s13 + $0x12a8] sm:$0xff] }
 0x211   : > { %6158 = vmatpush1.bf16.msra.mxu0 %v12517_v60  ;;  %6459 = vmatpush1.bf16.msra.mxu1 %v12519_v61  ;;  %v1105_v60 = vld [vmem:[%s14664_s13 + $0x1108] sm:$0xff] }
 0x212   : > { %6159 = vmatprep.subr.bf16.mxu0 %v12526_v62  ;;  %6460 = vmatprep.subr.bf16.mxu1 %v12528_v63  ;;  %v1109_v61 = vld [vmem:[%s14664_s13 + $0x1128] sm:$0xff]  ;;  %v12581_v62 = vcombine.low %v1096_v50, %v1100_v51  ;;  %v12583_v63 = vcombine.low %v1097_v52, %v1101_v53  ;;  %v1160_v50 = vld [vmem:[%s14664_s13 + $0x12c0] sm:$0xff] }
 0x213   : > { %v12592_v1 = vcombine.high %v1105_v60, %v1109_v61  ;;  %v1164_v51 = vld [vmem:[%s14664_s13 + $0x12e0] sm:$0xff]  ;;  %v1161_v52 = vld [vmem:[%s14664_s13 + $0x12c8] sm:$0xff] }
 0x214   : > { %v1165_v53 = vld [vmem:[%s14664_s13 + $0x12e8] sm:$0xff] }
 0x215   : > { %6160 = vmatpush1.bf16.msra.mxu0 %v12525_v4  ;;  %6461 = vmatpush1.bf16.msra.mxu1 %v12527_v5  ;;  %v1113_v4 = vld [vmem:[%s14664_s13 + $0x1148] sm:$0xff] }
 0x216   : > { %6161 = vmatprep.subr.bf16.mxu0 %v12534_v6  ;;  %6462 = vmatprep.subr.bf16.mxu1 %v12536_v7  ;;  %v1117_v5 = vld [vmem:[%s14664_s13 + $0x1168] sm:$0xff]  ;;  %v12589_v6 = vcombine.low %v1104_v58, %v1108_v59  ;;  %v12591_v7 = vcombine.low %v1105_v60, %v1109_v61  ;;  %v1168_v58 = vld [vmem:[%s14664_s13 + $0x1300] sm:$0xff] }
 0x217   : > { %v12600_v9 = vcombine.high %v1113_v4, %v1117_v5  ;;  %v1172_v59 = vld [vmem:[%s14664_s13 + $0x1320] sm:$0xff]  ;;  %v1169_v60 = vld [vmem:[%s14664_s13 + $0x1308] sm:$0xff] }
 0x218   : > { %v1173_v61 = vld [vmem:[%s14664_s13 + $0x1328] sm:$0xff] }
 0x219   : > { %6162 = vmatpush1.bf16.msra.mxu0 %v12533_v12  ;;  %6463 = vmatpush1.bf16.msra.mxu1 %v12535_v13  ;;  %v1121_v12 = vld [vmem:[%s14664_s13 + $0x1188] sm:$0xff] }
 0x21a   : > { %6163 = vmatprep.subr.bf16.mxu0 %v12542_v14  ;;  %6464 = vmatprep.subr.bf16.mxu1 %v12544_v15  ;;  %v1125_v13 = vld [vmem:[%s14664_s13 + $0x11a8] sm:$0xff]  ;;  %v12597_v14 = vcombine.low %v1112_v2, %v1116_v3  ;;  %v12599_v15 = vcombine.low %v1113_v4, %v1117_v5  ;;  %v1176_v2 = vld [vmem:[%s14664_s13 + $0x1340] sm:$0xff] }
 0x21b   : > { %v12608_v17 = vcombine.high %v1121_v12, %v1125_v13  ;;  %v1180_v3 = vld [vmem:[%s14664_s13 + $0x1360] sm:$0xff]  ;;  %v1177_v4 = vld [vmem:[%s14664_s13 + $0x1348] sm:$0xff] }
 0x21c   : > { %v1181_v5 = vld [vmem:[%s14664_s13 + $0x1368] sm:$0xff] }
 0x21d   : > { %6164 = vmatpush1.bf16.msra.mxu0 %v12541_v20  ;;  %6465 = vmatpush1.bf16.msra.mxu1 %v12543_v21  ;;  %v1129_v20 = vld [vmem:[%s14664_s13 + $0x11c8] sm:$0xff] }
 0x21e   : > { %6165 = vmatprep.subr.bf16.mxu0 %v12550_v22  ;;  %6466 = vmatprep.subr.bf16.mxu1 %v12552_v23  ;;  %v1133_v21 = vld [vmem:[%s14664_s13 + $0x11e8] sm:$0xff]  ;;  %v12605_v22 = vcombine.low %v1120_v10, %v1124_v11  ;;  %v12607_v23 = vcombine.low %v1121_v12, %v1125_v13  ;;  %v1184_v10 = vld [vmem:[%s14664_s13 + $0x1380] sm:$0xff] }
 0x21f   : > { %v12616_v25 = vcombine.high %v1129_v20, %v1133_v21  ;;  %v1188_v11 = vld [vmem:[%s14664_s13 + $0x13a0] sm:$0xff]  ;;  %v1185_v12 = vld [vmem:[%s14664_s13 + $0x1388] sm:$0xff] }
 0x220   : > { %v1189_v13 = vld [vmem:[%s14664_s13 + $0x13a8] sm:$0xff] }
 0x221   : > { %6166 = vmatpush1.bf16.msra.mxu0 %v12549_v28  ;;  %6467 = vmatpush1.bf16.msra.mxu1 %v12551_v29  ;;  %v1137_v28 = vld [vmem:[%s14664_s13 + $0x1208] sm:$0xff] }
 0x222   : > { %6178 = vmatprep.subr.bf16.mxu0 %v12558_v30  ;;  %6479 = vmatprep.subr.bf16.mxu1 %v12560_v31  ;;  %v1141_v29 = vld [vmem:[%s14664_s13 + $0x1228] sm:$0xff]  ;;  %v12613_v30 = vcombine.low %v1128_v18, %v1132_v19  ;;  %v12615_v31 = vcombine.low %v1129_v20, %v1133_v21  ;;  %v1192_v18 = vld [vmem:[%s14664_s13 + $0x13c0] sm:$0xff] }
 0x223   : > { %v12624_v33 = vcombine.high %v1137_v28, %v1141_v29  ;;  %v1196_v19 = vld [vmem:[%s14664_s13 + $0x13e0] sm:$0xff]  ;;  %v1193_v20 = vld [vmem:[%s14664_s13 + $0x13c8] sm:$0xff] }
 0x224   : > { %6168 = vmatmul.mubr.bf16.vlgmr.msra.gmra.mrb[0].mxu0 %v13918_v34  ;;  %6469 = vmatmul.mubr.bf16.vlgmr.msra.gmra.mrb[0].mxu1 %v13918_v34  ;;  %v1144_v34 = vld [vmem:[%s14664_s13 + $0x1240] sm:$0xff]  ;;  %v1197_v21 = vld [vmem:[%s14664_s13 + $0x13e8] sm:$0xff] }
 0x225   : > { %6179 = vmatpush1.bf16.msra.mxu0 %v12557_v37  ;;  %6480 = vmatpush1.bf16.msra.mxu1 %v12559_v38  ;;  %v1149_v37 = vld [vmem:[%s14664_s13 + $0x1268] sm:$0xff]  ;;  %v12621_v38 = vcombine.low %v1136_v26, %v1140_v27  ;;  %v1200_v26 = vld [vmem:[%s14664_s13 + $0x1400] sm:$0xff] }
 0x226   : > { %6180 = vmatprep.subr.bf16.mxu0 %v12566_v39  ;;  %6481 = vmatprep.subr.bf16.mxu1 %v12568_v40  ;;  %v12623_v39 = vcombine.low %v1137_v28, %v1141_v29  ;;  %v12630_v40 = vcombine.high %v1144_v34, %v1148_v35  ;;  %v12632_v41 = vcombine.high %v1145_v36, %v1149_v37  ;;  %v1204_v27 = vld [vmem:[%s14664_s13 + $0x1420] sm:$0xff]  ;;  %v1201_v28 = vld [vmem:[%s14664_s13 + $0x1408] sm:$0xff] }
 0x227   : > { %6210 = vmatprep.mubr.bf16.mxu0 %v13919_v43  ;;  %6511 = vmatprep.mubr.bf16.mxu1 %v13919_v43  ;;  %v1156_v43 = vld [vmem:[%s14664_s13 + $0x12a0] sm:$0xff]  ;;  %v1205_v29 = vld [vmem:[%s14664_s13 + $0x1428] sm:$0xff] }
 0x229   : > { %6181 = vmatpush1.bf16.msra.mxu0 %v12565_v46  ;;  %6482 = vmatpush1.bf16.msra.mxu1 %v12567_v47  ;;  %v12629_v46 = vcombine.low %v1144_v34, %v1148_v35  ;;  %v12631_v47 = vcombine.low %v1145_v36, %v1149_v37  ;;  %v1208_v34 = vld [vmem:[%s14664_s13 + $0x1440] sm:$0xff]  ;;  %v1209_v37 = vld [vmem:[%s14664_s13 + $0x1448] sm:$0xff] }
 0x22a   : > { %6182 = vmatprep.subr.bf16.mxu0 %v12574_v48  ;;  %6483 = vmatprep.subr.bf16.mxu1 %v12576_v49  ;;  %v12638_v48 = vcombine.high %v1152_v42, %v1156_v43  ;;  %v12640_v49 = vcombine.high %v1153_v44, %v1157_v45  ;;  %v1212_v35 = vld [vmem:[%s14664_s13 + $0x1460] sm:$0xff] }
 0x22b   : > { %v13921_v36 = vld [vmem:[%s14656_s3 + $0x20] ss:$56 sps:$4 sm:$0xff]  }
 0x22d   : > { %6183 = vmatpush1.bf16.msra.mxu0 %v12573_v54  ;;  %6484 = vmatpush1.bf16.msra.mxu1 %v12575_v55  ;;  %v12637_v54 = vcombine.low %v1152_v42, %v1156_v43  ;;  %v12639_v55 = vcombine.low %v1153_v44, %v1157_v45  ;;  %v1216_v43 = vld [vmem:[%s14664_s13 + $0x1480] sm:$0xff] }
 0x22e   : > { %6184 = vmatprep.subr.bf16.mxu0 %v12582_v56  ;;  %6485 = vmatprep.subr.bf16.mxu1 %v12584_v57  ;;  %v12646_v56 = vcombine.high %v1160_v50, %v1164_v51  ;;  %v12648_v57 = vcombine.high %v1161_v52, %v1165_v53  ;;  %v1220_v44 = vld [vmem:[%s14664_s13 + $0x14a0] sm:$0xff] }
 0x22f   : > { %v13922_v45 = vld [vmem:[%s14656_s3 + $0x2c] ss:$56 sps:$4 sm:$0xff]  }
 0x231   : > { %6185 = vmatpush1.bf16.msra.mxu0 %v12581_v62  ;;  %6486 = vmatpush1.bf16.msra.mxu1 %v12583_v63  ;;  %v12645_v62 = vcombine.low %v1160_v50, %v1164_v51  ;;  %v12647_v63 = vcombine.low %v1161_v52, %v1165_v53  ;;  %v12702_v50 = vcombine.high %v1216_v43, %v1220_v44  ;;  %v1224_v52 = vld [vmem:[%s14664_s13 + $0x14c0] sm:$0xff] }
 0x232   : > { %6186 = vmatprep.subr.bf16.mxu0 %v12590_v0  ;;  %6487 = vmatprep.subr.bf16.mxu1 %v12592_v1  ;;  %v12654_v0 = vcombine.high %v1168_v58, %v1172_v59  ;;  %v12656_v1 = vcombine.high %v1169_v60, %v1173_v61  ;;  %v1228_v53 = vld [vmem:[%s14664_s13 + $0x14e0] sm:$0xff] }
 0x235   : > { %6187 = vmatpush1.bf16.msra.mxu0 %v12589_v6  ;;  %6488 = vmatpush1.bf16.msra.mxu1 %v12591_v7  ;;  %v12653_v6 = vcombine.low %v1168_v58, %v1172_v59  ;;  %v12655_v7 = vcombine.low %v1169_v60, %v1173_v61  ;;  %v12710_v58 = vcombine.high %v1224_v52, %v1228_v53  ;;  %v1232_v60 = vld [vmem:[%s14664_s13 + $0x1500] sm:$0xff] }
 0x236   : > { %6188 = vmatprep.subr.bf16.mxu0 %v12598_v8  ;;  %6489 = vmatprep.subr.bf16.mxu1 %v12600_v9  ;;  %v12662_v8 = vcombine.high %v1176_v2, %v1180_v3  ;;  %v12664_v9 = vcombine.high %v1177_v4, %v1181_v5  ;;  %v1236_v61 = vld [vmem:[%s14664_s13 + $0x1520] sm:$0xff] }
 0x239   : > { %6189 = vmatpush1.bf16.msra.mxu0 %v12597_v14  ;;  %6490 = vmatpush1.bf16.msra.mxu1 %v12599_v15  ;;  %v12661_v14 = vcombine.low %v1176_v2, %v1180_v3  ;;  %v12663_v15 = vcombine.low %v1177_v4, %v1181_v5  ;;  %v12718_v2 = vcombine.high %v1232_v60, %v1236_v61  ;;  %v1240_v4 = vld [vmem:[%s14664_s13 + $0x1540] sm:$0xff] }
 0x23a   : > { %6190 = vmatprep.subr.bf16.mxu0 %v12606_v16  ;;  %6491 = vmatprep.subr.bf16.mxu1 %v12608_v17  ;;  %v12670_v16 = vcombine.high %v1184_v10, %v1188_v11  ;;  %v12672_v17 = vcombine.high %v1185_v12, %v1189_v13  ;;  %v1244_v5 = vld [vmem:[%s14664_s13 + $0x1560] sm:$0xff] }
 0x23d   : > { %6191 = vmatpush1.bf16.msra.mxu0 %v12605_v22  ;;  %6492 = vmatpush1.bf16.msra.mxu1 %v12607_v23  ;;  %v12669_v22 = vcombine.low %v1184_v10, %v1188_v11  ;;  %v12671_v23 = vcombine.low %v1185_v12, %v1189_v13  ;;  %v12726_v10 = vcombine.high %v1240_v4, %v1244_v5  ;;  %v1248_v12 = vld [vmem:[%s14664_s13 + $0x1580] sm:$0xff] }
 0x23e   : > { %6192 = vmatprep.subr.bf16.mxu0 %v12614_v24  ;;  %6493 = vmatprep.subr.bf16.mxu1 %v12616_v25  ;;  %v12678_v24 = vcombine.high %v1192_v18, %v1196_v19  ;;  %v12680_v25 = vcombine.high %v1193_v20, %v1197_v21  ;;  %v1252_v13 = vld [vmem:[%s14664_s13 + $0x15a0] sm:$0xff] }
 0x241   : > { %6193 = vmatpush1.bf16.msra.mxu0 %v12613_v30  ;;  %6494 = vmatpush1.bf16.msra.mxu1 %v12615_v31  ;;  %v12677_v30 = vcombine.low %v1192_v18, %v1196_v19  ;;  %v12679_v31 = vcombine.low %v1193_v20, %v1197_v21  ;;  %v12734_v18 = vcombine.high %v1248_v12, %v1252_v13  ;;  %v1256_v20 = vld [vmem:[%s14664_s13 + $0x15c0] sm:$0xff] }
 0x242   : > { %6194 = vmatprep.subr.bf16.mxu0 %v12622_v32  ;;  %6495 = vmatprep.subr.bf16.mxu1 %v12624_v33  ;;  %v12686_v32 = vcombine.high %v1200_v26, %v1204_v27  ;;  %v12688_v33 = vcombine.high %v1201_v28, %v1205_v29  ;;  %v1260_v21 = vld [vmem:[%s14664_s13 + $0x15e0] sm:$0xff] }
 0x245   : > { %6195 = vmatpush1.bf16.msra.mxu0 %v12621_v38  ;;  %6496 = vmatpush1.bf16.msra.mxu1 %v12623_v39  ;;  %v1213_v38 = vld [vmem:[%s14664_s13 + $0x1468] sm:$0xff]  ;;  %v12685_v39 = vcombine.low %v1200_v26, %v1204_v27  ;;  %v12742_v26 = vcombine.high %v1256_v20, %v1260_v21 }
 0x246   : > { %6196 = vmatprep.subr.bf16.mxu0 %v12630_v40  ;;  %6497 = vmatprep.subr.bf16.mxu1 %v12632_v41  ;;  %v12687_v40 = vcombine.low %v1201_v28, %v1205_v29  ;;  %v12694_v41 = vcombine.high %v1208_v34, %v1212_v35  ;;  %v12696_v42 = vcombine.high %v1209_v37, %v1213_v38  ;;  %v1264_v28 = vld [vmem:[%s14664_s13 + $0x1600] sm:$0xff] }
 0x247   : > { %v1268_v29 = vld [vmem:[%s14664_s13 + $0x1620] sm:$0xff] }
 0x249   : > { %6197 = vmatpush1.bf16.msra.mxu0 %v12629_v46  ;;  %6498 = vmatpush1.bf16.msra.mxu1 %v12631_v47  ;;  %v1217_v46 = vld [vmem:[%s14664_s13 + $0x1488] sm:$0xff] }
 0x24a   : > { %6198 = vmatprep.subr.bf16.mxu0 %v12638_v48  ;;  %6499 = vmatprep.subr.bf16.mxu1 %v12640_v49  ;;  %v1221_v47 = vld [vmem:[%s14664_s13 + $0x14a8] sm:$0xff]  ;;  %v12693_v48 = vcombine.low %v1208_v34, %v1212_v35  ;;  %v12695_v49 = vcombine.low %v1209_v37, %v1213_v38  ;;  %v12750_v34 = vcombine.high %v1264_v28, %v1268_v29  ;;  %v1276_v37 = vld [vmem:[%s14664_s13 + $0x1660] sm:$0xff] }
 0x24b   : > { %v12704_v51 = vcombine.high %v1217_v46, %v1221_v47  ;;  %v1273_v38 = vld [vmem:[%s14664_s13 + $0x1648] sm:$0xff] }
 0x24d   : > { %6199 = vmatpush1.bf16.msra.mxu0 %v12637_v54  ;;  %6500 = vmatpush1.bf16.msra.mxu1 %v12639_v55  ;;  %v1225_v54 = vld [vmem:[%s14664_s13 + $0x14c8] sm:$0xff] }
 0x24e   : > { %6200 = vmatprep.subr.bf16.mxu0 %v12646_v56  ;;  %6501 = vmatprep.subr.bf16.mxu1 %v12648_v57  ;;  %v1229_v55 = vld [vmem:[%s14664_s13 + $0x14e8] sm:$0xff]  ;;  %v12701_v56 = vcombine.low %v1216_v43, %v1220_v44  ;;  %v12703_v57 = vcombine.low %v1217_v46, %v1221_v47  ;;  %v1280_v44 = vld [vmem:[%s14664_s13 + $0x1680] sm:$0xff] }
 0x24f   : > { %v12712_v59 = vcombine.high %v1225_v54, %v1229_v55  ;;  %v1281_v46 = vld [vmem:[%s14664_s13 + $0x1688] sm:$0xff] }
 0x250   : > { %v1285_v47 = vld [vmem:[%s14664_s13 + $0x16a8] sm:$0xff] }
 0x251   : > { %6201 = vmatpush1.bf16.msra.mxu0 %v12645_v62  ;;  %6502 = vmatpush1.bf16.msra.mxu1 %v12647_v63  ;;  %v1233_v62 = vld [vmem:[%s14664_s13 + $0x1508] sm:$0xff] }
 0x252   : > { %6202 = vmatprep.subr.bf16.mxu0 %v12654_v0  ;;  %6503 = vmatprep.subr.bf16.mxu1 %v12656_v1  ;;  %v1237_v63 = vld [vmem:[%s14664_s13 + $0x1528] sm:$0xff]  ;;  %v12709_v0 = vcombine.low %v1224_v52, %v1228_v53  ;;  %v12711_v1 = vcombine.low %v1225_v54, %v1229_v55  ;;  %v1288_v52 = vld [vmem:[%s14664_s13 + $0x16c0] sm:$0xff] }
 0x253   : > { %v12720_v3 = vcombine.high %v1233_v62, %v1237_v63  ;;  %v1292_v53 = vld [vmem:[%s14664_s13 + $0x16e0] sm:$0xff]  ;;  %v1289_v54 = vld [vmem:[%s14664_s13 + $0x16c8] sm:$0xff] }
 0x254   : > { %v1293_v55 = vld [vmem:[%s14664_s13 + $0x16e8] sm:$0xff] }
 0x255   : > { %6203 = vmatpush1.bf16.msra.mxu0 %v12653_v6  ;;  %6504 = vmatpush1.bf16.msra.mxu1 %v12655_v7  ;;  %v1241_v6 = vld [vmem:[%s14664_s13 + $0x1548] sm:$0xff] }
 0x256   : > { %6204 = vmatprep.subr.bf16.mxu0 %v12662_v8  ;;  %6505 = vmatprep.subr.bf16.mxu1 %v12664_v9  ;;  %v1245_v7 = vld [vmem:[%s14664_s13 + $0x1568] sm:$0xff]  ;;  %v12717_v8 = vcombine.low %v1232_v60, %v1236_v61  ;;  %v12719_v9 = vcombine.low %v1233_v62, %v1237_v63  ;;  %v1296_v60 = vld [vmem:[%s14664_s13 + $0x1700] sm:$0xff] }
 0x257   : > { %v12728_v11 = vcombine.high %v1241_v6, %v1245_v7  ;;  %v1300_v61 = vld [vmem:[%s14664_s13 + $0x1720] sm:$0xff]  ;;  %v1297_v62 = vld [vmem:[%s14664_s13 + $0x1708] sm:$0xff] }
 0x258   : > { %v1301_v63 = vld [vmem:[%s14664_s13 + $0x1728] sm:$0xff] }
 0x259   : > { %6205 = vmatpush1.bf16.msra.mxu0 %v12661_v14  ;;  %6506 = vmatpush1.bf16.msra.mxu1 %v12663_v15  ;;  %v1249_v14 = vld [vmem:[%s14664_s13 + $0x1588] sm:$0xff] }
 0x25a   : > { %6206 = vmatprep.subr.bf16.mxu0 %v12670_v16  ;;  %6507 = vmatprep.subr.bf16.mxu1 %v12672_v17  ;;  %v1253_v15 = vld [vmem:[%s14664_s13 + $0x15a8] sm:$0xff]  ;;  %v12725_v16 = vcombine.low %v1240_v4, %v1244_v5  ;;  %v12727_v17 = vcombine.low %v1241_v6, %v1245_v7  ;;  %v1304_v4 = vld [vmem:[%s14664_s13 + $0x1740] sm:$0xff] }
 0x25b   : > { %v12736_v19 = vcombine.high %v1249_v14, %v1253_v15  ;;  %v1308_v5 = vld [vmem:[%s14664_s13 + $0x1760] sm:$0xff]  ;;  %v1305_v6 = vld [vmem:[%s14664_s13 + $0x1748] sm:$0xff] }
 0x25c   : > { %v1309_v7 = vld [vmem:[%s14664_s13 + $0x1768] sm:$0xff] }
 0x25d   : > { %6207 = vmatpush1.bf16.msra.mxu0 %v12669_v22  ;;  %6508 = vmatpush1.bf16.msra.mxu1 %v12671_v23  ;;  %v1257_v22 = vld [vmem:[%s14664_s13 + $0x15c8] sm:$0xff] }
 0x25e   : > { %6208 = vmatprep.subr.bf16.mxu0 %v12678_v24  ;;  %6509 = vmatprep.subr.bf16.mxu1 %v12680_v25  ;;  %v1261_v23 = vld [vmem:[%s14664_s13 + $0x15e8] sm:$0xff]  ;;  %v12733_v24 = vcombine.low %v1248_v12, %v1252_v13  ;;  %v12735_v25 = vcombine.low %v1249_v14, %v1253_v15  ;;  %v1312_v12 = vld [vmem:[%s14664_s13 + $0x1780] sm:$0xff] }
 0x25f   : > { %v12744_v27 = vcombine.high %v1257_v22, %v1261_v23  ;;  %v1316_v13 = vld [vmem:[%s14664_s13 + $0x17a0] sm:$0xff]  ;;  %v1313_v14 = vld [vmem:[%s14664_s13 + $0x1788] sm:$0xff] }
 0x260   : > { %v1317_v15 = vld [vmem:[%s14664_s13 + $0x17a8] sm:$0xff] }
 0x261   : > { %6209 = vmatpush1.bf16.msra.mxu0 %v12677_v30  ;;  %6510 = vmatpush1.bf16.msra.mxu1 %v12679_v31  ;;  %v1265_v30 = vld [vmem:[%s14664_s13 + $0x1608] sm:$0xff] }
 0x262   : > { %6221 = vmatprep.subr.bf16.mxu0 %v12686_v32  ;;  %6522 = vmatprep.subr.bf16.mxu1 %v12688_v33  ;;  %v1269_v31 = vld [vmem:[%s14664_s13 + $0x1628] sm:$0xff]  ;;  %v12741_v32 = vcombine.low %v1256_v20, %v1260_v21  ;;  %v12743_v33 = vcombine.low %v1257_v22, %v1261_v23  ;;  %v1320_v20 = vld [vmem:[%s14664_s13 + $0x17c0] sm:$0xff] }
 0x263   : > { %v12752_v35 = vcombine.high %v1265_v30, %v1269_v31  ;;  %v1324_v21 = vld [vmem:[%s14664_s13 + $0x17e0] sm:$0xff]  ;;  %v1321_v22 = vld [vmem:[%s14664_s13 + $0x17c8] sm:$0xff] }
 0x264   : > { %6211 = vmatmul.mubr.bf16.vlgmr.msra.gmra.mrb[0].mxu0 %v13921_v36  ;;  %6512 = vmatmul.mubr.bf16.vlgmr.msra.gmra.mrb[0].mxu1 %v13921_v36  ;;  %v1272_v36 = vld [vmem:[%s14664_s13 + $0x1640] sm:$0xff]  ;;  %v1325_v23 = vld [vmem:[%s14664_s13 + $0x17e8] sm:$0xff] }
 0x265   : > { %6222 = vmatpush1.bf16.msra.mxu0 %v12685_v39  ;;  %6523 = vmatpush1.bf16.msra.mxu1 %v12687_v40  ;;  %v1277_v39 = vld [vmem:[%s14664_s13 + $0x1668] sm:$0xff]  ;;  %v12749_v40 = vcombine.low %v1264_v28, %v1268_v29  ;;  %v1328_v28 = vld [vmem:[%s14664_s13 + $0x1800] sm:$0xff] }
 0x266   : > { %6223 = vmatprep.subr.bf16.mxu0 %v12694_v41  ;;  %6524 = vmatprep.subr.bf16.mxu1 %v12696_v42  ;;  %v12751_v41 = vcombine.low %v1265_v30, %v1269_v31  ;;  %v12758_v42 = vcombine.high %v1272_v36, %v1276_v37  ;;  %v12760_v43 = vcombine.high %v1273_v38, %v1277_v39  ;;  %v1332_v29 = vld [vmem:[%s14664_s13 + $0x1820] sm:$0xff]  ;;  %v1329_v30 = vld [vmem:[%s14664_s13 + $0x1808] sm:$0xff] }
 0x267   : > { %6253 = vmatprep.mubr.bf16.mxu0 %v13922_v45  ;;  %6554 = vmatprep.mubr.bf16.mxu1 %v13922_v45  ;;  %v1284_v45 = vld [vmem:[%s14664_s13 + $0x16a0] sm:$0xff]  ;;  %v1333_v31 = vld [vmem:[%s14664_s13 + $0x1828] sm:$0xff] }
 0x269   : > { %6224 = vmatpush1.bf16.msra.mxu0 %v12693_v48  ;;  %6525 = vmatpush1.bf16.msra.mxu1 %v12695_v49  ;;  %v12757_v48 = vcombine.low %v1272_v36, %v1276_v37  ;;  %v12759_v49 = vcombine.low %v1273_v38, %v1277_v39  ;;  %v1336_v36 = vld [vmem:[%s14664_s13 + $0x1840] sm:$0xff]  ;;  %v1337_v39 = vld [vmem:[%s14664_s13 + $0x1848] sm:$0xff] }
 0x26a   : > { %6225 = vmatprep.subr.bf16.mxu0 %v12702_v50  ;;  %6526 = vmatprep.subr.bf16.mxu1 %v12704_v51  ;;  %v12766_v50 = vcombine.high %v1280_v44, %v1284_v45  ;;  %v12768_v51 = vcombine.high %v1281_v46, %v1285_v47  ;;  %v1340_v37 = vld [vmem:[%s14664_s13 + $0x1860] sm:$0xff] }
 0x26b   : > { %v13924_v38 = vld [vmem:[%s14656_s3 + $0x28] ss:$56 sps:$4 sm:$0xff]  }
 0x26d   : > { %6226 = vmatpush1.bf16.msra.mxu0 %v12701_v56  ;;  %6527 = vmatpush1.bf16.msra.mxu1 %v12703_v57  ;;  %v12765_v56 = vcombine.low %v1280_v44, %v1284_v45  ;;  %v12767_v57 = vcombine.low %v1281_v46, %v1285_v47  ;;  %v1344_v45 = vld [vmem:[%s14664_s13 + $0x1880] sm:$0xff] }
 0x26e   : > { %6227 = vmatprep.subr.bf16.mxu0 %v12710_v58  ;;  %6528 = vmatprep.subr.bf16.mxu1 %v12712_v59  ;;  %v12774_v58 = vcombine.high %v1288_v52, %v1292_v53  ;;  %v12776_v59 = vcombine.high %v1289_v54, %v1293_v55  ;;  %v1348_v46 = vld [vmem:[%s14664_s13 + $0x18a0] sm:$0xff] }
 0x26f   : > { %v13925_v47 = vld [vmem:[%s14656_s3 + $0x34] ss:$56 sps:$4 sm:$0xff]  }
 0x271   : > { %6228 = vmatpush1.bf16.msra.mxu0 %v12709_v0  ;;  %6529 = vmatpush1.bf16.msra.mxu1 %v12711_v1  ;;  %v12773_v0 = vcombine.low %v1288_v52, %v1292_v53  ;;  %v12775_v1 = vcombine.low %v1289_v54, %v1293_v55  ;;  %v12830_v52 = vcombine.high %v1344_v45, %v1348_v46  ;;  %v1352_v54 = vld [vmem:[%s14664_s13 + $0x18c0] sm:$0xff] }
 0x272   : > { %6229 = vmatprep.subr.bf16.mxu0 %v12718_v2  ;;  %6530 = vmatprep.subr.bf16.mxu1 %v12720_v3  ;;  %v12782_v2 = vcombine.high %v1296_v60, %v1300_v61  ;;  %v12784_v3 = vcombine.high %v1297_v62, %v1301_v63  ;;  %v1356_v55 = vld [vmem:[%s14664_s13 + $0x18e0] sm:$0xff] }
 0x275   : > { %6230 = vmatpush1.bf16.msra.mxu0 %v12717_v8  ;;  %6531 = vmatpush1.bf16.msra.mxu1 %v12719_v9  ;;  %v12781_v8 = vcombine.low %v1296_v60, %v1300_v61  ;;  %v12783_v9 = vcombine.low %v1297_v62, %v1301_v63  ;;  %v12838_v60 = vcombine.high %v1352_v54, %v1356_v55  ;;  %v1360_v62 = vld [vmem:[%s14664_s13 + $0x1900] sm:$0xff] }
 0x276   : > { %6231 = vmatprep.subr.bf16.mxu0 %v12726_v10  ;;  %6532 = vmatprep.subr.bf16.mxu1 %v12728_v11  ;;  %v12790_v10 = vcombine.high %v1304_v4, %v1308_v5  ;;  %v12792_v11 = vcombine.high %v1305_v6, %v1309_v7  ;;  %v1364_v63 = vld [vmem:[%s14664_s13 + $0x1920] sm:$0xff] }
 0x279   : > { %6232 = vmatpush1.bf16.msra.mxu0 %v12725_v16  ;;  %6533 = vmatpush1.bf16.msra.mxu1 %v12727_v17  ;;  %v12789_v16 = vcombine.low %v1304_v4, %v1308_v5  ;;  %v12791_v17 = vcombine.low %v1305_v6, %v1309_v7  ;;  %v12846_v4 = vcombine.high %v1360_v62, %v1364_v63  ;;  %v1368_v6 = vld [vmem:[%s14664_s13 + $0x1940] sm:$0xff] }
 0x27a   : > { %6233 = vmatprep.subr.bf16.mxu0 %v12734_v18  ;;  %6534 = vmatprep.subr.bf16.mxu1 %v12736_v19  ;;  %v12798_v18 = vcombine.high %v1312_v12, %v1316_v13  ;;  %v12800_v19 = vcombine.high %v1313_v14, %v1317_v15  ;;  %v1372_v7 = vld [vmem:[%s14664_s13 + $0x1960] sm:$0xff] }
 0x27d   : > { %6234 = vmatpush1.bf16.msra.mxu0 %v12733_v24  ;;  %6535 = vmatpush1.bf16.msra.mxu1 %v12735_v25  ;;  %v12797_v24 = vcombine.low %v1312_v12, %v1316_v13  ;;  %v12799_v25 = vcombine.low %v1313_v14, %v1317_v15  ;;  %v12854_v12 = vcombine.high %v1368_v6, %v1372_v7  ;;  %v1376_v14 = vld [vmem:[%s14664_s13 + $0x1980] sm:$0xff] }
 0x27e   : > { %6235 = vmatprep.subr.bf16.mxu0 %v12742_v26  ;;  %6536 = vmatprep.subr.bf16.mxu1 %v12744_v27  ;;  %v12806_v26 = vcombine.high %v1320_v20, %v1324_v21  ;;  %v12808_v27 = vcombine.high %v1321_v22, %v1325_v23  ;;  %v1380_v15 = vld [vmem:[%s14664_s13 + $0x19a0] sm:$0xff] }
 0x281   : > { %6236 = vmatpush1.bf16.msra.mxu0 %v12741_v32  ;;  %6537 = vmatpush1.bf16.msra.mxu1 %v12743_v33  ;;  %v12805_v32 = vcombine.low %v1320_v20, %v1324_v21  ;;  %v12807_v33 = vcombine.low %v1321_v22, %v1325_v23  ;;  %v12862_v20 = vcombine.high %v1376_v14, %v1380_v15  ;;  %v1384_v22 = vld [vmem:[%s14664_s13 + $0x19c0] sm:$0xff] }
 0x282   : > { %6237 = vmatprep.subr.bf16.mxu0 %v12750_v34  ;;  %6538 = vmatprep.subr.bf16.mxu1 %v12752_v35  ;;  %v12814_v34 = vcombine.high %v1328_v28, %v1332_v29  ;;  %v12816_v35 = vcombine.high %v1329_v30, %v1333_v31  ;;  %v1388_v23 = vld [vmem:[%s14664_s13 + $0x19e0] sm:$0xff] }
 0x285   : > { %6238 = vmatpush1.bf16.msra.mxu0 %v12749_v40  ;;  %6539 = vmatpush1.bf16.msra.mxu1 %v12751_v41  ;;  %v1341_v40 = vld [vmem:[%s14664_s13 + $0x1868] sm:$0xff]  ;;  %v12813_v41 = vcombine.low %v1328_v28, %v1332_v29  ;;  %v12870_v28 = vcombine.high %v1384_v22, %v1388_v23 }
 0x286   : > { %6239 = vmatprep.subr.bf16.mxu0 %v12758_v42  ;;  %6540 = vmatprep.subr.bf16.mxu1 %v12760_v43  ;;  %v12815_v42 = vcombine.low %v1329_v30, %v1333_v31  ;;  %v12822_v43 = vcombine.high %v1336_v36, %v1340_v37  ;;  %v12824_v44 = vcombine.high %v1337_v39, %v1341_v40  ;;  %v1392_v30 = vld [vmem:[%s14664_s13 + $0x1a00] sm:$0xff] }
 0x287   : > { %v1396_v31 = vld [vmem:[%s14664_s13 + $0x1a20] sm:$0xff] }
 0x289   : > { %6240 = vmatpush1.bf16.msra.mxu0 %v12757_v48  ;;  %6541 = vmatpush1.bf16.msra.mxu1 %v12759_v49  ;;  %v1345_v48 = vld [vmem:[%s14664_s13 + $0x1888] sm:$0xff] }
 0x28a   : > { %6241 = vmatprep.subr.bf16.mxu0 %v12766_v50  ;;  %6542 = vmatprep.subr.bf16.mxu1 %v12768_v51  ;;  %v1349_v49 = vld [vmem:[%s14664_s13 + $0x18a8] sm:$0xff]  ;;  %v12821_v50 = vcombine.low %v1336_v36, %v1340_v37  ;;  %v12823_v51 = vcombine.low %v1337_v39, %v1341_v40  ;;  %v12878_v36 = vcombine.high %v1392_v30, %v1396_v31  ;;  %v1404_v39 = vld [vmem:[%s14664_s13 + $0x1a60] sm:$0xff] }
 0x28b   : > { %v12832_v53 = vcombine.high %v1345_v48, %v1349_v49  ;;  %v1401_v40 = vld [vmem:[%s14664_s13 + $0x1a48] sm:$0xff] }
 0x28d   : > { %6242 = vmatpush1.bf16.msra.mxu0 %v12765_v56  ;;  %6543 = vmatpush1.bf16.msra.mxu1 %v12767_v57  ;;  %v1353_v56 = vld [vmem:[%s14664_s13 + $0x18c8] sm:$0xff] }
 0x28e   : > { %6243 = vmatprep.subr.bf16.mxu0 %v12774_v58  ;;  %6544 = vmatprep.subr.bf16.mxu1 %v12776_v59  ;;  %v1357_v57 = vld [vmem:[%s14664_s13 + $0x18e8] sm:$0xff]  ;;  %v12829_v58 = vcombine.low %v1344_v45, %v1348_v46  ;;  %v12831_v59 = vcombine.low %v1345_v48, %v1349_v49  ;;  %v1408_v46 = vld [vmem:[%s14664_s13 + $0x1a80] sm:$0xff] }
 0x28f   : > { %v12840_v61 = vcombine.high %v1353_v56, %v1357_v57  ;;  %v1409_v48 = vld [vmem:[%s14664_s13 + $0x1a88] sm:$0xff] }
 0x290   : > { %v1413_v49 = vld [vmem:[%s14664_s13 + $0x1aa8] sm:$0xff] }
 0x291   : > { %6244 = vmatpush1.bf16.msra.mxu0 %v12773_v0  ;;  %6545 = vmatpush1.bf16.msra.mxu1 %v12775_v1  ;;  %v1361_v0 = vld [vmem:[%s14664_s13 + $0x1908] sm:$0xff] }
 0x292   : > { %6245 = vmatprep.subr.bf16.mxu0 %v12782_v2  ;;  %6546 = vmatprep.subr.bf16.mxu1 %v12784_v3  ;;  %v1365_v1 = vld [vmem:[%s14664_s13 + $0x1928] sm:$0xff]  ;;  %v12837_v2 = vcombine.low %v1352_v54, %v1356_v55  ;;  %v12839_v3 = vcombine.low %v1353_v56, %v1357_v57  ;;  %v1416_v54 = vld [vmem:[%s14664_s13 + $0x1ac0] sm:$0xff] }
 0x293   : > { %v12848_v5 = vcombine.high %v1361_v0, %v1365_v1  ;;  %v1420_v55 = vld [vmem:[%s14664_s13 + $0x1ae0] sm:$0xff]  ;;  %v1417_v56 = vld [vmem:[%s14664_s13 + $0x1ac8] sm:$0xff] }
 0x294   : > { %v1421_v57 = vld [vmem:[%s14664_s13 + $0x1ae8] sm:$0xff] }
 0x295   : > { %6246 = vmatpush1.bf16.msra.mxu0 %v12781_v8  ;;  %6547 = vmatpush1.bf16.msra.mxu1 %v12783_v9  ;;  %v1369_v8 = vld [vmem:[%s14664_s13 + $0x1948] sm:$0xff] }
 0x296   : > { %6247 = vmatprep.subr.bf16.mxu0 %v12790_v10  ;;  %6548 = vmatprep.subr.bf16.mxu1 %v12792_v11  ;;  %v1373_v9 = vld [vmem:[%s14664_s13 + $0x1968] sm:$0xff]  ;;  %v12845_v10 = vcombine.low %v1360_v62, %v1364_v63  ;;  %v12847_v11 = vcombine.low %v1361_v0, %v1365_v1  ;;  %v1424_v62 = vld [vmem:[%s14664_s13 + $0x1b00] sm:$0xff] }
 0x297   : > { %v12856_v13 = vcombine.high %v1369_v8, %v1373_v9  ;;  %v1428_v63 = vld [vmem:[%s14664_s13 + $0x1b20] sm:$0xff]  ;;  %v1425_v0 = vld [vmem:[%s14664_s13 + $0x1b08] sm:$0xff] }
 0x298   : > { %v1429_v1 = vld [vmem:[%s14664_s13 + $0x1b28] sm:$0xff] }
 0x299   : > { %6248 = vmatpush1.bf16.msra.mxu0 %v12789_v16  ;;  %6549 = vmatpush1.bf16.msra.mxu1 %v12791_v17  ;;  %v1377_v16 = vld [vmem:[%s14664_s13 + $0x1988] sm:$0xff] }
 0x29a   : > { %6249 = vmatprep.subr.bf16.mxu0 %v12798_v18  ;;  %6550 = vmatprep.subr.bf16.mxu1 %v12800_v19  ;;  %v1381_v17 = vld [vmem:[%s14664_s13 + $0x19a8] sm:$0xff]  ;;  %v12853_v18 = vcombine.low %v1368_v6, %v1372_v7  ;;  %v12855_v19 = vcombine.low %v1369_v8, %v1373_v9  ;;  %v1432_v6 = vld [vmem:[%s14664_s13 + $0x1b40] sm:$0xff] }
 0x29b   : > { %v12864_v21 = vcombine.high %v1377_v16, %v1381_v17  ;;  %v1436_v7 = vld [vmem:[%s14664_s13 + $0x1b60] sm:$0xff]  ;;  %v1433_v8 = vld [vmem:[%s14664_s13 + $0x1b48] sm:$0xff] }
 0x29c   : > { %v1437_v9 = vld [vmem:[%s14664_s13 + $0x1b68] sm:$0xff] }
 0x29d   : > { %6250 = vmatpush1.bf16.msra.mxu0 %v12797_v24  ;;  %6551 = vmatpush1.bf16.msra.mxu1 %v12799_v25  ;;  %v1385_v24 = vld [vmem:[%s14664_s13 + $0x19c8] sm:$0xff] }
 0x29e   : > { %6251 = vmatprep.subr.bf16.mxu0 %v12806_v26  ;;  %6552 = vmatprep.subr.bf16.mxu1 %v12808_v27  ;;  %v1389_v25 = vld [vmem:[%s14664_s13 + $0x19e8] sm:$0xff]  ;;  %v12861_v26 = vcombine.low %v1376_v14, %v1380_v15  ;;  %v12863_v27 = vcombine.low %v1377_v16, %v1381_v17  ;;  %v1440_v14 = vld [vmem:[%s14664_s13 + $0x1b80] sm:$0xff] }
 0x29f   : > { %v12872_v29 = vcombine.high %v1385_v24, %v1389_v25  ;;  %v1444_v15 = vld [vmem:[%s14664_s13 + $0x1ba0] sm:$0xff]  ;;  %v1441_v16 = vld [vmem:[%s14664_s13 + $0x1b88] sm:$0xff] }
 0x2a0   : > { %v1445_v17 = vld [vmem:[%s14664_s13 + $0x1ba8] sm:$0xff] }
 0x2a1   : > { %6252 = vmatpush1.bf16.msra.mxu0 %v12805_v32  ;;  %6553 = vmatpush1.bf16.msra.mxu1 %v12807_v33  ;;  %v1393_v32 = vld [vmem:[%s14664_s13 + $0x1a08] sm:$0xff] }
 0x2a2   : > { %6264 = vmatprep.subr.bf16.mxu0 %v12814_v34  ;;  %6565 = vmatprep.subr.bf16.mxu1 %v12816_v35  ;;  %v1397_v33 = vld [vmem:[%s14664_s13 + $0x1a28] sm:$0xff]  ;;  %v12869_v34 = vcombine.low %v1384_v22, %v1388_v23  ;;  %v12871_v35 = vcombine.low %v1385_v24, %v1389_v25  ;;  %v1448_v22 = vld [vmem:[%s14664_s13 + $0x1bc0] sm:$0xff] }
 0x2a3   : > { %v12880_v37 = vcombine.high %v1393_v32, %v1397_v33  ;;  %v1452_v23 = vld [vmem:[%s14664_s13 + $0x1be0] sm:$0xff]  ;;  %v1449_v24 = vld [vmem:[%s14664_s13 + $0x1bc8] sm:$0xff] }
 0x2a4   : > { %6254 = vmatmul.mubr.bf16.vlgmr.msra.gmra.mrb[0].mxu0 %v13924_v38  ;;  %6555 = vmatmul.mubr.bf16.vlgmr.msra.gmra.mrb[0].mxu1 %v13924_v38  ;;  %v1400_v38 = vld [vmem:[%s14664_s13 + $0x1a40] sm:$0xff]  ;;  %v1453_v25 = vld [vmem:[%s14664_s13 + $0x1be8] sm:$0xff] }
 0x2a5   : > { %6265 = vmatpush1.bf16.msra.mxu0 %v12813_v41  ;;  %6566 = vmatpush1.bf16.msra.mxu1 %v12815_v42  ;;  %v1405_v41 = vld [vmem:[%s14664_s13 + $0x1a68] sm:$0xff]  ;;  %v12877_v42 = vcombine.low %v1392_v30, %v1396_v31  ;;  %v562_v30 = vld [vmem:[%s14664_s13 + $0x10] sm:$0xff] }
 0x2a6   : > { %6266 = vmatprep.subr.bf16.mxu0 %v12822_v43  ;;  %6567 = vmatprep.subr.bf16.mxu1 %v12824_v44  ;;  %v12879_v43 = vcombine.low %v1393_v32, %v1397_v33  ;;  %v12886_v44 = vcombine.high %v1400_v38, %v1404_v39  ;;  %v12888_v45 = vcombine.high %v1401_v40, %v1405_v41  ;;  %v566_v31 = vld [vmem:[%s14664_s13 + $0x30] sm:$0xff]  ;;  %v563_v32 = vld [vmem:[%s14664_s13 + $0x18] sm:$0xff] }
 0x2a7   : > { %6296 = vmatprep.mubr.bf16.mxu0 %v13925_v47  ;;  %6597 = vmatprep.mubr.bf16.mxu1 %v13925_v47  ;;  %v1412_v47 = vld [vmem:[%s14664_s13 + $0x1aa0] sm:$0xff]  ;;  %v567_v33 = vld [vmem:[%s14664_s13 + $0x38] sm:$0xff] }
 0x2a9   : > { %6267 = vmatpush1.bf16.msra.mxu0 %v12821_v50  ;;  %6568 = vmatpush1.bf16.msra.mxu1 %v12823_v51  ;;  %v12885_v50 = vcombine.low %v1400_v38, %v1404_v39  ;;  %v12887_v51 = vcombine.low %v1401_v40, %v1405_v41  ;;  %v570_v38 = vld [vmem:[%s14664_s13 + $0x50] sm:$0xff]  ;;  %v571_v41 = vld [vmem:[%s14664_s13 + $0x58] sm:$0xff] }
 0x2aa   : > { %6268 = vmatprep.subr.bf16.mxu0 %v12830_v52  ;;  %6569 = vmatprep.subr.bf16.mxu1 %v12832_v53  ;;  %v12894_v52 = vcombine.high %v1408_v46, %v1412_v47  ;;  %v12896_v53 = vcombine.high %v1409_v48, %v1413_v49  ;;  %v574_v39 = vld [vmem:[%s14664_s13 + $0x70] sm:$0xff] }
 0x2ab   : > { %v13927_v40 = vld [vmem:[%s14656_s3 + $0x30] ss:$56 sps:$4 sm:$0xff]  }
 0x2ad   : > { %6269 = vmatpush1.bf16.msra.mxu0 %v12829_v58  ;;  %6570 = vmatpush1.bf16.msra.mxu1 %v12831_v59  ;;  %v12893_v58 = vcombine.low %v1408_v46, %v1412_v47  ;;  %v12895_v59 = vcombine.low %v1409_v48, %v1413_v49  ;;  %v578_v47 = vld [vmem:[%s14664_s13 + $0x90] sm:$0xff]  ;;  %v579_v49 = vld [vmem:[%s14664_s13 + $0x98] sm:$0xff] }
 0x2ae   : > { %6270 = vmatprep.subr.bf16.mxu0 %v12838_v60  ;;  %6571 = vmatprep.subr.bf16.mxu1 %v12840_v61  ;;  %v12902_v60 = vcombine.high %v1416_v54, %v1420_v55  ;;  %v12904_v61 = vcombine.high %v1417_v56, %v1421_v57  ;;  %v582_v48 = vld [vmem:[%s14664_s13 + $0xb0] sm:$0xff] }
 0x2b1   : > { %6271 = vmatpush1.bf16.msra.mxu0 %v12837_v2  ;;  %6572 = vmatpush1.bf16.msra.mxu1 %v12839_v3  ;;  %v12901_v2 = vcombine.low %v1416_v54, %v1420_v55  ;;  %v12903_v3 = vcombine.low %v1417_v56, %v1421_v57  ;;  %v586_v55 = vld [vmem:[%s14664_s13 + $0xd0] sm:$0xff] }
 0x2b2   : > { %6272 = vmatprep.subr.bf16.mxu0 %v12846_v4  ;;  %6573 = vmatprep.subr.bf16.mxu1 %v12848_v5  ;;  %v12910_v4 = vcombine.high %v1424_v62, %v1428_v63  ;;  %v12912_v5 = vcombine.high %v1425_v0, %v1429_v1  ;;  %v590_v56 = vld [vmem:[%s14664_s13 + $0xf0] sm:$0xff] }
 0x2b3   : > { %v13928_v57 = vld [vmem:[%s14656_s3 + $0x4] ss:$56 sps:$4 sm:$0xff]  }
 0x2b5   : > { %6273 = vmatpush1.bf16.msra.mxu0 %v12845_v10  ;;  %6574 = vmatpush1.bf16.msra.mxu1 %v12847_v11  ;;  %v12909_v10 = vcombine.low %v1424_v62, %v1428_v63  ;;  %v12911_v11 = vcombine.low %v1425_v0, %v1429_v1  ;;  %v12074_v62 = vcombine.high %v586_v55, %v590_v56  ;;  %v594_v0 = vld [vmem:[%s14664_s13 + $0x110] sm:$0xff] }
 0x2b6   : > { %6274 = vmatprep.subr.bf16.mxu0 %v12854_v12  ;;  %6575 = vmatprep.subr.bf16.mxu1 %v12856_v13  ;;  %v12918_v12 = vcombine.high %v1432_v6, %v1436_v7  ;;  %v12920_v13 = vcombine.high %v1433_v8, %v1437_v9  ;;  %v598_v1 = vld [vmem:[%s14664_s13 + $0x130] sm:$0xff] }
 0x2b9   : > { %6275 = vmatpush1.bf16.msra.mxu0 %v12853_v18  ;;  %6576 = vmatpush1.bf16.msra.mxu1 %v12855_v19  ;;  %v12917_v18 = vcombine.low %v1432_v6, %v1436_v7  ;;  %v12919_v19 = vcombine.low %v1433_v8, %v1437_v9  ;;  %v12082_v6 = vcombine.high %v594_v0, %v598_v1  ;;  %v602_v8 = vld [vmem:[%s14664_s13 + $0x150] sm:$0xff] }
 0x2ba   : > { %6276 = vmatprep.subr.bf16.mxu0 %v12862_v20  ;;  %6577 = vmatprep.subr.bf16.mxu1 %v12864_v21  ;;  %v12926_v20 = vcombine.high %v1440_v14, %v1444_v15  ;;  %v12928_v21 = vcombine.high %v1441_v16, %v1445_v17  ;;  %v606_v9 = vld [vmem:[%s14664_s13 + $0x170] sm:$0xff] }
 0x2bd   : > { %6277 = vmatpush1.bf16.msra.mxu0 %v12861_v26  ;;  %6578 = vmatpush1.bf16.msra.mxu1 %v12863_v27  ;;  %v12925_v26 = vcombine.low %v1440_v14, %v1444_v15  ;;  %v12927_v27 = vcombine.low %v1441_v16, %v1445_v17  ;;  %v12090_v14 = vcombine.high %v602_v8, %v606_v9  ;;  %v610_v16 = vld [vmem:[%s14664_s13 + $0x190] sm:$0xff] }
 0x2be   : > { %6278 = vmatprep.subr.bf16.mxu0 %v12870_v28  ;;  %6579 = vmatprep.subr.bf16.mxu1 %v12872_v29  ;;  %v12934_v28 = vcombine.high %v1448_v22, %v1452_v23  ;;  %v12936_v29 = vcombine.high %v1449_v24, %v1453_v25  ;;  %v614_v17 = vld [vmem:[%s14664_s13 + $0x1b0] sm:$0xff] }
 0x2c1   : > { %6279 = vmatpush1.bf16.msra.mxu0 %v12869_v34  ;;  %6580 = vmatpush1.bf16.msra.mxu1 %v12871_v35  ;;  %v12933_v34 = vcombine.low %v1448_v22, %v1452_v23  ;;  %v12935_v35 = vcombine.low %v1449_v24, %v1453_v25  ;;  %v12098_v22 = vcombine.high %v610_v16, %v614_v17  ;;  %v618_v24 = vld [vmem:[%s14664_s13 + $0x1d0] sm:$0xff] }
 0x2c2   : > { %6280 = vmatprep.subr.bf16.mxu0 %v12878_v36  ;;  %6581 = vmatprep.subr.bf16.mxu1 %v12880_v37  ;;  %v12050_v36 = vcombine.high %v562_v30, %v566_v31  ;;  %v12052_v37 = vcombine.high %v563_v32, %v567_v33  ;;  %v622_v25 = vld [vmem:[%s14664_s13 + $0x1f0] sm:$0xff] }
 0x2c5   : > { %6281 = vmatpush1.bf16.msra.mxu0 %v12877_v42  ;;  %6582 = vmatpush1.bf16.msra.mxu1 %v12879_v43  ;;  %v575_v42 = vld [vmem:[%s14664_s13 + $0x78] sm:$0xff]  ;;  %v12049_v43 = vcombine.low %v562_v30, %v566_v31  ;;  %v12106_v30 = vcombine.high %v618_v24, %v622_v25 }
 0x2c6   : > { %6282 = vmatprep.subr.bf16.mxu0 %v12886_v44  ;;  %6583 = vmatprep.subr.bf16.mxu1 %v12888_v45  ;;  %v12051_v44 = vcombine.low %v563_v32, %v567_v33  ;;  %v12058_v45 = vcombine.high %v570_v38, %v574_v39  ;;  %v12060_v46 = vcombine.high %v571_v41, %v575_v42  ;;  %v626_v32 = vld [vmem:[%s14664_s13 + $0x210] sm:$0xff] }
 0x2c7   : > { %v630_v33 = vld [vmem:[%s14664_s13 + $0x230] sm:$0xff] }
 0x2c9   : > { %6283 = vmatpush1.bf16.msra.mxu0 %v12885_v50  ;;  %6584 = vmatpush1.bf16.msra.mxu1 %v12887_v51  ;;  %v583_v50 = vld [vmem:[%s14664_s13 + $0xb8] sm:$0xff]  ;;  %v12057_v51 = vcombine.low %v570_v38, %v574_v39  ;;  %v12114_v38 = vcombine.high %v626_v32, %v630_v33 }
 0x2ca   : > { %6284 = vmatprep.subr.bf16.mxu0 %v12894_v52  ;;  %6585 = vmatprep.subr.bf16.mxu1 %v12896_v53  ;;  %v12059_v52 = vcombine.low %v571_v41, %v575_v42  ;;  %v12066_v53 = vcombine.high %v578_v47, %v582_v48  ;;  %v12068_v54 = vcombine.high %v579_v49, %v583_v50  ;;  %v638_v41 = vld [vmem:[%s14664_s13 + $0x270] sm:$0xff]  ;;  %v635_v42 = vld [vmem:[%s14664_s13 + $0x258] sm:$0xff] }
 0x2cd   : > { %6285 = vmatpush1.bf16.msra.mxu0 %v12893_v58  ;;  %6586 = vmatpush1.bf16.msra.mxu1 %v12895_v59  ;;  %v587_v58 = vld [vmem:[%s14664_s13 + $0xd8] sm:$0xff] }
 0x2ce   : > { %6286 = vmatprep.subr.bf16.mxu0 %v12902_v60  ;;  %6587 = vmatprep.subr.bf16.mxu1 %v12904_v61  ;;  %v591_v59 = vld [vmem:[%s14664_s13 + $0xf8] sm:$0xff]  ;;  %v12065_v60 = vcombine.low %v578_v47, %v582_v48  ;;  %v12067_v61 = vcombine.low %v579_v49, %v583_v50  ;;  %v642_v48 = vld [vmem:[%s14664_s13 + $0x290] sm:$0xff] }
 0x2cf   : > { %v12076_v63 = vcombine.high %v587_v58, %v591_v59  ;;  %v646_v49 = vld [vmem:[%s14664_s13 + $0x2b0] sm:$0xff]  ;;  %v643_v50 = vld [vmem:[%s14664_s13 + $0x298] sm:$0xff] }
 0x2d1   : > { %6287 = vmatpush1.bf16.msra.mxu0 %v12901_v2  ;;  %6588 = vmatpush1.bf16.msra.mxu1 %v12903_v3  ;;  %v595_v2 = vld [vmem:[%s14664_s13 + $0x118] sm:$0xff] }
 0x2d2   : > { %6288 = vmatprep.subr.bf16.mxu0 %v12910_v4  ;;  %6589 = vmatprep.subr.bf16.mxu1 %v12912_v5  ;;  %v599_v3 = vld [vmem:[%s14664_s13 + $0x138] sm:$0xff]  ;;  %v12073_v4 = vcombine.low %v586_v55, %v590_v56  ;;  %v12075_v5 = vcombine.low %v587_v58, %v591_v59  ;;  %v650_v56 = vld [vmem:[%s14664_s13 + $0x2d0] sm:$0xff] }
 0x2d3   : > { %v12084_v7 = vcombine.high %v595_v2, %v599_v3  ;;  %v651_v58 = vld [vmem:[%s14664_s13 + $0x2d8] sm:$0xff] }
 0x2d4   : > { %v655_v59 = vld [vmem:[%s14664_s13 + $0x2f8] sm:$0xff] }
 0x2d5   : > { %6289 = vmatpush1.bf16.msra.mxu0 %v12909_v10  ;;  %6590 = vmatpush1.bf16.msra.mxu1 %v12911_v11  ;;  %v603_v10 = vld [vmem:[%s14664_s13 + $0x158] sm:$0xff] }
 0x2d6   : > { %6290 = vmatprep.subr.bf16.mxu0 %v12918_v12  ;;  %6591 = vmatprep.subr.bf16.mxu1 %v12920_v13  ;;  %v607_v11 = vld [vmem:[%s14664_s13 + $0x178] sm:$0xff]  ;;  %v12081_v12 = vcombine.low %v594_v0, %v598_v1  ;;  %v12083_v13 = vcombine.low %v595_v2, %v599_v3  ;;  %v658_v0 = vld [vmem:[%s14664_s13 + $0x310] sm:$0xff] }
 0x2d7   : > { %v12092_v15 = vcombine.high %v603_v10, %v607_v11  ;;  %v662_v1 = vld [vmem:[%s14664_s13 + $0x330] sm:$0xff]  ;;  %v659_v2 = vld [vmem:[%s14664_s13 + $0x318] sm:$0xff] }
 0x2d8   : > { %v663_v3 = vld [vmem:[%s14664_s13 + $0x338] sm:$0xff] }
 0x2d9   : > { %6291 = vmatpush1.bf16.msra.mxu0 %v12917_v18  ;;  %6592 = vmatpush1.bf16.msra.mxu1 %v12919_v19  ;;  %v611_v18 = vld [vmem:[%s14664_s13 + $0x198] sm:$0xff] }
 0x2da   : > { %6292 = vmatprep.subr.bf16.mxu0 %v12926_v20  ;;  %6593 = vmatprep.subr.bf16.mxu1 %v12928_v21  ;;  %v615_v19 = vld [vmem:[%s14664_s13 + $0x1b8] sm:$0xff]  ;;  %v12089_v20 = vcombine.low %v602_v8, %v606_v9  ;;  %v12091_v21 = vcombine.low %v603_v10, %v607_v11  ;;  %v666_v8 = vld [vmem:[%s14664_s13 + $0x350] sm:$0xff] }
 0x2db   : > { %v12100_v23 = vcombine.high %v611_v18, %v615_v19  ;;  %v670_v9 = vld [vmem:[%s14664_s13 + $0x370] sm:$0xff]  ;;  %v667_v10 = vld [vmem:[%s14664_s13 + $0x358] sm:$0xff] }
 0x2dc   : > { %v671_v11 = vld [vmem:[%s14664_s13 + $0x378] sm:$0xff] }
 0x2dd   : > { %6293 = vmatpush1.bf16.msra.mxu0 %v12925_v26  ;;  %6594 = vmatpush1.bf16.msra.mxu1 %v12927_v27  ;;  %v619_v26 = vld [vmem:[%s14664_s13 + $0x1d8] sm:$0xff] }
 0x2de   : > { %6294 = vmatprep.subr.bf16.mxu0 %v12934_v28  ;;  %6595 = vmatprep.subr.bf16.mxu1 %v12936_v29  ;;  %v623_v27 = vld [vmem:[%s14664_s13 + $0x1f8] sm:$0xff]  ;;  %v12097_v28 = vcombine.low %v610_v16, %v614_v17  ;;  %v12099_v29 = vcombine.low %v611_v18, %v615_v19  ;;  %v674_v16 = vld [vmem:[%s14664_s13 + $0x390] sm:$0xff] }
 0x2df   : > { %v12108_v31 = vcombine.high %v619_v26, %v623_v27  ;;  %v678_v17 = vld [vmem:[%s14664_s13 + $0x3b0] sm:$0xff]  ;;  %v675_v18 = vld [vmem:[%s14664_s13 + $0x398] sm:$0xff] }
 0x2e0   : > { %v679_v19 = vld [vmem:[%s14664_s13 + $0x3b8] sm:$0xff] }
 0x2e1   : > { %6295 = vmatpush1.bf16.msra.mxu0 %v12933_v34  ;;  %6596 = vmatpush1.bf16.msra.mxu1 %v12935_v35  ;;  %v627_v34 = vld [vmem:[%s14664_s13 + $0x218] sm:$0xff] }
 0x2e2   : > { %6608 = vmatprep.subr.bf16.mxu0 %v12050_v36  ;;  %6909 = vmatprep.subr.bf16.mxu1 %v12052_v37  ;;  %v631_v35 = vld [vmem:[%s14664_s13 + $0x238] sm:$0xff]  ;;  %v12105_v36 = vcombine.low %v618_v24, %v622_v25  ;;  %v12107_v37 = vcombine.low %v619_v26, %v623_v27  ;;  %v682_v24 = vld [vmem:[%s14664_s13 + $0x3d0] sm:$0xff] }
 0x2e3   : > { %v12116_v39 = vcombine.high %v627_v34, %v631_v35  ;;  %v686_v25 = vld [vmem:[%s14664_s13 + $0x3f0] sm:$0xff]  ;;  %v683_v26 = vld [vmem:[%s14664_s13 + $0x3d8] sm:$0xff] }
 0x2e4   : > { %6297 = vmatmul.mubr.bf16.vlgmr.msra.gmra.mrb[0].mxu0 %v13927_v40  ;;  %6598 = vmatmul.mubr.bf16.vlgmr.msra.gmra.mrb[0].mxu1 %v13927_v40  ;;  %v634_v40 = vld [vmem:[%s14664_s13 + $0x250] sm:$0xff]  ;;  %v687_v27 = vld [vmem:[%s14664_s13 + $0x3f8] sm:$0xff] }
 0x2e5   : > { %6609 = vmatpush1.bf16.msra.mxu0 %v12049_v43  ;;  %6910 = vmatpush1.bf16.msra.mxu1 %v12051_v44  ;;  %v639_v43 = vld [vmem:[%s14664_s13 + $0x278] sm:$0xff]  ;;  %v12113_v44 = vcombine.low %v626_v32, %v630_v33  ;;  %v690_v32 = vld [vmem:[%s14664_s13 + $0x410] sm:$0xff] }
 0x2e6   : > { %6610 = vmatprep.subr.bf16.mxu0 %v12058_v45  ;;  %6911 = vmatprep.subr.bf16.mxu1 %v12060_v46  ;;  %v12115_v45 = vcombine.low %v627_v34, %v631_v35  ;;  %v12122_v46 = vcombine.high %v634_v40, %v638_v41  ;;  %v12124_v47 = vcombine.high %v635_v42, %v639_v43  ;;  %v694_v33 = vld [vmem:[%s14664_s13 + $0x430] sm:$0xff]  ;;  %v691_v34 = vld [vmem:[%s14664_s13 + $0x418] sm:$0xff] }
 0x2e7   : > { %6640 = vmatprep.mubr.bf16.mxu0 %v13928_v57  ;;  %6941 = vmatprep.mubr.bf16.mxu1 %v13928_v57  ;;  %v654_v57 = vld [vmem:[%s14664_s13 + $0x2f0] sm:$0xff]  ;;  %v695_v35 = vld [vmem:[%s14664_s13 + $0x438] sm:$0xff] }
 0x2e9   : > { %6611 = vmatpush1.bf16.msra.mxu0 %v12057_v51  ;;  %6912 = vmatpush1.bf16.msra.mxu1 %v12059_v52  ;;  %v647_v51 = vld [vmem:[%s14664_s13 + $0x2b8] sm:$0xff]  ;;  %v12121_v52 = vcombine.low %v634_v40, %v638_v41  ;;  %v698_v40 = vld [vmem:[%s14664_s13 + $0x450] sm:$0xff] }
 0x2ea   : > { %6612 = vmatprep.subr.bf16.mxu0 %v12066_v53  ;;  %6913 = vmatprep.subr.bf16.mxu1 %v12068_v54  ;;  %v12123_v53 = vcombine.low %v635_v42, %v639_v43  ;;  %v12130_v54 = vcombine.high %v642_v48, %v646_v49  ;;  %v12132_v55 = vcombine.high %v643_v50, %v647_v51  ;;  %v702_v41 = vld [vmem:[%s14664_s13 + $0x470] sm:$0xff]  ;;  %v699_v42 = vld [vmem:[%s14664_s13 + $0x458] sm:$0xff] }
 0x2eb   : > { %v703_v43 = vld [vmem:[%s14664_s13 + $0x478] sm:$0xff] }
 0x2ed   : > { %6613 = vmatpush1.bf16.msra.mxu0 %v12065_v60  ;;  %6914 = vmatpush1.bf16.msra.mxu1 %v12067_v61  ;;  %v12129_v60 = vcombine.low %v642_v48, %v646_v49  ;;  %v12131_v61 = vcombine.low %v643_v50, %v647_v51  ;;  %v706_v48 = vld [vmem:[%s14664_s13 + $0x490] sm:$0xff]  ;;  %v707_v51 = vld [vmem:[%s14664_s13 + $0x498] sm:$0xff] }
 0x2ee   : > { %6614 = vmatprep.subr.bf16.mxu0 %v12074_v62  ;;  %6915 = vmatprep.subr.bf16.mxu1 %v12076_v63  ;;  %v12138_v62 = vcombine.high %v650_v56, %v654_v57  ;;  %v12140_v63 = vcombine.high %v651_v58, %v655_v59  ;;  %v710_v49 = vld [vmem:[%s14664_s13 + $0x4b0] sm:$0xff] }
 0x2ef   : > { %v13929_v50 = vld [vmem:[%s14656_s3] ss:$56 sps:$4 sm:$0xff]  }
 0x2f1   : > { %6615 = vmatpush1.bf16.msra.mxu0 %v12073_v4  ;;  %6916 = vmatpush1.bf16.msra.mxu1 %v12075_v5  ;;  %v12137_v4 = vcombine.low %v650_v56, %v654_v57  ;;  %v12139_v5 = vcombine.low %v651_v58, %v655_v59  ;;  %v714_v57 = vld [vmem:[%s14664_s13 + $0x4d0] sm:$0xff] }
 0x2f2   : > { %6616 = vmatprep.subr.bf16.mxu0 %v12082_v6  ;;  %6917 = vmatprep.subr.bf16.mxu1 %v12084_v7  ;;  %v12146_v6 = vcombine.high %v658_v0, %v662_v1  ;;  %v12148_v7 = vcombine.high %v659_v2, %v663_v3  ;;  %v718_v58 = vld [vmem:[%s14664_s13 + $0x4f0] sm:$0xff] }
 0x2f3   : > { %v13930_v59 = vld [vmem:[%s14656_s3 + $0xc] ss:$56 sps:$4 sm:$0xff]  }
 0x2f5   : > { %6617 = vmatpush1.bf16.msra.mxu0 %v12081_v12  ;;  %6918 = vmatpush1.bf16.msra.mxu1 %v12083_v13  ;;  %v12145_v12 = vcombine.low %v658_v0, %v662_v1  ;;  %v12147_v13 = vcombine.low %v659_v2, %v663_v3  ;;  %v12202_v0 = vcombine.high %v714_v57, %v718_v58  ;;  %v722_v2 = vld [vmem:[%s14664_s13 + $0x510] sm:$0xff] }
 0x2f6   : > { %6618 = vmatprep.subr.bf16.mxu0 %v12090_v14  ;;  %6919 = vmatprep.subr.bf16.mxu1 %v12092_v15  ;;  %v12154_v14 = vcombine.high %v666_v8, %v670_v9  ;;  %v12156_v15 = vcombine.high %v667_v10, %v671_v11  ;;  %v726_v3 = vld [vmem:[%s14664_s13 + $0x530] sm:$0xff] }
 0x2f9   : > { %6619 = vmatpush1.bf16.msra.mxu0 %v12089_v20  ;;  %6920 = vmatpush1.bf16.msra.mxu1 %v12091_v21  ;;  %v12153_v20 = vcombine.low %v666_v8, %v670_v9  ;;  %v12155_v21 = vcombine.low %v667_v10, %v671_v11  ;;  %v12210_v8 = vcombine.high %v722_v2, %v726_v3  ;;  %v730_v10 = vld [vmem:[%s14664_s13 + $0x550] sm:$0xff] }
 0x2fa   : > { %6620 = vmatprep.subr.bf16.mxu0 %v12098_v22  ;;  %6921 = vmatprep.subr.bf16.mxu1 %v12100_v23  ;;  %v12162_v22 = vcombine.high %v674_v16, %v678_v17  ;;  %v12164_v23 = vcombine.high %v675_v18, %v679_v19  ;;  %v734_v11 = vld [vmem:[%s14664_s13 + $0x570] sm:$0xff] }
 0x2fd   : > { %6621 = vmatpush1.bf16.msra.mxu0 %v12097_v28  ;;  %6922 = vmatpush1.bf16.msra.mxu1 %v12099_v29  ;;  %v12161_v28 = vcombine.low %v674_v16, %v678_v17  ;;  %v12163_v29 = vcombine.low %v675_v18, %v679_v19  ;;  %v12218_v16 = vcombine.high %v730_v10, %v734_v11  ;;  %v738_v18 = vld [vmem:[%s14664_s13 + $0x590] sm:$0xff] }
 0x2fe   : > { %6622 = vmatprep.subr.bf16.mxu0 %v12106_v30  ;;  %6923 = vmatprep.subr.bf16.mxu1 %v12108_v31  ;;  %v12170_v30 = vcombine.high %v682_v24, %v686_v25  ;;  %v12172_v31 = vcombine.high %v683_v26, %v687_v27  ;;  %v742_v19 = vld [vmem:[%s14664_s13 + $0x5b0] sm:$0xff] }
 0x301   : > { %6623 = vmatpush1.bf16.msra.mxu0 %v12105_v36  ;;  %6924 = vmatpush1.bf16.msra.mxu1 %v12107_v37  ;;  %v12169_v36 = vcombine.low %v682_v24, %v686_v25  ;;  %v12171_v37 = vcombine.low %v683_v26, %v687_v27  ;;  %v12226_v24 = vcombine.high %v738_v18, %v742_v19  ;;  %v746_v26 = vld [vmem:[%s14664_s13 + $0x5d0] sm:$0xff] }
 0x302   : > { %6624 = vmatprep.subr.bf16.mxu0 %v12114_v38  ;;  %6925 = vmatprep.subr.bf16.mxu1 %v12116_v39  ;;  %v12178_v38 = vcombine.high %v690_v32, %v694_v33  ;;  %v12180_v39 = vcombine.high %v691_v34, %v695_v35  ;;  %v750_v27 = vld [vmem:[%s14664_s13 + $0x5f0] sm:$0xff] }
 0x305   : > { %6625 = vmatpush1.bf16.msra.mxu0 %v12113_v44  ;;  %6926 = vmatpush1.bf16.msra.mxu1 %v12115_v45  ;;  %v12177_v44 = vcombine.low %v690_v32, %v694_v33  ;;  %v12179_v45 = vcombine.low %v691_v34, %v695_v35  ;;  %v12234_v32 = vcombine.high %v746_v26, %v750_v27  ;;  %v754_v34 = vld [vmem:[%s14664_s13 + $0x610] sm:$0xff] }
 0x306   : > { %6626 = vmatprep.subr.bf16.mxu0 %v12122_v46  ;;  %6927 = vmatprep.subr.bf16.mxu1 %v12124_v47  ;;  %v12186_v46 = vcombine.high %v698_v40, %v702_v41  ;;  %v12188_v47 = vcombine.high %v699_v42, %v703_v43  ;;  %v758_v35 = vld [vmem:[%s14664_s13 + $0x630] sm:$0xff] }
 0x309   : > { %6627 = vmatpush1.bf16.msra.mxu0 %v12121_v52  ;;  %6928 = vmatpush1.bf16.msra.mxu1 %v12123_v53  ;;  %v711_v52 = vld [vmem:[%s14664_s13 + $0x4b8] sm:$0xff]  ;;  %v12185_v53 = vcombine.low %v698_v40, %v702_v41  ;;  %v12242_v40 = vcombine.high %v754_v34, %v758_v35 }
 0x30a   : > { %6628 = vmatprep.subr.bf16.mxu0 %v12130_v54  ;;  %6929 = vmatprep.subr.bf16.mxu1 %v12132_v55  ;;  %v12187_v54 = vcombine.low %v699_v42, %v703_v43  ;;  %v12194_v55 = vcombine.high %v706_v48, %v710_v49  ;;  %v12196_v56 = vcombine.high %v707_v51, %v711_v52  ;;  %v762_v42 = vld [vmem:[%s14664_s13 + $0x650] sm:$0xff] }
 0x30b   : > { %v766_v43 = vld [vmem:[%s14664_s13 + $0x670] sm:$0xff] }
 0x30d   : > { %6629 = vmatpush1.bf16.msra.mxu0 %v12129_v60  ;;  %6930 = vmatpush1.bf16.msra.mxu1 %v12131_v61  ;;  %v715_v60 = vld [vmem:[%s14664_s13 + $0x4d8] sm:$0xff] }
 0x30e   : > { %6630 = vmatprep.subr.bf16.mxu0 %v12138_v62  ;;  %6931 = vmatprep.subr.bf16.mxu1 %v12140_v63  ;;  %v719_v61 = vld [vmem:[%s14664_s13 + $0x4f8] sm:$0xff]  ;;  %v12193_v62 = vcombine.low %v706_v48, %v710_v49  ;;  %v12195_v63 = vcombine.low %v707_v51, %v711_v52  ;;  %v12250_v48 = vcombine.high %v762_v42, %v766_v43  ;;  %v774_v51 = vld [vmem:[%s14664_s13 + $0x6b0] sm:$0xff] }
 0x30f   : > { %v12204_v1 = vcombine.high %v715_v60, %v719_v61  ;;  %v771_v52 = vld [vmem:[%s14664_s13 + $0x698] sm:$0xff] }
 0x311   : > { %6631 = vmatpush1.bf16.msra.mxu0 %v12137_v4  ;;  %6932 = vmatpush1.bf16.msra.mxu1 %v12139_v5  ;;  %v723_v4 = vld [vmem:[%s14664_s13 + $0x518] sm:$0xff] }
 0x312   : > { %6632 = vmatprep.subr.bf16.mxu0 %v12146_v6  ;;  %6933 = vmatprep.subr.bf16.mxu1 %v12148_v7  ;;  %v727_v5 = vld [vmem:[%s14664_s13 + $0x538] sm:$0xff]  ;;  %v12201_v6 = vcombine.low %v714_v57, %v718_v58  ;;  %v12203_v7 = vcombine.low %v715_v60, %v719_v61  ;;  %v778_v58 = vld [vmem:[%s14664_s13 + $0x6d0] sm:$0xff] }
 0x313   : > { %v12212_v9 = vcombine.high %v723_v4, %v727_v5  ;;  %v779_v60 = vld [vmem:[%s14664_s13 + $0x6d8] sm:$0xff] }
 0x314   : > { %v783_v61 = vld [vmem:[%s14664_s13 + $0x6f8] sm:$0xff] }
 0x315   : > { %6633 = vmatpush1.bf16.msra.mxu0 %v12145_v12  ;;  %6934 = vmatpush1.bf16.msra.mxu1 %v12147_v13  ;;  %v731_v12 = vld [vmem:[%s14664_s13 + $0x558] sm:$0xff] }
 0x316   : > { %6634 = vmatprep.subr.bf16.mxu0 %v12154_v14  ;;  %6935 = vmatprep.subr.bf16.mxu1 %v12156_v15  ;;  %v735_v13 = vld [vmem:[%s14664_s13 + $0x578] sm:$0xff]  ;;  %v12209_v14 = vcombine.low %v722_v2, %v726_v3  ;;  %v12211_v15 = vcombine.low %v723_v4, %v727_v5  ;;  %v786_v2 = vld [vmem:[%s14664_s13 + $0x710] sm:$0xff] }
 0x317   : > { %v12220_v17 = vcombine.high %v731_v12, %v735_v13  ;;  %v790_v3 = vld [vmem:[%s14664_s13 + $0x730] sm:$0xff]  ;;  %v787_v4 = vld [vmem:[%s14664_s13 + $0x718] sm:$0xff] }
 0x318   : > { %v791_v5 = vld [vmem:[%s14664_s13 + $0x738] sm:$0xff] }
 0x319   : > { %6635 = vmatpush1.bf16.msra.mxu0 %v12153_v20  ;;  %6936 = vmatpush1.bf16.msra.mxu1 %v12155_v21  ;;  %v739_v20 = vld [vmem:[%s14664_s13 + $0x598] sm:$0xff] }
 0x31a   : > { %6636 = vmatprep.subr.bf16.mxu0 %v12162_v22  ;;  %6937 = vmatprep.subr.bf16.mxu1 %v12164_v23  ;;  %v743_v21 = vld [vmem:[%s14664_s13 + $0x5b8] sm:$0xff]  ;;  %v12217_v22 = vcombine.low %v730_v10, %v734_v11  ;;  %v12219_v23 = vcombine.low %v731_v12, %v735_v13  ;;  %v794_v10 = vld [vmem:[%s14664_s13 + $0x750] sm:$0xff] }
 0x31b   : > { %v12228_v25 = vcombine.high %v739_v20, %v743_v21  ;;  %v798_v11 = vld [vmem:[%s14664_s13 + $0x770] sm:$0xff]  ;;  %v795_v12 = vld [vmem:[%s14664_s13 + $0x758] sm:$0xff] }
 0x31c   : > { %v799_v13 = vld [vmem:[%s14664_s13 + $0x778] sm:$0xff] }
 0x31d   : > { %6637 = vmatpush1.bf16.msra.mxu0 %v12161_v28  ;;  %6938 = vmatpush1.bf16.msra.mxu1 %v12163_v29  ;;  %v747_v28 = vld [vmem:[%s14664_s13 + $0x5d8] sm:$0xff] }
 0x31e   : > { %6638 = vmatprep.subr.bf16.mxu0 %v12170_v30  ;;  %6939 = vmatprep.subr.bf16.mxu1 %v12172_v31  ;;  %v751_v29 = vld [vmem:[%s14664_s13 + $0x5f8] sm:$0xff]  ;;  %v12225_v30 = vcombine.low %v738_v18, %v742_v19  ;;  %v12227_v31 = vcombine.low %v739_v20, %v743_v21  ;;  %v802_v18 = vld [vmem:[%s14664_s13 + $0x790] sm:$0xff] }
 0x31f   : > { %v12236_v33 = vcombine.high %v747_v28, %v751_v29  ;;  %v806_v19 = vld [vmem:[%s14664_s13 + $0x7b0] sm:$0xff]  ;;  %v803_v20 = vld [vmem:[%s14664_s13 + $0x798] sm:$0xff] }
 0x320   : > { %v807_v21 = vld [vmem:[%s14664_s13 + $0x7b8] sm:$0xff] }
 0x321   : > { %6639 = vmatpush1.bf16.msra.mxu0 %v12169_v36  ;;  %6940 = vmatpush1.bf16.msra.mxu1 %v12171_v37  ;;  %v755_v36 = vld [vmem:[%s14664_s13 + $0x618] sm:$0xff] }
 0x322   : > { %6651 = vmatprep.subr.bf16.mxu0 %v12178_v38  ;;  %6952 = vmatprep.subr.bf16.mxu1 %v12180_v39  ;;  %v759_v37 = vld [vmem:[%s14664_s13 + $0x638] sm:$0xff]  ;;  %v12233_v38 = vcombine.low %v746_v26, %v750_v27  ;;  %v12235_v39 = vcombine.low %v747_v28, %v751_v29  ;;  %v810_v26 = vld [vmem:[%s14664_s13 + $0x7d0] sm:$0xff] }
 0x323   : > { %v12244_v41 = vcombine.high %v755_v36, %v759_v37  ;;  %v814_v27 = vld [vmem:[%s14664_s13 + $0x7f0] sm:$0xff]  ;;  %v811_v28 = vld [vmem:[%s14664_s13 + $0x7d8] sm:$0xff] }
 0x324   : > { %6641 = vmatmul.mubr.bf16.vlgmr.msra.gmra.mrb[4].mxu0 %v13929_v50  ;;  %6942 = vmatmul.mubr.bf16.vlgmr.msra.gmra.mrb[4].mxu1 %v13929_v50  ;;  %v770_v50 = vld [vmem:[%s14664_s13 + $0x690] sm:$0xff]  ;;  %v815_v29 = vld [vmem:[%s14664_s13 + $0x7f8] sm:$0xff] }
 0x325   : > { %6652 = vmatpush1.bf16.msra.mxu0 %v12177_v44  ;;  %6953 = vmatpush1.bf16.msra.mxu1 %v12179_v45  ;;  %v763_v44 = vld [vmem:[%s14664_s13 + $0x658] sm:$0xff] }
 0x326   : > { %6653 = vmatprep.subr.bf16.mxu0 %v12186_v46  ;;  %6954 = vmatprep.subr.bf16.mxu1 %v12188_v47  ;;  %v767_v45 = vld [vmem:[%s14664_s13 + $0x678] sm:$0xff]  ;;  %v12241_v46 = vcombine.low %v754_v34, %v758_v35  ;;  %v12243_v47 = vcombine.low %v755_v36, %v759_v37  ;;  %v818_v34 = vld [vmem:[%s14664_s13 + $0x810] sm:$0xff] }
 0x327   : > { %6683 = vmatprep.mubr.bf16.mxu0 %v13930_v59  ;;  %6984 = vmatprep.mubr.bf16.mxu1 %v13930_v59  ;;  %v12252_v49 = vcombine.high %v763_v44, %v767_v45  ;;  %v782_v59 = vld [vmem:[%s14664_s13 + $0x6f0] sm:$0xff]  ;;  %v819_v36 = vld [vmem:[%s14664_s13 + $0x818] sm:$0xff] }
 0x328   : > { %v822_v35 = vld [vmem:[%s14664_s13 + $0x830] sm:$0xff]  ;;  %v823_v37 = vld [vmem:[%s14664_s13 + $0x838] sm:$0xff] }
 0x329   : > { %6654 = vmatpush1.bf16.msra.mxu0 %v12185_v53  ;;  %6955 = vmatpush1.bf16.msra.mxu1 %v12187_v54  ;;  %v775_v53 = vld [vmem:[%s14664_s13 + $0x6b8] sm:$0xff]  ;;  %v12249_v54 = vcombine.low %v762_v42, %v766_v43  ;;  %v826_v42 = vld [vmem:[%s14664_s13 + $0x850] sm:$0xff] }
 0x32a   : > { %6655 = vmatprep.subr.bf16.mxu0 %v12194_v55  ;;  %6956 = vmatprep.subr.bf16.mxu1 %v12196_v56  ;;  %v12251_v55 = vcombine.low %v763_v44, %v767_v45  ;;  %v12258_v56 = vcombine.high %v770_v50, %v774_v51  ;;  %v12260_v57 = vcombine.high %v771_v52, %v775_v53  ;;  %v830_v43 = vld [vmem:[%s14664_s13 + $0x870] sm:$0xff]  ;;  %v827_v44 = vld [vmem:[%s14664_s13 + $0x858] sm:$0xff] }
 0x32b   : > { %v831_v45 = vld [vmem:[%s14664_s13 + $0x878] sm:$0xff] }
 0x32d   : > { %6656 = vmatpush1.bf16.msra.mxu0 %v12193_v62  ;;  %6957 = vmatpush1.bf16.msra.mxu1 %v12195_v63  ;;  %v12257_v62 = vcombine.low %v770_v50, %v774_v51  ;;  %v12259_v63 = vcombine.low %v771_v52, %v775_v53  ;;  %v834_v50 = vld [vmem:[%s14664_s13 + $0x890] sm:$0xff]  ;;  %v835_v53 = vld [vmem:[%s14664_s13 + $0x898] sm:$0xff] }
 0x32e   : > { %6657 = vmatprep.subr.bf16.mxu0 %v12202_v0  ;;  %6958 = vmatprep.subr.bf16.mxu1 %v12204_v1  ;;  %v12266_v0 = vcombine.high %v778_v58, %v782_v59  ;;  %v12268_v1 = vcombine.high %v779_v60, %v783_v61  ;;  %v838_v51 = vld [vmem:[%s14664_s13 + $0x8b0] sm:$0xff] }
 0x32f   : > { %v13931_v52 = vld [vmem:[%s14656_s3 + $0x8] ss:$56 sps:$4 sm:$0xff]  }
 0x331   : > { %6658 = vmatpush1.bf16.msra.mxu0 %v12201_v6  ;;  %6959 = vmatpush1.bf16.msra.mxu1 %v12203_v7  ;;  %v12265_v6 = vcombine.low %v778_v58, %v782_v59  ;;  %v12267_v7 = vcombine.low %v779_v60, %v783_v61  ;;  %v842_v59 = vld [vmem:[%s14664_s13 + $0x8d0] sm:$0xff] }
 0x332   : > { %6659 = vmatprep.subr.bf16.mxu0 %v12210_v8  ;;  %6960 = vmatprep.subr.bf16.mxu1 %v12212_v9  ;;  %v12274_v8 = vcombine.high %v786_v2, %v790_v3  ;;  %v12276_v9 = vcombine.high %v787_v4, %v791_v5  ;;  %v846_v60 = vld [vmem:[%s14664_s13 + $0x8f0] sm:$0xff] }
 0x333   : > { %v13932_v61 = vld [vmem:[%s14656_s3 + $0x14] ss:$56 sps:$4 sm:$0xff]  }
 0x335   : > { %6660 = vmatpush1.bf16.msra.mxu0 %v12209_v14  ;;  %6961 = vmatpush1.bf16.msra.mxu1 %v12211_v15  ;;  %v12273_v14 = vcombine.low %v786_v2, %v790_v3  ;;  %v12275_v15 = vcombine.low %v787_v4, %v791_v5  ;;  %v12330_v2 = vcombine.high %v842_v59, %v846_v60  ;;  %v850_v4 = vld [vmem:[%s14664_s13 + $0x910] sm:$0xff] }
 0x336   : > { %6661 = vmatprep.subr.bf16.mxu0 %v12218_v16  ;;  %6962 = vmatprep.subr.bf16.mxu1 %v12220_v17  ;;  %v12282_v16 = vcombine.high %v794_v10, %v798_v11  ;;  %v12284_v17 = vcombine.high %v795_v12, %v799_v13  ;;  %v854_v5 = vld [vmem:[%s14664_s13 + $0x930] sm:$0xff] }
 0x339   : > { %6662 = vmatpush1.bf16.msra.mxu0 %v12217_v22  ;;  %6963 = vmatpush1.bf16.msra.mxu1 %v12219_v23  ;;  %v12281_v22 = vcombine.low %v794_v10, %v798_v11  ;;  %v12283_v23 = vcombine.low %v795_v12, %v799_v13  ;;  %v12338_v10 = vcombine.high %v850_v4, %v854_v5  ;;  %v858_v12 = vld [vmem:[%s14664_s13 + $0x950] sm:$0xff] }
 0x33a   : > { %6663 = vmatprep.subr.bf16.mxu0 %v12226_v24  ;;  %6964 = vmatprep.subr.bf16.mxu1 %v12228_v25  ;;  %v12290_v24 = vcombine.high %v802_v18, %v806_v19  ;;  %v12292_v25 = vcombine.high %v803_v20, %v807_v21  ;;  %v862_v13 = vld [vmem:[%s14664_s13 + $0x970] sm:$0xff] }
 0x33d   : > { %6664 = vmatpush1.bf16.msra.mxu0 %v12225_v30  ;;  %6965 = vmatpush1.bf16.msra.mxu1 %v12227_v31  ;;  %v12289_v30 = vcombine.low %v802_v18, %v806_v19  ;;  %v12291_v31 = vcombine.low %v803_v20, %v807_v21  ;;  %v12346_v18 = vcombine.high %v858_v12, %v862_v13  ;;  %v866_v20 = vld [vmem:[%s14664_s13 + $0x990] sm:$0xff] }
 0x33e   : > { %6665 = vmatprep.subr.bf16.mxu0 %v12234_v32  ;;  %6966 = vmatprep.subr.bf16.mxu1 %v12236_v33  ;;  %v12298_v32 = vcombine.high %v810_v26, %v814_v27  ;;  %v12300_v33 = vcombine.high %v811_v28, %v815_v29  ;;  %v870_v21 = vld [vmem:[%s14664_s13 + $0x9b0] sm:$0xff] }
 0x341   : > { %6666 = vmatpush1.bf16.msra.mxu0 %v12233_v38  ;;  %6967 = vmatpush1.bf16.msra.mxu1 %v12235_v39  ;;  %v12297_v38 = vcombine.low %v810_v26, %v814_v27  ;;  %v12299_v39 = vcombine.low %v811_v28, %v815_v29  ;;  %v12354_v26 = vcombine.high %v866_v20, %v870_v21  ;;  %v874_v28 = vld [vmem:[%s14664_s13 + $0x9d0] sm:$0xff] }
 0x342   : > { %6667 = vmatprep.subr.bf16.mxu0 %v12242_v40  ;;  %6968 = vmatprep.subr.bf16.mxu1 %v12244_v41  ;;  %v12306_v40 = vcombine.high %v818_v34, %v822_v35  ;;  %v12308_v41 = vcombine.high %v819_v36, %v823_v37  ;;  %v878_v29 = vld [vmem:[%s14664_s13 + $0x9f0] sm:$0xff] }
 0x345   : > { %6668 = vmatpush1.bf16.msra.mxu0 %v12241_v46  ;;  %6969 = vmatpush1.bf16.msra.mxu1 %v12243_v47  ;;  %v12305_v46 = vcombine.low %v818_v34, %v822_v35  ;;  %v12307_v47 = vcombine.low %v819_v36, %v823_v37  ;;  %v12362_v34 = vcombine.high %v874_v28, %v878_v29  ;;  %v882_v36 = vld [vmem:[%s14664_s13 + $0xa10] sm:$0xff] }
 0x346   : > { %6669 = vmatprep.subr.bf16.mxu0 %v12250_v48  ;;  %6970 = vmatprep.subr.bf16.mxu1 %v12252_v49  ;;  %v12314_v48 = vcombine.high %v826_v42, %v830_v43  ;;  %v12316_v49 = vcombine.high %v827_v44, %v831_v45  ;;  %v886_v37 = vld [vmem:[%s14664_s13 + $0xa30] sm:$0xff] }
 0x349   : > { %6670 = vmatpush1.bf16.msra.mxu0 %v12249_v54  ;;  %6971 = vmatpush1.bf16.msra.mxu1 %v12251_v55  ;;  %v839_v54 = vld [vmem:[%s14664_s13 + $0x8b8] sm:$0xff]  ;;  %v12313_v55 = vcombine.low %v826_v42, %v830_v43  ;;  %v12370_v42 = vcombine.high %v882_v36, %v886_v37 }
 0x34a   : > { %6671 = vmatprep.subr.bf16.mxu0 %v12258_v56  ;;  %6972 = vmatprep.subr.bf16.mxu1 %v12260_v57  ;;  %v12315_v56 = vcombine.low %v827_v44, %v831_v45  ;;  %v12322_v57 = vcombine.high %v834_v50, %v838_v51  ;;  %v12324_v58 = vcombine.high %v835_v53, %v839_v54  ;;  %v890_v44 = vld [vmem:[%s14664_s13 + $0xa50] sm:$0xff] }
 0x34b   : > { %v894_v45 = vld [vmem:[%s14664_s13 + $0xa70] sm:$0xff] }
 0x34d   : > { %6672 = vmatpush1.bf16.msra.mxu0 %v12257_v62  ;;  %6973 = vmatpush1.bf16.msra.mxu1 %v12259_v63  ;;  %v843_v62 = vld [vmem:[%s14664_s13 + $0x8d8] sm:$0xff] }
 0x34e   : > { %6673 = vmatprep.subr.bf16.mxu0 %v12266_v0  ;;  %6974 = vmatprep.subr.bf16.mxu1 %v12268_v1  ;;  %v847_v63 = vld [vmem:[%s14664_s13 + $0x8f8] sm:$0xff]  ;;  %v12321_v0 = vcombine.low %v834_v50, %v838_v51  ;;  %v12323_v1 = vcombine.low %v835_v53, %v839_v54  ;;  %v12378_v50 = vcombine.high %v890_v44, %v894_v45  ;;  %v902_v53 = vld [vmem:[%s14664_s13 + $0xab0] sm:$0xff] }
 0x34f   : > { %v12332_v3 = vcombine.high %v843_v62, %v847_v63  ;;  %v899_v54 = vld [vmem:[%s14664_s13 + $0xa98] sm:$0xff] }
 0x351   : > { %6674 = vmatpush1.bf16.msra.mxu0 %v12265_v6  ;;  %6975 = vmatpush1.bf16.msra.mxu1 %v12267_v7  ;;  %v851_v6 = vld [vmem:[%s14664_s13 + $0x918] sm:$0xff] }
 0x352   : > { %6675 = vmatprep.subr.bf16.mxu0 %v12274_v8  ;;  %6976 = vmatprep.subr.bf16.mxu1 %v12276_v9  ;;  %v855_v7 = vld [vmem:[%s14664_s13 + $0x938] sm:$0xff]  ;;  %v12329_v8 = vcombine.low %v842_v59, %v846_v60  ;;  %v12331_v9 = vcombine.low %v843_v62, %v847_v63  ;;  %v906_v60 = vld [vmem:[%s14664_s13 + $0xad0] sm:$0xff] }
 0x353   : > { %v12340_v11 = vcombine.high %v851_v6, %v855_v7  ;;  %v907_v62 = vld [vmem:[%s14664_s13 + $0xad8] sm:$0xff] }
 0x354   : > { %v911_v63 = vld [vmem:[%s14664_s13 + $0xaf8] sm:$0xff] }
 0x355   : > { %6676 = vmatpush1.bf16.msra.mxu0 %v12273_v14  ;;  %6977 = vmatpush1.bf16.msra.mxu1 %v12275_v15  ;;  %v859_v14 = vld [vmem:[%s14664_s13 + $0x958] sm:$0xff] }
 0x356   : > { %6677 = vmatprep.subr.bf16.mxu0 %v12282_v16  ;;  %6978 = vmatprep.subr.bf16.mxu1 %v12284_v17  ;;  %v863_v15 = vld [vmem:[%s14664_s13 + $0x978] sm:$0xff]  ;;  %v12337_v16 = vcombine.low %v850_v4, %v854_v5  ;;  %v12339_v17 = vcombine.low %v851_v6, %v855_v7  ;;  %v914_v4 = vld [vmem:[%s14664_s13 + $0xb10] sm:$0xff] }
 0x357   : > { %v12348_v19 = vcombine.high %v859_v14, %v863_v15  ;;  %v918_v5 = vld [vmem:[%s14664_s13 + $0xb30] sm:$0xff]  ;;  %v915_v6 = vld [vmem:[%s14664_s13 + $0xb18] sm:$0xff] }
 0x358   : > { %v919_v7 = vld [vmem:[%s14664_s13 + $0xb38] sm:$0xff] }
 0x359   : > { %6678 = vmatpush1.bf16.msra.mxu0 %v12281_v22  ;;  %6979 = vmatpush1.bf16.msra.mxu1 %v12283_v23  ;;  %v867_v22 = vld [vmem:[%s14664_s13 + $0x998] sm:$0xff] }
 0x35a   : > { %6679 = vmatprep.subr.bf16.mxu0 %v12290_v24  ;;  %6980 = vmatprep.subr.bf16.mxu1 %v12292_v25  ;;  %v871_v23 = vld [vmem:[%s14664_s13 + $0x9b8] sm:$0xff]  ;;  %v12345_v24 = vcombine.low %v858_v12, %v862_v13  ;;  %v12347_v25 = vcombine.low %v859_v14, %v863_v15  ;;  %v922_v12 = vld [vmem:[%s14664_s13 + $0xb50] sm:$0xff] }
 0x35b   : > { %v12356_v27 = vcombine.high %v867_v22, %v871_v23  ;;  %v926_v13 = vld [vmem:[%s14664_s13 + $0xb70] sm:$0xff]  ;;  %v923_v14 = vld [vmem:[%s14664_s13 + $0xb58] sm:$0xff] }
 0x35c   : > { %v927_v15 = vld [vmem:[%s14664_s13 + $0xb78] sm:$0xff] }
 0x35d   : > { %6680 = vmatpush1.bf16.msra.mxu0 %v12289_v30  ;;  %6981 = vmatpush1.bf16.msra.mxu1 %v12291_v31  ;;  %v875_v30 = vld [vmem:[%s14664_s13 + $0x9d8] sm:$0xff] }
 0x35e   : > { %6681 = vmatprep.subr.bf16.mxu0 %v12298_v32  ;;  %6982 = vmatprep.subr.bf16.mxu1 %v12300_v33  ;;  %v879_v31 = vld [vmem:[%s14664_s13 + $0x9f8] sm:$0xff]  ;;  %v12353_v32 = vcombine.low %v866_v20, %v870_v21  ;;  %v12355_v33 = vcombine.low %v867_v22, %v871_v23  ;;  %v930_v20 = vld [vmem:[%s14664_s13 + $0xb90] sm:$0xff] }
 0x35f   : > { %v12364_v35 = vcombine.high %v875_v30, %v879_v31  ;;  %v934_v21 = vld [vmem:[%s14664_s13 + $0xbb0] sm:$0xff]  ;;  %v931_v22 = vld [vmem:[%s14664_s13 + $0xb98] sm:$0xff] }
 0x360   : > { %v935_v23 = vld [vmem:[%s14664_s13 + $0xbb8] sm:$0xff] }
 0x361   : > { %6682 = vmatpush1.bf16.msra.mxu0 %v12297_v38  ;;  %6983 = vmatpush1.bf16.msra.mxu1 %v12299_v39  ;;  %v883_v38 = vld [vmem:[%s14664_s13 + $0xa18] sm:$0xff] }
 0x362   : > { %6694 = vmatprep.subr.bf16.mxu0 %v12306_v40  ;;  %6995 = vmatprep.subr.bf16.mxu1 %v12308_v41  ;;  %v887_v39 = vld [vmem:[%s14664_s13 + $0xa38] sm:$0xff]  ;;  %v12361_v40 = vcombine.low %v874_v28, %v878_v29  ;;  %v12363_v41 = vcombine.low %v875_v30, %v879_v31  ;;  %v938_v28 = vld [vmem:[%s14664_s13 + $0xbd0] sm:$0xff] }
 0x363   : > { %v12372_v43 = vcombine.high %v883_v38, %v887_v39  ;;  %v942_v29 = vld [vmem:[%s14664_s13 + $0xbf0] sm:$0xff]  ;;  %v939_v30 = vld [vmem:[%s14664_s13 + $0xbd8] sm:$0xff] }
 0x364   : > { %6684 = vmatmul.mubr.bf16.vlgmr.msra.gmra.mrb[4].mxu0 %v13931_v52  ;;  %6985 = vmatmul.mubr.bf16.vlgmr.msra.gmra.mrb[4].mxu1 %v13931_v52  ;;  %v898_v52 = vld [vmem:[%s14664_s13 + $0xa90] sm:$0xff]  ;;  %v943_v31 = vld [vmem:[%s14664_s13 + $0xbf8] sm:$0xff] }
 0x365   : > { %6695 = vmatpush1.bf16.msra.mxu0 %v12305_v46  ;;  %6996 = vmatpush1.bf16.msra.mxu1 %v12307_v47  ;;  %v891_v46 = vld [vmem:[%s14664_s13 + $0xa58] sm:$0xff] }
 0x366   : > { %6696 = vmatprep.subr.bf16.mxu0 %v12314_v48  ;;  %6997 = vmatprep.subr.bf16.mxu1 %v12316_v49  ;;  %v895_v47 = vld [vmem:[%s14664_s13 + $0xa78] sm:$0xff]  ;;  %v12369_v48 = vcombine.low %v882_v36, %v886_v37  ;;  %v12371_v49 = vcombine.low %v883_v38, %v887_v39  ;;  %v946_v36 = vld [vmem:[%s14664_s13 + $0xc10] sm:$0xff] }
 0x367   : > { %6726 = vmatprep.mubr.bf16.mxu0 %v13932_v61  ;;  %7027 = vmatprep.mubr.bf16.mxu1 %v13932_v61  ;;  %v12380_v51 = vcombine.high %v891_v46, %v895_v47  ;;  %v910_v61 = vld [vmem:[%s14664_s13 + $0xaf0] sm:$0xff]  ;;  %v947_v38 = vld [vmem:[%s14664_s13 + $0xc18] sm:$0xff] }
 0x368   : > { %v950_v37 = vld [vmem:[%s14664_s13 + $0xc30] sm:$0xff]  ;;  %v951_v39 = vld [vmem:[%s14664_s13 + $0xc38] sm:$0xff] }
 0x369   : > { %6697 = vmatpush1.bf16.msra.mxu0 %v12313_v55  ;;  %6998 = vmatpush1.bf16.msra.mxu1 %v12315_v56  ;;  %v903_v55 = vld [vmem:[%s14664_s13 + $0xab8] sm:$0xff]  ;;  %v12377_v56 = vcombine.low %v890_v44, %v894_v45  ;;  %v954_v44 = vld [vmem:[%s14664_s13 + $0xc50] sm:$0xff] }
 0x36a   : > { %6698 = vmatprep.subr.bf16.mxu0 %v12322_v57  ;;  %6999 = vmatprep.subr.bf16.mxu1 %v12324_v58  ;;  %v12379_v57 = vcombine.low %v891_v46, %v895_v47  ;;  %v12386_v58 = vcombine.high %v898_v52, %v902_v53  ;;  %v12388_v59 = vcombine.high %v899_v54, %v903_v55  ;;  %v958_v45 = vld [vmem:[%s14664_s13 + $0xc70] sm:$0xff]  ;;  %v955_v46 = vld [vmem:[%s14664_s13 + $0xc58] sm:$0xff] }
 0x36b   : > { %v959_v47 = vld [vmem:[%s14664_s13 + $0xc78] sm:$0xff] }
 0x36d   : > { %6699 = vmatpush1.bf16.msra.mxu0 %v12321_v0  ;;  %7000 = vmatpush1.bf16.msra.mxu1 %v12323_v1  ;;  %v12385_v0 = vcombine.low %v898_v52, %v902_v53  ;;  %v12387_v1 = vcombine.low %v899_v54, %v903_v55  ;;  %v962_v52 = vld [vmem:[%s14664_s13 + $0xc90] sm:$0xff]  ;;  %v963_v55 = vld [vmem:[%s14664_s13 + $0xc98] sm:$0xff] }
 0x36e   : > { %6700 = vmatprep.subr.bf16.mxu0 %v12330_v2  ;;  %7001 = vmatprep.subr.bf16.mxu1 %v12332_v3  ;;  %v12394_v2 = vcombine.high %v906_v60, %v910_v61  ;;  %v12396_v3 = vcombine.high %v907_v62, %v911_v63  ;;  %v966_v53 = vld [vmem:[%s14664_s13 + $0xcb0] sm:$0xff] }
 0x36f   : > { %v13933_v54 = vld [vmem:[%s14656_s3 + $0x10] ss:$56 sps:$4 sm:$0xff]  }
 0x371   : > { %6701 = vmatpush1.bf16.msra.mxu0 %v12329_v8  ;;  %7002 = vmatpush1.bf16.msra.mxu1 %v12331_v9  ;;  %v12393_v8 = vcombine.low %v906_v60, %v910_v61  ;;  %v12395_v9 = vcombine.low %v907_v62, %v911_v63  ;;  %v970_v61 = vld [vmem:[%s14664_s13 + $0xcd0] sm:$0xff] }
 0x372   : > { %6702 = vmatprep.subr.bf16.mxu0 %v12338_v10  ;;  %7003 = vmatprep.subr.bf16.mxu1 %v12340_v11  ;;  %v12402_v10 = vcombine.high %v914_v4, %v918_v5  ;;  %v12404_v11 = vcombine.high %v915_v6, %v919_v7  ;;  %v974_v62 = vld [vmem:[%s14664_s13 + $0xcf0] sm:$0xff] }
 0x373   : > { %v13934_v63 = vld [vmem:[%s14656_s3 + $0x1c] ss:$56 sps:$4 sm:$0xff]  }
 0x375   : > { %6703 = vmatpush1.bf16.msra.mxu0 %v12337_v16  ;;  %7004 = vmatpush1.bf16.msra.mxu1 %v12339_v17  ;;  %v12401_v16 = vcombine.low %v914_v4, %v918_v5  ;;  %v12403_v17 = vcombine.low %v915_v6, %v919_v7  ;;  %v12458_v4 = vcombine.high %v970_v61, %v974_v62  ;;  %v978_v6 = vld [vmem:[%s14664_s13 + $0xd10] sm:$0xff] }
 0x376   : > { %6704 = vmatprep.subr.bf16.mxu0 %v12346_v18  ;;  %7005 = vmatprep.subr.bf16.mxu1 %v12348_v19  ;;  %v12410_v18 = vcombine.high %v922_v12, %v926_v13  ;;  %v12412_v19 = vcombine.high %v923_v14, %v927_v15  ;;  %v982_v7 = vld [vmem:[%s14664_s13 + $0xd30] sm:$0xff] }
 0x379   : > { %6705 = vmatpush1.bf16.msra.mxu0 %v12345_v24  ;;  %7006 = vmatpush1.bf16.msra.mxu1 %v12347_v25  ;;  %v12409_v24 = vcombine.low %v922_v12, %v926_v13  ;;  %v12411_v25 = vcombine.low %v923_v14, %v927_v15  ;;  %v12466_v12 = vcombine.high %v978_v6, %v982_v7  ;;  %v986_v14 = vld [vmem:[%s14664_s13 + $0xd50] sm:$0xff] }
 0x37a   : > { %6706 = vmatprep.subr.bf16.mxu0 %v12354_v26  ;;  %7007 = vmatprep.subr.bf16.mxu1 %v12356_v27  ;;  %v12418_v26 = vcombine.high %v930_v20, %v934_v21  ;;  %v12420_v27 = vcombine.high %v931_v22, %v935_v23  ;;  %v990_v15 = vld [vmem:[%s14664_s13 + $0xd70] sm:$0xff] }
 0x37d   : > { %6707 = vmatpush1.bf16.msra.mxu0 %v12353_v32  ;;  %7008 = vmatpush1.bf16.msra.mxu1 %v12355_v33  ;;  %v12417_v32 = vcombine.low %v930_v20, %v934_v21  ;;  %v12419_v33 = vcombine.low %v931_v22, %v935_v23  ;;  %v12474_v20 = vcombine.high %v986_v14, %v990_v15  ;;  %v994_v22 = vld [vmem:[%s14664_s13 + $0xd90] sm:$0xff] }
 0x37e   : > { %6708 = vmatprep.subr.bf16.mxu0 %v12362_v34  ;;  %7009 = vmatprep.subr.bf16.mxu1 %v12364_v35  ;;  %v12426_v34 = vcombine.high %v938_v28, %v942_v29  ;;  %v12428_v35 = vcombine.high %v939_v30, %v943_v31  ;;  %v998_v23 = vld [vmem:[%s14664_s13 + $0xdb0] sm:$0xff] }
 0x381   : > { %6709 = vmatpush1.bf16.msra.mxu0 %v12361_v40  ;;  %7010 = vmatpush1.bf16.msra.mxu1 %v12363_v41  ;;  %v12425_v40 = vcombine.low %v938_v28, %v942_v29  ;;  %v12427_v41 = vcombine.low %v939_v30, %v943_v31  ;;  %v12473_v28 = vcombine.low %v986_v14, %v990_v15  ;;  %v531_v29 = vld [vmem:[#allocation2 + $0x8] sm:$0xff]  ;;  %v533_v30 = vld [vmem:[#allocation2 + $0x18] sm:$0xff]  ;;  %v1026_v14 = vld [vmem:[%s14664_s13 + $0xe90] sm:$0xff] }
 0x382   : > { %6710 = vmatprep.subr.bf16.mxu0 %v12370_v42  ;;  %7011 = vmatprep.subr.bf16.mxu1 %v12372_v43  ;;  %v12434_v42 = vcombine.high %v946_v36, %v950_v37  ;;  %v12436_v43 = vcombine.high %v947_v38, %v951_v39  ;;  %v1030_v15 = vld [vmem:[%s14664_s13 + $0xeb0] sm:$0xff] }
 0x385   : > { %6711 = vmatpush1.bf16.msra.mxu0 %v12369_v48  ;;  %7012 = vmatpush1.bf16.msra.mxu1 %v12371_v49  ;;  %v12433_v48 = vcombine.low %v946_v36, %v950_v37  ;;  %v12435_v49 = vcombine.low %v947_v38, %v951_v39  ;;  %v1002_v37 = vld [vmem:[%s14664_s13 + $0xdd0] sm:$0xff] }
 0x386   : > { %6712 = vmatprep.subr.bf16.mxu0 %v12378_v50  ;;  %7013 = vmatprep.subr.bf16.mxu1 %v12380_v51  ;;  %v12442_v50 = vcombine.high %v954_v44, %v958_v45  ;;  %v12444_v51 = vcombine.high %v955_v46, %v959_v47  ;;  %v1006_v38 = vld [vmem:[%s14664_s13 + $0xdf0] sm:$0xff] }
 0x389   : > { %6713 = vmatpush1.bf16.msra.mxu0 %v12377_v56  ;;  %7014 = vmatpush1.bf16.msra.mxu1 %v12379_v57  ;;  %v967_v56 = vld [vmem:[%s14664_s13 + $0xcb8] sm:$0xff]  ;;  %v12441_v57 = vcombine.low %v954_v44, %v958_v45 }
 0x38a   : > { %6714 = vmatprep.subr.bf16.mxu0 %v12386_v58  ;;  %7015 = vmatprep.subr.bf16.mxu1 %v12388_v59  ;;  %v12443_v58 = vcombine.low %v955_v46, %v959_v47  ;;  %v12450_v59 = vcombine.high %v962_v52, %v966_v53  ;;  %v12452_v60 = vcombine.high %v963_v55, %v967_v56  ;;  %v1007_v44 = vld [vmem:[%s14664_s13 + $0xdf8] sm:$0xff] }
 0x38d   : > { %6715 = vmatpush1.bf16.msra.mxu0 %v12385_v0  ;;  %7016 = vmatpush1.bf16.msra.mxu1 %v12387_v1  ;;  %v971_v0 = vld [vmem:[%s14664_s13 + $0xcd8] sm:$0xff] }
 0x38e   : > { %6716 = vmatprep.subr.bf16.mxu0 %v12394_v2  ;;  %7017 = vmatprep.subr.bf16.mxu1 %v12396_v3  ;;  %v975_v1 = vld [vmem:[%s14664_s13 + $0xcf8] sm:$0xff]  ;;  %v12449_v2 = vcombine.low %v962_v52, %v966_v53  ;;  %v12451_v3 = vcombine.low %v963_v55, %v967_v56  ;;  %v12490_v56 = vcombine.high %v1002_v37, %v1006_v38 }
 0x38f   : > { %v12460_v5 = vcombine.high %v971_v0, %v975_v1 }
 0x391   : > { %6717 = vmatpush1.bf16.msra.mxu0 %v12393_v8  ;;  %7018 = vmatpush1.bf16.msra.mxu1 %v12395_v9  ;;  %v979_v8 = vld [vmem:[%s14664_s13 + $0xd18] sm:$0xff] }
 0x392   : > { %6718 = vmatprep.subr.bf16.mxu0 %v12402_v10  ;;  %7019 = vmatprep.subr.bf16.mxu1 %v12404_v11  ;;  %v983_v9 = vld [vmem:[%s14664_s13 + $0xd38] sm:$0xff]  ;;  %v12457_v10 = vcombine.low %v970_v61, %v974_v62  ;;  %v12459_v11 = vcombine.low %v971_v0, %v975_v1  ;;  %v1010_v61 = vld [vmem:[%s14664_s13 + $0xe10] sm:$0xff] }
 0x393   : > { %v12468_v13 = vcombine.high %v979_v8, %v983_v9  ;;  %v1014_v62 = vld [vmem:[%s14664_s13 + $0xe30] sm:$0xff]  ;;  %v1011_v0 = vld [vmem:[%s14664_s13 + $0xe18] sm:$0xff] }
 0x394   : > { %v1015_v1 = vld [vmem:[%s14664_s13 + $0xe38] sm:$0xff] }
 0x395   : > { %6719 = vmatpush1.bf16.msra.mxu0 %v12401_v16  ;;  %7020 = vmatpush1.bf16.msra.mxu1 %v12403_v17  ;;  %v987_v16 = vld [vmem:[%s14664_s13 + $0xd58] sm:$0xff] }
 0x396   : > { %6720 = vmatprep.subr.bf16.mxu0 %v12410_v18  ;;  %7021 = vmatprep.subr.bf16.mxu1 %v12412_v19  ;;  %v991_v17 = vld [vmem:[%s14664_s13 + $0xd78] sm:$0xff]  ;;  %v12465_v18 = vcombine.low %v978_v6, %v982_v7  ;;  %v12467_v19 = vcombine.low %v979_v8, %v983_v9  ;;  %v1018_v6 = vld [vmem:[%s14664_s13 + $0xe50] sm:$0xff] }
 0x397   : > { %v12476_v21 = vcombine.high %v987_v16, %v991_v17  ;;  %v12475_v31 = vcombine.low %v987_v16, %v991_v17  ;;  %v1022_v7 = vld [vmem:[%s14664_s13 + $0xe70] sm:$0xff]  ;;  %v1019_v8 = vld [vmem:[%s14664_s13 + $0xe58] sm:$0xff] }
 0x398   : > { %v1023_v9 = vld [vmem:[%s14664_s13 + $0xe78] sm:$0xff] }
 0x399   : > { %6721 = vmatpush1.bf16.msra.mxu0 %v12409_v24  ;;  %7022 = vmatpush1.bf16.msra.mxu1 %v12411_v25  ;;  %v995_v24 = vld [vmem:[%s14664_s13 + $0xd98] sm:$0xff] }
 0x39a   : > { %6722 = vmatprep.subr.bf16.mxu0 %v12418_v26  ;;  %7023 = vmatprep.subr.bf16.mxu1 %v12420_v27  ;;  %v999_v25 = vld [vmem:[%s14664_s13 + $0xdb8] sm:$0xff]  ;;  %v530_v26 = vld [vmem:[#allocation2] sm:$0xff]  ;;  %v532_v27 = vld [vmem:[#allocation2 + $0x10] sm:$0xff] }
 0x39b   : > { %v12484_v36 = vcombine.high %v995_v24, %v999_v25  ;;  %v1027_v16 = vld [vmem:[%s14664_s13 + $0xe98] sm:$0xff] }
 0x39c   : > { %v1031_v17 = vld [vmem:[%s14664_s13 + $0xeb8] sm:$0xff] }
 0x39d   : > { %6723 = vmatpush1.bf16.msra.mxu0 %v12417_v32  ;;  %7024 = vmatpush1.bf16.msra.mxu1 %v12419_v33  ;;  %v538_v32 = vld [vmem:[#allocation2 + $0x40] sm:$0xff]  ;;  %v12482_v33 = vcombine.high %v994_v22, %v998_v23 }
 0x39e   : > { %6724 = vmatprep.subr.bf16.mxu0 %v12426_v34  ;;  %7025 = vmatprep.subr.bf16.mxu1 %v12428_v35  ;;  %v540_v35 = vld [vmem:[#allocation2 + $0x50] sm:$0xff] }
 0x3a1   : > { %6725 = vmatpush1.bf16.msra.mxu0 %v12425_v40  ;;  %7026 = vmatpush1.bf16.msra.mxu1 %v12427_v41 }
 0x3a2   : > { %6737 = vmatprep.subr.bf16.mxu0 %v12434_v42  ;;  %7038 = vmatprep.subr.bf16.mxu1 %v12436_v43  ;;  %v539_v42 = vld [vmem:[#allocation2 + $0x48] sm:$0xff]  ;;  %v1003_v43 = vld [vmem:[%s14664_s13 + $0xdd8] sm:$0xff] }
 0x3a4   : > { %6727 = vmatmul.mubr.bf16.vlgmr.msra.gmra.mrb[4].mxu0 %v13933_v54  ;;  %7028 = vmatmul.mubr.bf16.vlgmr.msra.gmra.mrb[4].mxu1 %v13933_v54 }
 0x3a5   : > { %6738 = vmatpush1.bf16.msra.mxu0 %v12433_v48  ;;  %7039 = vmatpush1.bf16.msra.mxu1 %v12435_v49  ;;  %v541_v49 = vld [vmem:[#allocation2 + $0x58] sm:$0xff] }
 0x3a6   : > { %6739 = vmatprep.subr.bf16.mxu0 %v12442_v50  ;;  %7040 = vmatprep.subr.bf16.mxu1 %v12444_v51  ;;  %v12481_v50 = vcombine.low %v994_v22, %v998_v23  ;;  %v12483_v51 = vcombine.low %v995_v24, %v999_v25  ;;  %v1034_v22 = vld [vmem:[%s14664_s13 + $0xed0] sm:$0xff]  ;;  %v1035_v24 = vld [vmem:[%s14664_s13 + $0xed8] sm:$0xff] }
 0x3a7   : > { %6769 = vmatprep.mubr.bf16.mxu0 %v13934_v63  ;;  %7070 = vmatprep.mubr.bf16.mxu1 %v13934_v63  ;;  %v1038_v23 = vld [vmem:[%s14664_s13 + $0xef0] sm:$0xff]  ;;  %v1039_v25 = vld [vmem:[%s14664_s13 + $0xef8] sm:$0xff] }
 0x3a9   : > { %6740 = vmatpush1.bf16.msra.mxu0 %v12441_v57  ;;  %7041 = vmatpush1.bf16.msra.mxu1 %v12443_v58 }
 0x3aa   : > { %6741 = vmatprep.subr.bf16.mxu0 %v12450_v59  ;;  %7042 = vmatprep.subr.bf16.mxu1 %v12452_v60  ;;  %v12492_v60 = vcombine.high %v1003_v43, %v1007_v44 }
 0x3ad   : > { %6742 = vmatpush1.bf16.msra.mxu0 %v12449_v2  ;;  %7043 = vmatpush1.bf16.msra.mxu1 %v12451_v3  ;;  %v12489_v2 = vcombine.low %v1002_v37, %v1006_v38  ;;  %v12491_v3 = vcombine.low %v1003_v43, %v1007_v44  ;;  %v1050_v38 = vld [vmem:[%s14664_s13 + $0xf50] sm:$0xff] }
 0x3ae   : > { %6743 = vmatprep.subr.bf16.mxu0 %v12458_v4  ;;  %7044 = vmatprep.subr.bf16.mxu1 %v12460_v5  ;;  %v12498_v4 = vcombine.high %v1010_v61, %v1014_v62  ;;  %v12500_v5 = vcombine.high %v1011_v0, %v1015_v1 }
 0x3b1   : > { %6744 = vmatpush1.bf16.msra.mxu0 %v12457_v10  ;;  %7045 = vmatpush1.bf16.msra.mxu1 %v12459_v11  ;;  %v12497_v10 = vcombine.low %v1010_v61, %v1014_v62  ;;  %v12499_v11 = vcombine.low %v1011_v0, %v1015_v1  ;;  %v1074_v62 = vld [vmem:[%s14664_s13 + $0x1010] sm:$0xff]  ;;  %v1075_v0 = vld [vmem:[%s14664_s13 + $0x1018] sm:$0xff] }
 0x3b2   : > { %6745 = vmatprep.subr.bf16.mxu0 %v12466_v12  ;;  %7046 = vmatprep.subr.bf16.mxu1 %v12468_v13  ;;  %v12506_v12 = vcombine.high %v1018_v6, %v1022_v7  ;;  %v12508_v13 = vcombine.high %v1019_v8, %v1023_v9  ;;  %v1079_v1 = vld [vmem:[%s14664_s13 + $0x1038] sm:$0xff] }
 0x3b5   : > { %6746 = vmatpush1.bf16.msra.mxu0 %v12465_v18  ;;  %7047 = vmatpush1.bf16.msra.mxu1 %v12467_v19  ;;  %v12505_v18 = vcombine.low %v1018_v6, %v1022_v7  ;;  %v12507_v19 = vcombine.low %v1019_v8, %v1023_v9  ;;  %v1082_v6 = vld [vmem:[%s14664_s13 + $0x1050] sm:$0xff]  ;;  %v1083_v8 = vld [vmem:[%s14664_s13 + $0x1058] sm:$0xff] }
 0x3b6   : > { %6747 = vmatprep.subr.bf16.mxu0 %v12474_v20  ;;  %7048 = vmatprep.subr.bf16.mxu1 %v12476_v21  ;;  %v12514_v20 = vcombine.high %v1026_v14, %v1030_v15  ;;  %v12516_v21 = vcombine.high %v1027_v16, %v1031_v17  ;;  %v1086_v7 = vld [vmem:[%s14664_s13 + $0x1070] sm:$0xff]  ;;  %v1087_v9 = vld [vmem:[%s14664_s13 + $0x1078] sm:$0xff] }
 0x3b7   : > { %v6298_v34 = vpop.f32.mrb[0].mxu0  ;;  %v6599_v40 = vpop.f32.mrb[0].mxu1 }
 0x3b8   : > { %v7210_v39 = vadd.f32 %v6298_v34, %v530_v26  ;;  %v6300_v41 = vpop.f32.mrb[1].mxu0  ;;  %v7212_v45 = vadd.f32 %v6599_v40, %v532_v27  ;;  %v6601_v47 = vpop.f32.mrb[1].mxu1  ;;  %v12513_v26 = vcombine.low %v1026_v14, %v1030_v15  ;;  %v12515_v27 = vcombine.low %v1027_v16, %v1031_v17  ;;  %v1051_v40 = vld [vmem:[%s14664_s13 + $0xf58] sm:$0xff]  ;;  %v1090_v14 = vld [vmem:[%s14664_s13 + $0x1090] sm:$0xff] }
 0x3b9   : > { %v7211_v46 = vadd.f32 %v6300_v41, %v531_v29  ;;  %v6302_v48 = vpop.f32.mrb[2].mxu0  ;;  %6748 = vmatpush1.bf16.msra.mxu0 %v12473_v28  ;;  %v7213_v52 = vadd.f32 %v6601_v47, %v533_v30  ;;  %v6603_v54 = vpop.f32.mrb[2].mxu1  ;;  %7049 = vmatpush1.bf16.msra.mxu1 %v12475_v31  ;;  %v12522_v28 = vcombine.high %v1034_v22, %v1038_v23  ;;  %v1042_v30 = vld [vmem:[%s14664_s13 + $0xf10] sm:$0xff]  ;;  %v1055_v41 = vld [vmem:[%s14664_s13 + $0xf78] sm:$0xff] }
 0x3ba   : > { %7226 = vst [vmem:[#allocation2] sm:$0xff] %v7210_v39  ;;  %v7218_v53 = vadd.f32 %v6302_v48, %v538_v32  ;;  %v6304_v55 = vpop.f32.mrb[3].mxu0  ;;  %6749 = vmatprep.subr.bf16.mxu0 %v12482_v33  ;;  %7228 = vst [vmem:[#allocation2 + $0x10] sm:$0xff] %v7212_v45  ;;  %v7220_v57 = vadd.f32 %v6603_v54, %v540_v35  ;;  %v6605_v59 = vpop.f32.mrb[3].mxu1  ;;  %7050 = vmatprep.subr.bf16.mxu1 %v12484_v36  ;;  %v1046_v31 = vld [vmem:[%s14664_s13 + $0xf30] sm:$0xff]  ;;  %v1043_v32 = vld [vmem:[%s14664_s13 + $0xf18] sm:$0xff] }
 0x3bb   : > { %7227 = vst [vmem:[#allocation2 + $0x8] sm:$0xff] %v7211_v46  ;;  %v7219_v58 = vadd.f32 %v6304_v55, %v539_v42  ;;  %7229 = vst [vmem:[#allocation2 + $0x18] sm:$0xff] %v7213_v52  ;;  %v7221_v63 = vadd.f32 %v6605_v59, %v541_v49  ;;  %v12524_v29 = vcombine.high %v1035_v24, %v1039_v25  ;;  %v1047_v33 = vld [vmem:[%s14664_s13 + $0xf38] sm:$0xff]  ;;  %v1054_v39 = vld [vmem:[%s14664_s13 + $0xf70] sm:$0xff] }
 0x3bc   : > { %7234 = vst [vmem:[#allocation2 + $0x40] sm:$0xff] %v7218_v53  ;;  %7236 = vst [vmem:[#allocation2 + $0x50] sm:$0xff] %v7220_v57  ;;  %v12521_v34 = vcombine.low %v1034_v22, %v1038_v23  ;;  %v12523_v35 = vcombine.low %v1035_v24, %v1039_v25  ;;  %v12530_v36 = vcombine.high %v1042_v30, %v1046_v31  ;;  %v1058_v46 = vld [vmem:[%s14664_s13 + $0xf90] sm:$0xff]  ;;  %v1059_v48 = vld [vmem:[%s14664_s13 + $0xf98] sm:$0xff] }
 0x3bd   : > { %7235 = vst [vmem:[#allocation2 + $0x48] sm:$0xff] %v7219_v58  ;;  %6750 = vmatpush1.bf16.msra.mxu0 %v12481_v50  ;;  %7237 = vst [vmem:[#allocation2 + $0x58] sm:$0xff] %v7221_v63  ;;  %7051 = vmatpush1.bf16.msra.mxu1 %v12483_v51  ;;  %v12532_v37 = vcombine.high %v1043_v32, %v1047_v33  ;;  %v12529_v42 = vcombine.low %v1042_v30, %v1046_v31  ;;  %v1062_v47 = vld [vmem:[%s14664_s13 + $0xfb0] sm:$0xff]  ;;  %v1063_v49 = vld [vmem:[%s14664_s13 + $0xfb8] sm:$0xff] }
 0x3be   : > { %6751 = vmatprep.subr.bf16.mxu0 %v12490_v56  ;;  %7052 = vmatprep.subr.bf16.mxu1 %v12492_v60  ;;  %v12531_v43 = vcombine.low %v1043_v32, %v1047_v33  ;;  %v12538_v44 = vcombine.high %v1050_v38, %v1054_v39  ;;  %v12540_v45 = vcombine.high %v1051_v40, %v1055_v41  ;;  %v1066_v54 = vld [vmem:[%s14664_s13 + $0xfd0] sm:$0xff]  ;;  %v1067_v56 = vld [vmem:[%s14664_s13 + $0xfd8] sm:$0xff] }
 0x3bf   : > { %v12537_v50 = vcombine.low %v1050_v38, %v1054_v39  ;;  %v12539_v51 = vcombine.low %v1051_v40, %v1055_v41  ;;  %v12546_v52 = vcombine.high %v1058_v46, %v1062_v47  ;;  %v12548_v53 = vcombine.high %v1059_v48, %v1063_v49  ;;  %v1070_v55 = vld [vmem:[%s14664_s13 + $0xff0] sm:$0xff]  ;;  %v1071_v57 = vld [vmem:[%s14664_s13 + $0xff8] sm:$0xff] }
 0x3c0   : > { %v12545_v58 = vcombine.low %v1058_v46, %v1062_v47  ;;  %v12547_v59 = vcombine.low %v1059_v48, %v1063_v49  ;;  %v12554_v60 = vcombine.high %v1066_v54, %v1070_v55  ;;  %v12556_v61 = vcombine.high %v1067_v56, %v1071_v57  ;;  %v1078_v63 = vld [vmem:[%s14664_s13 + $0x1030] sm:$0xff]  ;;  %v1091_v17 = vld [vmem:[%s14664_s13 + $0x1098] sm:$0xff] }
 0x3c1   : > { %6752 = vmatpush1.bf16.msra.mxu0 %v12489_v2  ;;  %7053 = vmatpush1.bf16.msra.mxu1 %v12491_v3  ;;  %v12553_v2 = vcombine.low %v1066_v54, %v1070_v55  ;;  %v12555_v3 = vcombine.low %v1067_v56, %v1071_v57  ;;  %v1094_v15 = vld [vmem:[%s14664_s13 + $0x10b0] sm:$0xff] }
 0x3c2   : > { %6753 = vmatprep.subr.bf16.mxu0 %v12498_v4  ;;  %7054 = vmatprep.subr.bf16.mxu1 %v12500_v5  ;;  %v12562_v4 = vcombine.high %v1074_v62, %v1078_v63  ;;  %v12564_v5 = vcombine.high %v1075_v0, %v1079_v1  ;;  %v13935_v16 = vld [vmem:[%s14656_s3 + $0x18] ss:$56 sps:$4 sm:$0xff]   ;;  %v13936_v25 = vld [vmem:[%s14656_s3 + $0x24] ss:$56 sps:$4 sm:$0xff]  }
 0x3c3   : > { %v1098_v23 = vld [vmem:[%s14664_s13 + $0x10d0] sm:$0xff] }
 0x3c4   : > { %v1102_v24 = vld [vmem:[%s14664_s13 + $0x10f0] sm:$0xff] }
 0x3c5   : > { %6754 = vmatpush1.bf16.msra.mxu0 %v12497_v10  ;;  %7055 = vmatpush1.bf16.msra.mxu1 %v12499_v11  ;;  %v12561_v10 = vcombine.low %v1074_v62, %v1078_v63  ;;  %v12563_v11 = vcombine.low %v1075_v0, %v1079_v1  ;;  %v12586_v30 = vcombine.high %v1098_v23, %v1102_v24  ;;  %v1106_v32 = vld [vmem:[%s14664_s13 + $0x1110] sm:$0xff] }
 0x3c6   : > { %6755 = vmatprep.subr.bf16.mxu0 %v12506_v12  ;;  %7056 = vmatprep.subr.bf16.mxu1 %v12508_v13  ;;  %v12570_v12 = vcombine.high %v1082_v6, %v1086_v7  ;;  %v12572_v13 = vcombine.high %v1083_v8, %v1087_v9  ;;  %v1110_v33 = vld [vmem:[%s14664_s13 + $0x1130] sm:$0xff] }
 0x3c7   : > { %v12594_v38 = vcombine.high %v1106_v32, %v1110_v33  ;;  %v1114_v40 = vld [vmem:[%s14664_s13 + $0x1150] sm:$0xff] }
 0x3c8   : > { %v1118_v41 = vld [vmem:[%s14664_s13 + $0x1170] sm:$0xff] }
 0x3c9   : > { %6756 = vmatpush1.bf16.msra.mxu0 %v12505_v18  ;;  %7057 = vmatpush1.bf16.msra.mxu1 %v12507_v19  ;;  %v1095_v18 = vld [vmem:[%s14664_s13 + $0x10b8] sm:$0xff]  ;;  %v12569_v19 = vcombine.low %v1082_v6, %v1086_v7  ;;  %v12602_v46 = vcombine.high %v1114_v40, %v1118_v41  ;;  %v1122_v48 = vld [vmem:[%s14664_s13 + $0x1190] sm:$0xff] }
 0x3ca   : > { %6757 = vmatprep.subr.bf16.mxu0 %v12514_v20  ;;  %7058 = vmatprep.subr.bf16.mxu1 %v12516_v21  ;;  %v12571_v20 = vcombine.low %v1083_v8, %v1087_v9  ;;  %v12578_v21 = vcombine.high %v1090_v14, %v1094_v15  ;;  %v12580_v22 = vcombine.high %v1091_v17, %v1095_v18  ;;  %v1126_v49 = vld [vmem:[%s14664_s13 + $0x11b0] sm:$0xff] }
 0x3cb   : > { %v12610_v54 = vcombine.high %v1122_v48, %v1126_v49  ;;  %v1130_v56 = vld [vmem:[%s14664_s13 + $0x11d0] sm:$0xff] }
 0x3cc   : > { %v1134_v57 = vld [vmem:[%s14664_s13 + $0x11f0] sm:$0xff] }
 0x3cd   : > { %6758 = vmatpush1.bf16.msra.mxu0 %v12513_v26  ;;  %7059 = vmatpush1.bf16.msra.mxu1 %v12515_v27  ;;  %v1099_v26 = vld [vmem:[%s14664_s13 + $0x10d8] sm:$0xff]  ;;  %v12618_v62 = vcombine.high %v1130_v56, %v1134_v57  ;;  %v1138_v0 = vld [vmem:[%s14664_s13 + $0x1210] sm:$0xff] }
 0x3ce   : > { %6759 = vmatprep.subr.bf16.mxu0 %v12522_v28  ;;  %7060 = vmatprep.subr.bf16.mxu1 %v12524_v29  ;;  %v1103_v27 = vld [vmem:[%s14664_s13 + $0x10f8] sm:$0xff]  ;;  %v12577_v28 = vcombine.low %v1090_v14, %v1094_v15  ;;  %v12579_v29 = vcombine.low %v1091_v17, %v1095_v18  ;;  %v1142_v1 = vld [vmem:[%s14664_s13 + $0x1230] sm:$0xff] }
 0x3cf   : > { %v12588_v31 = vcombine.high %v1099_v26, %v1103_v27  ;;  %v12626_v6 = vcombine.high %v1138_v0, %v1142_v1  ;;  %v1146_v8 = vld [vmem:[%s14664_s13 + $0x1250] sm:$0xff]  ;;  %v1155_v18 = vld [vmem:[%s14664_s13 + $0x1298] sm:$0xff] }
 0x3d0   : > { %v1150_v9 = vld [vmem:[%s14664_s13 + $0x1270] sm:$0xff] }
 0x3d1   : > { %6760 = vmatpush1.bf16.msra.mxu0 %v12521_v34  ;;  %7061 = vmatpush1.bf16.msra.mxu1 %v12523_v35  ;;  %v1107_v34 = vld [vmem:[%s14664_s13 + $0x1118] sm:$0xff]  ;;  %v12634_v14 = vcombine.high %v1146_v8, %v1150_v9  ;;  %v1158_v17 = vld [vmem:[%s14664_s13 + $0x12b0] sm:$0xff] }
 0x3d2   : > { %6761 = vmatprep.subr.bf16.mxu0 %v12530_v36  ;;  %7062 = vmatprep.subr.bf16.mxu1 %v12532_v37  ;;  %v1111_v35 = vld [vmem:[%s14664_s13 + $0x1138] sm:$0xff]  ;;  %v12585_v36 = vcombine.low %v1098_v23, %v1102_v24  ;;  %v12587_v37 = vcombine.low %v1099_v26, %v1103_v27  ;;  %v1162_v24 = vld [vmem:[%s14664_s13 + $0x12d0] sm:$0xff] }
 0x3d3   : > { %v12596_v39 = vcombine.high %v1107_v34, %v1111_v35  ;;  %v1163_v26 = vld [vmem:[%s14664_s13 + $0x12d8] sm:$0xff] }
 0x3d4   : > { %v1167_v27 = vld [vmem:[%s14664_s13 + $0x12f8] sm:$0xff] }
 0x3d5   : > { %6762 = vmatpush1.bf16.msra.mxu0 %v12529_v42  ;;  %7063 = vmatpush1.bf16.msra.mxu1 %v12531_v43  ;;  %v1115_v42 = vld [vmem:[%s14664_s13 + $0x1158] sm:$0xff] }
 0x3d6   : > { %6763 = vmatprep.subr.bf16.mxu0 %v12538_v44  ;;  %7064 = vmatprep.subr.bf16.mxu1 %v12540_v45  ;;  %v1119_v43 = vld [vmem:[%s14664_s13 + $0x1178] sm:$0xff]  ;;  %v12593_v44 = vcombine.low %v1106_v32, %v1110_v33  ;;  %v12595_v45 = vcombine.low %v1107_v34, %v1111_v35  ;;  %v1170_v32 = vld [vmem:[%s14664_s13 + $0x1310] sm:$0xff] }
 0x3d7   : > { %v12604_v47 = vcombine.high %v1115_v42, %v1119_v43  ;;  %v1174_v33 = vld [vmem:[%s14664_s13 + $0x1330] sm:$0xff]  ;;  %v1171_v34 = vld [vmem:[%s14664_s13 + $0x1318] sm:$0xff] }
 0x3d8   : > { %v1175_v35 = vld [vmem:[%s14664_s13 + $0x1338] sm:$0xff] }
 0x3d9   : > { %6764 = vmatpush1.bf16.msra.mxu0 %v12537_v50  ;;  %7065 = vmatpush1.bf16.msra.mxu1 %v12539_v51  ;;  %v1123_v50 = vld [vmem:[%s14664_s13 + $0x1198] sm:$0xff] }
 0x3da   : > { %6765 = vmatprep.subr.bf16.mxu0 %v12546_v52  ;;  %7066 = vmatprep.subr.bf16.mxu1 %v12548_v53  ;;  %v1127_v51 = vld [vmem:[%s14664_s13 + $0x11b8] sm:$0xff]  ;;  %v12601_v52 = vcombine.low %v1114_v40, %v1118_v41  ;;  %v12603_v53 = vcombine.low %v1115_v42, %v1119_v43  ;;  %v1178_v40 = vld [vmem:[%s14664_s13 + $0x1350] sm:$0xff] }
 0x3db   : > { %v12612_v55 = vcombine.high %v1123_v50, %v1127_v51  ;;  %v1182_v41 = vld [vmem:[%s14664_s13 + $0x1370] sm:$0xff]  ;;  %v1179_v42 = vld [vmem:[%s14664_s13 + $0x1358] sm:$0xff] }
 0x3dc   : > { %v1183_v43 = vld [vmem:[%s14664_s13 + $0x1378] sm:$0xff] }
 0x3dd   : > { %6766 = vmatpush1.bf16.msra.mxu0 %v12545_v58  ;;  %7067 = vmatpush1.bf16.msra.mxu1 %v12547_v59  ;;  %v1131_v58 = vld [vmem:[%s14664_s13 + $0x11d8] sm:$0xff] }
 0x3de   : > { %6767 = vmatprep.subr.bf16.mxu0 %v12554_v60  ;;  %7068 = vmatprep.subr.bf16.mxu1 %v12556_v61  ;;  %v1135_v59 = vld [vmem:[%s14664_s13 + $0x11f8] sm:$0xff]  ;;  %v12609_v60 = vcombine.low %v1122_v48, %v1126_v49  ;;  %v12611_v61 = vcombine.low %v1123_v50, %v1127_v51  ;;  %v1186_v48 = vld [vmem:[%s14664_s13 + $0x1390] sm:$0xff] }
 0x3df   : > { %v12620_v63 = vcombine.high %v1131_v58, %v1135_v59  ;;  %v1190_v49 = vld [vmem:[%s14664_s13 + $0x13b0] sm:$0xff]  ;;  %v1187_v50 = vld [vmem:[%s14664_s13 + $0x1398] sm:$0xff] }
 0x3e0   : > { %v1191_v51 = vld [vmem:[%s14664_s13 + $0x13b8] sm:$0xff] }
 0x3e1   : > { %6768 = vmatpush1.bf16.msra.mxu0 %v12553_v2  ;;  %7069 = vmatpush1.bf16.msra.mxu1 %v12555_v3  ;;  %v1139_v2 = vld [vmem:[%s14664_s13 + $0x1218] sm:$0xff] }
 0x3e2   : > { %6780 = vmatprep.subr.bf16.mxu0 %v12562_v4  ;;  %7081 = vmatprep.subr.bf16.mxu1 %v12564_v5  ;;  %v1143_v3 = vld [vmem:[%s14664_s13 + $0x1238] sm:$0xff]  ;;  %v12617_v4 = vcombine.low %v1130_v56, %v1134_v57  ;;  %v12619_v5 = vcombine.low %v1131_v58, %v1135_v59  ;;  %v1194_v56 = vld [vmem:[%s14664_s13 + $0x13d0] sm:$0xff] }
 0x3e3   : > { %v12628_v7 = vcombine.high %v1139_v2, %v1143_v3  ;;  %v1198_v57 = vld [vmem:[%s14664_s13 + $0x13f0] sm:$0xff]  ;;  %v1195_v58 = vld [vmem:[%s14664_s13 + $0x13d8] sm:$0xff] }
 0x3e4   : > { %6770 = vmatmul.mubr.bf16.vlgmr.msra.gmra.mrb[4].mxu0 %v13935_v16  ;;  %7071 = vmatmul.mubr.bf16.vlgmr.msra.gmra.mrb[4].mxu1 %v13935_v16  ;;  %v1154_v16 = vld [vmem:[%s14664_s13 + $0x1290] sm:$0xff]  ;;  %v1199_v59 = vld [vmem:[%s14664_s13 + $0x13f8] sm:$0xff] }
 0x3e5   : > { %6781 = vmatpush1.bf16.msra.mxu0 %v12561_v10  ;;  %7082 = vmatpush1.bf16.msra.mxu1 %v12563_v11  ;;  %v1147_v10 = vld [vmem:[%s14664_s13 + $0x1258] sm:$0xff] }
 0x3e6   : > { %6782 = vmatprep.subr.bf16.mxu0 %v12570_v12  ;;  %7083 = vmatprep.subr.bf16.mxu1 %v12572_v13  ;;  %v1151_v11 = vld [vmem:[%s14664_s13 + $0x1278] sm:$0xff]  ;;  %v12625_v12 = vcombine.low %v1138_v0, %v1142_v1  ;;  %v12627_v13 = vcombine.low %v1139_v2, %v1143_v3  ;;  %v1202_v0 = vld [vmem:[%s14664_s13 + $0x1410] sm:$0xff] }
 0x3e7   : > { %6812 = vmatprep.mubr.bf16.mxu0 %v13936_v25  ;;  %7113 = vmatprep.mubr.bf16.mxu1 %v13936_v25  ;;  %v12636_v15 = vcombine.high %v1147_v10, %v1151_v11  ;;  %v1166_v25 = vld [vmem:[%s14664_s13 + $0x12f0] sm:$0xff]  ;;  %v1203_v2 = vld [vmem:[%s14664_s13 + $0x1418] sm:$0xff] }
 0x3e8   : > { %v1206_v1 = vld [vmem:[%s14664_s13 + $0x1430] sm:$0xff]  ;;  %v1207_v3 = vld [vmem:[%s14664_s13 + $0x1438] sm:$0xff] }
 0x3e9   : > { %6783 = vmatpush1.bf16.msra.mxu0 %v12569_v19  ;;  %7084 = vmatpush1.bf16.msra.mxu1 %v12571_v20  ;;  %v1159_v19 = vld [vmem:[%s14664_s13 + $0x12b8] sm:$0xff]  ;;  %v12633_v20 = vcombine.low %v1146_v8, %v1150_v9  ;;  %v1210_v8 = vld [vmem:[%s14664_s13 + $0x1450] sm:$0xff] }
 0x3ea   : > { %6784 = vmatprep.subr.bf16.mxu0 %v12578_v21  ;;  %7085 = vmatprep.subr.bf16.mxu1 %v12580_v22  ;;  %v12635_v21 = vcombine.low %v1147_v10, %v1151_v11  ;;  %v12642_v22 = vcombine.high %v1154_v16, %v1158_v17  ;;  %v12644_v23 = vcombine.high %v1155_v18, %v1159_v19  ;;  %v1214_v9 = vld [vmem:[%s14664_s13 + $0x1470] sm:$0xff]  ;;  %v1211_v10 = vld [vmem:[%s14664_s13 + $0x1458] sm:$0xff] }
 0x3eb   : > { %v1215_v11 = vld [vmem:[%s14664_s13 + $0x1478] sm:$0xff] }
 0x3ed   : > { %6785 = vmatpush1.bf16.msra.mxu0 %v12577_v28  ;;  %7086 = vmatpush1.bf16.msra.mxu1 %v12579_v29  ;;  %v12641_v28 = vcombine.low %v1154_v16, %v1158_v17  ;;  %v12643_v29 = vcombine.low %v1155_v18, %v1159_v19  ;;  %v1218_v16 = vld [vmem:[%s14664_s13 + $0x1490] sm:$0xff]  ;;  %v1219_v19 = vld [vmem:[%s14664_s13 + $0x1498] sm:$0xff] }
 0x3ee   : > { %6786 = vmatprep.subr.bf16.mxu0 %v12586_v30  ;;  %7087 = vmatprep.subr.bf16.mxu1 %v12588_v31  ;;  %v12650_v30 = vcombine.high %v1162_v24, %v1166_v25  ;;  %v12652_v31 = vcombine.high %v1163_v26, %v1167_v27  ;;  %v1222_v17 = vld [vmem:[%s14664_s13 + $0x14b0] sm:$0xff] }
 0x3ef   : > { %v13937_v18 = vld [vmem:[%s14656_s3 + $0x20] ss:$56 sps:$4 sm:$0xff]  }
 0x3f1   : > { %6787 = vmatpush1.bf16.msra.mxu0 %v12585_v36  ;;  %7088 = vmatpush1.bf16.msra.mxu1 %v12587_v37  ;;  %v12649_v36 = vcombine.low %v1162_v24, %v1166_v25  ;;  %v12651_v37 = vcombine.low %v1163_v26, %v1167_v27  ;;  %v1226_v25 = vld [vmem:[%s14664_s13 + $0x14d0] sm:$0xff] }
 0x3f2   : > { %6788 = vmatprep.subr.bf16.mxu0 %v12594_v38  ;;  %7089 = vmatprep.subr.bf16.mxu1 %v12596_v39  ;;  %v12658_v38 = vcombine.high %v1170_v32, %v1174_v33  ;;  %v12660_v39 = vcombine.high %v1171_v34, %v1175_v35  ;;  %v1230_v26 = vld [vmem:[%s14664_s13 + $0x14f0] sm:$0xff] }
 0x3f3   : > { %v13938_v27 = vld [vmem:[%s14656_s3 + $0x2c] ss:$56 sps:$4 sm:$0xff]  }
 0x3f5   : > { %6789 = vmatpush1.bf16.msra.mxu0 %v12593_v44  ;;  %7090 = vmatpush1.bf16.msra.mxu1 %v12595_v45  ;;  %v12657_v44 = vcombine.low %v1170_v32, %v1174_v33  ;;  %v12659_v45 = vcombine.low %v1171_v34, %v1175_v35  ;;  %v12714_v32 = vcombine.high %v1226_v25, %v1230_v26  ;;  %v1234_v34 = vld [vmem:[%s14664_s13 + $0x1510] sm:$0xff] }
 0x3f6   : > { %6790 = vmatprep.subr.bf16.mxu0 %v12602_v46  ;;  %7091 = vmatprep.subr.bf16.mxu1 %v12604_v47  ;;  %v12666_v46 = vcombine.high %v1178_v40, %v1182_v41  ;;  %v12668_v47 = vcombine.high %v1179_v42, %v1183_v43  ;;  %v1238_v35 = vld [vmem:[%s14664_s13 + $0x1530] sm:$0xff] }
 0x3f9   : > { %6791 = vmatpush1.bf16.msra.mxu0 %v12601_v52  ;;  %7092 = vmatpush1.bf16.msra.mxu1 %v12603_v53  ;;  %v12665_v52 = vcombine.low %v1178_v40, %v1182_v41  ;;  %v12667_v53 = vcombine.low %v1179_v42, %v1183_v43  ;;  %v12722_v40 = vcombine.high %v1234_v34, %v1238_v35  ;;  %v1242_v42 = vld [vmem:[%s14664_s13 + $0x1550] sm:$0xff] }
 0x3fa   : > { %6792 = vmatprep.subr.bf16.mxu0 %v12610_v54  ;;  %7093 = vmatprep.subr.bf16.mxu1 %v12612_v55  ;;  %v12674_v54 = vcombine.high %v1186_v48, %v1190_v49  ;;  %v12676_v55 = vcombine.high %v1187_v50, %v1191_v51  ;;  %v1246_v43 = vld [vmem:[%s14664_s13 + $0x1570] sm:$0xff] }
 0x3fd   : > { %6793 = vmatpush1.bf16.msra.mxu0 %v12609_v60  ;;  %7094 = vmatpush1.bf16.msra.mxu1 %v12611_v61  ;;  %v12673_v60 = vcombine.low %v1186_v48, %v1190_v49  ;;  %v12675_v61 = vcombine.low %v1187_v50, %v1191_v51  ;;  %v12730_v48 = vcombine.high %v1242_v42, %v1246_v43  ;;  %v1250_v50 = vld [vmem:[%s14664_s13 + $0x1590] sm:$0xff] }
 0x3fe   : > { %6794 = vmatprep.subr.bf16.mxu0 %v12618_v62  ;;  %7095 = vmatprep.subr.bf16.mxu1 %v12620_v63  ;;  %v12682_v62 = vcombine.high %v1194_v56, %v1198_v57  ;;  %v12684_v63 = vcombine.high %v1195_v58, %v1199_v59  ;;  %v1254_v51 = vld [vmem:[%s14664_s13 + $0x15b0] sm:$0xff] }
 0x401   : > { %6795 = vmatpush1.bf16.msra.mxu0 %v12617_v4  ;;  %7096 = vmatpush1.bf16.msra.mxu1 %v12619_v5  ;;  %v12681_v4 = vcombine.low %v1194_v56, %v1198_v57  ;;  %v12683_v5 = vcombine.low %v1195_v58, %v1199_v59  ;;  %v12738_v56 = vcombine.high %v1250_v50, %v1254_v51  ;;  %v1258_v58 = vld [vmem:[%s14664_s13 + $0x15d0] sm:$0xff] }
 0x402   : > { %6796 = vmatprep.subr.bf16.mxu0 %v12626_v6  ;;  %7097 = vmatprep.subr.bf16.mxu1 %v12628_v7  ;;  %v12690_v6 = vcombine.high %v1202_v0, %v1206_v1  ;;  %v12692_v7 = vcombine.high %v1203_v2, %v1207_v3  ;;  %v1262_v59 = vld [vmem:[%s14664_s13 + $0x15f0] sm:$0xff] }
 0x405   : > { %6797 = vmatpush1.bf16.msra.mxu0 %v12625_v12  ;;  %7098 = vmatpush1.bf16.msra.mxu1 %v12627_v13  ;;  %v12689_v12 = vcombine.low %v1202_v0, %v1206_v1  ;;  %v12691_v13 = vcombine.low %v1203_v2, %v1207_v3  ;;  %v12746_v0 = vcombine.high %v1258_v58, %v1262_v59  ;;  %v1266_v2 = vld [vmem:[%s14664_s13 + $0x1610] sm:$0xff] }
 0x406   : > { %6798 = vmatprep.subr.bf16.mxu0 %v12634_v14  ;;  %7099 = vmatprep.subr.bf16.mxu1 %v12636_v15  ;;  %v12698_v14 = vcombine.high %v1210_v8, %v1214_v9  ;;  %v12700_v15 = vcombine.high %v1211_v10, %v1215_v11  ;;  %v1270_v3 = vld [vmem:[%s14664_s13 + $0x1630] sm:$0xff] }
 0x409   : > { %6799 = vmatpush1.bf16.msra.mxu0 %v12633_v20  ;;  %7100 = vmatpush1.bf16.msra.mxu1 %v12635_v21  ;;  %v1223_v20 = vld [vmem:[%s14664_s13 + $0x14b8] sm:$0xff]  ;;  %v12697_v21 = vcombine.low %v1210_v8, %v1214_v9  ;;  %v12754_v8 = vcombine.high %v1266_v2, %v1270_v3 }
 0x40a   : > { %6800 = vmatprep.subr.bf16.mxu0 %v12642_v22  ;;  %7101 = vmatprep.subr.bf16.mxu1 %v12644_v23  ;;  %v12699_v22 = vcombine.low %v1211_v10, %v1215_v11  ;;  %v12706_v23 = vcombine.high %v1218_v16, %v1222_v17  ;;  %v12708_v24 = vcombine.high %v1219_v19, %v1223_v20  ;;  %v1274_v10 = vld [vmem:[%s14664_s13 + $0x1650] sm:$0xff] }
 0x40b   : > { %v1278_v11 = vld [vmem:[%s14664_s13 + $0x1670] sm:$0xff] }
 0x40d   : > { %6801 = vmatpush1.bf16.msra.mxu0 %v12641_v28  ;;  %7102 = vmatpush1.bf16.msra.mxu1 %v12643_v29  ;;  %v1227_v28 = vld [vmem:[%s14664_s13 + $0x14d8] sm:$0xff] }
 0x40e   : > { %6802 = vmatprep.subr.bf16.mxu0 %v12650_v30  ;;  %7103 = vmatprep.subr.bf16.mxu1 %v12652_v31  ;;  %v1231_v29 = vld [vmem:[%s14664_s13 + $0x14f8] sm:$0xff]  ;;  %v12705_v30 = vcombine.low %v1218_v16, %v1222_v17  ;;  %v12707_v31 = vcombine.low %v1219_v19, %v1223_v20  ;;  %v12762_v16 = vcombine.high %v1274_v10, %v1278_v11  ;;  %v1286_v19 = vld [vmem:[%s14664_s13 + $0x16b0] sm:$0xff] }
 0x40f   : > { %v12716_v33 = vcombine.high %v1227_v28, %v1231_v29  ;;  %v1283_v20 = vld [vmem:[%s14664_s13 + $0x1698] sm:$0xff] }
 0x411   : > { %6803 = vmatpush1.bf16.msra.mxu0 %v12649_v36  ;;  %7104 = vmatpush1.bf16.msra.mxu1 %v12651_v37  ;;  %v1235_v36 = vld [vmem:[%s14664_s13 + $0x1518] sm:$0xff] }
 0x412   : > { %6804 = vmatprep.subr.bf16.mxu0 %v12658_v38  ;;  %7105 = vmatprep.subr.bf16.mxu1 %v12660_v39  ;;  %v1239_v37 = vld [vmem:[%s14664_s13 + $0x1538] sm:$0xff]  ;;  %v12713_v38 = vcombine.low %v1226_v25, %v1230_v26  ;;  %v12715_v39 = vcombine.low %v1227_v28, %v1231_v29  ;;  %v1290_v26 = vld [vmem:[%s14664_s13 + $0x16d0] sm:$0xff] }
 0x413   : > { %v12724_v41 = vcombine.high %v1235_v36, %v1239_v37  ;;  %v1291_v28 = vld [vmem:[%s14664_s13 + $0x16d8] sm:$0xff] }
 0x414   : > { %v1295_v29 = vld [vmem:[%s14664_s13 + $0x16f8] sm:$0xff] }
 0x415   : > { %6805 = vmatpush1.bf16.msra.mxu0 %v12657_v44  ;;  %7106 = vmatpush1.bf16.msra.mxu1 %v12659_v45  ;;  %v1243_v44 = vld [vmem:[%s14664_s13 + $0x1558] sm:$0xff] }
 0x416   : > { %6806 = vmatprep.subr.bf16.mxu0 %v12666_v46  ;;  %7107 = vmatprep.subr.bf16.mxu1 %v12668_v47  ;;  %v1247_v45 = vld [vmem:[%s14664_s13 + $0x1578] sm:$0xff]  ;;  %v12721_v46 = vcombine.low %v1234_v34, %v1238_v35  ;;  %v12723_v47 = vcombine.low %v1235_v36, %v1239_v37  ;;  %v1298_v34 = vld [vmem:[%s14664_s13 + $0x1710] sm:$0xff] }
 0x417   : > { %v12732_v49 = vcombine.high %v1243_v44, %v1247_v45  ;;  %v1302_v35 = vld [vmem:[%s14664_s13 + $0x1730] sm:$0xff]  ;;  %v1299_v36 = vld [vmem:[%s14664_s13 + $0x1718] sm:$0xff] }
 0x418   : > { %v1303_v37 = vld [vmem:[%s14664_s13 + $0x1738] sm:$0xff] }
 0x419   : > { %6807 = vmatpush1.bf16.msra.mxu0 %v12665_v52  ;;  %7108 = vmatpush1.bf16.msra.mxu1 %v12667_v53  ;;  %v1251_v52 = vld [vmem:[%s14664_s13 + $0x1598] sm:$0xff] }
 0x41a   : > { %6808 = vmatprep.subr.bf16.mxu0 %v12674_v54  ;;  %7109 = vmatprep.subr.bf16.mxu1 %v12676_v55  ;;  %v1255_v53 = vld [vmem:[%s14664_s13 + $0x15b8] sm:$0xff]  ;;  %v12729_v54 = vcombine.low %v1242_v42, %v1246_v43  ;;  %v12731_v55 = vcombine.low %v1243_v44, %v1247_v45  ;;  %v1306_v42 = vld [vmem:[%s14664_s13 + $0x1750] sm:$0xff] }
 0x41b   : > { %v12740_v57 = vcombine.high %v1251_v52, %v1255_v53  ;;  %v1310_v43 = vld [vmem:[%s14664_s13 + $0x1770] sm:$0xff]  ;;  %v1307_v44 = vld [vmem:[%s14664_s13 + $0x1758] sm:$0xff] }
 0x41c   : > { %v1311_v45 = vld [vmem:[%s14664_s13 + $0x1778] sm:$0xff] }
 0x41d   : > { %6809 = vmatpush1.bf16.msra.mxu0 %v12673_v60  ;;  %7110 = vmatpush1.bf16.msra.mxu1 %v12675_v61  ;;  %v1259_v60 = vld [vmem:[%s14664_s13 + $0x15d8] sm:$0xff] }
 0x41e   : > { %6810 = vmatprep.subr.bf16.mxu0 %v12682_v62  ;;  %7111 = vmatprep.subr.bf16.mxu1 %v12684_v63  ;;  %v1263_v61 = vld [vmem:[%s14664_s13 + $0x15f8] sm:$0xff]  ;;  %v12737_v62 = vcombine.low %v1250_v50, %v1254_v51  ;;  %v12739_v63 = vcombine.low %v1251_v52, %v1255_v53  ;;  %v1314_v50 = vld [vmem:[%s14664_s13 + $0x1790] sm:$0xff] }
 0x41f   : > { %v12748_v1 = vcombine.high %v1259_v60, %v1263_v61  ;;  %v1318_v51 = vld [vmem:[%s14664_s13 + $0x17b0] sm:$0xff]  ;;  %v1315_v52 = vld [vmem:[%s14664_s13 + $0x1798] sm:$0xff] }
 0x420   : > { %v1319_v53 = vld [vmem:[%s14664_s13 + $0x17b8] sm:$0xff] }
 0x421   : > { %6811 = vmatpush1.bf16.msra.mxu0 %v12681_v4  ;;  %7112 = vmatpush1.bf16.msra.mxu1 %v12683_v5  ;;  %v1267_v4 = vld [vmem:[%s14664_s13 + $0x1618] sm:$0xff] }
 0x422   : > { %6823 = vmatprep.subr.bf16.mxu0 %v12690_v6  ;;  %7124 = vmatprep.subr.bf16.mxu1 %v12692_v7  ;;  %v1271_v5 = vld [vmem:[%s14664_s13 + $0x1638] sm:$0xff]  ;;  %v12745_v6 = vcombine.low %v1258_v58, %v1262_v59  ;;  %v12747_v7 = vcombine.low %v1259_v60, %v1263_v61  ;;  %v1322_v58 = vld [vmem:[%s14664_s13 + $0x17d0] sm:$0xff] }
 0x423   : > { %v12756_v9 = vcombine.high %v1267_v4, %v1271_v5  ;;  %v1326_v59 = vld [vmem:[%s14664_s13 + $0x17f0] sm:$0xff]  ;;  %v1323_v60 = vld [vmem:[%s14664_s13 + $0x17d8] sm:$0xff] }
 0x424   : > { %6813 = vmatmul.mubr.bf16.vlgmr.msra.gmra.mrb[4].mxu0 %v13937_v18  ;;  %7114 = vmatmul.mubr.bf16.vlgmr.msra.gmra.mrb[4].mxu1 %v13937_v18  ;;  %v1282_v18 = vld [vmem:[%s14664_s13 + $0x1690] sm:$0xff]  ;;  %v1327_v61 = vld [vmem:[%s14664_s13 + $0x17f8] sm:$0xff] }
 0x425   : > { %6824 = vmatpush1.bf16.msra.mxu0 %v12689_v12  ;;  %7125 = vmatpush1.bf16.msra.mxu1 %v12691_v13  ;;  %v1275_v12 = vld [vmem:[%s14664_s13 + $0x1658] sm:$0xff] }
 0x426   : > { %6825 = vmatprep.subr.bf16.mxu0 %v12698_v14  ;;  %7126 = vmatprep.subr.bf16.mxu1 %v12700_v15  ;;  %v1279_v13 = vld [vmem:[%s14664_s13 + $0x1678] sm:$0xff]  ;;  %v12753_v14 = vcombine.low %v1266_v2, %v1270_v3  ;;  %v12755_v15 = vcombine.low %v1267_v4, %v1271_v5  ;;  %v1330_v2 = vld [vmem:[%s14664_s13 + $0x1810] sm:$0xff] }
 0x427   : > { %6855 = vmatprep.mubr.bf16.mxu0 %v13938_v27  ;;  %7156 = vmatprep.mubr.bf16.mxu1 %v13938_v27  ;;  %v12764_v17 = vcombine.high %v1275_v12, %v1279_v13  ;;  %v1294_v27 = vld [vmem:[%s14664_s13 + $0x16f0] sm:$0xff]  ;;  %v1331_v4 = vld [vmem:[%s14664_s13 + $0x1818] sm:$0xff] }
 0x428   : > { %v1334_v3 = vld [vmem:[%s14664_s13 + $0x1830] sm:$0xff]  ;;  %v1335_v5 = vld [vmem:[%s14664_s13 + $0x1838] sm:$0xff] }
 0x429   : > { %6826 = vmatpush1.bf16.msra.mxu0 %v12697_v21  ;;  %7127 = vmatpush1.bf16.msra.mxu1 %v12699_v22  ;;  %v1287_v21 = vld [vmem:[%s14664_s13 + $0x16b8] sm:$0xff]  ;;  %v12761_v22 = vcombine.low %v1274_v10, %v1278_v11  ;;  %v1338_v10 = vld [vmem:[%s14664_s13 + $0x1850] sm:$0xff] }
 0x42a   : > { %6827 = vmatprep.subr.bf16.mxu0 %v12706_v23  ;;  %7128 = vmatprep.subr.bf16.mxu1 %v12708_v24  ;;  %v12763_v23 = vcombine.low %v1275_v12, %v1279_v13  ;;  %v12770_v24 = vcombine.high %v1282_v18, %v1286_v19  ;;  %v12772_v25 = vcombine.high %v1283_v20, %v1287_v21  ;;  %v1342_v11 = vld [vmem:[%s14664_s13 + $0x1870] sm:$0xff]  ;;  %v1339_v12 = vld [vmem:[%s14664_s13 + $0x1858] sm:$0xff] }
 0x42b   : > { %v1343_v13 = vld [vmem:[%s14664_s13 + $0x1878] sm:$0xff] }
 0x42d   : > { %6828 = vmatpush1.bf16.msra.mxu0 %v12705_v30  ;;  %7129 = vmatpush1.bf16.msra.mxu1 %v12707_v31  ;;  %v12769_v30 = vcombine.low %v1282_v18, %v1286_v19  ;;  %v12771_v31 = vcombine.low %v1283_v20, %v1287_v21  ;;  %v1346_v18 = vld [vmem:[%s14664_s13 + $0x1890] sm:$0xff]  ;;  %v1347_v21 = vld [vmem:[%s14664_s13 + $0x1898] sm:$0xff] }
 0x42e   : > { %6829 = vmatprep.subr.bf16.mxu0 %v12714_v32  ;;  %7130 = vmatprep.subr.bf16.mxu1 %v12716_v33  ;;  %v12778_v32 = vcombine.high %v1290_v26, %v1294_v27  ;;  %v12780_v33 = vcombine.high %v1291_v28, %v1295_v29  ;;  %v1350_v19 = vld [vmem:[%s14664_s13 + $0x18b0] sm:$0xff] }
 0x42f   : > { %v13939_v20 = vld [vmem:[%s14656_s3 + $0x28] ss:$56 sps:$4 sm:$0xff]  }
 0x431   : > { %6830 = vmatpush1.bf16.msra.mxu0 %v12713_v38  ;;  %7131 = vmatpush1.bf16.msra.mxu1 %v12715_v39  ;;  %v12777_v38 = vcombine.low %v1290_v26, %v1294_v27  ;;  %v12779_v39 = vcombine.low %v1291_v28, %v1295_v29  ;;  %v1354_v27 = vld [vmem:[%s14664_s13 + $0x18d0] sm:$0xff] }
 0x432   : > { %6831 = vmatprep.subr.bf16.mxu0 %v12722_v40  ;;  %7132 = vmatprep.subr.bf16.mxu1 %v12724_v41  ;;  %v12786_v40 = vcombine.high %v1298_v34, %v1302_v35  ;;  %v12788_v41 = vcombine.high %v1299_v36, %v1303_v37  ;;  %v1358_v28 = vld [vmem:[%s14664_s13 + $0x18f0] sm:$0xff] }
 0x433   : > { %v13940_v29 = vld [vmem:[%s14656_s3 + $0x34] ss:$56 sps:$4 sm:$0xff]  }
 0x435   : > { %6832 = vmatpush1.bf16.msra.mxu0 %v12721_v46  ;;  %7133 = vmatpush1.bf16.msra.mxu1 %v12723_v47  ;;  %v12785_v46 = vcombine.low %v1298_v34, %v1302_v35  ;;  %v12787_v47 = vcombine.low %v1299_v36, %v1303_v37  ;;  %v12842_v34 = vcombine.high %v1354_v27, %v1358_v28  ;;  %v1362_v36 = vld [vmem:[%s14664_s13 + $0x1910] sm:$0xff] }
 0x436   : > { %6833 = vmatprep.subr.bf16.mxu0 %v12730_v48  ;;  %7134 = vmatprep.subr.bf16.mxu1 %v12732_v49  ;;  %v12794_v48 = vcombine.high %v1306_v42, %v1310_v43  ;;  %v12796_v49 = vcombine.high %v1307_v44, %v1311_v45  ;;  %v1366_v37 = vld [vmem:[%s14664_s13 + $0x1930] sm:$0xff] }
 0x439   : > { %6834 = vmatpush1.bf16.msra.mxu0 %v12729_v54  ;;  %7135 = vmatpush1.bf16.msra.mxu1 %v12731_v55  ;;  %v12793_v54 = vcombine.low %v1306_v42, %v1310_v43  ;;  %v12795_v55 = vcombine.low %v1307_v44, %v1311_v45  ;;  %v12850_v42 = vcombine.high %v1362_v36, %v1366_v37  ;;  %v1370_v44 = vld [vmem:[%s14664_s13 + $0x1950] sm:$0xff] }
 0x43a   : > { %6835 = vmatprep.subr.bf16.mxu0 %v12738_v56  ;;  %7136 = vmatprep.subr.bf16.mxu1 %v12740_v57  ;;  %v12802_v56 = vcombine.high %v1314_v50, %v1318_v51  ;;  %v12804_v57 = vcombine.high %v1315_v52, %v1319_v53  ;;  %v1374_v45 = vld [vmem:[%s14664_s13 + $0x1970] sm:$0xff] }
 0x43d   : > { %6836 = vmatpush1.bf16.msra.mxu0 %v12737_v62  ;;  %7137 = vmatpush1.bf16.msra.mxu1 %v12739_v63  ;;  %v12801_v62 = vcombine.low %v1314_v50, %v1318_v51  ;;  %v12803_v63 = vcombine.low %v1315_v52, %v1319_v53  ;;  %v12858_v50 = vcombine.high %v1370_v44, %v1374_v45  ;;  %v1378_v52 = vld [vmem:[%s14664_s13 + $0x1990] sm:$0xff] }
 0x43e   : > { %6837 = vmatprep.subr.bf16.mxu0 %v12746_v0  ;;  %7138 = vmatprep.subr.bf16.mxu1 %v12748_v1  ;;  %v12810_v0 = vcombine.high %v1322_v58, %v1326_v59  ;;  %v12812_v1 = vcombine.high %v1323_v60, %v1327_v61  ;;  %v1382_v53 = vld [vmem:[%s14664_s13 + $0x19b0] sm:$0xff] }
 0x441   : > { %6838 = vmatpush1.bf16.msra.mxu0 %v12745_v6  ;;  %7139 = vmatpush1.bf16.msra.mxu1 %v12747_v7  ;;  %v12809_v6 = vcombine.low %v1322_v58, %v1326_v59  ;;  %v12811_v7 = vcombine.low %v1323_v60, %v1327_v61  ;;  %v12866_v58 = vcombine.high %v1378_v52, %v1382_v53  ;;  %v1386_v60 = vld [vmem:[%s14664_s13 + $0x19d0] sm:$0xff] }
 0x442   : > { %6839 = vmatprep.subr.bf16.mxu0 %v12754_v8  ;;  %7140 = vmatprep.subr.bf16.mxu1 %v12756_v9  ;;  %v12818_v8 = vcombine.high %v1330_v2, %v1334_v3  ;;  %v12820_v9 = vcombine.high %v1331_v4, %v1335_v5  ;;  %v1390_v61 = vld [vmem:[%s14664_s13 + $0x19f0] sm:$0xff] }
 0x445   : > { %6840 = vmatpush1.bf16.msra.mxu0 %v12753_v14  ;;  %7141 = vmatpush1.bf16.msra.mxu1 %v12755_v15  ;;  %v12817_v14 = vcombine.low %v1330_v2, %v1334_v3  ;;  %v12819_v15 = vcombine.low %v1331_v4, %v1335_v5  ;;  %v12874_v2 = vcombine.high %v1386_v60, %v1390_v61  ;;  %v1394_v4 = vld [vmem:[%s14664_s13 + $0x1a10] sm:$0xff] }
 0x446   : > { %6841 = vmatprep.subr.bf16.mxu0 %v12762_v16  ;;  %7142 = vmatprep.subr.bf16.mxu1 %v12764_v17  ;;  %v12826_v16 = vcombine.high %v1338_v10, %v1342_v11  ;;  %v12828_v17 = vcombine.high %v1339_v12, %v1343_v13  ;;  %v1398_v5 = vld [vmem:[%s14664_s13 + $0x1a30] sm:$0xff] }
 0x449   : > { %6842 = vmatpush1.bf16.msra.mxu0 %v12761_v22  ;;  %7143 = vmatpush1.bf16.msra.mxu1 %v12763_v23  ;;  %v1351_v22 = vld [vmem:[%s14664_s13 + $0x18b8] sm:$0xff]  ;;  %v12825_v23 = vcombine.low %v1338_v10, %v1342_v11  ;;  %v12882_v10 = vcombine.high %v1394_v4, %v1398_v5 }
 0x44a   : > { %6843 = vmatprep.subr.bf16.mxu0 %v12770_v24  ;;  %7144 = vmatprep.subr.bf16.mxu1 %v12772_v25  ;;  %v12827_v24 = vcombine.low %v1339_v12, %v1343_v13  ;;  %v12834_v25 = vcombine.high %v1346_v18, %v1350_v19  ;;  %v12836_v26 = vcombine.high %v1347_v21, %v1351_v22  ;;  %v1402_v12 = vld [vmem:[%s14664_s13 + $0x1a50] sm:$0xff] }
 0x44b   : > { %v1406_v13 = vld [vmem:[%s14664_s13 + $0x1a70] sm:$0xff] }
 0x44d   : > { %6844 = vmatpush1.bf16.msra.mxu0 %v12769_v30  ;;  %7145 = vmatpush1.bf16.msra.mxu1 %v12771_v31  ;;  %v1355_v30 = vld [vmem:[%s14664_s13 + $0x18d8] sm:$0xff] }
 0x44e   : > { %6845 = vmatprep.subr.bf16.mxu0 %v12778_v32  ;;  %7146 = vmatprep.subr.bf16.mxu1 %v12780_v33  ;;  %v1359_v31 = vld [vmem:[%s14664_s13 + $0x18f8] sm:$0xff]  ;;  %v12833_v32 = vcombine.low %v1346_v18, %v1350_v19  ;;  %v12835_v33 = vcombine.low %v1347_v21, %v1351_v22  ;;  %v12890_v18 = vcombine.high %v1402_v12, %v1406_v13  ;;  %v1414_v21 = vld [vmem:[%s14664_s13 + $0x1ab0] sm:$0xff] }
 0x44f   : > { %v12844_v35 = vcombine.high %v1355_v30, %v1359_v31  ;;  %v1411_v22 = vld [vmem:[%s14664_s13 + $0x1a98] sm:$0xff] }
 0x451   : > { %6846 = vmatpush1.bf16.msra.mxu0 %v12777_v38  ;;  %7147 = vmatpush1.bf16.msra.mxu1 %v12779_v39  ;;  %v1363_v38 = vld [vmem:[%s14664_s13 + $0x1918] sm:$0xff] }
 0x452   : > { %6847 = vmatprep.subr.bf16.mxu0 %v12786_v40  ;;  %7148 = vmatprep.subr.bf16.mxu1 %v12788_v41  ;;  %v1367_v39 = vld [vmem:[%s14664_s13 + $0x1938] sm:$0xff]  ;;  %v12841_v40 = vcombine.low %v1354_v27, %v1358_v28  ;;  %v12843_v41 = vcombine.low %v1355_v30, %v1359_v31  ;;  %v1418_v28 = vld [vmem:[%s14664_s13 + $0x1ad0] sm:$0xff] }
 0x453   : > { %v12852_v43 = vcombine.high %v1363_v38, %v1367_v39  ;;  %v1419_v30 = vld [vmem:[%s14664_s13 + $0x1ad8] sm:$0xff] }
 0x454   : > { %v1423_v31 = vld [vmem:[%s14664_s13 + $0x1af8] sm:$0xff] }
 0x455   : > { %6848 = vmatpush1.bf16.msra.mxu0 %v12785_v46  ;;  %7149 = vmatpush1.bf16.msra.mxu1 %v12787_v47  ;;  %v1371_v46 = vld [vmem:[%s14664_s13 + $0x1958] sm:$0xff] }
 0x456   : > { %6849 = vmatprep.subr.bf16.mxu0 %v12794_v48  ;;  %7150 = vmatprep.subr.bf16.mxu1 %v12796_v49  ;;  %v1375_v47 = vld [vmem:[%s14664_s13 + $0x1978] sm:$0xff]  ;;  %v12849_v48 = vcombine.low %v1362_v36, %v1366_v37  ;;  %v12851_v49 = vcombine.low %v1363_v38, %v1367_v39  ;;  %v1426_v36 = vld [vmem:[%s14664_s13 + $0x1b10] sm:$0xff] }
 0x457   : > { %v12860_v51 = vcombine.high %v1371_v46, %v1375_v47  ;;  %v1430_v37 = vld [vmem:[%s14664_s13 + $0x1b30] sm:$0xff]  ;;  %v1427_v38 = vld [vmem:[%s14664_s13 + $0x1b18] sm:$0xff] }
 0x458   : > { %v1431_v39 = vld [vmem:[%s14664_s13 + $0x1b38] sm:$0xff] }
 0x459   : > { %6850 = vmatpush1.bf16.msra.mxu0 %v12793_v54  ;;  %7151 = vmatpush1.bf16.msra.mxu1 %v12795_v55  ;;  %v1379_v54 = vld [vmem:[%s14664_s13 + $0x1998] sm:$0xff] }
 0x45a   : > { %6851 = vmatprep.subr.bf16.mxu0 %v12802_v56  ;;  %7152 = vmatprep.subr.bf16.mxu1 %v12804_v57  ;;  %v1383_v55 = vld [vmem:[%s14664_s13 + $0x19b8] sm:$0xff]  ;;  %v12857_v56 = vcombine.low %v1370_v44, %v1374_v45  ;;  %v12859_v57 = vcombine.low %v1371_v46, %v1375_v47  ;;  %v1434_v44 = vld [vmem:[%s14664_s13 + $0x1b50] sm:$0xff] }
 0x45b   : > { %v12868_v59 = vcombine.high %v1379_v54, %v1383_v55  ;;  %v1438_v45 = vld [vmem:[%s14664_s13 + $0x1b70] sm:$0xff]  ;;  %v1435_v46 = vld [vmem:[%s14664_s13 + $0x1b58] sm:$0xff] }
 0x45c   : > { %v1439_v47 = vld [vmem:[%s14664_s13 + $0x1b78] sm:$0xff] }
 0x45d   : > { %6852 = vmatpush1.bf16.msra.mxu0 %v12801_v62  ;;  %7153 = vmatpush1.bf16.msra.mxu1 %v12803_v63  ;;  %v1387_v62 = vld [vmem:[%s14664_s13 + $0x19d8] sm:$0xff] }
 0x45e   : > { %6853 = vmatprep.subr.bf16.mxu0 %v12810_v0  ;;  %7154 = vmatprep.subr.bf16.mxu1 %v12812_v1  ;;  %v1391_v63 = vld [vmem:[%s14664_s13 + $0x19f8] sm:$0xff]  ;;  %v12865_v0 = vcombine.low %v1378_v52, %v1382_v53  ;;  %v12867_v1 = vcombine.low %v1379_v54, %v1383_v55  ;;  %v1442_v52 = vld [vmem:[%s14664_s13 + $0x1b90] sm:$0xff] }
 0x45f   : > { %v12876_v3 = vcombine.high %v1387_v62, %v1391_v63  ;;  %v1446_v53 = vld [vmem:[%s14664_s13 + $0x1bb0] sm:$0xff]  ;;  %v1443_v54 = vld [vmem:[%s14664_s13 + $0x1b98] sm:$0xff] }
 0x460   : > { %v1447_v55 = vld [vmem:[%s14664_s13 + $0x1bb8] sm:$0xff] }
 0x461   : > { %6854 = vmatpush1.bf16.msra.mxu0 %v12809_v6  ;;  %7155 = vmatpush1.bf16.msra.mxu1 %v12811_v7  ;;  %v1395_v6 = vld [vmem:[%s14664_s13 + $0x1a18] sm:$0xff] }
 0x462   : > { %6866 = vmatprep.subr.bf16.mxu0 %v12818_v8  ;;  %7167 = vmatprep.subr.bf16.mxu1 %v12820_v9  ;;  %v1399_v7 = vld [vmem:[%s14664_s13 + $0x1a38] sm:$0xff]  ;;  %v12873_v8 = vcombine.low %v1386_v60, %v1390_v61  ;;  %v12875_v9 = vcombine.low %v1387_v62, %v1391_v63  ;;  %v1450_v60 = vld [vmem:[%s14664_s13 + $0x1bd0] sm:$0xff] }
 0x463   : > { %v12884_v11 = vcombine.high %v1395_v6, %v1399_v7  ;;  %v1454_v61 = vld [vmem:[%s14664_s13 + $0x1bf0] sm:$0xff]  ;;  %v1451_v62 = vld [vmem:[%s14664_s13 + $0x1bd8] sm:$0xff] }
 0x464   : > { %6856 = vmatmul.mubr.bf16.vlgmr.msra.gmra.mrb[4].mxu0 %v13939_v20  ;;  %7157 = vmatmul.mubr.bf16.vlgmr.msra.gmra.mrb[4].mxu1 %v13939_v20  ;;  %v1410_v20 = vld [vmem:[%s14664_s13 + $0x1a90] sm:$0xff]  ;;  %v1455_v63 = vld [vmem:[%s14664_s13 + $0x1bf8] sm:$0xff] }
 0x465   : > { %6867 = vmatpush1.bf16.msra.mxu0 %v12817_v14  ;;  %7168 = vmatpush1.bf16.msra.mxu1 %v12819_v15  ;;  %v1403_v14 = vld [vmem:[%s14664_s13 + $0x1a58] sm:$0xff] }
 0x466   : > { %6868 = vmatprep.subr.bf16.mxu0 %v12826_v16  ;;  %7169 = vmatprep.subr.bf16.mxu1 %v12828_v17  ;;  %v1407_v15 = vld [vmem:[%s14664_s13 + $0x1a78] sm:$0xff]  ;;  %v12881_v16 = vcombine.low %v1394_v4, %v1398_v5  ;;  %v12883_v17 = vcombine.low %v1395_v6, %v1399_v7  ;;  %v12937_v4 = vcombine.low %v1450_v60, %v1454_v61  ;;  %v534_v7 = vld [vmem:[#allocation2 + $0x20] sm:$0xff] }
 0x467   : > { %6898 = vmatprep.mubr.bf16.mxu0 %v13940_v29  ;;  %7199 = vmatprep.mubr.bf16.mxu1 %v13940_v29  ;;  %v12892_v19 = vcombine.high %v1403_v14, %v1407_v15  ;;  %v1422_v29 = vld [vmem:[%s14664_s13 + $0x1af0] sm:$0xff]  ;;  %v12939_v5 = vcombine.low %v1451_v62, %v1455_v63 }
 0x468   : > { %v13941_v6 = vld [vmem:[%s14656_s3 + $0x30] ss:$56 sps:$4 sm:$0xff]  }
 0x469   : > { %6869 = vmatpush1.bf16.msra.mxu0 %v12825_v23  ;;  %7170 = vmatpush1.bf16.msra.mxu1 %v12827_v24  ;;  %v1415_v23 = vld [vmem:[%s14664_s13 + $0x1ab8] sm:$0xff]  ;;  %v12889_v24 = vcombine.low %v1402_v12, %v1406_v13  ;;  %v542_v12 = vld [vmem:[#allocation2 + $0x60] sm:$0xff] }
 0x46a   : > { %6870 = vmatprep.subr.bf16.mxu0 %v12834_v25  ;;  %7171 = vmatprep.subr.bf16.mxu1 %v12836_v26  ;;  %v12891_v25 = vcombine.low %v1403_v14, %v1407_v15  ;;  %v12898_v26 = vcombine.high %v1410_v20, %v1414_v21  ;;  %v12900_v27 = vcombine.high %v1411_v22, %v1415_v23 }
 0x46d   : > { %6871 = vmatpush1.bf16.msra.mxu0 %v12833_v32  ;;  %7172 = vmatpush1.bf16.msra.mxu1 %v12835_v33  ;;  %v12897_v32 = vcombine.low %v1410_v20, %v1414_v21  ;;  %v12899_v33 = vcombine.low %v1411_v22, %v1415_v23  ;;  %v545_v22 = vld [vmem:[#allocation2 + $0x78] sm:$0xff] }
 0x46e   : > { %6872 = vmatprep.subr.bf16.mxu0 %v12842_v34  ;;  %7173 = vmatprep.subr.bf16.mxu1 %v12844_v35  ;;  %v12906_v34 = vcombine.high %v1418_v28, %v1422_v29  ;;  %v12908_v35 = vcombine.high %v1419_v30, %v1423_v31 }
 0x471   : > { %6873 = vmatpush1.bf16.msra.mxu0 %v12841_v40  ;;  %7174 = vmatpush1.bf16.msra.mxu1 %v12843_v41  ;;  %v12905_v40 = vcombine.low %v1418_v28, %v1422_v29  ;;  %v12907_v41 = vcombine.low %v1419_v30, %v1423_v31  ;;  %v7344_v31 = vld [vmem:[#allocation10] sm:$0xff] (!%p12941_p1) }
 0x472   : > { %6874 = vmatprep.subr.bf16.mxu0 %v12850_v42  ;;  %7175 = vmatprep.subr.bf16.mxu1 %v12852_v43  ;;  %v12914_v42 = vcombine.high %v1426_v36, %v1430_v37  ;;  %v12916_v43 = vcombine.high %v1427_v38, %v1431_v39 }
 0x475   : > { %6875 = vmatpush1.bf16.msra.mxu0 %v12849_v48  ;;  %7176 = vmatpush1.bf16.msra.mxu1 %v12851_v49  ;;  %v12913_v48 = vcombine.low %v1426_v36, %v1430_v37  ;;  %v12915_v49 = vcombine.low %v1427_v38, %v1431_v39  ;;  %v7352_v37 = vld [vmem:[#allocation10 + $0x40] sm:$0xff] (!%p12941_p1) }
 0x476   : > { %6876 = vmatprep.subr.bf16.mxu0 %v12858_v50  ;;  %7177 = vmatprep.subr.bf16.mxu1 %v12860_v51  ;;  %v12922_v50 = vcombine.high %v1434_v44, %v1438_v45  ;;  %v12924_v51 = vcombine.high %v1435_v46, %v1439_v47  ;;  %v7356_v38 = vld [vmem:[#allocation10 + $0x60] sm:$0xff] (!%p12941_p1) }
 0x479   : > { %6877 = vmatpush1.bf16.msra.mxu0 %v12857_v56  ;;  %7178 = vmatpush1.bf16.msra.mxu1 %v12859_v57  ;;  %v12921_v56 = vcombine.low %v1434_v44, %v1438_v45  ;;  %v12923_v57 = vcombine.low %v1435_v46, %v1439_v47  ;;  %v7360_v44 = vld [vmem:[#allocation10 + $0x80] sm:$0xff] (!%p12941_p1)  ;;  %v7361_v47 = vld [vmem:[#allocation10 + $0x88] sm:$0xff] (!%p12941_p1) }
 0x47a   : > { %6878 = vmatprep.subr.bf16.mxu0 %v12866_v58  ;;  %7179 = vmatprep.subr.bf16.mxu1 %v12868_v59  ;;  %v12930_v58 = vcombine.high %v1442_v52, %v1446_v53  ;;  %v12932_v59 = vcombine.high %v1443_v54, %v1447_v55  ;;  %v7364_v46 = vld [vmem:[#allocation10 + $0xa0] sm:$0xff] (!%p12941_p1) }
 0x47d   : > { %6879 = vmatpush1.bf16.msra.mxu0 %v12865_v0  ;;  %7180 = vmatpush1.bf16.msra.mxu1 %v12867_v1  ;;  %v12929_v0 = vcombine.low %v1442_v52, %v1446_v53  ;;  %v12931_v1 = vcombine.low %v1443_v54, %v1447_v55  ;;  %v7368_v53 = vld [vmem:[#allocation10 + $0xc0] sm:$0xff] (!%p12941_p1)  ;;  %v7369_v55 = vld [vmem:[#allocation10 + $0xc8] sm:$0xff] (!%p12941_p1) }
 0x47e   : > { %6880 = vmatprep.subr.bf16.mxu0 %v12874_v2  ;;  %7181 = vmatprep.subr.bf16.mxu1 %v12876_v3  ;;  %v12938_v2 = vcombine.high %v1450_v60, %v1454_v61  ;;  %v12940_v3 = vcombine.high %v1451_v62, %v1455_v63  ;;  %v7372_v54 = vld [vmem:[#allocation10 + $0xe0] sm:$0xff] (!%p12941_p1)  ;;  %v7377_v63 = vld [vmem:[#allocation10 + $0x108] sm:$0xff] (!%p12941_p1) }
 0x47f   : > { %v7376_v61 = vld [vmem:[#allocation10 + $0x100] sm:$0xff] (!%p12941_p1) }
 0x480   : > { %v7380_v62 = vld [vmem:[#allocation10 + $0x120] sm:$0xff] (!%p12941_p1) }
 0x481   : > { %6881 = vmatpush1.bf16.msra.mxu0 %v12873_v8  ;;  %7182 = vmatpush1.bf16.msra.mxu1 %v12875_v9  ;;  %v536_v8 = vld [vmem:[#allocation2 + $0x30] sm:$0xff]  ;;  %v535_v9 = vld [vmem:[#allocation2 + $0x28] sm:$0xff] }
 0x482   : > { %6882 = vmatprep.subr.bf16.mxu0 %v12882_v10  ;;  %7183 = vmatprep.subr.bf16.mxu1 %v12884_v11  ;;  %v537_v11 = vld [vmem:[#allocation2 + $0x38] sm:$0xff] }
 0x485   : > { %6883 = vmatpush1.bf16.msra.mxu0 %v12881_v16  ;;  %7184 = vmatpush1.bf16.msra.mxu1 %v12883_v17  ;;  %v544_v16 = vld [vmem:[#allocation2 + $0x70] sm:$0xff]  ;;  %v543_v17 = vld [vmem:[#allocation2 + $0x68] sm:$0xff] }
 0x486   : > { %6884 = vmatprep.subr.bf16.mxu0 %v12890_v18  ;;  %7185 = vmatprep.subr.bf16.mxu1 %v12892_v19 }
 0x489   : > { %6885 = vmatpush1.bf16.msra.mxu0 %v12889_v24  ;;  %7186 = vmatpush1.bf16.msra.mxu1 %v12891_v25 }
 0x48a   : > { %6886 = vmatprep.subr.bf16.mxu0 %v12898_v26  ;;  %7187 = vmatprep.subr.bf16.mxu1 %v12900_v27 }
 0x48d   : > { %6887 = vmatpush1.bf16.msra.mxu0 %v12897_v32  ;;  %7188 = vmatpush1.bf16.msra.mxu1 %v12899_v33  ;;  %v7348_v32 = vld [vmem:[#allocation10 + $0x20] sm:$0xff] (!%p12941_p1)  ;;  %v7345_v33 = vld [vmem:[#allocation10 + $0x8] sm:$0xff] (!%p12941_p1) }
 0x48e   : > { %6888 = vmatprep.subr.bf16.mxu0 %v12906_v34  ;;  %7189 = vmatprep.subr.bf16.mxu1 %v12908_v35  ;;  %v12943_v34 = vcombine.high (!%p12941_p1), %v7344_v31, %v7348_v32  ;;  %v7349_v35 = vld [vmem:[#allocation10 + $0x28] sm:$0xff] (!%p12941_p1)  ;;  %v12942_v36 = vcombine.low (!%p12941_p1), %v7344_v31, %v7348_v32 }
 0x48f   : > { %v12945_v39 = vcombine.high (!%p12941_p1), %v7345_v33, %v7349_v35 }
 0x491   : > { %6889 = vmatpush1.bf16.msra.mxu0 %v12905_v40  ;;  %7190 = vmatpush1.bf16.msra.mxu1 %v12907_v41  ;;  %v12944_v40 = vcombine.low (!%p12941_p1), %v7345_v33, %v7349_v35  ;;  %v12951_v41 = vcombine.high (!%p12941_p1), %v7352_v37, %v7356_v38 }
 0x492   : > { %6890 = vmatprep.subr.bf16.mxu0 %v12914_v42  ;;  %7191 = vmatprep.subr.bf16.mxu1 %v12916_v43  ;;  %v7353_v42 = vld [vmem:[#allocation10 + $0x48] sm:$0xff] (!%p12941_p1) }
 0x493   : > { %v7357_v43 = vld [vmem:[#allocation10 + $0x68] sm:$0xff] (!%p12941_p1) }
 0x494   : > { %v12953_v45 = vcombine.high (!%p12941_p1), %v7353_v42, %v7357_v43 }
 0x495   : > { %6891 = vmatpush1.bf16.msra.mxu0 %v12913_v48  ;;  %7192 = vmatpush1.bf16.msra.mxu1 %v12915_v49  ;;  %v7365_v48 = vld [vmem:[#allocation10 + $0xa8] sm:$0xff] (!%p12941_p1)  ;;  %v12950_v49 = vcombine.low (!%p12941_p1), %v7352_v37, %v7356_v38  ;;  %v7408_v38 = vld [vmem:[#allocation10 + $0x200] sm:$0xff] (!%p12941_p1) }
 0x496   : > { %6892 = vmatprep.subr.bf16.mxu0 %v12922_v50  ;;  %7193 = vmatprep.subr.bf16.mxu1 %v12924_v51  ;;  %v12952_v50 = vcombine.low (!%p12941_p1), %v7353_v42, %v7357_v43  ;;  %v12959_v51 = vcombine.high (!%p12941_p1), %v7360_v44, %v7364_v46  ;;  %v12961_v52 = vcombine.high (!%p12941_p1), %v7361_v47, %v7365_v48 }
 0x499   : > { %6893 = vmatpush1.bf16.msra.mxu0 %v12921_v56  ;;  %7194 = vmatpush1.bf16.msra.mxu1 %v12923_v57  ;;  %v7373_v56 = vld [vmem:[#allocation10 + $0xe8] sm:$0xff] (!%p12941_p1)  ;;  %v12958_v57 = vcombine.low (!%p12941_p1), %v7360_v44, %v7364_v46 }
 0x49a   : > { %6894 = vmatprep.subr.bf16.mxu0 %v12930_v58  ;;  %7195 = vmatprep.subr.bf16.mxu1 %v12932_v59  ;;  %v12960_v58 = vcombine.low (!%p12941_p1), %v7361_v47, %v7365_v48  ;;  %v12967_v59 = vcombine.high (!%p12941_p1), %v7368_v53, %v7372_v54  ;;  %v12969_v60 = vcombine.high (!%p12941_p1), %v7369_v55, %v7373_v56 }
 0x49d   : > { %6895 = vmatpush1.bf16.msra.mxu0 %v12929_v0  ;;  %7196 = vmatpush1.bf16.msra.mxu1 %v12931_v1  ;;  %v7381_v0 = vld [vmem:[#allocation10 + $0x128] sm:$0xff] (!%p12941_p1)  ;;  %v7264_v1 = vlaneseq (!%p12941_p1) }
 0x49e   : > { %6896 = vmatprep.subr.bf16.mxu0 %v12938_v2  ;;  %7197 = vmatprep.subr.bf16.mxu1 %v12940_v3  ;;  %v12966_v2 = vcombine.low (!%p12941_p1), %v7368_v53, %v7372_v54  ;;  %v12968_v3 = vcombine.low (!%p12941_p1), %v7369_v55, %v7373_v56 }
 0x4a1   : > { %6897 = vmatpush1.bf16.msra.mxu0 %v12937_v4  ;;  %7198 = vmatpush1.bf16.msra.mxu1 %v12939_v5  ;;  %v12975_v4 = vcombine.high (!%p12941_p1), %v7376_v61, %v7380_v62  ;;  %v12977_v5 = vcombine.high (!%p12941_p1), %v7377_v63, %v7381_v0 }
 0x4a2   : > { %10458 = vmatprep.subr.bf16.mxu0 (!%p12941_p1), %v12943_v34  ;;  %10630 = vmatprep.subr.bf16.mxu1 (!%p12941_p1), %v12945_v39  ;;  %v7412_v39 = vld [vmem:[#allocation10 + $0x220] sm:$0xff] (!%p12941_p1) }
 0x4a3   : > { %v13007_v46 = vcombine.high (!%p12941_p1), %v7408_v38, %v7412_v39  ;;  %v13006_v53 = vcombine.low (!%p12941_p1), %v7408_v38, %v7412_v39 }
 0x4a4   : > { %6899 = vmatmul.mubr.bf16.vlgmr.msra.gmra.mrb[4].mxu0 %v13941_v6  ;;  %7200 = vmatmul.mubr.bf16.vlgmr.msra.gmra.mrb[4].mxu1 %v13941_v6  ;;  %v7384_v6 = vld [vmem:[#allocation10 + $0x140] sm:$0xff] (!%p12941_p1) }
 0x4a5   : > { %10459 = vmatpush1.bf16.msra.mxu0 (!%p12941_p1), %v12942_v36  ;;  %10631 = vmatpush1.bf16.msra.mxu1 (!%p12941_p1), %v12944_v40  ;;  %v7409_v40 = vld [vmem:[#allocation10 + $0x208] sm:$0xff] (!%p12941_p1) }
 0x4a6   : > { %10460 = vmatprep.subr.bf16.mxu0 (!%p12941_p1), %v12951_v41  ;;  %10632 = vmatprep.subr.bf16.mxu1 (!%p12941_p1), %v12953_v45  ;;  %v7413_v41 = vld [vmem:[#allocation10 + $0x228] sm:$0xff] (!%p12941_p1) }
 0x4a7   : > { %v13009_v48 = vcombine.high (!%p12941_p1), %v7409_v40, %v7413_v41  ;;  %v13008_v54 = vcombine.low (!%p12941_p1), %v7409_v40, %v7413_v41  ;;  %v7464_v41 = vld [vmem:[#allocation10 + $0x3c0] sm:$0xff] (!%p12941_p1) }
 0x4a9   : > { %10461 = vmatpush1.bf16.msra.mxu0 (!%p12941_p1), %v12950_v49  ;;  %10633 = vmatpush1.bf16.msra.mxu1 (!%p12941_p1), %v12952_v50  ;;  %v7416_v49 = vld [vmem:[#allocation10 + $0x240] sm:$0xff] (!%p12941_p1) }
 0x4aa   : > { %10462 = vmatprep.subr.bf16.mxu0 (!%p12941_p1), %v12959_v51  ;;  %10634 = vmatprep.subr.bf16.mxu1 (!%p12941_p1), %v12961_v52  ;;  %v7420_v50 = vld [vmem:[#allocation10 + $0x260] sm:$0xff] (!%p12941_p1)  ;;  %v7417_v51 = vld [vmem:[#allocation10 + $0x248] sm:$0xff] (!%p12941_p1) }
 0x4ab   : > { %v7421_v52 = vld [vmem:[#allocation10 + $0x268] sm:$0xff] (!%p12941_p1)  ;;  %v13015_v55 = vcombine.high (!%p12941_p1), %v7416_v49, %v7420_v50 }
 0x4ac   : > { %v13017_v56 = vcombine.high (!%p12941_p1), %v7417_v51, %v7421_v52 }
 0x4ad   : > { %10463 = vmatpush1.bf16.msra.mxu0 (!%p12941_p1), %v12958_v57  ;;  %10635 = vmatpush1.bf16.msra.mxu1 (!%p12941_p1), %v12960_v58  ;;  %v7424_v57 = vld [vmem:[#allocation10 + $0x280] sm:$0xff] (!%p12941_p1) }
 0x4ae   : > { %10464 = vmatprep.subr.bf16.mxu0 (!%p12941_p1), %v12967_v59  ;;  %10636 = vmatprep.subr.bf16.mxu1 (!%p12941_p1), %v12969_v60  ;;  %v7428_v58 = vld [vmem:[#allocation10 + $0x2a0] sm:$0xff] (!%p12941_p1)  ;;  %v7425_v59 = vld [vmem:[#allocation10 + $0x288] sm:$0xff] (!%p12941_p1) }
 0x4af   : > { %v7429_v60 = vld [vmem:[#allocation10 + $0x2a8] sm:$0xff] (!%p12941_p1) }
 0x4b1   : > { %10465 = vmatpush1.bf16.msra.mxu0 (!%p12941_p1), %v12966_v2  ;;  %10637 = vmatpush1.bf16.msra.mxu1 (!%p12941_p1), %v12968_v3  ;;  %v7436_v2 = vld [vmem:[#allocation10 + $0x2e0] sm:$0xff] (!%p12941_p1)  ;;  %v7433_v3 = vld [vmem:[#allocation10 + $0x2c8] sm:$0xff] (!%p12941_p1) }
 0x4b2   : > { %10466 = vmatprep.subr.bf16.mxu0 (!%p12941_p1), %v12975_v4  ;;  %10638 = vmatprep.subr.bf16.mxu1 (!%p12941_p1), %v12977_v5  ;;  %v7437_v4 = vld [vmem:[#allocation10 + $0x2e8] sm:$0xff] (!%p12941_p1)  ;;  %v13022_v5 = vcombine.low (!%p12941_p1), %v7424_v57, %v7428_v58 }
 0x577   : > { %v6900_v10 = vpop.f32.mrb[4].mxu0  ;;  %v7201_v14 = vpop.f32.mrb[4].mxu1  ;;  %7245 = sbr.rel (%p12941_p1) target bundleno = 2343 (0x927), region = 92 }
 0x578   : > { %v7214_v13 = vadd.f32 %v6900_v10, %v534_v7  ;;  %v6902_v15 = vpop.f32.mrb[5].mxu0  ;;  %v7216_v18 = vadd.f32 %v7201_v14, %v536_v8  ;;  %v7203_v20 = vpop.f32.mrb[5].mxu1  ;;  %v7388_v7 = vld [vmem:[#allocation10 + $0x160] sm:$0xff] (!%p12941_p1)  ;;  %v7385_v8 = vld [vmem:[#allocation10 + $0x148] sm:$0xff] (!%p12941_p1)  ;;  %v15612_v10 = vshrl.u32 (!%p12941_p1), %v7264_v1, 7 }
 0x579   : > { %v7215_v19 = vadd.f32 %v6902_v15, %v535_v9  ;;  %v6904_v21 = vpop.f32.mrb[6].mxu0  ;;  %v7217_v23 = vadd.f32 %v7203_v20, %v537_v11  ;;  %v7205_v25 = vpop.f32.mrb[6].mxu1  ;;  %v7389_v9 = vld [vmem:[#allocation10 + $0x168] sm:$0xff] (!%p12941_p1)  ;;  %v12974_v11 = vcombine.low (!%p12941_p1), %v7376_v61, %v7380_v62  ;;  %v7392_v15 = vld [vmem:[#allocation10 + $0x180] sm:$0xff] (!%p12941_p1)  ;;  %v12982_v20 = vcombine.low (!%p12941_p1), %v7384_v6, %v7388_v7 }
 0x57a   : > { %7230 = vst [vmem:[#allocation2 + $0x20] sm:$0xff] %v7214_v13  ;;  %v7222_v24 = vadd.f32 %v6904_v21, %v542_v12  ;;  %v6906_v26 = vpop.f32.mrb[7].mxu0  ;;  %7232 = vst [vmem:[#allocation2 + $0x30] sm:$0xff] %v7216_v18  ;;  %v7224_v27 = vadd.f32 %v7205_v25, %v544_v16  ;;  %v7207_v29 = vpop.f32.mrb[7].mxu1  ;;  %v12976_v12 = vcombine.low (!%p12941_p1), %v7377_v63, %v7381_v0  ;;  %v7396_v16 = vld [vmem:[#allocation10 + $0x1a0] sm:$0xff] (!%p12941_p1)  ;;  %v7397_v18 = vld [vmem:[#allocation10 + $0x1a8] sm:$0xff] (!%p12941_p1) }
 0x57b   : > { %7231 = vst [vmem:[#allocation2 + $0x28] sm:$0xff] %v7215_v19  ;;  %v7223_v28 = vadd.f32 %v6906_v26, %v543_v17  ;;  %7233 = vst [vmem:[#allocation2 + $0x38] sm:$0xff] %v7217_v23  ;;  %v7225_v30 = vadd.f32 %v7207_v29, %v545_v22  ;;  %v12983_v13 = vcombine.high (!%p12941_p1), %v7384_v6, %v7388_v7  ;;  %v7393_v17 = vld [vmem:[#allocation10 + $0x188] sm:$0xff] (!%p12941_p1)  ;;  %v7270_v19 = vsub.s32 (!%p12941_p1), 1, %v15612_v10  ;;  %v7400_v23 = vld [vmem:[#allocation10 + $0x1c0] sm:$0xff] (!%p12941_p1) }
 0x57c   : > { %7238 = vst [vmem:[#allocation2 + $0x60] sm:$0xff] %v7222_v24  ;;  %7240 = vst [vmem:[#allocation2 + $0x70] sm:$0xff] %v7224_v27  ;;  %v12985_v14 = vcombine.high (!%p12941_p1), %v7385_v8, %v7389_v9  ;;  %10467 = vmatpush1.bf16.msra.mxu0 (!%p12941_p1), %v12974_v11  ;;  %10639 = vmatpush1.bf16.msra.mxu1 (!%p12941_p1), %v12976_v12  ;;  %v12984_v21 = vcombine.low (!%p12941_p1), %v7385_v8, %v7389_v9  ;;  %v7404_v24 = vld [vmem:[#allocation10 + $0x1e0] sm:$0xff] (!%p12941_p1)  ;;  %v7247_v26 = vld [vmem:[#allocation2 + $0x8] sm:$0xff] (!%p12941_p1) }
 0x57d   : > { %7239 = vst [vmem:[#allocation2 + $0x68] sm:$0xff] %v7223_v28  ;;  %7241 = vst [vmem:[#allocation2 + $0x78] sm:$0xff] %v7225_v30  ;;  %10468 = vmatprep.subr.bf16.mxu0 (!%p12941_p1), %v12983_v13  ;;  %v12991_v22 = vcombine.high (!%p12941_p1), %v7392_v15, %v7396_v16  ;;  %v12993_v25 = vcombine.high (!%p12941_p1), %v7393_v17, %v7397_v18  ;;  %v7255_v27 = vld [vmem:[#allocation2 + $0x48] sm:$0xff] (!%p12941_p1)  ;;  %v15615_v28 = vld [vmem:[#allocation7] sm:$0xff] (!%p12941_p1)  ;;  %v12990_v32 = vcombine.low (!%p12941_p1), %v7392_v15, %v7396_v16 }
 0x57e   : > { %10640 = vmatprep.subr.bf16.mxu1 %v12985_v14  ;;  %v7401_v29 = vld [vmem:[#allocation10 + $0x1c8] sm:$0xff]  ;;  %v7271_v31 = vrot.slane %v15615_v28, %v7270_v19  ;;  %v12992_v33 = vcombine.low %v7393_v17, %v7397_v18  ;;  %v12999_v34 = vcombine.high %v7400_v23, %v7404_v24  ;;  %v12998_v44 = vcombine.low %v7400_v23, %v7404_v24  ;;  %v7432_v1 = vld [vmem:[#allocation10 + $0x2c0] sm:$0xff] }
 0x57f   : > { %v7405_v30 = vld [vmem:[#allocation10 + $0x1e8] sm:$0xff]  ;;  %v13014_v61 = vcombine.low %v7416_v49, %v7420_v50  ;;  %v13016_v62 = vcombine.low %v7417_v51, %v7421_v52  ;;  %v13023_v63 = vcombine.high %v7424_v57, %v7428_v58  ;;  %v13025_v0 = vcombine.high %v7425_v59, %v7429_v60  ;;  %v7440_v9 = vld [vmem:[#allocation10 + $0x300] sm:$0xff] }
 0x580   : > { %10469 = vmatpush1.bf16.msra.mxu0 %v12982_v20  ;;  %10641 = vmatpush1.bf16.msra.mxu1 %v12984_v21  ;;  %v7305_v35 = vmul.f32 %v7271_v31, %v7247_v26  ;;  %v7313_v36 = vmul.f32 %v7271_v31, %v7255_v27  ;;  %v13001_v37 = vcombine.high %v7401_v29, %v7405_v30  ;;  %v7444_v11 = vld [vmem:[#allocation10 + $0x320] sm:$0xff]  ;;  %v7441_v12 = vld [vmem:[#allocation10 + $0x308] sm:$0xff]  ;;  %v7266_v23 = vsub.s32 0, %v15612_v10 }
 0x581   : > { %10470 = vmatprep.subr.bf16.mxu0 %v12991_v22  ;;  %10642 = vmatprep.subr.bf16.mxu1 %v12993_v25  ;;  %v13000_v45 = vcombine.low %v7401_v29, %v7405_v30  ;;  %v13024_v6 = vcombine.low %v7425_v59, %v7429_v60  ;;  %v13031_v7 = vcombine.high %v7432_v1, %v7436_v2  ;;  %v7445_v13 = vld [vmem:[#allocation10 + $0x328] sm:$0xff]  ;;  %v7448_v18 = vld [vmem:[#allocation10 + $0x340] sm:$0xff]  ;;  %v7278_v31 = vsub.s32 3, %v15612_v10 }
 0x582   : > { %v7321_v42 = vmax.f32 %v7305_v35, 0.0  ;;  %v7329_v43 = vmax.f32 %v7313_v36, 0.0  ;;  %v13033_v8 = vcombine.high %v7433_v3, %v7437_v4  ;;  %v13030_v14 = vcombine.low %v7432_v1, %v7436_v2  ;;  %v7452_v20 = vld [vmem:[#allocation10 + $0x360] sm:$0xff]  ;;  %v7449_v21 = vld [vmem:[#allocation10 + $0x348] sm:$0xff]  ;;  %v7246_v36 = vld [vmem:[#allocation2] sm:$0xff] }
 0x583   : > { %v13032_v15 = vcombine.low %v7433_v3, %v7437_v4  ;;  %v13039_v16 = vcombine.high %v7440_v9, %v7444_v11  ;;  %v13041_v17 = vcombine.high %v7441_v12, %v7445_v13  ;;  %v7453_v22 = vld [vmem:[#allocation10 + $0x368] sm:$0xff]  ;;  %v13038_v24 = vcombine.low %v7440_v9, %v7444_v11  ;;  %v7456_v29 = vld [vmem:[#allocation10 + $0x380] sm:$0xff] }
 0x584   : > { %10471 = vmatpush1.bf16.msra.mxu0 %v12990_v32  ;;  %10643 = vmatpush1.bf16.msra.mxu1 %v12992_v33  ;;  %v15620_v47 = vpack.c.bf16 %v7329_v43, %v7321_v42  ;;  %v13040_v25 = vcombine.low %v7441_v12, %v7445_v13  ;;  %v13047_v26 = vcombine.high %v7448_v18, %v7452_v20  ;;  %v7460_v30 = vld [vmem:[#allocation10 + $0x3a0] sm:$0xff]  ;;  %v7457_v32 = vld [vmem:[#allocation10 + $0x388] sm:$0xff] }
 0x585   : > { %10472 = vmatprep.subr.bf16.mxu0 %v12999_v34  ;;  %10644 = vmatprep.subr.bf16.mxu1 %v13001_v37  ;;  %v13049_v27 = vcombine.high %v7449_v21, %v7453_v22  ;;  %v7461_v33 = vld [vmem:[#allocation10 + $0x3a8] sm:$0xff]  ;;  %v7267_v34 = vrot.slane %v15615_v28, %v7266_v23  ;;  %v13046_v35 = vcombine.low %v7448_v18, %v7452_v20  ;;  %v7254_v37 = vld [vmem:[#allocation2 + $0x40] sm:$0xff]  ;;  %v7468_v42 = vld [vmem:[#allocation10 + $0x3e0] sm:$0xff] }
 0x586   : > { %10490 = vmatprep.mubr.bf16.mxu0 %v15620_v47  ;;  %10662 = vmatprep.mubr.bf16.mxu1 %v15620_v47  ;;  %v13048_v38 = vcombine.low %v7449_v21, %v7453_v22  ;;  %v13055_v39 = vcombine.high %v7456_v29, %v7460_v30  ;;  %v13057_v40 = vcombine.high %v7457_v32, %v7461_v33  ;;  %v7465_v43 = vld [vmem:[#allocation10 + $0x3c8] sm:$0xff]  ;;  %v7480_v3 = vld [vmem:[#allocation10 + $0x440] sm:$0xff] }
 0x587   : > { %v7249_v49 = vld [vmem:[#allocation2 + $0x18] sm:$0xff]  ;;  %v13054_v51 = vcombine.low %v7456_v29, %v7460_v30  ;;  %v13056_v52 = vcombine.low %v7457_v32, %v7461_v33  ;;  %v7484_v4 = vld [vmem:[#allocation10 + $0x460] sm:$0xff] }
 0x588   : > { %10473 = vmatpush1.bf16.msra.mxu0 %v12998_v44  ;;  %10645 = vmatpush1.bf16.msra.mxu1 %v13000_v45  ;;  %v7279_v44 = vrot.slane %v15615_v28, %v7278_v31  ;;  %v7469_v45 = vld [vmem:[#allocation10 + $0x3e8] sm:$0xff]  ;;  %v13079_v13 = vcombine.high %v7480_v3, %v7484_v4  ;;  %v13078_v21 = vcombine.low %v7480_v3, %v7484_v4  ;;  %v7536_v4 = vld [vmem:[#allocation10 + $0x600] sm:$0xff] }
 0x589   : > { %10474 = vmatprep.subr.bf16.mxu0 %v13007_v46  ;;  %10646 = vmatprep.subr.bf16.mxu1 %v13009_v48  ;;  %v7304_v46 = vmul.f32 %v7267_v34, %v7246_v36  ;;  %v7312_v48 = vmul.f32 %v7267_v34, %v7254_v37  ;;  %v7257_v50 = vld [vmem:[#allocation2 + $0x58] sm:$0xff]  ;;  %v7508_v36 = vld [vmem:[#allocation10 + $0x520] sm:$0xff] }
 0x58a   : > { %v7307_v57 = vmul.f32 %v7279_v44, %v7249_v49  ;;  %v7315_v58 = vmul.f32 %v7279_v44, %v7257_v50  ;;  %v7473_v59 = vld [vmem:[#allocation10 + $0x408] sm:$0xff]  ;;  %v7516_v44 = vld [vmem:[#allocation10 + $0x560] sm:$0xff] }
 0x58b   : > { %v7477_v60 = vld [vmem:[#allocation10 + $0x428] sm:$0xff] }
 0x58c   : > { %10475 = vmatpush1.bf16.msra.mxu0 %v13006_v53  ;;  %10647 = vmatpush1.bf16.msra.mxu1 %v13008_v54  ;;  %v13063_v53 = vcombine.high %v7464_v41, %v7468_v42  ;;  %v13065_v54 = vcombine.high %v7465_v43, %v7469_v45  ;;  %v13073_v2 = vcombine.high %v7473_v59, %v7477_v60  ;;  %v7485_v9 = vld [vmem:[#allocation10 + $0x468] sm:$0xff] }
 0x58d   : > { %10476 = vmatprep.subr.bf16.mxu0 %v13015_v55  ;;  %10648 = vmatprep.subr.bf16.mxu1 %v13017_v56  ;;  %v7472_v55 = vld [vmem:[#allocation10 + $0x400] sm:$0xff]  ;;  %v13072_v12 = vcombine.low %v7473_v59, %v7477_v60  ;;  %v7489_v18 = vld [vmem:[#allocation10 + $0x488] sm:$0xff] }
 0x58e   : > { %v7476_v56 = vld [vmem:[#allocation10 + $0x420] sm:$0xff]  ;;  %v7493_v20 = vld [vmem:[#allocation10 + $0x4a8] sm:$0xff] }
 0x58f   : > { %v13071_v1 = vcombine.high %v7472_v55, %v7476_v56  ;;  %v13070_v11 = vcombine.low %v7472_v55, %v7476_v56  ;;  %v7497_v29 = vld [vmem:[#allocation10 + $0x4c8] sm:$0xff]  ;;  %v13088_v33 = vcombine.low %v7489_v18, %v7493_v20  ;;  %v7528_v60 = vld [vmem:[#allocation10 + $0x5c0] sm:$0xff] }
 0x590   : > { %10477 = vmatpush1.bf16.msra.mxu0 %v13014_v61  ;;  %10649 = vmatpush1.bf16.msra.mxu1 %v13016_v62  ;;  %v7320_v61 = vmax.f32 %v7304_v46, 0.0  ;;  %v7328_v62 = vmax.f32 %v7312_v48, 0.0  ;;  %v7501_v30 = vld [vmem:[#allocation10 + $0x4e8] sm:$0xff] }
 0x591   : > { %10478 = vmatprep.subr.bf16.mxu0 %v13023_v63  ;;  %10650 = vmatprep.subr.bf16.mxu1 %v13025_v0  ;;  %v13062_v63 = vcombine.low %v7464_v41, %v7468_v42  ;;  %v13064_v0 = vcombine.low %v7465_v43, %v7469_v45  ;;  %v7505_v37 = vld [vmem:[#allocation10 + $0x508] sm:$0xff]  ;;  %v13096_v41 = vcombine.low %v7497_v29, %v7501_v30  ;;  %v7512_v43 = vld [vmem:[#allocation10 + $0x540] sm:$0xff] }
 0x592   : > { %v7513_v45 = vld [vmem:[#allocation10 + $0x548] sm:$0xff] }
 0x593   : > { %v7517_v48 = vld [vmem:[#allocation10 + $0x568] sm:$0xff] }
 0x594   : > { %10479 = vmatpush1.bf16.msra.mxu0 %v13022_v5  ;;  %10651 = vmatpush1.bf16.msra.mxu1 %v13024_v6  ;;  %v7323_v5 = vmax.f32 %v7307_v57, 0.0  ;;  %v7331_v6 = vmax.f32 %v7315_v58, 0.0  ;;  %v13113_v55 = vcombine.high %v7513_v45, %v7517_v48  ;;  %v7525_v56 = vld [vmem:[#allocation10 + $0x5a8] sm:$0xff]  ;;  %v13110_v57 = vcombine.low %v7512_v43, %v7516_v44 }
 0x595   : > { %10480 = vmatprep.subr.bf16.mxu0 %v13031_v7  ;;  %10652 = vmatprep.subr.bf16.mxu1 %v13033_v8  ;;  %v15632_v7 = vpack.c.bf16 %v7328_v62, %v7320_v61  ;;  %v7481_v8 = vld [vmem:[#allocation10 + $0x448] sm:$0xff]  ;;  %v13112_v58 = vcombine.low %v7513_v45, %v7517_v48  ;;  %v7532_v61 = vld [vmem:[#allocation10 + $0x5e0] sm:$0xff] }
 0x596   : > { %v13080_v22 = vcombine.low %v7481_v8, %v7485_v9  ;;  %v7529_v62 = vld [vmem:[#allocation10 + $0x5c8] sm:$0xff]  ;;  %v13127_v3 = vcombine.high %v7528_v60, %v7532_v61 }
 0x597   : > { %v7569_v45 = vld [vmem:[#allocation10 + $0x708] sm:$0xff] }
 0x598   : > { %10481 = vmatpush1.bf16.msra.mxu0 %v13030_v14  ;;  %10653 = vmatpush1.bf16.msra.mxu1 %v13032_v15  ;;  %v13081_v14 = vcombine.high %v7481_v8, %v7485_v9  ;;  %v7488_v15 = vld [vmem:[#allocation10 + $0x480] sm:$0xff]  ;;  %v7541_v9 = vld [vmem:[#allocation10 + $0x628] sm:$0xff] }
 0x599   : > { %10482 = vmatprep.subr.bf16.mxu0 %v13039_v16  ;;  %10654 = vmatprep.subr.bf16.mxu1 %v13041_v17  ;;  %v7492_v16 = vld [vmem:[#allocation10 + $0x4a0] sm:$0xff]  ;;  %v15634_v17 = vpack.c.bf16 %v7331_v6, %v7323_v5  ;;  %v7537_v6 = vld [vmem:[#allocation10 + $0x608] sm:$0xff] }
 0x59a   : > { %v13086_v32 = vcombine.low %v7488_v15, %v7492_v16  ;;  %v7540_v5 = vld [vmem:[#allocation10 + $0x620] sm:$0xff]  ;;  %v7573_v48 = vld [vmem:[#allocation10 + $0x728] sm:$0xff] }
 0x59c   : > { %10483 = vmatpush1.bf16.msra.mxu0 %v13038_v24  ;;  %10655 = vmatpush1.bf16.msra.mxu1 %v13040_v25  ;;  %v13087_v24 = vcombine.high %v7488_v15, %v7492_v16  ;;  %v7496_v25 = vld [vmem:[#allocation10 + $0x4c0] sm:$0xff]  ;;  %v7545_v16 = vld [vmem:[#allocation10 + $0x648] sm:$0xff] }
 0x59d   : > { %10484 = vmatprep.subr.bf16.mxu0 %v13047_v26  ;;  %10656 = vmatprep.subr.bf16.mxu1 %v13049_v27  ;;  %v13089_v26 = vcombine.high %v7489_v18, %v7493_v20  ;;  %v7500_v27 = vld [vmem:[#allocation10 + $0x4e0] sm:$0xff]  ;;  %v13137_v18 = vcombine.high %v7537_v6, %v7541_v9  ;;  %v7549_v20 = vld [vmem:[#allocation10 + $0x668] sm:$0xff] }
 0x59e   : > { %v13095_v34 = vcombine.high %v7496_v25, %v7500_v27  ;;  %v7548_v15 = vld [vmem:[#allocation10 + $0x660] sm:$0xff] }
 0x5a0   : > { %10485 = vmatpush1.bf16.msra.mxu0 %v13046_v35  ;;  %10657 = vmatpush1.bf16.msra.mxu1 %v13048_v38  ;;  %v7504_v35 = vld [vmem:[#allocation10 + $0x500] sm:$0xff]  ;;  %v13097_v38 = vcombine.high %v7497_v29, %v7501_v30  ;;  %v13145_v29 = vcombine.high %v7545_v16, %v7549_v20  ;;  %v7557_v30 = vld [vmem:[#allocation10 + $0x6a8] sm:$0xff] }
 0x5a1   : > { %10486 = vmatprep.subr.bf16.mxu0 %v13055_v39  ;;  %10658 = vmatprep.subr.bf16.mxu1 %v13057_v40  ;;  %v7509_v39 = vld [vmem:[#allocation10 + $0x528] sm:$0xff]  ;;  %v13094_v40 = vcombine.low %v7496_v25, %v7500_v27  ;;  %v13103_v42 = vcombine.high %v7504_v35, %v7508_v36  ;;  %v13102_v49 = vcombine.low %v7504_v35, %v7508_v36  ;;  %v7552_v25 = vld [vmem:[#allocation10 + $0x680] sm:$0xff] }
 0x5a2   : > { %v13105_v46 = vcombine.high %v7505_v37, %v7509_v39  ;;  %v13104_v50 = vcombine.low %v7505_v37, %v7509_v39  ;;  %v7553_v27 = vld [vmem:[#allocation10 + $0x688] sm:$0xff]  ;;  %v7560_v35 = vld [vmem:[#allocation10 + $0x6c0] sm:$0xff] }
 0x5a3   : > { %v7564_v36 = vld [vmem:[#allocation10 + $0x6e0] sm:$0xff]  ;;  %v7561_v37 = vld [vmem:[#allocation10 + $0x6c8] sm:$0xff] }
 0x5a4   : > { %10487 = vmatpush1.bf16.msra.mxu0 %v13054_v51  ;;  %10659 = vmatpush1.bf16.msra.mxu1 %v13056_v52  ;;  %v13111_v51 = vcombine.high %v7512_v43, %v7516_v44  ;;  %v7520_v52 = vld [vmem:[#allocation10 + $0x580] sm:$0xff]  ;;  %v7565_v39 = vld [vmem:[#allocation10 + $0x6e8] sm:$0xff] }
 0x5a5   : > { %10488 = vmatprep.subr.bf16.mxu0 %v13063_v53  ;;  %10660 = vmatprep.subr.bf16.mxu1 %v13065_v54  ;;  %v7524_v53 = vld [vmem:[#allocation10 + $0x5a0] sm:$0xff]  ;;  %v7521_v54 = vld [vmem:[#allocation10 + $0x588] sm:$0xff] }
 0x5a6   : > { %v13119_v59 = vcombine.high %v7520_v52, %v7524_v53  ;;  %v7568_v43 = vld [vmem:[#allocation10 + $0x700] sm:$0xff] }
 0x5a7   : > { %v7572_v44 = vld [vmem:[#allocation10 + $0x720] sm:$0xff] }
 0x5a8   : > { %10489 = vmatpush1.bf16.msra.mxu0 %v13062_v63  ;;  %10661 = vmatpush1.bf16.msra.mxu1 %v13064_v0  ;;  %v13121_v63 = vcombine.high %v7521_v54, %v7525_v56  ;;  %v7533_v0 = vld [vmem:[#allocation10 + $0x5e8] sm:$0xff] }
 0x5a9   : > { %10501 = vmatprep.subr.bf16.mxu0 %v13071_v1  ;;  %10673 = vmatprep.subr.bf16.mxu1 %v13073_v2  ;;  %v13118_v1 = vcombine.low %v7520_v52, %v7524_v53  ;;  %v13120_v2 = vcombine.low %v7521_v54, %v7525_v56  ;;  %v13129_v8 = vcombine.high %v7529_v62, %v7533_v0  ;;  %v7576_v52 = vld [vmem:[#allocation10 + $0x740] sm:$0xff]  ;;  %v7577_v54 = vld [vmem:[#allocation10 + $0x748] sm:$0xff] }
 0x5aa   : > { %v7580_v53 = vld [vmem:[#allocation10 + $0x760] sm:$0xff]  ;;  %v7581_v56 = vld [vmem:[#allocation10 + $0x768] sm:$0xff] }
 0x5ab   : > { %10491 = vmatmul.mubr.bf16.vlgmr.msra.gmra.mrb[0].mxu0 %v15632_v7  ;;  %10663 = vmatmul.mubr.bf16.vlgmr.msra.gmra.mrb[0].mxu1 %v15632_v7 }
 0x5ac   : > { %10502 = vmatpush1.bf16.msra.mxu0 %v13070_v11  ;;  %10674 = vmatpush1.bf16.msra.mxu1 %v13072_v12  ;;  %v13126_v11 = vcombine.low %v7528_v60, %v7532_v61  ;;  %v13128_v12 = vcombine.low %v7529_v62, %v7533_v0  ;;  %v7588_v60 = vld [vmem:[#allocation10 + $0x7a0] sm:$0xff]  ;;  %v13168_v61 = vcombine.low %v7569_v45, %v7573_v48  ;;  %v7589_v0 = vld [vmem:[#allocation10 + $0x7a8] sm:$0xff] }
 0x5ad   : > { %10503 = vmatprep.subr.bf16.mxu0 %v13079_v13  ;;  %10675 = vmatprep.subr.bf16.mxu1 %v13081_v14  ;;  %v13135_v13 = vcombine.high %v7536_v4, %v7540_v5  ;;  %v7544_v14 = vld [vmem:[#allocation10 + $0x640] sm:$0xff]  ;;  %v13175_v62 = vcombine.high %v7576_v52, %v7580_v53 }
 0x5ae   : > { %10533 = vmatprep.mubr.bf16.mxu0 %v15634_v17  ;;  %10705 = vmatprep.mubr.bf16.mxu1 %v15634_v17 }
 0x5b0   : > { %10504 = vmatpush1.bf16.msra.mxu0 %v13078_v21  ;;  %10676 = vmatpush1.bf16.msra.mxu1 %v13080_v22  ;;  %v13134_v21 = vcombine.low %v7536_v4, %v7540_v5  ;;  %v13136_v22 = vcombine.low %v7537_v6, %v7541_v9  ;;  %v7286_v5 = vsub.s32 5, %v15612_v10  ;;  %v13174_v6 = vcombine.low %v7576_v52, %v7580_v53  ;;  %v7596_v9 = vld [vmem:[#allocation10 + $0x7e0] sm:$0xff] }
 0x5b1   : > { %10505 = vmatprep.subr.bf16.mxu0 %v13087_v24  ;;  %10677 = vmatprep.subr.bf16.mxu1 %v13089_v26  ;;  %v13143_v24 = vcombine.high %v7544_v14, %v7548_v15  ;;  %v7556_v26 = vld [vmem:[#allocation10 + $0x6a0] sm:$0xff] }
 0x5b2   : > { %v7616_v52 = vld [vmem:[#allocation10 + $0x880] sm:$0xff] }
 0x5b3   : > { %v7620_v53 = vld [vmem:[#allocation10 + $0x8a0] sm:$0xff] }
 0x5b4   : > { %10506 = vmatpush1.bf16.msra.mxu0 %v13086_v32  ;;  %10678 = vmatpush1.bf16.msra.mxu1 %v13088_v33  ;;  %v13142_v32 = vcombine.low %v7544_v14, %v7548_v15  ;;  %v13144_v33 = vcombine.low %v7545_v16, %v7549_v20  ;;  %v7597_v14 = vld [vmem:[#allocation10 + $0x7e8] sm:$0xff]  ;;  %v7251_v15 = vld [vmem:[#allocation2 + $0x28] sm:$0xff] }
 0x5b5   : > { %10507 = vmatprep.subr.bf16.mxu0 %v13095_v34  ;;  %10679 = vmatprep.subr.bf16.mxu1 %v13097_v38  ;;  %v13151_v34 = vcombine.high %v7552_v25, %v7556_v26  ;;  %v13153_v38 = vcombine.high %v7553_v27, %v7557_v30 }
 0x5b8   : > { %10508 = vmatpush1.bf16.msra.mxu0 %v13094_v40  ;;  %10680 = vmatpush1.bf16.msra.mxu1 %v13096_v41  ;;  %v13150_v40 = vcombine.low %v7552_v25, %v7556_v26  ;;  %v13152_v41 = vcombine.low %v7553_v27, %v7557_v30  ;;  %v7600_v25 = vld [vmem:[#allocation10 + $0x800] sm:$0xff] }
 0x5b9   : > { %10509 = vmatprep.subr.bf16.mxu0 %v13103_v42  ;;  %10681 = vmatprep.subr.bf16.mxu1 %v13105_v46  ;;  %v13159_v42 = vcombine.high %v7560_v35, %v7564_v36  ;;  %v13161_v46 = vcombine.high %v7561_v37, %v7565_v39  ;;  %v7604_v30 = vld [vmem:[#allocation10 + $0x820] sm:$0xff] }
 0x5bc   : > { %10510 = vmatpush1.bf16.msra.mxu0 %v13102_v49  ;;  %10682 = vmatpush1.bf16.msra.mxu1 %v13104_v50  ;;  %v13158_v49 = vcombine.low %v7560_v35, %v7564_v36  ;;  %v13160_v50 = vcombine.low %v7561_v37, %v7565_v39  ;;  %v13199_v39 = vcombine.high %v7600_v25, %v7604_v30 }
 0x5bd   : > { %10511 = vmatprep.subr.bf16.mxu0 %v13111_v51  ;;  %10683 = vmatprep.subr.bf16.mxu1 %v13113_v55  ;;  %v13167_v51 = vcombine.high %v7568_v43, %v7572_v44  ;;  %v13169_v55 = vcombine.high %v7569_v45, %v7573_v48  ;;  %v7613_v48 = vld [vmem:[#allocation10 + $0x868] sm:$0xff] }
 0x5c0   : > { %10512 = vmatpush1.bf16.msra.mxu0 %v13110_v57  ;;  %10684 = vmatpush1.bf16.msra.mxu1 %v13112_v58  ;;  %v7274_v57 = vsub.s32 2, %v15612_v10  ;;  %v13166_v58 = vcombine.low %v7568_v43, %v7572_v44  ;;  %v7609_v43 = vld [vmem:[#allocation10 + $0x848] sm:$0xff] }
 0x5c1   : > { %10513 = vmatprep.subr.bf16.mxu0 %v13119_v59  ;;  %10685 = vmatprep.subr.bf16.mxu1 %v13121_v63  ;;  %v7584_v59 = vld [vmem:[#allocation10 + $0x780] sm:$0xff]  ;;  %v7585_v63 = vld [vmem:[#allocation10 + $0x788] sm:$0xff] }
 0x5c2   : > { %v7275_v4 = vrot.slane %v15615_v28, %v7274_v57  ;;  %v13185_v16 = vcombine.high %v7585_v63, %v7589_v0  ;;  %v13184_v26 = vcombine.low %v7585_v63, %v7589_v0  ;;  %v7628_v63 = vld [vmem:[#allocation10 + $0x8e0] sm:$0xff]  ;;  %v7625_v0 = vld [vmem:[#allocation10 + $0x8c8] sm:$0xff] }
 0x5c4   : > { %10514 = vmatpush1.bf16.msra.mxu0 %v13118_v1  ;;  %10686 = vmatpush1.bf16.msra.mxu1 %v13120_v2  ;;  %v7248_v1 = vld [vmem:[#allocation2 + $0x10] sm:$0xff]  ;;  %v13177_v2 = vcombine.high %v7577_v54, %v7581_v56 }
 0x5c5   : > { %10515 = vmatprep.subr.bf16.mxu0 %v13127_v3  ;;  %10687 = vmatprep.subr.bf16.mxu1 %v13129_v8  ;;  %v7256_v3 = vld [vmem:[#allocation2 + $0x50] sm:$0xff] }
 0x5c6   : > { %v7592_v8 = vld [vmem:[#allocation10 + $0x7c0] sm:$0xff]  ;;  %v7314_v20 = vmul.f32 %v7275_v4, %v7256_v3  ;;  %v13214_v3 = vcombine.low %v7616_v52, %v7620_v53 }
 0x5c7   : > { %v13191_v27 = vcombine.high %v7592_v8, %v7596_v9 }
 0x5c8   : > { %10516 = vmatpush1.bf16.msra.mxu0 %v13126_v11  ;;  %10688 = vmatpush1.bf16.msra.mxu1 %v13128_v12  ;;  %v13176_v11 = vcombine.low %v7577_v54, %v7581_v56  ;;  %v13183_v12 = vcombine.high %v7584_v59, %v7588_v60  ;;  %v7330_v35 = vmax.f32 %v7314_v20, 0.0  ;;  %v13209_v54 = vcombine.high %v7609_v43, %v7613_v48  ;;  %v7621_v56 = vld [vmem:[#allocation10 + $0x8a8] sm:$0xff]  ;;  %v7640_v20 = vld [vmem:[#allocation10 + $0x940] sm:$0xff] }
 0x5c9   : > { %10517 = vmatprep.subr.bf16.mxu0 %v13135_v13  ;;  %10689 = vmatprep.subr.bf16.mxu1 %v13137_v18  ;;  %v7593_v13 = vld [vmem:[#allocation10 + $0x7c8] sm:$0xff]  ;;  %v7306_v18 = vmul.f32 %v7275_v4, %v7248_v1 }
 0x5cc   : > { %10518 = vmatpush1.bf16.msra.mxu0 %v13134_v21  ;;  %10690 = vmatpush1.bf16.msra.mxu1 %v13136_v22  ;;  %v7259_v21 = vld [vmem:[#allocation2 + $0x68] sm:$0xff]  ;;  %v7287_v22 = vrot.slane %v15615_v28, %v7286_v5  ;;  %v13192_v28 = vcombine.low %v7593_v13, %v7597_v14 }
 0x5cd   : > { %10519 = vmatprep.subr.bf16.mxu0 %v13143_v24  ;;  %10691 = vmatprep.subr.bf16.mxu1 %v13145_v29  ;;  %v13182_v24 = vcombine.low %v7584_v59, %v7588_v60  ;;  %v13193_v29 = vcombine.high %v7593_v13, %v7597_v14  ;;  %v13208_v60 = vcombine.low %v7609_v43, %v7613_v48  ;;  %v7637_v13 = vld [vmem:[#allocation10 + $0x928] sm:$0xff]  ;;  %v7664_v48 = vld [vmem:[#allocation10 + $0xa00] sm:$0xff] }
 0x5ce   : > { %v7309_v36 = vmul.f32 %v7287_v22, %v7251_v15  ;;  %v7317_v37 = vmul.f32 %v7287_v22, %v7259_v21  ;;  %v7644_v21 = vld [vmem:[#allocation10 + $0x960] sm:$0xff]  ;;  %v7641_v22 = vld [vmem:[#allocation10 + $0x948] sm:$0xff] }
 0x5d0   : > { %10520 = vmatpush1.bf16.msra.mxu0 %v13142_v32  ;;  %10692 = vmatpush1.bf16.msra.mxu1 %v13144_v33  ;;  %v7601_v32 = vld [vmem:[#allocation10 + $0x808] sm:$0xff]  ;;  %v7325_v44 = vmax.f32 %v7309_v36, 0.0  ;;  %v7333_v45 = vmax.f32 %v7317_v37, 0.0 }
 0x5d1   : > { %10521 = vmatprep.subr.bf16.mxu0 %v13151_v34  ;;  %10693 = vmatprep.subr.bf16.mxu1 %v13153_v38  ;;  %v7605_v33 = vld [vmem:[#allocation10 + $0x828] sm:$0xff]  ;;  %v7322_v34 = vmax.f32 %v7306_v18, 0.0  ;;  %v13190_v38 = vcombine.low %v7592_v8, %v7596_v9  ;;  %v7632_v9 = vld [vmem:[#allocation10 + $0x900] sm:$0xff] }
 0x5d4   : > { %10522 = vmatpush1.bf16.msra.mxu0 %v13150_v40  ;;  %10694 = vmatpush1.bf16.msra.mxu1 %v13152_v41  ;;  %v13201_v40 = vcombine.high %v7601_v32, %v7605_v33  ;;  %v7608_v41 = vld [vmem:[#allocation10 + $0x840] sm:$0xff] }
 0x5d5   : > { %10523 = vmatprep.subr.bf16.mxu0 %v13159_v42  ;;  %10695 = vmatprep.subr.bf16.mxu1 %v13161_v46  ;;  %v7612_v42 = vld [vmem:[#allocation10 + $0x860] sm:$0xff]  ;;  %v15648_v46 = vpack.c.bf16 %v7330_v35, %v7322_v34  ;;  %v7653_v34 = vld [vmem:[#allocation10 + $0x9a8] sm:$0xff]  ;;  %v13238_v35 = vcombine.low %v7640_v20, %v7644_v21 }
 0x5d6   : > { %v13206_v59 = vcombine.low %v7608_v41, %v7612_v42 }
 0x5d8   : > { %10524 = vmatpush1.bf16.msra.mxu0 %v13158_v49  ;;  %10696 = vmatpush1.bf16.msra.mxu1 %v13160_v50  ;;  %v13198_v49 = vcombine.low %v7600_v25, %v7604_v30  ;;  %v13200_v50 = vcombine.low %v7601_v32, %v7605_v33  ;;  %v7648_v30 = vld [vmem:[#allocation10 + $0x980] sm:$0xff]  ;;  %v7649_v33 = vld [vmem:[#allocation10 + $0x988] sm:$0xff] }
 0x5d9   : > { %10525 = vmatprep.subr.bf16.mxu0 %v13167_v51  ;;  %10697 = vmatprep.subr.bf16.mxu1 %v13169_v55  ;;  %v13207_v51 = vcombine.high %v7608_v41, %v7612_v42  ;;  %v7617_v55 = vld [vmem:[#allocation10 + $0x888] sm:$0xff]  ;;  %v7652_v32 = vld [vmem:[#allocation10 + $0x9a0] sm:$0xff]  ;;  %v13248_v43 = vcombine.low %v7649_v33, %v7653_v34 }
 0x5da   : > { %v13217_v1 = vcombine.high %v7617_v55, %v7621_v56  ;;  %v13216_v4 = vcombine.low %v7617_v55, %v7621_v56  ;;  %v13247_v37 = vcombine.high %v7648_v30, %v7652_v32  ;;  %v7661_v41 = vld [vmem:[#allocation10 + $0x9e8] sm:$0xff]  ;;  %v13246_v42 = vcombine.low %v7648_v30, %v7652_v32  ;;  %v7672_v56 = vld [vmem:[#allocation10 + $0xa40] sm:$0xff] }
 0x5dc   : > { %10526 = vmatpush1.bf16.msra.mxu0 %v13166_v58  ;;  %10698 = vmatpush1.bf16.msra.mxu1 %v13168_v61  ;;  %v15650_v58 = vpack.c.bf16 %v7333_v45, %v7325_v44  ;;  %v13215_v61 = vcombine.high %v7616_v52, %v7620_v53 }
 0x5dd   : > { %10527 = vmatprep.subr.bf16.mxu0 %v13175_v62  ;;  %10699 = vmatprep.subr.bf16.mxu1 %v13177_v2  ;;  %v7624_v62 = vld [vmem:[#allocation10 + $0x8c0] sm:$0xff]  ;;  %v7629_v2 = vld [vmem:[#allocation10 + $0x8e8] sm:$0xff] }
 0x5de   : > { %v13225_v8 = vcombine.high %v7625_v0, %v7629_v2  ;;  %v13222_v14 = vcombine.low %v7624_v62, %v7628_v63  ;;  %v13224_v15 = vcombine.low %v7625_v0, %v7629_v2  ;;  %v7680_v2 = vld [vmem:[#allocation10 + $0xa80] sm:$0xff] }
 0x5e0   : > { %10528 = vmatpush1.bf16.msra.mxu0 %v13174_v6  ;;  %10700 = vmatpush1.bf16.msra.mxu1 %v13176_v11  ;;  %v13223_v6 = vcombine.high %v7624_v62, %v7628_v63  ;;  %v7636_v11 = vld [vmem:[#allocation10 + $0x920] sm:$0xff] }
 0x5e1   : > { %10529 = vmatprep.subr.bf16.mxu0 %v13183_v12  ;;  %10701 = vmatprep.subr.bf16.mxu1 %v13185_v16  ;;  %v7633_v12 = vld [vmem:[#allocation10 + $0x908] sm:$0xff]  ;;  %v13231_v16 = vcombine.high %v7632_v9, %v7636_v11  ;;  %v13230_v25 = vcombine.low %v7632_v9, %v7636_v11 }
 0x5e2   : > { %v13233_v18 = vcombine.high %v7633_v12, %v7637_v13 }
 0x5e4   : > { %10530 = vmatpush1.bf16.msra.mxu0 %v13182_v24  ;;  %10702 = vmatpush1.bf16.msra.mxu1 %v13184_v26  ;;  %v7645_v24 = vld [vmem:[#allocation10 + $0x968] sm:$0xff]  ;;  %v13232_v26 = vcombine.low %v7633_v12, %v7637_v13  ;;  %v7688_v13 = vld [vmem:[#allocation10 + $0xac0] sm:$0xff] }
 0x5e5   : > { %10531 = vmatprep.subr.bf16.mxu0 %v13191_v27  ;;  %10703 = vmatprep.subr.bf16.mxu1 %v13193_v29  ;;  %v13239_v27 = vcombine.high %v7640_v20, %v7644_v21  ;;  %v13241_v29 = vcombine.high %v7641_v22, %v7645_v24  ;;  %v13240_v36 = vcombine.low %v7641_v22, %v7645_v24  ;;  %v7696_v24 = vld [vmem:[#allocation10 + $0xb00] sm:$0xff] }
 0x5e8   : > { %10532 = vmatpush1.bf16.msra.mxu0 %v13190_v38  ;;  %10704 = vmatpush1.bf16.msra.mxu1 %v13192_v28  ;;  %v13249_v38 = vcombine.high %v7649_v33, %v7653_v34  ;;  %v7656_v28 = vld [vmem:[#allocation10 + $0x9c0] sm:$0xff] }
 0x5e9   : > { %10544 = vmatprep.subr.bf16.mxu0 %v13199_v39  ;;  %10716 = vmatprep.subr.bf16.mxu1 %v13201_v40  ;;  %v7660_v39 = vld [vmem:[#allocation10 + $0x9e0] sm:$0xff]  ;;  %v7657_v40 = vld [vmem:[#allocation10 + $0x9c8] sm:$0xff] }
 0x5ea   : > { %v13255_v44 = vcombine.high %v7656_v28, %v7660_v39  ;;  %v13257_v45 = vcombine.high %v7657_v40, %v7661_v41  ;;  %v13254_v52 = vcombine.low %v7656_v28, %v7660_v39  ;;  %v13256_v53 = vcombine.low %v7657_v40, %v7661_v41  ;;  %v7704_v34 = vld [vmem:[#allocation10 + $0xb40] sm:$0xff] }
 0x5eb   : > { %10534 = vmatmul.mubr.bf16.vlgmr.msra.gmra.mrb[0].mxu0 %v15648_v46  ;;  %10706 = vmatmul.mubr.bf16.vlgmr.msra.gmra.mrb[0].mxu1 %v15648_v46 }
 0x5ec   : > { %10545 = vmatpush1.bf16.msra.mxu0 %v13198_v49  ;;  %10717 = vmatpush1.bf16.msra.mxu1 %v13200_v50  ;;  %v7668_v49 = vld [vmem:[#allocation10 + $0xa20] sm:$0xff]  ;;  %v7665_v50 = vld [vmem:[#allocation10 + $0xa08] sm:$0xff] }
 0x5ed   : > { %10546 = vmatprep.subr.bf16.mxu0 %v13207_v51  ;;  %10718 = vmatprep.subr.bf16.mxu1 %v13209_v54  ;;  %v7669_v51 = vld [vmem:[#allocation10 + $0xa28] sm:$0xff]  ;;  %v13263_v54 = vcombine.high %v7664_v48, %v7668_v49  ;;  %v13262_v62 = vcombine.low %v7664_v48, %v7668_v49  ;;  %v15658_v49 = vld [vmem:[#allocation7] sm:$0xff] }
 0x5ee   : > { %10576 = vmatprep.mubr.bf16.mxu0 %v15650_v58  ;;  %10748 = vmatprep.mubr.bf16.mxu1 %v15650_v58  ;;  %v13265_v55 = vcombine.high %v7665_v50, %v7669_v51  ;;  %v13264_v63 = vcombine.low %v7665_v50, %v7669_v51  ;;  %v7717_v48 = vld [vmem:[#allocation10 + $0xba8] sm:$0xff] }
 0x5f0   : > { %10547 = vmatpush1.bf16.msra.mxu0 %v13206_v59  ;;  %10719 = vmatpush1.bf16.msra.mxu1 %v13208_v60  ;;  %v7676_v59 = vld [vmem:[#allocation10 + $0xa60] sm:$0xff]  ;;  %v7673_v60 = vld [vmem:[#allocation10 + $0xa48] sm:$0xff] }
 0x5f1   : > { %10548 = vmatprep.subr.bf16.mxu0 %v13215_v61  ;;  %10720 = vmatprep.subr.bf16.mxu1 %v13217_v1  ;;  %v7677_v61 = vld [vmem:[#allocation10 + $0xa68] sm:$0xff]  ;;  %v13271_v0 = vcombine.high %v7672_v56, %v7676_v59 }
 0x5f2   : > { %v13273_v1 = vcombine.high %v7673_v60, %v7677_v61  ;;  %v13272_v9 = vcombine.low %v7673_v60, %v7677_v61  ;;  %v7724_v60 = vld [vmem:[#allocation10 + $0xbe0] sm:$0xff]  ;;  %v7721_v61 = vld [vmem:[#allocation10 + $0xbc8] sm:$0xff] }
 0x5f4   : > { %10549 = vmatpush1.bf16.msra.mxu0 %v13214_v3  ;;  %10721 = vmatpush1.bf16.msra.mxu1 %v13216_v4  ;;  %v7684_v3 = vld [vmem:[#allocation10 + $0xaa0] sm:$0xff]  ;;  %v7681_v4 = vld [vmem:[#allocation10 + $0xa88] sm:$0xff] }
 0x5f5   : > { %10550 = vmatprep.subr.bf16.mxu0 %v13223_v6  ;;  %10722 = vmatprep.subr.bf16.mxu1 %v13225_v8  ;;  %v7685_v6 = vld [vmem:[#allocation10 + $0xaa8] sm:$0xff]  ;;  %v13270_v8 = vcombine.low %v7672_v56, %v7676_v59  ;;  %v13279_v11 = vcombine.high %v7680_v2, %v7684_v3  ;;  %v7720_v59 = vld [vmem:[#allocation10 + $0xbc0] sm:$0xff] }
 0x5f6   : > { %v13281_v12 = vcombine.high %v7681_v4, %v7685_v6  ;;  %v13280_v20 = vcombine.low %v7681_v4, %v7685_v6 }
 0x5f8   : > { %10551 = vmatpush1.bf16.msra.mxu0 %v13222_v14  ;;  %10723 = vmatpush1.bf16.msra.mxu1 %v13224_v15  ;;  %v7692_v14 = vld [vmem:[#allocation10 + $0xae0] sm:$0xff]  ;;  %v7689_v15 = vld [vmem:[#allocation10 + $0xac8] sm:$0xff] }
 0x5f9   : > { %10552 = vmatprep.subr.bf16.mxu0 %v13231_v16  ;;  %10724 = vmatprep.subr.bf16.mxu1 %v13233_v18  ;;  %v7693_v16 = vld [vmem:[#allocation10 + $0xae8] sm:$0xff]  ;;  %v13278_v18 = vcombine.low %v7680_v2, %v7684_v3  ;;  %v13287_v21 = vcombine.high %v7688_v13, %v7692_v14 }
 0x5fa   : > { %v13289_v22 = vcombine.high %v7689_v15, %v7693_v16  ;;  %v13288_v30 = vcombine.low %v7689_v15, %v7693_v16  ;;  %v7253_v2 = vld [vmem:[#allocation2 + $0x38] sm:$0xff] }
 0x5fb   : > { %v7261_v3 = vld [vmem:[#allocation2 + $0x78] sm:$0xff] }
 0x5fc   : > { %10553 = vmatpush1.bf16.msra.mxu0 %v13230_v25  ;;  %10725 = vmatpush1.bf16.msra.mxu1 %v13232_v26  ;;  %v7700_v25 = vld [vmem:[#allocation10 + $0xb20] sm:$0xff]  ;;  %v7697_v26 = vld [vmem:[#allocation10 + $0xb08] sm:$0xff] }
 0x5fd   : > { %10554 = vmatprep.subr.bf16.mxu0 %v13239_v27  ;;  %10726 = vmatprep.subr.bf16.mxu1 %v13241_v29  ;;  %v7701_v27 = vld [vmem:[#allocation10 + $0xb28] sm:$0xff]  ;;  %v13286_v29 = vcombine.low %v7688_v13, %v7692_v14  ;;  %v13295_v32 = vcombine.high %v7696_v24, %v7700_v25  ;;  %v13294_v28 = vcombine.low %v7696_v24, %v7700_v25 }
 0x5fe   : > { %v13297_v33 = vcombine.high %v7697_v26, %v7701_v27  ;;  %v13296_v39 = vcombine.low %v7697_v26, %v7701_v27  ;;  %v7729_v15 = vld [vmem:[#allocation10 + $0xc08] sm:$0xff]  ;;  %v7736_v26 = vld [vmem:[#allocation10 + $0xc40] sm:$0xff] }
 0x5ff   : > { %v7733_v16 = vld [vmem:[#allocation10 + $0xc28] sm:$0xff]  ;;  %v7740_v27 = vld [vmem:[#allocation10 + $0xc60] sm:$0xff] }
 0x600   : > { %10555 = vmatpush1.bf16.msra.mxu0 %v13238_v35  ;;  %10727 = vmatpush1.bf16.msra.mxu1 %v13240_v36  ;;  %v7708_v35 = vld [vmem:[#allocation10 + $0xb60] sm:$0xff]  ;;  %v7705_v36 = vld [vmem:[#allocation10 + $0xb48] sm:$0xff]  ;;  %v13329_v25 = vcombine.high %v7729_v15, %v7733_v16 }
 0x601   : > { %10556 = vmatprep.subr.bf16.mxu0 %v13247_v37  ;;  %10728 = vmatprep.subr.bf16.mxu1 %v13249_v38  ;;  %v7709_v37 = vld [vmem:[#allocation10 + $0xb68] sm:$0xff]  ;;  %v7282_v38 = vsub.s32 4, %v15612_v10  ;;  %v13303_v40 = vcombine.high %v7704_v34, %v7708_v35  ;;  %v13302_v51 = vcombine.low %v7704_v34, %v7708_v35 }
 0x602   : > { %v13305_v41 = vcombine.high %v7705_v36, %v7709_v37  ;;  %v7741_v34 = vld [vmem:[#allocation10 + $0xc68] sm:$0xff] }
 0x603   : > { %v7283_v50 = vrot.slane %v15658_v49, %v7282_v38 }
 0x604   : > { %10557 = vmatpush1.bf16.msra.mxu0 %v13246_v42  ;;  %10729 = vmatpush1.bf16.msra.mxu1 %v13248_v43  ;;  %v7712_v42 = vld [vmem:[#allocation10 + $0xb80] sm:$0xff] }
 0x605   : > { %10558 = vmatprep.subr.bf16.mxu0 %v13255_v44  ;;  %10730 = vmatprep.subr.bf16.mxu1 %v13257_v45  ;;  %v7716_v43 = vld [vmem:[#allocation10 + $0xba0] sm:$0xff]  ;;  %v7294_v44 = vsub.s32 7, %v15612_v10  ;;  %v7713_v45 = vld [vmem:[#allocation10 + $0xb88] sm:$0xff] }
 0x606   : > { %v13313_v56 = vcombine.high %v7713_v45, %v7717_v48  ;;  %v13310_v4 = vcombine.low %v7712_v42, %v7716_v43  ;;  %v13312_v6 = vcombine.low %v7713_v45, %v7717_v48  ;;  %v13334_v45 = vcombine.low %v7736_v26, %v7740_v27 }
 0x608   : > { %10559 = vmatpush1.bf16.msra.mxu0 %v13254_v52  ;;  %10731 = vmatpush1.bf16.msra.mxu1 %v13256_v53  ;;  %v7250_v52 = vld [vmem:[#allocation2 + $0x20] sm:$0xff] }
 0x609   : > { %10560 = vmatprep.subr.bf16.mxu0 %v13263_v54  ;;  %10732 = vmatprep.subr.bf16.mxu1 %v13265_v55  ;;  %v7258_v53 = vld [vmem:[#allocation2 + $0x60] sm:$0xff]  ;;  %v13304_v54 = vcombine.low %v7705_v36, %v7709_v37  ;;  %v13311_v55 = vcombine.high %v7712_v42, %v7716_v43  ;;  %v13328_v36 = vcombine.low %v7729_v15, %v7733_v16  ;;  %v7745_v42 = vld [vmem:[#allocation10 + $0xc88] sm:$0xff] }
 0x60a   : > { %v13335_v37 = vcombine.high %v7736_v26, %v7740_v27  ;;  %v7749_v43 = vld [vmem:[#allocation10 + $0xca8] sm:$0xff] }
 0x60c   : > { %10561 = vmatpush1.bf16.msra.mxu0 %v13262_v62  ;;  %10733 = vmatpush1.bf16.msra.mxu1 %v13264_v63  ;;  %v7295_v62 = vrot.slane %v15658_v49, %v7294_v44  ;;  %v7725_v63 = vld [vmem:[#allocation10 + $0xbe8] sm:$0xff] }
 0x60d   : > { %10562 = vmatprep.subr.bf16.mxu0 %v13271_v0  ;;  %10734 = vmatprep.subr.bf16.mxu1 %v13273_v1  ;;  %v7308_v0 = vmul.f32 %v7283_v50, %v7250_v52  ;;  %v7316_v1 = vmul.f32 %v7283_v50, %v7258_v53  ;;  %v7752_v52 = vld [vmem:[#allocation10 + $0xcc0] sm:$0xff] }
 0x60e   : > { %v7311_v13 = vmul.f32 %v7295_v62, %v7253_v2  ;;  %v7319_v14 = vmul.f32 %v7295_v62, %v7261_v3  ;;  %v7756_v53 = vld [vmem:[#allocation10 + $0xce0] sm:$0xff] }
 0x60f   : > { %v7760_v62 = vld [vmem:[#allocation10 + $0xd00] sm:$0xff]  ;;  %v13350_v2 = vcombine.low %v7752_v52, %v7756_v53 }
 0x610   : > { %10563 = vmatpush1.bf16.msra.mxu0 %v13270_v8  ;;  %10735 = vmatpush1.bf16.msra.mxu1 %v13272_v9  ;;  %v13319_v8 = vcombine.high %v7720_v59, %v7724_v60  ;;  %v13321_v9 = vcombine.high %v7721_v61, %v7725_v63 }
 0x611   : > { %10564 = vmatprep.subr.bf16.mxu0 %v13279_v11  ;;  %10736 = vmatprep.subr.bf16.mxu1 %v13281_v12  ;;  %v7728_v11 = vld [vmem:[#allocation10 + $0xc00] sm:$0xff] }
 0x612   : > { %v7732_v12 = vld [vmem:[#allocation10 + $0xc20] sm:$0xff] }
 0x613   : > { %v13327_v24 = vcombine.high %v7728_v11, %v7732_v12  ;;  %v13326_v35 = vcombine.low %v7728_v11, %v7732_v12  ;;  %v7769_v11 = vld [vmem:[#allocation10 + $0xd48] sm:$0xff] }
 0x614   : > { %10565 = vmatpush1.bf16.msra.mxu0 %v13278_v18  ;;  %10737 = vmatpush1.bf16.msra.mxu1 %v13280_v20  ;;  %v7324_v18 = vmax.f32 %v7308_v0, 0.0  ;;  %v7332_v20 = vmax.f32 %v7316_v1, 0.0  ;;  %v7761_v0 = vld [vmem:[#allocation10 + $0xd08] sm:$0xff] }
 0x615   : > { %10566 = vmatprep.subr.bf16.mxu0 %v13287_v21  ;;  %10738 = vmatprep.subr.bf16.mxu1 %v13289_v22  ;;  %v13318_v21 = vcombine.low %v7720_v59, %v7724_v60  ;;  %v13320_v22 = vcombine.low %v7721_v61, %v7725_v63  ;;  %v13344_v59 = vcombine.low %v7745_v42, %v7749_v43  ;;  %v7764_v63 = vld [vmem:[#allocation10 + $0xd20] sm:$0xff]  ;;  %v7765_v1 = vld [vmem:[#allocation10 + $0xd28] sm:$0xff] }
 0x616   : > { %v13351_v60 = vcombine.high %v7752_v52, %v7756_v53  ;;  %v7773_v12 = vld [vmem:[#allocation10 + $0xd68] sm:$0xff]  ;;  %v7800_v52 = vld [vmem:[#allocation10 + $0xe40] sm:$0xff] }
 0x617   : > { %v13369_v16 = vcombine.high %v7769_v11, %v7773_v12  ;;  %v7804_v53 = vld [vmem:[#allocation10 + $0xe60] sm:$0xff] }
 0x618   : > { %10567 = vmatpush1.bf16.msra.mxu0 %v13286_v29  ;;  %10739 = vmatpush1.bf16.msra.mxu1 %v13288_v30  ;;  %v7327_v29 = vmax.f32 %v7311_v13, 0.0  ;;  %v7335_v30 = vmax.f32 %v7319_v14, 0.0  ;;  %v13358_v13 = vcombine.low %v7760_v62, %v7764_v63  ;;  %v13360_v14 = vcombine.low %v7761_v0, %v7765_v1 }
 0x619   : > { %10568 = vmatprep.subr.bf16.mxu0 %v13295_v32  ;;  %10740 = vmatprep.subr.bf16.mxu1 %v13297_v33  ;;  %v15666_v32 = vpack.c.bf16 %v7332_v20, %v7324_v18  ;;  %v7737_v33 = vld [vmem:[#allocation10 + $0xc48] sm:$0xff]  ;;  %v7776_v18 = vld [vmem:[#allocation10 + $0xd80] sm:$0xff] }
 0x61a   : > { %v13336_v48 = vcombine.low %v7737_v33, %v7741_v34  ;;  %v7780_v20 = vld [vmem:[#allocation10 + $0xda0] sm:$0xff] }
 0x61b   : > { %v13375_v26 = vcombine.high %v7776_v18, %v7780_v20 }
 0x61c   : > { %10569 = vmatpush1.bf16.msra.mxu0 %v13294_v28  ;;  %10741 = vmatpush1.bf16.msra.mxu1 %v13296_v39  ;;  %v13337_v28 = vcombine.high %v7737_v33, %v7741_v34  ;;  %v7744_v39 = vld [vmem:[#allocation10 + $0xc80] sm:$0xff]  ;;  %v7785_v33 = vld [vmem:[#allocation10 + $0xdc8] sm:$0xff] }
 0x61d   : > { %10570 = vmatprep.subr.bf16.mxu0 %v13303_v40  ;;  %10742 = vmatprep.subr.bf16.mxu1 %v13305_v41  ;;  %v7748_v40 = vld [vmem:[#allocation10 + $0xca0] sm:$0xff]  ;;  %v15668_v41 = vpack.c.bf16 %v7335_v30, %v7327_v29  ;;  %v7789_v34 = vld [vmem:[#allocation10 + $0xde8] sm:$0xff] }
 0x61e   : > { %v13343_v50 = vcombine.high %v7744_v39, %v7748_v40  ;;  %v7784_v29 = vld [vmem:[#allocation10 + $0xdc0] sm:$0xff] }
 0x61f   : > { %v7788_v30 = vld [vmem:[#allocation10 + $0xde0] sm:$0xff] }
 0x620   : > { %10571 = vmatpush1.bf16.msra.mxu0 %v13302_v51  ;;  %10743 = vmatpush1.bf16.msra.mxu1 %v13304_v54  ;;  %v13345_v51 = vcombine.high %v7745_v42, %v7749_v43  ;;  %v7753_v54 = vld [vmem:[#allocation10 + $0xcc8] sm:$0xff] }
 0x621   : > { %10572 = vmatprep.subr.bf16.mxu0 %v13311_v55  ;;  %10744 = vmatprep.subr.bf16.mxu1 %v13313_v56  ;;  %v7757_v55 = vld [vmem:[#allocation10 + $0xce8] sm:$0xff]  ;;  %v13342_v56 = vcombine.low %v7744_v39, %v7748_v40  ;;  %v7792_v39 = vld [vmem:[#allocation10 + $0xe00] sm:$0xff] }
 0x622   : > { %v13353_v61 = vcombine.high %v7753_v54, %v7757_v55  ;;  %v13352_v3 = vcombine.low %v7753_v54, %v7757_v55  ;;  %v7796_v40 = vld [vmem:[#allocation10 + $0xe20] sm:$0xff]  ;;  %v7793_v42 = vld [vmem:[#allocation10 + $0xe08] sm:$0xff] }
 0x623   : > { %v7797_v43 = vld [vmem:[#allocation10 + $0xe28] sm:$0xff] }
 0x624   : > { %10573 = vmatpush1.bf16.msra.mxu0 %v13310_v4  ;;  %10745 = vmatpush1.bf16.msra.mxu1 %v13312_v6  ;;  %v13359_v4 = vcombine.high %v7760_v62, %v7764_v63  ;;  %v13361_v6 = vcombine.high %v7761_v0, %v7765_v1  ;;  %v7801_v54 = vld [vmem:[#allocation10 + $0xe48] sm:$0xff]  ;;  %v7808_v62 = vld [vmem:[#allocation10 + $0xe80] sm:$0xff] }
 0x625   : > { %10574 = vmatprep.subr.bf16.mxu0 %v13319_v8  ;;  %10746 = vmatprep.subr.bf16.mxu1 %v13321_v9  ;;  %v7768_v8 = vld [vmem:[#allocation10 + $0xd40] sm:$0xff]  ;;  %v7805_v55 = vld [vmem:[#allocation10 + $0xe68] sm:$0xff] }
 0x626   : > { %v7772_v9 = vld [vmem:[#allocation10 + $0xd60] sm:$0xff]  ;;  %v7809_v0 = vld [vmem:[#allocation10 + $0xe88] sm:$0xff] }
 0x627   : > { %v13367_v15 = vcombine.high %v7768_v8, %v7772_v9  ;;  %v7812_v63 = vld [vmem:[#allocation10 + $0xea0] sm:$0xff]  ;;  %v7813_v1 = vld [vmem:[#allocation10 + $0xea8] sm:$0xff] }
 0x628   : > { %10575 = vmatpush1.bf16.msra.mxu0 %v13318_v21  ;;  %10747 = vmatpush1.bf16.msra.mxu1 %v13320_v22  ;;  %v7777_v21 = vld [vmem:[#allocation10 + $0xd88] sm:$0xff] }
 0x629   : > { %10587 = vmatprep.subr.bf16.mxu0 %v13327_v24  ;;  %10759 = vmatprep.subr.bf16.mxu1 %v13329_v25  ;;  %v7781_v22 = vld [vmem:[#allocation10 + $0xda8] sm:$0xff]  ;;  %v13366_v24 = vcombine.low %v7768_v8, %v7772_v9  ;;  %v13368_v25 = vcombine.low %v7769_v11, %v7773_v12  ;;  %v7816_v8 = vld [vmem:[#allocation10 + $0xec0] sm:$0xff] }
 0x62a   : > { %v13377_v27 = vcombine.high %v7777_v21, %v7781_v22  ;;  %v7820_v9 = vld [vmem:[#allocation10 + $0xee0] sm:$0xff]  ;;  %v7817_v11 = vld [vmem:[#allocation10 + $0xec8] sm:$0xff] }
 0x62b   : > { %10577 = vmatmul.mubr.bf16.vlgmr.msra.gmra.mrb[0].mxu0 %v15666_v32  ;;  %10749 = vmatmul.mubr.bf16.vlgmr.msra.gmra.mrb[0].mxu1 %v15666_v32  ;;  %v7821_v12 = vld [vmem:[#allocation10 + $0xee8] sm:$0xff] }
 0x62c   : > { %10588 = vmatpush1.bf16.msra.mxu0 %v13326_v35  ;;  %10760 = vmatpush1.bf16.msra.mxu1 %v13328_v36  ;;  %v13374_v35 = vcombine.low %v7776_v18, %v7780_v20  ;;  %v13376_v36 = vcombine.low %v7777_v21, %v7781_v22  ;;  %v7824_v18 = vld [vmem:[#allocation10 + $0xf00] sm:$0xff]  ;;  %v7825_v21 = vld [vmem:[#allocation10 + $0xf08] sm:$0xff] }
 0x62d   : > { %10589 = vmatprep.subr.bf16.mxu0 %v13335_v37  ;;  %10761 = vmatprep.subr.bf16.mxu1 %v13337_v28  ;;  %v13383_v37 = vcombine.high %v7784_v29, %v7788_v30  ;;  %v13385_v28 = vcombine.high %v7785_v33, %v7789_v34  ;;  %v7828_v20 = vld [vmem:[#allocation10 + $0xf20] sm:$0xff]  ;;  %v7829_v22 = vld [vmem:[#allocation10 + $0xf28] sm:$0xff] }
 0x62e   : > { %10619 = vmatprep.mubr.bf16.mxu0 %v15668_v41  ;;  %10791 = vmatprep.mubr.bf16.mxu1 %v15668_v41 }
 0x630   : > { %10590 = vmatpush1.bf16.msra.mxu0 %v13334_v45  ;;  %10762 = vmatpush1.bf16.msra.mxu1 %v13336_v48  ;;  %v13382_v45 = vcombine.low %v7784_v29, %v7788_v30  ;;  %v13384_v48 = vcombine.low %v7785_v33, %v7789_v34  ;;  %v7832_v29 = vld [vmem:[#allocation10 + $0xf40] sm:$0xff]  ;;  %v7833_v33 = vld [vmem:[#allocation10 + $0xf48] sm:$0xff] }
 0x631   : > { %10591 = vmatprep.subr.bf16.mxu0 %v13343_v50  ;;  %10763 = vmatprep.subr.bf16.mxu1 %v13345_v51  ;;  %v13391_v50 = vcombine.high %v7792_v39, %v7796_v40  ;;  %v13393_v51 = vcombine.high %v7793_v42, %v7797_v43  ;;  %v7836_v30 = vld [vmem:[#allocation10 + $0xf60] sm:$0xff]  ;;  %v7837_v34 = vld [vmem:[#allocation10 + $0xf68] sm:$0xff] }
 0x634   : > { %10592 = vmatpush1.bf16.msra.mxu0 %v13342_v56  ;;  %10764 = vmatpush1.bf16.msra.mxu1 %v13344_v59  ;;  %v13390_v56 = vcombine.low %v7792_v39, %v7796_v40  ;;  %v13392_v59 = vcombine.low %v7793_v42, %v7797_v43  ;;  %v13433_v39 = vcombine.high %v7833_v33, %v7837_v34  ;;  %v7840_v40 = vld [vmem:[#allocation10 + $0xf80] sm:$0xff]  ;;  %v7841_v43 = vld [vmem:[#allocation10 + $0xf88] sm:$0xff] }
 0x635   : > { %10593 = vmatprep.subr.bf16.mxu0 %v13351_v60  ;;  %10765 = vmatprep.subr.bf16.mxu1 %v13353_v61  ;;  %v13399_v60 = vcombine.high %v7800_v52, %v7804_v53  ;;  %v13401_v61 = vcombine.high %v7801_v54, %v7805_v55  ;;  %v7844_v42 = vld [vmem:[#allocation10 + $0xfa0] sm:$0xff] }
 0x638   : > { %10594 = vmatpush1.bf16.msra.mxu0 %v13350_v2  ;;  %10766 = vmatpush1.bf16.msra.mxu1 %v13352_v3  ;;  %v13398_v2 = vcombine.low %v7800_v52, %v7804_v53  ;;  %v13400_v3 = vcombine.low %v7801_v54, %v7805_v55  ;;  %v7260_v52 = vld [vmem:[#allocation2 + $0x70] sm:$0xff]  ;;  %v13432_v53 = vcombine.low %v7833_v33, %v7837_v34  ;;  %v7363_v33 = vld [vmem:[#allocation10 + $0x98] sm:$0xff] }
 0x639   : > { %10595 = vmatprep.subr.bf16.mxu0 %v13359_v4  ;;  %10767 = vmatprep.subr.bf16.mxu1 %v13361_v6  ;;  %v13407_v4 = vcombine.high %v7808_v62, %v7812_v63  ;;  %v13409_v6 = vcombine.high %v7809_v0, %v7813_v1  ;;  %v13439_v54 = vcombine.high %v7840_v40, %v7844_v42  ;;  %v7367_v34 = vld [vmem:[#allocation10 + $0xb8] sm:$0xff] }
 0x63c   : > { %10596 = vmatpush1.bf16.msra.mxu0 %v13358_v13  ;;  %10768 = vmatpush1.bf16.msra.mxu1 %v13360_v14  ;;  %v13406_v13 = vcombine.low %v7808_v62, %v7812_v63  ;;  %v13408_v14 = vcombine.low %v7809_v0, %v7813_v1  ;;  %v13438_v0 = vcombine.low %v7840_v40, %v7844_v42  ;;  %v7370_v40 = vld [vmem:[#allocation10 + $0xd0] sm:$0xff] }
 0x63d   : > { %10597 = vmatprep.subr.bf16.mxu0 %v13367_v15  ;;  %10769 = vmatprep.subr.bf16.mxu1 %v13369_v16  ;;  %v13415_v15 = vcombine.high %v7816_v8, %v7820_v9  ;;  %v13417_v16 = vcombine.high %v7817_v11, %v7821_v12  ;;  %v7374_v42 = vld [vmem:[#allocation10 + $0xf0] sm:$0xff] }
 0x640   : > { %10598 = vmatpush1.bf16.msra.mxu0 %v13366_v24  ;;  %10770 = vmatpush1.bf16.msra.mxu1 %v13368_v25  ;;  %v13414_v24 = vcombine.low %v7816_v8, %v7820_v9  ;;  %v13416_v25 = vcombine.low %v7817_v11, %v7821_v12  ;;  %v7347_v9 = vld [vmem:[#allocation10 + $0x18] sm:$0xff] }
 0x641   : > { %10599 = vmatprep.subr.bf16.mxu0 %v13375_v26  ;;  %10771 = vmatprep.subr.bf16.mxu1 %v13377_v27  ;;  %v13423_v26 = vcombine.high %v7824_v18, %v7828_v20  ;;  %v13425_v27 = vcombine.high %v7825_v21, %v7829_v22  ;;  %v7351_v11 = vld [vmem:[#allocation10 + $0x38] sm:$0xff] }
 0x644   : > { %10600 = vmatpush1.bf16.msra.mxu0 %v13374_v35  ;;  %10772 = vmatpush1.bf16.msra.mxu1 %v13376_v36  ;;  %v7290_v35 = vsub.s32 6, %v15612_v10  ;;  %v13422_v36 = vcombine.low %v7824_v18, %v7828_v20  ;;  %v7358_v18 = vld [vmem:[#allocation10 + $0x70] sm:$0xff] }
 0x645   : > { %10601 = vmatprep.subr.bf16.mxu0 %v13383_v37  ;;  %10773 = vmatprep.subr.bf16.mxu1 %v13385_v28  ;;  %v13424_v37 = vcombine.low %v7825_v21, %v7829_v22  ;;  %v13431_v28 = vcombine.high %v7832_v29, %v7836_v30  ;;  %v7355_v21 = vld [vmem:[#allocation10 + $0x58] sm:$0xff] }
 0x646   : > { %v7359_v22 = vld [vmem:[#allocation10 + $0x78] sm:$0xff] }
 0x648   : > { %10602 = vmatpush1.bf16.msra.mxu0 %v13382_v45  ;;  %10774 = vmatpush1.bf16.msra.mxu1 %v13384_v48  ;;  %v7845_v45 = vld [vmem:[#allocation10 + $0xfa8] sm:$0xff]  ;;  %v7291_v48 = vrot.slane %v15658_v49, %v7290_v35 }
 0x649   : > { %10603 = vmatprep.subr.bf16.mxu0 %v13391_v50  ;;  %10775 = vmatprep.subr.bf16.mxu1 %v13393_v51  ;;  %v13430_v50 = vcombine.low %v7832_v29, %v7836_v30  ;;  %v7252_v51 = vld [vmem:[#allocation2 + $0x30] sm:$0xff]  ;;  %v13441_v55 = vcombine.high %v7841_v43, %v7845_v45  ;;  %v13440_v49 = vcombine.low %v7841_v43, %v7845_v45  ;;  %v7362_v29 = vld [vmem:[#allocation10 + $0x90] sm:$0xff]  ;;  %v7371_v43 = vld [vmem:[#allocation10 + $0xd8] sm:$0xff] }
 0x64a   : > { %v7310_v62 = vmul.f32 %v7291_v48, %v7252_v51  ;;  %v7318_v63 = vmul.f32 %v7291_v48, %v7260_v52  ;;  %v7366_v30 = vld [vmem:[#allocation10 + $0xb0] sm:$0xff]  ;;  %v7375_v45 = vld [vmem:[#allocation10 + $0xf8] sm:$0xff]  ;;  %v12971_v51 = vcombine.high %v7370_v40, %v7374_v42 }
 0x64b   : > { %v12962_v48 = vcombine.low %v7362_v29, %v7366_v30  ;;  %v12973_v52 = vcombine.high %v7371_v43, %v7375_v45 }
 0x64c   : > { %10604 = vmatpush1.bf16.msra.mxu0 %v13390_v56  ;;  %10776 = vmatpush1.bf16.msra.mxu1 %v13392_v59  ;;  %v7848_v56 = vld [vmem:[#allocation10 + $0xfc0] sm:$0xff]  ;;  %v7334_v8 = vmax.f32 %v7318_v63, 0.0  ;;  %v7390_v63 = vld [vmem:[#allocation10 + $0x170] sm:$0xff] }
 0x64d   : > { %10605 = vmatprep.subr.bf16.mxu0 %v13399_v60  ;;  %10777 = vmatprep.subr.bf16.mxu1 %v13401_v61  ;;  %v7852_v59 = vld [vmem:[#allocation10 + $0xfe0] sm:$0xff]  ;;  %v7849_v60 = vld [vmem:[#allocation10 + $0xfc8] sm:$0xff] }
 0x64e   : > { %v7853_v61 = vld [vmem:[#allocation10 + $0xfe8] sm:$0xff]  ;;  %v13447_v1 = vcombine.high %v7848_v56, %v7852_v59  ;;  %v13446_v12 = vcombine.low %v7848_v56, %v7852_v59  ;;  %v7383_v56 = vld [vmem:[#allocation10 + $0x138] sm:$0xff]  ;;  %v12970_v59 = vcombine.low %v7370_v40, %v7374_v42  ;;  %v7418_v40 = vld [vmem:[#allocation10 + $0x250] sm:$0xff] }
 0x64f   : > { %v7422_v42 = vld [vmem:[#allocation10 + $0x270] sm:$0xff] }
 0x650   : > { %10606 = vmatpush1.bf16.msra.mxu0 %v13398_v2  ;;  %10778 = vmatpush1.bf16.msra.mxu1 %v13400_v3  ;;  %v13449_v2 = vcombine.high %v7849_v60, %v7853_v61  ;;  %v7346_v3 = vld [vmem:[#allocation10 + $0x10] sm:$0xff] }
 0x651   : > { %10607 = vmatprep.subr.bf16.mxu0 %v13407_v4  ;;  %10779 = vmatprep.subr.bf16.mxu1 %v13409_v6  ;;  %v7350_v4 = vld [vmem:[#allocation10 + $0x30] sm:$0xff]  ;;  %v7326_v6 = vmax.f32 %v7310_v62, 0.0 }
 0x652   : > { %v7386_v62 = vld [vmem:[#allocation10 + $0x150] sm:$0xff] }
 0x653   : > { %v15678_v20 = vpack.c.bf16 %v7334_v8, %v7326_v6  ;;  %v7394_v6 = vld [vmem:[#allocation10 + $0x190] sm:$0xff] }
 0x654   : > { %10608 = vmatpush1.bf16.msra.mxu0 %v13406_v13  ;;  %10780 = vmatpush1.bf16.msra.mxu1 %v13408_v14  ;;  %v13448_v13 = vcombine.low %v7849_v60, %v7853_v61  ;;  %v12947_v14 = vcombine.high %v7346_v3, %v7350_v4  ;;  %v12972_v60 = vcombine.low %v7371_v43, %v7375_v45  ;;  %v7398_v8 = vld [vmem:[#allocation10 + $0x1b0] sm:$0xff]  ;;  %v7419_v43 = vld [vmem:[#allocation10 + $0x258] sm:$0xff] }
 0x655   : > { %10609 = vmatprep.subr.bf16.mxu0 %v13415_v15  ;;  %10781 = vmatprep.subr.bf16.mxu1 %v13417_v16  ;;  %v12949_v15 = vcombine.high %v7347_v9, %v7351_v11  ;;  %v7354_v16 = vld [vmem:[#allocation10 + $0x50] sm:$0xff]  ;;  %v7423_v45 = vld [vmem:[#allocation10 + $0x278] sm:$0xff] }
 0x658   : > { %10610 = vmatpush1.bf16.msra.mxu0 %v13414_v24  ;;  %10782 = vmatpush1.bf16.msra.mxu1 %v13416_v25  ;;  %v12946_v24 = vcombine.low %v7346_v3, %v7350_v4  ;;  %v12948_v25 = vcombine.low %v7347_v9, %v7351_v11  ;;  %v12987_v3 = vcombine.high %v7386_v62, %v7390_v63  ;;  %v7395_v9 = vld [vmem:[#allocation10 + $0x198] sm:$0xff] }
 0x659   : > { %10611 = vmatprep.subr.bf16.mxu0 %v13423_v26  ;;  %10783 = vmatprep.subr.bf16.mxu1 %v13425_v27  ;;  %v12955_v26 = vcombine.high %v7354_v16, %v7358_v18  ;;  %v12957_v27 = vcombine.high %v7355_v21, %v7359_v22  ;;  %v7399_v11 = vld [vmem:[#allocation10 + $0x1b8] sm:$0xff] }
 0x65c   : > { %10612 = vmatpush1.bf16.msra.mxu0 %v13422_v36  ;;  %10784 = vmatpush1.bf16.msra.mxu1 %v13424_v37  ;;  %v12954_v36 = vcombine.low %v7354_v16, %v7358_v18  ;;  %v12956_v37 = vcombine.low %v7355_v21, %v7359_v22  ;;  %v7402_v16 = vld [vmem:[#allocation10 + $0x1d0] sm:$0xff]  ;;  %v7403_v21 = vld [vmem:[#allocation10 + $0x1d8] sm:$0xff] }
 0x65d   : > { %10613 = vmatprep.subr.bf16.mxu0 %v13431_v28  ;;  %10785 = vmatprep.subr.bf16.mxu1 %v13433_v39  ;;  %v12963_v28 = vcombine.high %v7362_v29, %v7366_v30  ;;  %v12965_v39 = vcombine.high %v7363_v33, %v7367_v34  ;;  %v7406_v18 = vld [vmem:[#allocation10 + $0x1f0] sm:$0xff]  ;;  %v7407_v22 = vld [vmem:[#allocation10 + $0x1f8] sm:$0xff] }
 0x65e   : > { %v7410_v29 = vld [vmem:[#allocation10 + $0x210] sm:$0xff] }
 0x65f   : > { %v7414_v30 = vld [vmem:[#allocation10 + $0x230] sm:$0xff] }
 0x660   : > { %10614 = vmatpush1.bf16.msra.mxu0 %v13430_v50  ;;  %10786 = vmatpush1.bf16.msra.mxu1 %v13432_v53  ;;  %v12964_v50 = vcombine.low %v7363_v33, %v7367_v34  ;;  %v7378_v53 = vld [vmem:[#allocation10 + $0x110] sm:$0xff]  ;;  %v7411_v33 = vld [vmem:[#allocation10 + $0x218] sm:$0xff] }
 0x661   : > { %10615 = vmatprep.subr.bf16.mxu0 %v13439_v54  ;;  %10787 = vmatprep.subr.bf16.mxu1 %v13441_v55  ;;  %v7382_v54 = vld [vmem:[#allocation10 + $0x130] sm:$0xff]  ;;  %v7379_v55 = vld [vmem:[#allocation10 + $0x118] sm:$0xff] }
 0x662   : > { %v12979_v61 = vcombine.high %v7378_v53, %v7382_v54  ;;  %v7415_v34 = vld [vmem:[#allocation10 + $0x238] sm:$0xff] }
 0x664   : > { %10616 = vmatpush1.bf16.msra.mxu0 %v13438_v0  ;;  %10788 = vmatpush1.bf16.msra.mxu1 %v13440_v49  ;;  %v7387_v0 = vld [vmem:[#allocation10 + $0x158] sm:$0xff] }
 0x665   : > { %10617 = vmatprep.subr.bf16.mxu0 %v13447_v1  ;;  %10789 = vmatprep.subr.bf16.mxu1 %v13449_v2  ;;  %v7391_v49 = vld [vmem:[#allocation10 + $0x178] sm:$0xff]  ;;  %v12978_v1 = vcombine.low %v7378_v53, %v7382_v54  ;;  %v12980_v2 = vcombine.low %v7379_v55, %v7383_v56  ;;  %v7426_v53 = vld [vmem:[#allocation10 + $0x290] sm:$0xff] }
 0x666   : > { %v12989_v4 = vcombine.high %v7387_v0, %v7391_v49  ;;  %v7430_v54 = vld [vmem:[#allocation10 + $0x2b0] sm:$0xff] }
 0x668   : > { %10618 = vmatpush1.bf16.msra.mxu0 %v13446_v12  ;;  %10790 = vmatpush1.bf16.msra.mxu1 %v13448_v13  ;;  %v12986_v12 = vcombine.low %v7386_v62, %v7390_v63  ;;  %v12988_v13 = vcombine.low %v7387_v0, %v7391_v49  ;;  %v7434_v62 = vld [vmem:[#allocation10 + $0x2d0] sm:$0xff]  ;;  %v7435_v0 = vld [vmem:[#allocation10 + $0x2d8] sm:$0xff] }
 0x669   : > { %10802 = vmatprep.subr.bf16.mxu0 %v12947_v14  ;;  %10974 = vmatprep.subr.bf16.mxu1 %v12949_v15  ;;  %v12995_v14 = vcombine.high %v7394_v6, %v7398_v8  ;;  %v12997_v15 = vcombine.high %v7395_v9, %v7399_v11  ;;  %v7438_v63 = vld [vmem:[#allocation10 + $0x2f0] sm:$0xff]  ;;  %v7439_v49 = vld [vmem:[#allocation10 + $0x2f8] sm:$0xff] }
 0x66b   : > { %10620 = vmatmul.mubr.bf16.vlgmr.msra.gmra.mrb[0].mxu0 %v15678_v20  ;;  %10792 = vmatmul.mubr.bf16.vlgmr.msra.gmra.mrb[0].mxu1 %v15678_v20 }
 0x66c   : > { %10803 = vmatpush1.bf16.msra.mxu0 %v12946_v24  ;;  %10975 = vmatpush1.bf16.msra.mxu1 %v12948_v25  ;;  %v12994_v24 = vcombine.low %v7394_v6, %v7398_v8  ;;  %v12996_v25 = vcombine.low %v7395_v9, %v7399_v11  ;;  %v7442_v6 = vld [vmem:[#allocation10 + $0x310] sm:$0xff]  ;;  %v7443_v9 = vld [vmem:[#allocation10 + $0x318] sm:$0xff] }
 0x66d   : > { %10804 = vmatprep.subr.bf16.mxu0 %v12955_v26  ;;  %10976 = vmatprep.subr.bf16.mxu1 %v12957_v27  ;;  %v13003_v26 = vcombine.high %v7402_v16, %v7406_v18  ;;  %v13005_v27 = vcombine.high %v7403_v21, %v7407_v22  ;;  %v7446_v8 = vld [vmem:[#allocation10 + $0x330] sm:$0xff]  ;;  %v7447_v11 = vld [vmem:[#allocation10 + $0x338] sm:$0xff] }
 0x66e   : > { %10834 = vmatprep.mubr.bf16.mxu0 %v15620_v47  ;;  %11006 = vmatprep.mubr.bf16.mxu1 %v15620_v47  ;;  %v12981_v47 = vcombine.high %v7379_v55, %v7383_v56  ;;  %v7427_v55 = vld [vmem:[#allocation10 + $0x298] sm:$0xff] }
 0x66f   : > { %v7431_v56 = vld [vmem:[#allocation10 + $0x2b8] sm:$0xff] }
 0x670   : > { %10805 = vmatpush1.bf16.msra.mxu0 %v12954_v36  ;;  %10977 = vmatpush1.bf16.msra.mxu1 %v12956_v37  ;;  %v13002_v36 = vcombine.low %v7402_v16, %v7406_v18  ;;  %v13004_v37 = vcombine.low %v7403_v21, %v7407_v22  ;;  %v7450_v16 = vld [vmem:[#allocation10 + $0x350] sm:$0xff]  ;;  %v7451_v21 = vld [vmem:[#allocation10 + $0x358] sm:$0xff] }
 0x671   : > { %10806 = vmatprep.subr.bf16.mxu0 %v12963_v28  ;;  %10978 = vmatprep.subr.bf16.mxu1 %v12965_v39  ;;  %v13011_v28 = vcombine.high %v7410_v29, %v7414_v30  ;;  %v13013_v39 = vcombine.high %v7411_v33, %v7415_v34  ;;  %v7454_v18 = vld [vmem:[#allocation10 + $0x370] sm:$0xff]  ;;  %v7455_v22 = vld [vmem:[#allocation10 + $0x378] sm:$0xff] }
 0x674   : > { %10807 = vmatpush1.bf16.msra.mxu0 %v12962_v48  ;;  %10979 = vmatpush1.bf16.msra.mxu1 %v12964_v50  ;;  %v13010_v48 = vcombine.low %v7410_v29, %v7414_v30  ;;  %v13012_v50 = vcombine.low %v7411_v33, %v7415_v34  ;;  %v7458_v29 = vld [vmem:[#allocation10 + $0x390] sm:$0xff]  ;;  %v7459_v33 = vld [vmem:[#allocation10 + $0x398] sm:$0xff] }
 0x675   : > { %10808 = vmatprep.subr.bf16.mxu0 %v12971_v51  ;;  %10980 = vmatprep.subr.bf16.mxu1 %v12973_v52  ;;  %v13019_v51 = vcombine.high %v7418_v40, %v7422_v42  ;;  %v13021_v52 = vcombine.high %v7419_v43, %v7423_v45  ;;  %v7462_v30 = vld [vmem:[#allocation10 + $0x3b0] sm:$0xff]  ;;  %v7463_v34 = vld [vmem:[#allocation10 + $0x3b8] sm:$0xff] }
 0x678   : > { %10809 = vmatpush1.bf16.msra.mxu0 %v12970_v59  ;;  %10981 = vmatpush1.bf16.msra.mxu1 %v12972_v60  ;;  %v13018_v59 = vcombine.low %v7418_v40, %v7422_v42  ;;  %v13020_v60 = vcombine.low %v7419_v43, %v7423_v45  ;;  %v7466_v40 = vld [vmem:[#allocation10 + $0x3d0] sm:$0xff]  ;;  %v7467_v43 = vld [vmem:[#allocation10 + $0x3d8] sm:$0xff] }
 0x679   : > { %10810 = vmatprep.subr.bf16.mxu0 %v12979_v61  ;;  %10982 = vmatprep.subr.bf16.mxu1 %v12981_v47  ;;  %v13027_v61 = vcombine.high %v7426_v53, %v7430_v54  ;;  %v13029_v47 = vcombine.high %v7427_v55, %v7431_v56  ;;  %v7470_v42 = vld [vmem:[#allocation10 + $0x3f0] sm:$0xff]  ;;  %v7471_v45 = vld [vmem:[#allocation10 + $0x3f8] sm:$0xff] }
 0x67c   : > { %10811 = vmatpush1.bf16.msra.mxu0 %v12978_v1  ;;  %10983 = vmatpush1.bf16.msra.mxu1 %v12980_v2  ;;  %v13026_v1 = vcombine.low %v7426_v53, %v7430_v54  ;;  %v13028_v2 = vcombine.low %v7427_v55, %v7431_v56  ;;  %v7474_v53 = vld [vmem:[#allocation10 + $0x410] sm:$0xff]  ;;  %v7475_v55 = vld [vmem:[#allocation10 + $0x418] sm:$0xff] }
 0x67d   : > { %10812 = vmatprep.subr.bf16.mxu0 %v12987_v3  ;;  %10984 = vmatprep.subr.bf16.mxu1 %v12989_v4  ;;  %v13035_v3 = vcombine.high %v7434_v62, %v7438_v63  ;;  %v13037_v4 = vcombine.high %v7435_v0, %v7439_v49  ;;  %v7478_v54 = vld [vmem:[#allocation10 + $0x430] sm:$0xff]  ;;  %v7479_v56 = vld [vmem:[#allocation10 + $0x438] sm:$0xff] }
 0x680   : > { %10813 = vmatpush1.bf16.msra.mxu0 %v12986_v12  ;;  %10985 = vmatpush1.bf16.msra.mxu1 %v12988_v13  ;;  %v13034_v12 = vcombine.low %v7434_v62, %v7438_v63  ;;  %v13036_v13 = vcombine.low %v7435_v0, %v7439_v49  ;;  %v7482_v62 = vld [vmem:[#allocation10 + $0x450] sm:$0xff]  ;;  %v7483_v0 = vld [vmem:[#allocation10 + $0x458] sm:$0xff] }
 0x681   : > { %10814 = vmatprep.subr.bf16.mxu0 %v12995_v14  ;;  %10986 = vmatprep.subr.bf16.mxu1 %v12997_v15  ;;  %v13043_v14 = vcombine.high %v7442_v6, %v7446_v8  ;;  %v13045_v15 = vcombine.high %v7443_v9, %v7447_v11  ;;  %v7486_v63 = vld [vmem:[#allocation10 + $0x470] sm:$0xff]  ;;  %v7487_v49 = vld [vmem:[#allocation10 + $0x478] sm:$0xff] }
 0x684   : > { %10815 = vmatpush1.bf16.msra.mxu0 %v12994_v24  ;;  %10987 = vmatpush1.bf16.msra.mxu1 %v12996_v25  ;;  %v13042_v24 = vcombine.low %v7442_v6, %v7446_v8  ;;  %v13044_v25 = vcombine.low %v7443_v9, %v7447_v11  ;;  %v7490_v6 = vld [vmem:[#allocation10 + $0x490] sm:$0xff]  ;;  %v7491_v9 = vld [vmem:[#allocation10 + $0x498] sm:$0xff] }
 0x685   : > { %10816 = vmatprep.subr.bf16.mxu0 %v13003_v26  ;;  %10988 = vmatprep.subr.bf16.mxu1 %v13005_v27  ;;  %v13051_v26 = vcombine.high %v7450_v16, %v7454_v18  ;;  %v13053_v27 = vcombine.high %v7451_v21, %v7455_v22  ;;  %v7494_v8 = vld [vmem:[#allocation10 + $0x4b0] sm:$0xff]  ;;  %v7495_v11 = vld [vmem:[#allocation10 + $0x4b8] sm:$0xff] }
 0x688   : > { %10817 = vmatpush1.bf16.msra.mxu0 %v13002_v36  ;;  %10989 = vmatpush1.bf16.msra.mxu1 %v13004_v37  ;;  %v13050_v36 = vcombine.low %v7450_v16, %v7454_v18  ;;  %v13052_v37 = vcombine.low %v7451_v21, %v7455_v22  ;;  %v7498_v16 = vld [vmem:[#allocation10 + $0x4d0] sm:$0xff]  ;;  %v7499_v21 = vld [vmem:[#allocation10 + $0x4d8] sm:$0xff] }
 0x689   : > { %10818 = vmatprep.subr.bf16.mxu0 %v13011_v28  ;;  %10990 = vmatprep.subr.bf16.mxu1 %v13013_v39  ;;  %v13059_v28 = vcombine.high %v7458_v29, %v7462_v30  ;;  %v13061_v39 = vcombine.high %v7459_v33, %v7463_v34  ;;  %v7502_v18 = vld [vmem:[#allocation10 + $0x4f0] sm:$0xff]  ;;  %v7503_v22 = vld [vmem:[#allocation10 + $0x4f8] sm:$0xff] }
 0x68c   : > { %10819 = vmatpush1.bf16.msra.mxu0 %v13010_v48  ;;  %10991 = vmatpush1.bf16.msra.mxu1 %v13012_v50  ;;  %v13058_v48 = vcombine.low %v7458_v29, %v7462_v30  ;;  %v13060_v50 = vcombine.low %v7459_v33, %v7463_v34  ;;  %v7510_v29 = vld [vmem:[#allocation10 + $0x530] sm:$0xff]  ;;  %v7507_v30 = vld [vmem:[#allocation10 + $0x518] sm:$0xff]  ;;  %v13098_v34 = vcombine.low %v7498_v16, %v7502_v18 }
 0x68d   : > { %10820 = vmatprep.subr.bf16.mxu0 %v13019_v51  ;;  %10992 = vmatprep.subr.bf16.mxu1 %v13021_v52  ;;  %v13067_v51 = vcombine.high %v7466_v40, %v7470_v42  ;;  %v13069_v52 = vcombine.high %v7467_v43, %v7471_v45  ;;  %v7511_v33 = vld [vmem:[#allocation10 + $0x538] sm:$0xff] }
 0x690   : > { %10821 = vmatpush1.bf16.msra.mxu0 %v13018_v59  ;;  %10993 = vmatpush1.bf16.msra.mxu1 %v13020_v60  ;;  %v13066_v59 = vcombine.low %v7466_v40, %v7470_v42  ;;  %v13068_v60 = vcombine.low %v7467_v43, %v7471_v45  ;;  %v7515_v40 = vld [vmem:[#allocation10 + $0x558] sm:$0xff]  ;;  %v13108_v45 = vcombine.low %v7507_v30, %v7511_v33 }
 0x691   : > { %10822 = vmatprep.subr.bf16.mxu0 %v13027_v61  ;;  %10994 = vmatprep.subr.bf16.mxu1 %v13029_v47  ;;  %v13075_v61 = vcombine.high %v7474_v53, %v7478_v54  ;;  %v13077_v47 = vcombine.high %v7475_v55, %v7479_v56  ;;  %v7519_v42 = vld [vmem:[#allocation10 + $0x578] sm:$0xff] }
 0x694   : > { %10823 = vmatpush1.bf16.msra.mxu0 %v13026_v1  ;;  %10995 = vmatpush1.bf16.msra.mxu1 %v13028_v2  ;;  %v13074_v1 = vcombine.low %v7474_v53, %v7478_v54  ;;  %v13076_v2 = vcombine.low %v7475_v55, %v7479_v56  ;;  %v7523_v53 = vld [vmem:[#allocation10 + $0x598] sm:$0xff]  ;;  %v13116_v56 = vcombine.low %v7515_v40, %v7519_v42 }
 0x695   : > { %10824 = vmatprep.subr.bf16.mxu0 %v13035_v3  ;;  %10996 = vmatprep.subr.bf16.mxu1 %v13037_v4  ;;  %v13083_v3 = vcombine.high %v7482_v62, %v7486_v63  ;;  %v13085_v4 = vcombine.high %v7483_v0, %v7487_v49  ;;  %v7527_v54 = vld [vmem:[#allocation10 + $0x5b8] sm:$0xff] }
 0x698   : > { %10825 = vmatpush1.bf16.msra.mxu0 %v13034_v12  ;;  %10997 = vmatpush1.bf16.msra.mxu1 %v13036_v13  ;;  %v13082_v12 = vcombine.low %v7482_v62, %v7486_v63  ;;  %v13084_v13 = vcombine.low %v7483_v0, %v7487_v49  ;;  %v7531_v62 = vld [vmem:[#allocation10 + $0x5d8] sm:$0xff]  ;;  %v13124_v49 = vcombine.low %v7523_v53, %v7527_v54 }
 0x699   : > { %10826 = vmatprep.subr.bf16.mxu0 %v13043_v14  ;;  %10998 = vmatprep.subr.bf16.mxu1 %v13045_v15  ;;  %v13091_v14 = vcombine.high %v7490_v6, %v7494_v8  ;;  %v13093_v15 = vcombine.high %v7491_v9, %v7495_v11  ;;  %v7535_v63 = vld [vmem:[#allocation10 + $0x5f8] sm:$0xff] }
 0x69c   : > { %10827 = vmatpush1.bf16.msra.mxu0 %v13042_v24  ;;  %10999 = vmatpush1.bf16.msra.mxu1 %v13044_v25  ;;  %v13090_v24 = vcombine.low %v7490_v6, %v7494_v8  ;;  %v13099_v25 = vcombine.high %v7498_v16, %v7502_v18  ;;  %v7539_v6 = vld [vmem:[#allocation10 + $0x618] sm:$0xff] }
 0x69d   : > { %10828 = vmatprep.subr.bf16.mxu0 %v13051_v26  ;;  %11000 = vmatprep.subr.bf16.mxu1 %v13053_v27  ;;  %v13101_v26 = vcombine.high %v7499_v21, %v7503_v22  ;;  %v7506_v27 = vld [vmem:[#allocation10 + $0x510] sm:$0xff]  ;;  %v7543_v8 = vld [vmem:[#allocation10 + $0x638] sm:$0xff] }
 0x69e   : > { %v13106_v43 = vcombine.low %v7506_v27, %v7510_v29  ;;  %v7547_v16 = vld [vmem:[#allocation10 + $0x658] sm:$0xff] }
 0x69f   : > { %v7551_v18 = vld [vmem:[#allocation10 + $0x678] sm:$0xff] }
 0x6a0   : > { %10829 = vmatpush1.bf16.msra.mxu0 %v13050_v36  ;;  %11001 = vmatpush1.bf16.msra.mxu1 %v13052_v37  ;;  %v13100_v36 = vcombine.low %v7499_v21, %v7503_v22  ;;  %v13107_v37 = vcombine.high %v7506_v27, %v7510_v29  ;;  %v13140_v22 = vcombine.low %v7539_v6, %v7543_v8  ;;  %v7555_v27 = vld [vmem:[#allocation10 + $0x698] sm:$0xff] }
 0x6a1   : > { %10830 = vmatprep.subr.bf16.mxu0 %v13059_v28  ;;  %11002 = vmatprep.subr.bf16.mxu1 %v13061_v39  ;;  %v7514_v28 = vld [vmem:[#allocation10 + $0x550] sm:$0xff]  ;;  %v7559_v29 = vld [vmem:[#allocation10 + $0x6b8] sm:$0xff] }
 0x6a2   : > { %v7518_v39 = vld [vmem:[#allocation10 + $0x570] sm:$0xff] }
 0x6a3   : > { %v13114_v55 = vcombine.low %v7514_v28, %v7518_v39 }
 0x6a4   : > { %10831 = vmatpush1.bf16.msra.mxu0 %v13058_v48  ;;  %11003 = vmatpush1.bf16.msra.mxu1 %v13060_v50  ;;  %v13115_v48 = vcombine.high %v7514_v28, %v7518_v39  ;;  %v13117_v50 = vcombine.high %v7515_v40, %v7519_v42  ;;  %v7563_v28 = vld [vmem:[#allocation10 + $0x6d8] sm:$0xff]  ;;  %v13156_v42 = vcombine.low %v7555_v27, %v7559_v29 }
 0x6a5   : > { %10832 = vmatprep.subr.bf16.mxu0 %v13067_v51  ;;  %11004 = vmatprep.subr.bf16.mxu1 %v13069_v52  ;;  %v7522_v51 = vld [vmem:[#allocation10 + $0x590] sm:$0xff]  ;;  %v7567_v39 = vld [vmem:[#allocation10 + $0x6f8] sm:$0xff] }
 0x6a6   : > { %v7526_v52 = vld [vmem:[#allocation10 + $0x5b0] sm:$0xff] }
 0x6a7   : > { %v13122_v0 = vcombine.low %v7522_v51, %v7526_v52 }
 0x6a8   : > { %10833 = vmatpush1.bf16.msra.mxu0 %v13066_v59  ;;  %11005 = vmatpush1.bf16.msra.mxu1 %v13068_v60  ;;  %v13123_v59 = vcombine.high %v7522_v51, %v7526_v52  ;;  %v13125_v60 = vcombine.high %v7523_v53, %v7527_v54  ;;  %v7571_v51 = vld [vmem:[#allocation10 + $0x718] sm:$0xff]  ;;  %v13164_v54 = vcombine.low %v7563_v28, %v7567_v39 }
 0x6a9   : > { %10845 = vmatprep.subr.bf16.mxu0 %v13075_v61  ;;  %11017 = vmatprep.subr.bf16.mxu1 %v13077_v47  ;;  %v7530_v61 = vld [vmem:[#allocation10 + $0x5d0] sm:$0xff]  ;;  %v7575_v52 = vld [vmem:[#allocation10 + $0x738] sm:$0xff] }
 0x6aa   : > { %v7534_v47 = vld [vmem:[#allocation10 + $0x5f0] sm:$0xff] }
 0x6ab   : > { %10835 = vmatmul.mubr.bf16.vlgmr.msra.gmra.mrb[4].mxu0 %v15632_v7  ;;  %11007 = vmatmul.mubr.bf16.vlgmr.msra.gmra.mrb[4].mxu1 %v15632_v7  ;;  %v13092_v7 = vcombine.low %v7491_v9, %v7495_v11  ;;  %v13130_v9 = vcombine.low %v7530_v61, %v7534_v47  ;;  %v13132_v11 = vcombine.low %v7531_v62, %v7535_v63 }
 0x6ac   : > { %10846 = vmatpush1.bf16.msra.mxu0 %v13074_v1  ;;  %11018 = vmatpush1.bf16.msra.mxu1 %v13076_v2  ;;  %v13131_v1 = vcombine.high %v7530_v61, %v7534_v47  ;;  %v13133_v2 = vcombine.high %v7531_v62, %v7535_v63  ;;  %v7579_v61 = vld [vmem:[#allocation10 + $0x758] sm:$0xff]  ;;  %v13172_v63 = vcombine.low %v7571_v51, %v7575_v52 }
 0x6ad   : > { %10847 = vmatprep.subr.bf16.mxu0 %v13083_v3  ;;  %11019 = vmatprep.subr.bf16.mxu1 %v13085_v4  ;;  %v7538_v3 = vld [vmem:[#allocation10 + $0x610] sm:$0xff]  ;;  %v7583_v47 = vld [vmem:[#allocation10 + $0x778] sm:$0xff] }
 0x6ae   : > { %10877 = vmatprep.mubr.bf16.mxu0 %v15634_v17  ;;  %11049 = vmatprep.mubr.bf16.mxu1 %v15634_v17  ;;  %v13109_v17 = vcombine.high %v7507_v30, %v7511_v33  ;;  %v7542_v4 = vld [vmem:[#allocation10 + $0x630] sm:$0xff]  ;;  %v13148_v33 = vcombine.low %v7547_v16, %v7551_v18 }
 0x6af   : > { %v13138_v21 = vcombine.low %v7538_v3, %v7542_v4 }
 0x6b0   : > { %10848 = vmatpush1.bf16.msra.mxu0 %v13082_v12  ;;  %11020 = vmatpush1.bf16.msra.mxu1 %v13084_v13  ;;  %v13139_v12 = vcombine.high %v7538_v3, %v7542_v4  ;;  %v13141_v13 = vcombine.high %v7539_v6, %v7543_v8  ;;  %v7587_v3 = vld [vmem:[#allocation10 + $0x798] sm:$0xff]  ;;  %v13180_v8 = vcombine.low %v7579_v61, %v7583_v47 }
 0x6b1   : > { %10849 = vmatprep.subr.bf16.mxu0 %v13091_v14  ;;  %11021 = vmatprep.subr.bf16.mxu1 %v13093_v15  ;;  %v7546_v14 = vld [vmem:[#allocation10 + $0x650] sm:$0xff]  ;;  %v7591_v4 = vld [vmem:[#allocation10 + $0x7b8] sm:$0xff] }
 0x6b2   : > { %v7550_v15 = vld [vmem:[#allocation10 + $0x670] sm:$0xff] }
 0x6b3   : > { %v13146_v30 = vcombine.low %v7546_v14, %v7550_v15 }
 0x6b4   : > { %10850 = vmatpush1.bf16.msra.mxu0 %v13090_v24  ;;  %11022 = vmatpush1.bf16.msra.mxu1 %v13092_v7  ;;  %v13147_v24 = vcombine.high %v7546_v14, %v7550_v15  ;;  %v13149_v7 = vcombine.high %v7547_v16, %v7551_v18  ;;  %v7595_v14 = vld [vmem:[#allocation10 + $0x7d8] sm:$0xff]  ;;  %v13188_v18 = vcombine.low %v7587_v3, %v7591_v4 }
 0x6b5   : > { %10851 = vmatprep.subr.bf16.mxu0 %v13099_v25  ;;  %11023 = vmatprep.subr.bf16.mxu1 %v13101_v26  ;;  %v7554_v25 = vld [vmem:[#allocation10 + $0x690] sm:$0xff]  ;;  %v7599_v15 = vld [vmem:[#allocation10 + $0x7f8] sm:$0xff] }
 0x6b6   : > { %v7558_v26 = vld [vmem:[#allocation10 + $0x6b0] sm:$0xff] }
 0x6b7   : > { %v13154_v40 = vcombine.low %v7554_v25, %v7558_v26 }
 0x6b8   : > { %10852 = vmatpush1.bf16.msra.mxu0 %v13098_v34  ;;  %11024 = vmatpush1.bf16.msra.mxu1 %v13100_v36  ;;  %v13155_v34 = vcombine.high %v7554_v25, %v7558_v26  ;;  %v13157_v36 = vcombine.high %v7555_v27, %v7559_v29  ;;  %v7603_v25 = vld [vmem:[#allocation10 + $0x818] sm:$0xff]  ;;  %v13196_v29 = vcombine.low %v7595_v14, %v7599_v15 }
 0x6b9   : > { %10853 = vmatprep.subr.bf16.mxu0 %v13107_v37  ;;  %11025 = vmatprep.subr.bf16.mxu1 %v13109_v17  ;;  %v7562_v37 = vld [vmem:[#allocation10 + $0x6d0] sm:$0xff]  ;;  %v7607_v26 = vld [vmem:[#allocation10 + $0x838] sm:$0xff] }
 0x6ba   : > { %v7566_v17 = vld [vmem:[#allocation10 + $0x6f0] sm:$0xff] }
 0x6bb   : > { %v13162_v53 = vcombine.low %v7562_v37, %v7566_v17 }
 0x6bc   : > { %10854 = vmatpush1.bf16.msra.mxu0 %v13106_v43  ;;  %11026 = vmatpush1.bf16.msra.mxu1 %v13108_v45  ;;  %v13163_v43 = vcombine.high %v7562_v37, %v7566_v17  ;;  %v13165_v45 = vcombine.high %v7563_v28, %v7567_v39  ;;  %v7611_v37 = vld [vmem:[#allocation10 + $0x858] sm:$0xff]  ;;  %v13204_v39 = vcombine.low %v7603_v25, %v7607_v26 }
 0x6bd   : > { %10855 = vmatprep.subr.bf16.mxu0 %v13115_v48  ;;  %11027 = vmatprep.subr.bf16.mxu1 %v13117_v50  ;;  %v7570_v48 = vld [vmem:[#allocation10 + $0x710] sm:$0xff]  ;;  %v7615_v17 = vld [vmem:[#allocation10 + $0x878] sm:$0xff] }
 0x6be   : > { %v7574_v50 = vld [vmem:[#allocation10 + $0x730] sm:$0xff] }
 0x6bf   : > { %v13170_v62 = vcombine.low %v7570_v48, %v7574_v50 }
 0x6c0   : > { %10856 = vmatpush1.bf16.msra.mxu0 %v13114_v55  ;;  %11028 = vmatpush1.bf16.msra.mxu1 %v13116_v56  ;;  %v13171_v55 = vcombine.high %v7570_v48, %v7574_v50  ;;  %v13173_v56 = vcombine.high %v7571_v51, %v7575_v52  ;;  %v7619_v48 = vld [vmem:[#allocation10 + $0x898] sm:$0xff]  ;;  %v13212_v52 = vcombine.low %v7611_v37, %v7615_v17 }
 0x6c1   : > { %10857 = vmatprep.subr.bf16.mxu0 %v13123_v59  ;;  %11029 = vmatprep.subr.bf16.mxu1 %v13125_v60  ;;  %v7578_v59 = vld [vmem:[#allocation10 + $0x750] sm:$0xff]  ;;  %v7623_v50 = vld [vmem:[#allocation10 + $0x8b8] sm:$0xff] }
 0x6c2   : > { %v7582_v60 = vld [vmem:[#allocation10 + $0x770] sm:$0xff] }
 0x6c3   : > { %v13178_v6 = vcombine.low %v7578_v59, %v7582_v60 }
 0x6c4   : > { %10858 = vmatpush1.bf16.msra.mxu0 %v13122_v0  ;;  %11030 = vmatpush1.bf16.msra.mxu1 %v13124_v49  ;;  %v13179_v0 = vcombine.high %v7578_v59, %v7582_v60  ;;  %v13181_v49 = vcombine.high %v7579_v61, %v7583_v47  ;;  %v7627_v59 = vld [vmem:[#allocation10 + $0x8d8] sm:$0xff] }
 0x6c5   : > { %10859 = vmatprep.subr.bf16.mxu0 %v13131_v1  ;;  %11031 = vmatprep.subr.bf16.mxu1 %v13133_v2  ;;  %v7586_v1 = vld [vmem:[#allocation10 + $0x790] sm:$0xff]  ;;  %v7631_v60 = vld [vmem:[#allocation10 + $0x8f8] sm:$0xff] }
 0x6c6   : > { %v7590_v2 = vld [vmem:[#allocation10 + $0x7b0] sm:$0xff] }
 0x6c7   : > { %v13186_v16 = vcombine.low %v7586_v1, %v7590_v2 }
 0x6c8   : > { %10860 = vmatpush1.bf16.msra.mxu0 %v13130_v9  ;;  %11032 = vmatpush1.bf16.msra.mxu1 %v13132_v11  ;;  %v13187_v9 = vcombine.high %v7586_v1, %v7590_v2  ;;  %v13189_v11 = vcombine.high %v7587_v3, %v7591_v4  ;;  %v7639_v1 = vld [vmem:[#allocation10 + $0x938] sm:$0xff]  ;;  %v13228_v3 = vcombine.low %v7627_v59, %v7631_v60 }
 0x6c9   : > { %10861 = vmatprep.subr.bf16.mxu0 %v13139_v12  ;;  %11033 = vmatprep.subr.bf16.mxu1 %v13141_v13  ;;  %v7594_v12 = vld [vmem:[#allocation10 + $0x7d0] sm:$0xff] }
 0x6ca   : > { %v7598_v13 = vld [vmem:[#allocation10 + $0x7f0] sm:$0xff] }
 0x6cb   : > { %v13194_v27 = vcombine.low %v7594_v12, %v7598_v13 }
 0x6cc   : > { %10862 = vmatpush1.bf16.msra.mxu0 %v13138_v21  ;;  %11034 = vmatpush1.bf16.msra.mxu1 %v13140_v22  ;;  %v13195_v21 = vcombine.high %v7594_v12, %v7598_v13  ;;  %v13197_v22 = vcombine.high %v7595_v14, %v7599_v15 }
 0x6cd   : > { %10863 = vmatprep.subr.bf16.mxu0 %v13147_v24  ;;  %11035 = vmatprep.subr.bf16.mxu1 %v13149_v7  ;;  %v7602_v24 = vld [vmem:[#allocation10 + $0x810] sm:$0xff] }
 0x6ce   : > { %v7606_v7 = vld [vmem:[#allocation10 + $0x830] sm:$0xff] }
 0x6cf   : > { %v13202_v28 = vcombine.low %v7602_v24, %v7606_v7 }
 0x6d0   : > { %10864 = vmatpush1.bf16.msra.mxu0 %v13146_v30  ;;  %11036 = vmatpush1.bf16.msra.mxu1 %v13148_v33  ;;  %v13203_v30 = vcombine.high %v7602_v24, %v7606_v7  ;;  %v13205_v33 = vcombine.high %v7603_v25, %v7607_v26 }
 0x6d1   : > { %10865 = vmatprep.subr.bf16.mxu0 %v13155_v34  ;;  %11037 = vmatprep.subr.bf16.mxu1 %v13157_v36  ;;  %v7610_v34 = vld [vmem:[#allocation10 + $0x850] sm:$0xff] }
 0x6d2   : > { %v7614_v36 = vld [vmem:[#allocation10 + $0x870] sm:$0xff] }
 0x6d3   : > { %v13210_v51 = vcombine.low %v7610_v34, %v7614_v36 }
 0x6d4   : > { %10866 = vmatpush1.bf16.msra.mxu0 %v13154_v40  ;;  %11038 = vmatpush1.bf16.msra.mxu1 %v13156_v42  ;;  %v13211_v40 = vcombine.high %v7610_v34, %v7614_v36  ;;  %v13213_v42 = vcombine.high %v7611_v37, %v7615_v17 }
 0x6d5   : > { %10867 = vmatprep.subr.bf16.mxu0 %v13163_v43  ;;  %11039 = vmatprep.subr.bf16.mxu1 %v13165_v45  ;;  %v7618_v43 = vld [vmem:[#allocation10 + $0x890] sm:$0xff] }
 0x6d6   : > { %v7622_v45 = vld [vmem:[#allocation10 + $0x8b0] sm:$0xff] }
 0x6d7   : > { %v13218_v61 = vcombine.low %v7618_v43, %v7622_v45 }
 0x6d8   : > { %10868 = vmatpush1.bf16.msra.mxu0 %v13162_v53  ;;  %11040 = vmatpush1.bf16.msra.mxu1 %v13164_v54  ;;  %v13219_v53 = vcombine.high %v7618_v43, %v7622_v45  ;;  %v13221_v54 = vcombine.high %v7619_v48, %v7623_v50 }
 0x6d9   : > { %10869 = vmatprep.subr.bf16.mxu0 %v13171_v55  ;;  %11041 = vmatprep.subr.bf16.mxu1 %v13173_v56  ;;  %v7626_v55 = vld [vmem:[#allocation10 + $0x8d0] sm:$0xff] }
 0x6da   : > { %v7630_v56 = vld [vmem:[#allocation10 + $0x8f0] sm:$0xff] }
 0x6db   : > { %v13227_v47 = vcombine.high %v7626_v55, %v7630_v56  ;;  %v13226_v2 = vcombine.low %v7626_v55, %v7630_v56 }
 0x6dc   : > { %10870 = vmatpush1.bf16.msra.mxu0 %v13170_v62  ;;  %11042 = vmatpush1.bf16.msra.mxu1 %v13172_v63  ;;  %v13229_v62 = vcombine.high %v7627_v59, %v7631_v60  ;;  %v7634_v63 = vld [vmem:[#allocation10 + $0x910] sm:$0xff] }
 0x6dd   : > { %10871 = vmatprep.subr.bf16.mxu0 %v13179_v0  ;;  %11043 = vmatprep.subr.bf16.mxu1 %v13181_v49  ;;  %v7638_v0 = vld [vmem:[#allocation10 + $0x930] sm:$0xff]  ;;  %v7635_v49 = vld [vmem:[#allocation10 + $0x918] sm:$0xff] }
 0x6de   : > { %v13235_v4 = vcombine.high %v7634_v63, %v7638_v0  ;;  %v13234_v12 = vcombine.low %v7634_v63, %v7638_v0  ;;  %v13236_v13 = vcombine.low %v7635_v49, %v7639_v1 }
 0x6e0   : > { %10872 = vmatpush1.bf16.msra.mxu0 %v13178_v6  ;;  %11044 = vmatpush1.bf16.msra.mxu1 %v13180_v8  ;;  %v7642_v6 = vld [vmem:[#allocation10 + $0x950] sm:$0xff] }
 0x6e1   : > { %10873 = vmatprep.subr.bf16.mxu0 %v13187_v9  ;;  %11045 = vmatprep.subr.bf16.mxu1 %v13189_v11  ;;  %v7646_v8 = vld [vmem:[#allocation10 + $0x970] sm:$0xff]  ;;  %v7643_v9 = vld [vmem:[#allocation10 + $0x958] sm:$0xff] }
 0x6e2   : > { %v7647_v11 = vld [vmem:[#allocation10 + $0x978] sm:$0xff]  ;;  %v13243_v14 = vcombine.high %v7642_v6, %v7646_v8  ;;  %v13242_v24 = vcombine.low %v7642_v6, %v7646_v8 }
 0x6e3   : > { %v13245_v15 = vcombine.high %v7643_v9, %v7647_v11  ;;  %v13244_v7 = vcombine.low %v7643_v9, %v7647_v11 }
 0x6e4   : > { %10874 = vmatpush1.bf16.msra.mxu0 %v13186_v16  ;;  %11046 = vmatpush1.bf16.msra.mxu1 %v13188_v18  ;;  %v7650_v16 = vld [vmem:[#allocation10 + $0x990] sm:$0xff] }
 0x6e5   : > { %10875 = vmatprep.subr.bf16.mxu0 %v13195_v21  ;;  %11047 = vmatprep.subr.bf16.mxu1 %v13197_v22  ;;  %v7654_v18 = vld [vmem:[#allocation10 + $0x9b0] sm:$0xff]  ;;  %v7651_v21 = vld [vmem:[#allocation10 + $0x998] sm:$0xff] }
 0x6e6   : > { %v7655_v22 = vld [vmem:[#allocation10 + $0x9b8] sm:$0xff]  ;;  %v13251_v25 = vcombine.high %v7650_v16, %v7654_v18  ;;  %v13250_v34 = vcombine.low %v7650_v16, %v7654_v18 }
 0x6e7   : > { %v13253_v26 = vcombine.high %v7651_v21, %v7655_v22  ;;  %v13252_v36 = vcombine.low %v7651_v21, %v7655_v22 }
 0x6e8   : > { %10876 = vmatpush1.bf16.msra.mxu0 %v13194_v27  ;;  %11048 = vmatpush1.bf16.msra.mxu1 %v13196_v29  ;;  %v7658_v27 = vld [vmem:[#allocation10 + $0x9d0] sm:$0xff] }
 0x6e9   : > { %10888 = vmatprep.subr.bf16.mxu0 %v13203_v30  ;;  %11060 = vmatprep.subr.bf16.mxu1 %v13205_v33  ;;  %v7662_v29 = vld [vmem:[#allocation10 + $0x9f0] sm:$0xff]  ;;  %v7659_v30 = vld [vmem:[#allocation10 + $0x9d8] sm:$0xff] }
 0x6ea   : > { %v7663_v33 = vld [vmem:[#allocation10 + $0x9f8] sm:$0xff]  ;;  %v13259_v37 = vcombine.high %v7658_v27, %v7662_v29  ;;  %v13258_v43 = vcombine.low %v7658_v27, %v7662_v29 }
 0x6eb   : > { %10878 = vmatmul.mubr.bf16.vlgmr.msra.gmra.mrb[4].mxu0 %v15648_v46  ;;  %11050 = vmatmul.mubr.bf16.vlgmr.msra.gmra.mrb[4].mxu1 %v15648_v46  ;;  %v13220_v46 = vcombine.low %v7619_v48, %v7623_v50  ;;  %v13261_v17 = vcombine.high %v7659_v30, %v7663_v33  ;;  %v13260_v45 = vcombine.low %v7659_v30, %v7663_v33 }
 0x6ec   : > { %10889 = vmatpush1.bf16.msra.mxu0 %v13202_v28  ;;  %11061 = vmatpush1.bf16.msra.mxu1 %v13204_v39  ;;  %v7666_v28 = vld [vmem:[#allocation10 + $0xa10] sm:$0xff] }
 0x6ed   : > { %10890 = vmatprep.subr.bf16.mxu0 %v13211_v40  ;;  %11062 = vmatprep.subr.bf16.mxu1 %v13213_v42  ;;  %v7670_v39 = vld [vmem:[#allocation10 + $0xa30] sm:$0xff]  ;;  %v7667_v40 = vld [vmem:[#allocation10 + $0xa18] sm:$0xff] }
 0x6ee   : > { %10920 = vmatprep.mubr.bf16.mxu0 %v15650_v58  ;;  %11092 = vmatprep.mubr.bf16.mxu1 %v15650_v58  ;;  %v13237_v58 = vcombine.high %v7635_v49, %v7639_v1  ;;  %v7671_v42 = vld [vmem:[#allocation10 + $0xa38] sm:$0xff]  ;;  %v13267_v48 = vcombine.high %v7666_v28, %v7670_v39  ;;  %v13266_v55 = vcombine.low %v7666_v28, %v7670_v39 }
 0x6ef   : > { %v13269_v50 = vcombine.high %v7667_v40, %v7671_v42  ;;  %v13268_v56 = vcombine.low %v7667_v40, %v7671_v42 }
 0x6f0   : > { %10891 = vmatpush1.bf16.msra.mxu0 %v13210_v51  ;;  %11063 = vmatpush1.bf16.msra.mxu1 %v13212_v52  ;;  %v7674_v51 = vld [vmem:[#allocation10 + $0xa50] sm:$0xff] }
 0x6f1   : > { %10892 = vmatprep.subr.bf16.mxu0 %v13219_v53  ;;  %11064 = vmatprep.subr.bf16.mxu1 %v13221_v54  ;;  %v7678_v52 = vld [vmem:[#allocation10 + $0xa70] sm:$0xff]  ;;  %v7675_v53 = vld [vmem:[#allocation10 + $0xa58] sm:$0xff] }
 0x6f2   : > { %v7679_v54 = vld [vmem:[#allocation10 + $0xa78] sm:$0xff]  ;;  %v13275_v59 = vcombine.high %v7674_v51, %v7678_v52  ;;  %v13274_v63 = vcombine.low %v7674_v51, %v7678_v52 }
 0x6f3   : > { %v13277_v60 = vcombine.high %v7675_v53, %v7679_v54  ;;  %v13276_v0 = vcombine.low %v7675_v53, %v7679_v54 }
 0x6f4   : > { %10893 = vmatpush1.bf16.msra.mxu0 %v13218_v61  ;;  %11065 = vmatpush1.bf16.msra.mxu1 %v13220_v46  ;;  %v7682_v61 = vld [vmem:[#allocation10 + $0xa90] sm:$0xff] }
 0x6f5   : > { %10894 = vmatprep.subr.bf16.mxu0 %v13227_v47  ;;  %11066 = vmatprep.subr.bf16.mxu1 %v13229_v62  ;;  %v7686_v46 = vld [vmem:[#allocation10 + $0xab0] sm:$0xff]  ;;  %v7683_v47 = vld [vmem:[#allocation10 + $0xa98] sm:$0xff] }
 0x6f6   : > { %v7687_v62 = vld [vmem:[#allocation10 + $0xab8] sm:$0xff]  ;;  %v13283_v49 = vcombine.high %v7682_v61, %v7686_v46  ;;  %v13282_v6 = vcombine.low %v7682_v61, %v7686_v46 }
 0x6f7   : > { %v13285_v1 = vcombine.high %v7683_v47, %v7687_v62  ;;  %v13284_v8 = vcombine.low %v7683_v47, %v7687_v62 }
 0x6f8   : > { %10895 = vmatpush1.bf16.msra.mxu0 %v13226_v2  ;;  %11067 = vmatpush1.bf16.msra.mxu1 %v13228_v3  ;;  %v7690_v2 = vld [vmem:[#allocation10 + $0xad0] sm:$0xff] }
 0x6f9   : > { %10896 = vmatprep.subr.bf16.mxu0 %v13235_v4  ;;  %11068 = vmatprep.subr.bf16.mxu1 %v13237_v58  ;;  %v7694_v3 = vld [vmem:[#allocation10 + $0xaf0] sm:$0xff]  ;;  %v7691_v4 = vld [vmem:[#allocation10 + $0xad8] sm:$0xff] }
 0x6fa   : > { %v7695_v58 = vld [vmem:[#allocation10 + $0xaf8] sm:$0xff]  ;;  %v13291_v9 = vcombine.high %v7690_v2, %v7694_v3  ;;  %v13290_v16 = vcombine.low %v7690_v2, %v7694_v3 }
 0x6fb   : > { %v13293_v11 = vcombine.high %v7691_v4, %v7695_v58  ;;  %v13292_v18 = vcombine.low %v7691_v4, %v7695_v58 }
 0x6fc   : > { %10897 = vmatpush1.bf16.msra.mxu0 %v13234_v12  ;;  %11069 = vmatpush1.bf16.msra.mxu1 %v13236_v13  ;;  %v7698_v12 = vld [vmem:[#allocation10 + $0xb10] sm:$0xff] }
 0x6fd   : > { %10898 = vmatprep.subr.bf16.mxu0 %v13243_v14  ;;  %11070 = vmatprep.subr.bf16.mxu1 %v13245_v15  ;;  %v7702_v13 = vld [vmem:[#allocation10 + $0xb30] sm:$0xff]  ;;  %v7699_v14 = vld [vmem:[#allocation10 + $0xb18] sm:$0xff] }
 0x6fe   : > { %v7703_v15 = vld [vmem:[#allocation10 + $0xb38] sm:$0xff]  ;;  %v13299_v21 = vcombine.high %v7698_v12, %v7702_v13  ;;  %v13298_v27 = vcombine.low %v7698_v12, %v7702_v13 }
 0x6ff   : > { %v13301_v22 = vcombine.high %v7699_v14, %v7703_v15  ;;  %v13300_v29 = vcombine.low %v7699_v14, %v7703_v15 }
 0x700   : > { %10899 = vmatpush1.bf16.msra.mxu0 %v13242_v24  ;;  %11071 = vmatpush1.bf16.msra.mxu1 %v13244_v7  ;;  %v7706_v24 = vld [vmem:[#allocation10 + $0xb50] sm:$0xff] }
 0x701   : > { %10900 = vmatprep.subr.bf16.mxu0 %v13251_v25  ;;  %11072 = vmatprep.subr.bf16.mxu1 %v13253_v26  ;;  %v7710_v7 = vld [vmem:[#allocation10 + $0xb70] sm:$0xff]  ;;  %v7707_v25 = vld [vmem:[#allocation10 + $0xb58] sm:$0xff] }
 0x702   : > { %v7711_v26 = vld [vmem:[#allocation10 + $0xb78] sm:$0xff]  ;;  %v13307_v30 = vcombine.high %v7706_v24, %v7710_v7  ;;  %v13306_v28 = vcombine.low %v7706_v24, %v7710_v7 }
 0x703   : > { %v13309_v33 = vcombine.high %v7707_v25, %v7711_v26  ;;  %v13308_v39 = vcombine.low %v7707_v25, %v7711_v26  ;;  %v7762_v26 = vld [vmem:[#allocation10 + $0xd10] sm:$0xff] }
 0x704   : > { %10901 = vmatpush1.bf16.msra.mxu0 %v13250_v34  ;;  %11073 = vmatpush1.bf16.msra.mxu1 %v13252_v36  ;;  %v7714_v34 = vld [vmem:[#allocation10 + $0xb90] sm:$0xff] }
 0x705   : > { %10902 = vmatprep.subr.bf16.mxu0 %v13259_v37  ;;  %11074 = vmatprep.subr.bf16.mxu1 %v13261_v17  ;;  %v7718_v36 = vld [vmem:[#allocation10 + $0xbb0] sm:$0xff]  ;;  %v7715_v37 = vld [vmem:[#allocation10 + $0xb98] sm:$0xff] }
 0x706   : > { %v7719_v17 = vld [vmem:[#allocation10 + $0xbb8] sm:$0xff]  ;;  %v13315_v40 = vcombine.high %v7714_v34, %v7718_v36  ;;  %v13314_v51 = vcombine.low %v7714_v34, %v7718_v36 }
 0x707   : > { %v13317_v42 = vcombine.high %v7715_v37, %v7719_v17  ;;  %v13316_v52 = vcombine.low %v7715_v37, %v7719_v17  ;;  %v7770_v37 = vld [vmem:[#allocation10 + $0xd50] sm:$0xff] }
 0x708   : > { %10903 = vmatpush1.bf16.msra.mxu0 %v13258_v43  ;;  %11075 = vmatpush1.bf16.msra.mxu1 %v13260_v45  ;;  %v7722_v43 = vld [vmem:[#allocation10 + $0xbd0] sm:$0xff] }
 0x709   : > { %10904 = vmatprep.subr.bf16.mxu0 %v13267_v48  ;;  %11076 = vmatprep.subr.bf16.mxu1 %v13269_v50  ;;  %v7726_v45 = vld [vmem:[#allocation10 + $0xbf0] sm:$0xff]  ;;  %v7723_v48 = vld [vmem:[#allocation10 + $0xbd8] sm:$0xff] }
 0x70a   : > { %v7727_v50 = vld [vmem:[#allocation10 + $0xbf8] sm:$0xff]  ;;  %v13323_v53 = vcombine.high %v7722_v43, %v7726_v45  ;;  %v13322_v61 = vcombine.low %v7722_v43, %v7726_v45  ;;  %v7774_v17 = vld [vmem:[#allocation10 + $0xd70] sm:$0xff] }
 0x70b   : > { %v13325_v54 = vcombine.high %v7723_v48, %v7727_v50  ;;  %v13324_v46 = vcombine.low %v7723_v48, %v7727_v50  ;;  %v13371_v45 = vcombine.high %v7770_v37, %v7774_v17  ;;  %v7778_v50 = vld [vmem:[#allocation10 + $0xd90] sm:$0xff] }
 0x70c   : > { %10905 = vmatpush1.bf16.msra.mxu0 %v13266_v55  ;;  %11077 = vmatpush1.bf16.msra.mxu1 %v13268_v56  ;;  %v7730_v55 = vld [vmem:[#allocation10 + $0xc10] sm:$0xff] }
 0x70d   : > { %10906 = vmatprep.subr.bf16.mxu0 %v13275_v59  ;;  %11078 = vmatprep.subr.bf16.mxu1 %v13277_v60  ;;  %v7734_v56 = vld [vmem:[#allocation10 + $0xc30] sm:$0xff]  ;;  %v7731_v59 = vld [vmem:[#allocation10 + $0xc18] sm:$0xff] }
 0x70e   : > { %v7735_v60 = vld [vmem:[#allocation10 + $0xc38] sm:$0xff]  ;;  %v13331_v47 = vcombine.high %v7730_v55, %v7734_v56  ;;  %v13330_v2 = vcombine.low %v7730_v55, %v7734_v56 }
 0x70f   : > { %v13333_v62 = vcombine.high %v7731_v59, %v7735_v60  ;;  %v13332_v3 = vcombine.low %v7731_v59, %v7735_v60  ;;  %v13370_v59 = vcombine.low %v7770_v37, %v7774_v17 }
 0x710   : > { %10907 = vmatpush1.bf16.msra.mxu0 %v13274_v63  ;;  %11079 = vmatpush1.bf16.msra.mxu1 %v13276_v0  ;;  %v7738_v63 = vld [vmem:[#allocation10 + $0xc50] sm:$0xff] }
 0x711   : > { %10908 = vmatprep.subr.bf16.mxu0 %v13283_v49  ;;  %11080 = vmatprep.subr.bf16.mxu1 %v13285_v1  ;;  %v7742_v0 = vld [vmem:[#allocation10 + $0xc70] sm:$0xff]  ;;  %v7739_v49 = vld [vmem:[#allocation10 + $0xc58] sm:$0xff] }
 0x712   : > { %v7743_v1 = vld [vmem:[#allocation10 + $0xc78] sm:$0xff]  ;;  %v13339_v4 = vcombine.high %v7738_v63, %v7742_v0  ;;  %v13338_v12 = vcombine.low %v7738_v63, %v7742_v0  ;;  %v7790_v63 = vld [vmem:[#allocation10 + $0xdf0] sm:$0xff] }
 0x713   : > { %v13341_v58 = vcombine.high %v7739_v49, %v7743_v1  ;;  %v13340_v13 = vcombine.low %v7739_v49, %v7743_v1  ;;  %v7787_v1 = vld [vmem:[#allocation10 + $0xdd8] sm:$0xff] }
 0x714   : > { %10909 = vmatpush1.bf16.msra.mxu0 %v13282_v6  ;;  %11081 = vmatpush1.bf16.msra.mxu1 %v13284_v8  ;;  %v7746_v6 = vld [vmem:[#allocation10 + $0xc90] sm:$0xff] }
 0x715   : > { %10910 = vmatprep.subr.bf16.mxu0 %v13291_v9  ;;  %11082 = vmatprep.subr.bf16.mxu1 %v13293_v11  ;;  %v7750_v8 = vld [vmem:[#allocation10 + $0xcb0] sm:$0xff]  ;;  %v7747_v9 = vld [vmem:[#allocation10 + $0xc98] sm:$0xff] }
 0x716   : > { %v7751_v11 = vld [vmem:[#allocation10 + $0xcb8] sm:$0xff]  ;;  %v13347_v14 = vcombine.high %v7746_v6, %v7750_v8  ;;  %v13346_v24 = vcombine.low %v7746_v6, %v7750_v8 }
 0x717   : > { %v13349_v15 = vcombine.high %v7747_v9, %v7751_v11 }
 0x718   : > { %10911 = vmatpush1.bf16.msra.mxu0 %v13290_v16  ;;  %11083 = vmatpush1.bf16.msra.mxu1 %v13292_v18  ;;  %v7754_v16 = vld [vmem:[#allocation10 + $0xcd0] sm:$0xff] }
 0x719   : > { %10912 = vmatprep.subr.bf16.mxu0 %v13299_v21  ;;  %11084 = vmatprep.subr.bf16.mxu1 %v13301_v22  ;;  %v7758_v18 = vld [vmem:[#allocation10 + $0xcf0] sm:$0xff]  ;;  %v7755_v21 = vld [vmem:[#allocation10 + $0xcd8] sm:$0xff] }
 0x71a   : > { %v7759_v22 = vld [vmem:[#allocation10 + $0xcf8] sm:$0xff]  ;;  %v13355_v7 = vcombine.high %v7754_v16, %v7758_v18 }
 0x71b   : > { %v13357_v25 = vcombine.high %v7755_v21, %v7759_v22  ;;  %v13356_v34 = vcombine.low %v7755_v21, %v7759_v22  ;;  %v7794_v22 = vld [vmem:[#allocation10 + $0xe10] sm:$0xff] }
 0x71c   : > { %10913 = vmatpush1.bf16.msra.mxu0 %v13298_v27  ;;  %11085 = vmatpush1.bf16.msra.mxu1 %v13300_v29  ;;  %v7766_v27 = vld [vmem:[#allocation10 + $0xd30] sm:$0xff]  ;;  %v7763_v29 = vld [vmem:[#allocation10 + $0xd18] sm:$0xff] }
 0x71d   : > { %10914 = vmatprep.subr.bf16.mxu0 %v13307_v30  ;;  %11086 = vmatprep.subr.bf16.mxu1 %v13309_v33  ;;  %v7767_v30 = vld [vmem:[#allocation10 + $0xd38] sm:$0xff]  ;;  %v13354_v33 = vcombine.low %v7754_v16, %v7758_v18  ;;  %v13363_v36 = vcombine.high %v7762_v26, %v7766_v27 }
 0x71e   : > { %v13364_v43 = vcombine.low %v7763_v29, %v7767_v30 }
 0x720   : > { %10915 = vmatpush1.bf16.msra.mxu0 %v13306_v28  ;;  %11087 = vmatpush1.bf16.msra.mxu1 %v13308_v39  ;;  %v7771_v28 = vld [vmem:[#allocation10 + $0xd58] sm:$0xff] }
 0x721   : > { %10916 = vmatprep.subr.bf16.mxu0 %v13315_v40  ;;  %11088 = vmatprep.subr.bf16.mxu1 %v13317_v42  ;;  %v7775_v39 = vld [vmem:[#allocation10 + $0xd78] sm:$0xff]  ;;  %v13362_v40 = vcombine.low %v7762_v26, %v7766_v27  ;;  %v15696_v42 = vld [vmem:[#allocation11] sm:$0xff] }
 0x722   : > { %v13373_v48 = vcombine.high %v7771_v28, %v7775_v39  ;;  %v7869_v55 = vrot.slane %v15696_v42, %v7274_v57  ;;  %v7865_v56 = vrot.slane %v15696_v42, %v7270_v19  ;;  %v7873_v60 = vrot.slane %v15696_v42, %v7278_v31  ;;  %v7795_v27 = vld [vmem:[#allocation10 + $0xe18] sm:$0xff] }
 0x724   : > { %10917 = vmatpush1.bf16.msra.mxu0 %v13314_v51  ;;  %11089 = vmatpush1.bf16.msra.mxu1 %v13316_v52  ;;  %v7782_v51 = vld [vmem:[#allocation10 + $0xdb0] sm:$0xff]  ;;  %v7861_v52 = vrot.slane %v15696_v42, %v7266_v23 }
 0x725   : > { %10918 = vmatprep.subr.bf16.mxu0 %v13323_v53  ;;  %11090 = vmatprep.subr.bf16.mxu1 %v13325_v54  ;;  %v7779_v53 = vld [vmem:[#allocation10 + $0xd98] sm:$0xff]  ;;  %v13379_v23 = vcombine.high %v7778_v50, %v7782_v51  ;;  %v13378_v6 = vcombine.low %v7778_v50, %v7782_v51 }
 0x726   : > { %v7783_v54 = vld [vmem:[#allocation10 + $0xdb8] sm:$0xff] }
 0x727   : > { %v13380_v31 = vcombine.low %v7779_v53, %v7783_v54  ;;  %v7803_v51 = vld [vmem:[#allocation10 + $0xe58] sm:$0xff] }
 0x728   : > { %10919 = vmatpush1.bf16.msra.mxu0 %v13322_v61  ;;  %11091 = vmatpush1.bf16.msra.mxu1 %v13324_v46  ;;  %v13372_v61 = vcombine.low %v7771_v28, %v7775_v39 }
 0x729   : > { %10931 = vmatprep.subr.bf16.mxu0 %v13331_v47  ;;  %11103 = vmatprep.subr.bf16.mxu1 %v13333_v62  ;;  %v13381_v47 = vcombine.high %v7779_v53, %v7783_v54  ;;  %v7786_v62 = vld [vmem:[#allocation10 + $0xdd0] sm:$0xff] }
 0x72a   : > { %v13386_v18 = vcombine.low %v7786_v62, %v7790_v63 }
 0x72b   : > { %10921 = vmatmul.mubr.bf16.vlgmr.msra.gmra.mrb[4].mxu0 %v15666_v32  ;;  %11093 = vmatmul.mubr.bf16.vlgmr.msra.gmra.mrb[4].mxu1 %v15666_v32  ;;  %v13348_v32 = vcombine.low %v7747_v9, %v7751_v11 }
 0x72c   : > { %10932 = vmatpush1.bf16.msra.mxu0 %v13330_v2  ;;  %11104 = vmatpush1.bf16.msra.mxu1 %v13332_v3  ;;  %v7791_v2 = vld [vmem:[#allocation10 + $0xdf8] sm:$0xff] }
 0x72d   : > { %10933 = vmatprep.subr.bf16.mxu0 %v13339_v4  ;;  %11105 = vmatprep.subr.bf16.mxu1 %v13341_v58  ;;  %v13389_v21 = vcombine.high %v7787_v1, %v7791_v2  ;;  %v13388_v26 = vcombine.low %v7787_v1, %v7791_v2  ;;  %v7823_v1 = vld [vmem:[#allocation10 + $0xef8] sm:$0xff] }
 0x72e   : > { %10963 = vmatprep.mubr.bf16.mxu0 %v15668_v41  ;;  %11135 = vmatprep.mubr.bf16.mxu1 %v15668_v41  ;;  %v13365_v41 = vcombine.high %v7763_v29, %v7767_v30  ;;  %v7799_v29 = vld [vmem:[#allocation10 + $0xe38] sm:$0xff] }
 0x72f   : > { %v13396_v54 = vcombine.low %v7795_v27, %v7799_v29 }
 0x730   : > { %10934 = vmatpush1.bf16.msra.mxu0 %v13338_v12  ;;  %11106 = vmatpush1.bf16.msra.mxu1 %v13340_v13  ;;  %v13387_v13 = vcombine.high %v7786_v62, %v7790_v63 }
 0x731   : > { %10935 = vmatprep.subr.bf16.mxu0 %v13347_v14  ;;  %11107 = vmatprep.subr.bf16.mxu1 %v13349_v15 }
 0x734   : > { %10936 = vmatpush1.bf16.msra.mxu0 %v13346_v24  ;;  %11108 = vmatpush1.bf16.msra.mxu1 %v13348_v32  ;;  %v7798_v24 = vld [vmem:[#allocation10 + $0xe30] sm:$0xff] }
 0x735   : > { %10937 = vmatprep.subr.bf16.mxu0 %v13355_v7  ;;  %11109 = vmatprep.subr.bf16.mxu1 %v13357_v25  ;;  %v13395_v28 = vcombine.high %v7794_v22, %v7798_v24  ;;  %v13394_v53 = vcombine.low %v7794_v22, %v7798_v24 }
 0x738   : > { %10938 = vmatpush1.bf16.msra.mxu0 %v13354_v33  ;;  %11110 = vmatpush1.bf16.msra.mxu1 %v13356_v34 }
 0x739   : > { %10939 = vmatprep.subr.bf16.mxu0 %v13363_v36  ;;  %11111 = vmatprep.subr.bf16.mxu1 %v13365_v41 }
 0x73c   : > { %10940 = vmatpush1.bf16.msra.mxu0 %v13362_v40  ;;  %11112 = vmatpush1.bf16.msra.mxu1 %v13364_v43  ;;  %v13397_v43 = vcombine.high %v7795_v27, %v7799_v29  ;;  %v7847_v27 = vld [vmem:[#allocation10 + $0xfb8] sm:$0xff] }
 0x73d   : > { %10941 = vmatprep.subr.bf16.mxu0 %v13371_v45  ;;  %11113 = vmatprep.subr.bf16.mxu1 %v13373_v48  ;;  %v7802_v45 = vld [vmem:[#allocation10 + $0xe50] sm:$0xff] }
 0x73e   : > { %v10621_v46 = vpop.f32.mrb[0].mxu0  ;;  %v10793_v57 = vpop.f32.mrb[0].mxu1  ;;  %v7806_v48 = vld [vmem:[#allocation10 + $0xe70] sm:$0xff] }
 0x73f   : > { %v13711_v0 = vadd.f32 %v10621_v46, %v7861_v52  ;;  %v10623_v49 = vpop.f32.mrb[1].mxu0  ;;  %v13715_v19 = vadd.f32 %v10793_v57, %v7869_v55  ;;  %v10795_v4 = vpop.f32.mrb[1].mxu1  ;;  %v13402_v46 = vcombine.low %v7802_v45, %v7806_v48  ;;  %v7822_v57 = vld [vmem:[#allocation10 + $0xef0] sm:$0xff] }
 0x740   : > { %v13712_v3 = vadd.f32 %v10623_v49, %v7865_v56  ;;  %v10625_v58 = vpop.f32.mrb[2].mxu0  ;;  %10942 = vmatpush1.bf16.msra.mxu0 %v13370_v59  ;;  %v13716_v8 = vadd.f32 %v10795_v4, %v7873_v60  ;;  %v10797_v11 = vpop.f32.mrb[2].mxu1  ;;  %11114 = vmatpush1.bf16.msra.mxu1 %v13372_v61  ;;  %v7810_v59 = vld [vmem:[#allocation10 + $0xe90] sm:$0xff]  ;;  %v7811_v61 = vld [vmem:[#allocation10 + $0xe98] sm:$0xff] }
 0x741   : > { %v13713_v9 = vadd.f32 %v10625_v58, %v7861_v52  ;;  %v10627_v12 = vpop.f32.mrb[3].mxu0  ;;  %10943 = vmatprep.subr.bf16.mxu0 %v13379_v23  ;;  %v13717_v14 = vadd.f32 %v10797_v11, %v7869_v55  ;;  %v10799_v16 = vpop.f32.mrb[3].mxu1  ;;  %11115 = vmatprep.subr.bf16.mxu1 %v13381_v47  ;;  %v11146_v32 = vmax.f32 %v13711_v0, 0.0  ;;  %v11148_v30 = vmax.f32 %v13715_v19, 0.0  ;;  %v7807_v52 = vld [vmem:[#allocation10 + $0xe78] sm:$0xff]  ;;  %v7818_v0 = vld [vmem:[#allocation10 + $0xed0] sm:$0xff] }
 0x742   : > { %v13714_v15 = vadd.f32 %v10627_v12, %v7865_v56  ;;  %v13718_v25 = vadd.f32 %v10799_v16, %v7873_v60  ;;  %v11147_v33 = vmax.f32 %v13712_v3, 0.0  ;;  %v11149_v41 = vmax.f32 %v13716_v8, 0.0  ;;  %v7814_v60 = vld [vmem:[#allocation10 + $0xeb0] sm:$0xff]  ;;  %v7815_v23 = vld [vmem:[#allocation10 + $0xeb8] sm:$0xff] }
 0x743   : > { %v11154_v7 = vmax.f32 %v13713_v9, 0.0  ;;  %v11156_v34 = vmax.f32 %v13717_v14, 0.0  ;;  %v13403_v55 = vcombine.high %v7802_v45, %v7806_v48  ;;  %v13405_v56 = vcombine.high %v7803_v51, %v7807_v52  ;;  %v7819_v49 = vld [vmem:[#allocation10 + $0xed8] sm:$0xff]  ;;  %v7826_v58 = vld [vmem:[#allocation10 + $0xf10] sm:$0xff] }
 0x744   : > { %v11155_v36 = vmax.f32 %v13714_v15, 0.0  ;;  %10944 = vmatpush1.bf16.msra.mxu0 %v13378_v6  ;;  %v11157_v17 = vmax.f32 %v13718_v25, 0.0  ;;  %11116 = vmatpush1.bf16.msra.mxu1 %v13380_v31  ;;  %v13404_v47 = vcombine.low %v7803_v51, %v7807_v52  ;;  %v13411_v62 = vcombine.high %v7810_v59, %v7814_v60  ;;  %v7830_v6 = vld [vmem:[#allocation10 + $0xf30] sm:$0xff]  ;;  %v7827_v31 = vld [vmem:[#allocation10 + $0xf18] sm:$0xff] }
 0x745   : > { %v15710_v37 = vpack.c.bf16 %v11154_v7, %v11146_v32  ;;  %10945 = vmatprep.subr.bf16.mxu0 %v13387_v13  ;;  %v15712_v39 = vpack.c.bf16 %v11156_v34, %v11148_v30  ;;  %11117 = vmatprep.subr.bf16.mxu1 %v13389_v21  ;;  %v13413_v63 = vcombine.high %v7811_v61, %v7815_v23  ;;  %v7831_v8 = vld [vmem:[#allocation10 + $0xf38] sm:$0xff]  ;;  %v7834_v14 = vld [vmem:[#allocation10 + $0xf50] sm:$0xff] }
 0x746   : > { %v15714_v40 = vpack.c.bf16 %v11155_v36, %v11147_v33  ;;  %v15716_v50 = vpack.c.bf16 %v11157_v17, %v11149_v41  ;;  %v13410_v2 = vcombine.low %v7810_v59, %v7814_v60  ;;  %v13412_v19 = vcombine.low %v7811_v61, %v7815_v23  ;;  %v7838_v15 = vld [vmem:[#allocation10 + $0xf70] sm:$0xff]  ;;  %v7835_v16 = vld [vmem:[#allocation10 + $0xf58] sm:$0xff]  ;;  %v13945_v59 = vld [vmem:[#allocation13 + $0x80] sm:$0xff]  }
 0x747   : > { %v13419_v3 = vcombine.high %v7818_v0, %v7822_v57  ;;  %v13421_v4 = vcombine.high %v7819_v49, %v7823_v1  ;;  %v13418_v9 = vcombine.low %v7818_v0, %v7822_v57  ;;  %v13420_v11 = vcombine.low %v7819_v49, %v7823_v1  ;;  %v7842_v7 = vld [vmem:[#allocation10 + $0xf90] sm:$0xff]  ;;  %v7851_v17 = vld [vmem:[#allocation10 + $0xfd8] sm:$0xff]  ;;  %v13954_v57 = vld [vmem:[#allocation13 + $0x58] sm:$0xff]  }
 0x748   : > { %10946 = vmatpush1.bf16.msra.mxu0 %v13386_v18  ;;  %11118 = vmatpush1.bf16.msra.mxu1 %v13388_v26  ;;  %v13427_v12 = vcombine.high %v7826_v58, %v7830_v6  ;;  %v13429_v13 = vcombine.high %v7827_v31, %v7831_v8  ;;  %v7839_v18 = vld [vmem:[#allocation10 + $0xf78] sm:$0xff]  ;;  %v13426_v21 = vcombine.low %v7826_v58, %v7830_v6  ;;  %v7846_v25 = vld [vmem:[#allocation10 + $0xfb0] sm:$0xff]  ;;  %v13956_v49 = vld [vmem:[#allocation13 + $0x18] sm:$0xff]  }
 0x749   : > { %10947 = vmatprep.subr.bf16.mxu0 %v13395_v28  ;;  %11119 = vmatprep.subr.bf16.mxu1 %v13397_v43  ;;  %v13428_v22 = vcombine.low %v7827_v31, %v7831_v8  ;;  %v13435_v24 = vcombine.high %v7834_v14, %v7838_v15  ;;  %v13437_v32 = vcombine.high %v7835_v16, %v7839_v18  ;;  %v7843_v26 = vld [vmem:[#allocation10 + $0xf98] sm:$0xff]  ;;  %v7850_v36 = vld [vmem:[#allocation10 + $0xfd0] sm:$0xff]  ;;  %v13958_v1 = vld [vmem:[#allocation13 + $0x60] sm:$0xff]  }
 0x74a   : > { %v13434_v29 = vcombine.low %v7834_v14, %v7838_v15  ;;  %v13436_v30 = vcombine.low %v7835_v16, %v7839_v18  ;;  %v13443_v33 = vcombine.high %v7842_v7, %v7846_v25  ;;  %v13445_v34 = vcombine.high %v7843_v26, %v7847_v27  ;;  %v7854_v41 = vld [vmem:[#allocation10 + $0xff0] sm:$0xff]  ;;  %v7855_v28 = vld [vmem:[#allocation10 + $0xff8] sm:$0xff]  ;;  %v13972_v14 = vld [vmem:[#allocation13 + $0x38] sm:$0xff]  }
 0x74b   : > { %v13442_v43 = vcombine.low %v7842_v7, %v7846_v25  ;;  %v13444_v45 = vcombine.low %v7843_v26, %v7847_v27  ;;  %v13451_v48 = vcombine.high %v7850_v36, %v7854_v41  ;;  %v13453_v51 = vcombine.high %v7851_v17, %v7855_v28  ;;  %v13946_v60 = vld [vmem:[#allocation13 + $0x48] sm:$0xff]   ;;  %v13953_v0 = vld [vmem:[#allocation13 + $0x90] sm:$0xff]   ;;  %v13973_v15 = vld [vmem:[#allocation13 + $0xb8] sm:$0xff]  }
 0x74c   : > { %10948 = vmatpush1.bf16.msra.mxu0 %v13394_v53  ;;  %11120 = vmatpush1.bf16.msra.mxu1 %v13396_v54  ;;  %v13450_v52 = vcombine.low %v7850_v36, %v7854_v41  ;;  %v13452_v53 = vcombine.low %v7851_v17, %v7855_v28  ;;  %v13942_v54 = vld [vmem:[#allocation13 + $0x40] sm:$0xff]   ;;  %v13947_v61 = vld [vmem:[#allocation13 + $0xc8] sm:$0xff]   ;;  %v13966_v31 = vld [vmem:[#allocation13 + $0x70] sm:$0xff]  }
 0x74d   : > { %10949 = vmatprep.subr.bf16.mxu0 %v13403_v55  ;;  %11121 = vmatprep.subr.bf16.mxu1 %v13405_v56  ;;  %v13943_v55 = vld [vmem:[#allocation13 + $0xc0] sm:$0xff]   ;;  %v13948_v23 = vld [vmem:[#allocation13 + $0x8] sm:$0xff]   ;;  %v13967_v8 = vld [vmem:[#allocation13 + $0xf0] sm:$0xff]  }
 0x74e   : > { %v13944_v56 = vld [vmem:[#allocation13] sm:$0xff]   ;;  %v13964_v58 = vld [vmem:[#allocation13 + $0x28] sm:$0xff]   ;;  %v13982_v26 = vld [vmem:[#allocation13 + $0x150] sm:$0xff]  }
 0x74f   : > { %v13965_v6 = vld [vmem:[#allocation13 + $0xa8] sm:$0xff]   ;;  %v13974_v16 = vld [vmem:[#allocation13 + $0x140] sm:$0xff]   ;;  %v13983_v27 = vld [vmem:[#allocation13 + $0x1d0] sm:$0xff]  }
 0x750   : > { %10950 = vmatpush1.bf16.msra.mxu0 %v13402_v46  ;;  %11122 = vmatpush1.bf16.msra.mxu1 %v13404_v47  ;;  %v13949_v46 = vld [vmem:[#allocation13 + $0x88] sm:$0xff]   ;;  %v13950_v47 = vld [vmem:[#allocation13 + $0x50] sm:$0xff]   ;;  %v13975_v18 = vld [vmem:[#allocation13 + $0x1c0] sm:$0xff]  }
 0x751   : > { %10951 = vmatprep.subr.bf16.mxu0 %v13411_v62  ;;  %11123 = vmatprep.subr.bf16.mxu1 %v13413_v63  ;;  %v13951_v62 = vld [vmem:[#allocation13 + $0xd0] sm:$0xff]   ;;  %v13980_v7 = vld [vmem:[#allocation13 + $0x108] sm:$0xff]   ;;  %v13990_v36 = vld [vmem:[#allocation13 + $0x160] sm:$0xff]  }
 0x752   : > { %v13952_v63 = vld [vmem:[#allocation13 + $0x10] sm:$0xff]   ;;  %v13981_v25 = vld [vmem:[#allocation13 + $0x188] sm:$0xff]   ;;  %v13991_v41 = vld [vmem:[#allocation13 + $0x1e0] sm:$0xff]  }
 0x753   : > { %v13992_v17 = vld [vmem:[#allocation13 + $0x120] sm:$0xff]  }
 0x754   : > { %10952 = vmatpush1.bf16.msra.mxu0 %v13410_v2  ;;  %11124 = vmatpush1.bf16.msra.mxu1 %v13412_v19  ;;  %v13959_v2 = vld [vmem:[#allocation13 + $0xe0] sm:$0xff]  }
 0x755   : > { %10953 = vmatprep.subr.bf16.mxu0 %v13419_v3  ;;  %11125 = vmatprep.subr.bf16.mxu1 %v13421_v4  ;;  %v13961_v19 = vld [vmem:[#allocation13 + $0xa0] sm:$0xff]   ;;  %v13962_v3 = vld [vmem:[#allocation13 + $0x68] sm:$0xff]  }
 0x756   : > { %v13963_v4 = vld [vmem:[#allocation13 + $0xe8] sm:$0xff]   ;;  %v13993_v28 = vld [vmem:[#allocation13 + $0x1a0] sm:$0xff]  }
 0x758   : > { %10954 = vmatpush1.bf16.msra.mxu0 %v13418_v9  ;;  %11126 = vmatpush1.bf16.msra.mxu1 %v13420_v11  ;;  %v13968_v9 = vld [vmem:[#allocation13 + $0x30] sm:$0xff]  }
 0x759   : > { %10955 = vmatprep.subr.bf16.mxu0 %v13427_v12  ;;  %11127 = vmatprep.subr.bf16.mxu1 %v13429_v13  ;;  %v13969_v11 = vld [vmem:[#allocation13 + $0xb0] sm:$0xff]   ;;  %v13970_v12 = vld [vmem:[#allocation13 + $0x78] sm:$0xff]  }
 0x75a   : > { %v13971_v13 = vld [vmem:[#allocation13 + $0xf8] sm:$0xff]  }
 0x75c   : > { %10956 = vmatpush1.bf16.msra.mxu0 %v13426_v21  ;;  %11128 = vmatpush1.bf16.msra.mxu1 %v13428_v22  ;;  %v13976_v21 = vld [vmem:[#allocation13 + $0x100] sm:$0xff]  }
 0x75d   : > { %10957 = vmatprep.subr.bf16.mxu0 %v13435_v24  ;;  %11129 = vmatprep.subr.bf16.mxu1 %v13437_v32  ;;  %v13977_v22 = vld [vmem:[#allocation13 + $0x180] sm:$0xff]   ;;  %v13978_v24 = vld [vmem:[#allocation13 + $0x148] sm:$0xff]  }
 0x75e   : > { %v13979_v32 = vld [vmem:[#allocation13 + $0x1c8] sm:$0xff]  }
 0x760   : > { %10958 = vmatpush1.bf16.msra.mxu0 %v13434_v29  ;;  %11130 = vmatpush1.bf16.msra.mxu1 %v13436_v30  ;;  %v13984_v29 = vld [vmem:[#allocation13 + $0x110] sm:$0xff]  }
 0x761   : > { %10959 = vmatprep.subr.bf16.mxu0 %v13443_v33  ;;  %11131 = vmatprep.subr.bf16.mxu1 %v13445_v34  ;;  %v13985_v30 = vld [vmem:[#allocation13 + $0x190] sm:$0xff]   ;;  %v13986_v33 = vld [vmem:[#allocation13 + $0x158] sm:$0xff]  }
 0x762   : > { %v13987_v34 = vld [vmem:[#allocation13 + $0x1d8] sm:$0xff]  }
 0x764   : > { %10960 = vmatpush1.bf16.msra.mxu0 %v13442_v43  ;;  %11132 = vmatpush1.bf16.msra.mxu1 %v13444_v45  ;;  %v13994_v43 = vld [vmem:[#allocation13 + $0x168] sm:$0xff]  }
 0x765   : > { %10961 = vmatprep.subr.bf16.mxu0 %v13451_v48  ;;  %11133 = vmatprep.subr.bf16.mxu1 %v13453_v51  ;;  %v13995_v45 = vld [vmem:[#allocation13 + $0x1e8] sm:$0xff]  }
 0x766   : > { %v13996_v48 = vld [vmem:[#allocation13 + $0x128] sm:$0xff]  }
 0x767   : > { %v13997_v51 = vld [vmem:[#allocation13 + $0x1a8] sm:$0xff]  }
 0x768   : > { %10962 = vmatpush1.bf16.msra.mxu0 %v13450_v52  ;;  %11134 = vmatpush1.bf16.msra.mxu1 %v13452_v53  ;;  %v13998_v52 = vld [vmem:[#allocation13 + $0x170] sm:$0xff]  }
 0x769   : > { %13527 = vmatprep.subr.bf16.mxu0 %v13942_v54  ;;  %13549 = vmatprep.subr.bf16.mxu1 %v13943_v55  ;;  %v13999_v53 = vld [vmem:[#allocation13 + $0x1f0] sm:$0xff]  }
 0x76a   : > { %v14000_v54 = vld [vmem:[#allocation13 + $0x130] sm:$0xff]  }
 0x76b   : > { %10964 = vmatmul.mubr.bf16.vlgmr.msra.gmra.mrb[4].mxu0 %v15678_v20  ;;  %11136 = vmatmul.mubr.bf16.vlgmr.msra.gmra.mrb[4].mxu1 %v15678_v20  ;;  %v13955_v20 = vld [vmem:[#allocation13 + $0xd8] sm:$0xff]   ;;  %v14001_v55 = vld [vmem:[#allocation13 + $0x1b0] sm:$0xff]  }
 0x76c   : > { %13528 = vmatpush3.bf16.msra.mxu0 %v13944_v56  ;;  %11721 = vmatprep.mubr.bf16.mxu0 %v15714_v40  ;;  %v13957_v40 = vld [vmem:[#allocation13 + $0x98] sm:$0xff]  }
 0x76d   : > { %13550 = vmatpush3.bf16.msra.mxu1 %v13945_v59  ;;  %11762 = vmatprep.mubr.bf16.mxu1 %v15716_v50  ;;  %v13960_v50 = vld [vmem:[#allocation13 + $0x20] sm:$0xff]   ;;  %v14002_v56 = vld [vmem:[#allocation13 + $0x178] sm:$0xff]  }
 0x76e   : > { %13529 = vmatprep.subr.bf16.mxu0 %v13946_v60  ;;  %13551 = vmatprep.subr.bf16.mxu1 %v13947_v61  ;;  %v14003_v59 = vld [vmem:[#allocation13 + $0x1f8] sm:$0xff]  }
 0x76f   : > { %v14004_v60 = vld [vmem:[#allocation13 + $0x138] sm:$0xff]  }
 0x770   : > { %13530 = vmatpush3.bf16.msra.mxu0 %v13948_v23  ;;  %v14005_v61 = vld [vmem:[#allocation13 + $0x1b8] sm:$0xff]   ;;  %v7877_v23 = vrot.slane %v15696_v42, %v7282_v38 }
 0x771   : > { %13552 = vmatpush3.bf16.msra.mxu1 %v13949_v46  ;;  %13531 = vmatprep.subr.bf16.mxu0 %v13950_v47  ;;  %v7885_v46 = vrot.slane %v15696_v42, %v7290_v35  ;;  %v7881_v47 = vrot.slane %v15696_v42, %v7286_v5 }
 0x772   : > { %13553 = vmatprep.subr.bf16.mxu1 %v13951_v62  ;;  %v7889_v62 = vrot.slane %v15696_v42, %v7294_v44 }
 0x774   : > { %13532 = vmatpush3.bf16.msra.mxu0 %v13952_v63 }
 0x775   : > { %13554 = vmatpush3.bf16.msra.mxu1 %v13953_v0  ;;  %13533 = vmatprep.subr.bf16.mxu0 %v13954_v57 }
 0x776   : > { %13555 = vmatprep.subr.bf16.mxu1 %v13955_v20 }
 0x778   : > { %13534 = vmatpush3.bf16.msra.mxu0 %v13956_v49 }
 0x779   : > { %13556 = vmatpush3.bf16.msra.mxu1 %v13957_v40  ;;  %13535 = vmatprep.subr.bf16.mxu0 %v13958_v1 }
 0x77a   : > { %13557 = vmatprep.subr.bf16.mxu1 %v13959_v2 }
 0x77c   : > { %13536 = vmatpush3.bf16.msra.mxu0 %v13960_v50 }
 0x77d   : > { %13558 = vmatpush3.bf16.msra.mxu1 %v13961_v19  ;;  %13537 = vmatprep.subr.bf16.mxu0 %v13962_v3 }
 0x77e   : > { %13559 = vmatprep.subr.bf16.mxu1 %v13963_v4 }
 0x780   : > { %13538 = vmatpush3.bf16.msra.mxu0 %v13964_v58 }
 0x781   : > { %13560 = vmatpush3.bf16.msra.mxu1 %v13965_v6  ;;  %13539 = vmatprep.subr.bf16.mxu0 %v13966_v31 }
 0x782   : > { %13561 = vmatprep.subr.bf16.mxu1 %v13967_v8 }
 0x784   : > { %13540 = vmatpush3.bf16.msra.mxu0 %v13968_v9 }
 0x785   : > { %13562 = vmatpush3.bf16.msra.mxu1 %v13969_v11  ;;  %13541 = vmatprep.subr.bf16.mxu0 %v13970_v12 }
 0x786   : > { %13563 = vmatprep.subr.bf16.mxu1 %v13971_v13 }
 0x788   : > { %13542 = vmatpush3.bf16.msra.mxu0 %v13972_v14 }
 0x789   : > { %13564 = vmatpush3.bf16.msra.mxu1 %v13973_v15  ;;  %13571 = vmatprep.subr.bf16.mxu0 %v13974_v16 }
 0x78a   : > { %13593 = vmatprep.subr.bf16.mxu1 %v13975_v18 }
 0x78b   : > { %11722 = vmatmul.mubr.bf16.vlgmr.msra.gmra.mrb[8].mxu0 %v15710_v37  ;;  %v13988_v37 = vld [vmem:[#allocation13 + $0x118] sm:$0xff]  }
 0x78c   : > { %11763 = vmatmul.mubr.bf16.vlgmr.msra.gmra.mrb[8].mxu1 %v15712_v39  ;;  %13572 = vmatpush3.bf16.msra.mxu0 %v13976_v21  ;;  %v13989_v39 = vld [vmem:[#allocation13 + $0x198] sm:$0xff]   ;;  %v13454_v21 = vld [vmem:[#allocation14] ss:$0 sm:$0xff] }
 0x78d   : > { %13594 = vmatpush3.bf16.msra.mxu1 %v13977_v22  ;;  %13573 = vmatprep.subr.bf16.mxu0 %v13978_v24 }
 0x78e   : > { %13595 = vmatprep.subr.bf16.mxu1 %v13979_v32 }
 0x790   : > { %13574 = vmatpush3.bf16.msra.mxu0 %v13980_v7 }
 0x791   : > { %13596 = vmatpush3.bf16.msra.mxu1 %v13981_v25  ;;  %13575 = vmatprep.subr.bf16.mxu0 %v13982_v26 }
 0x792   : > { %13597 = vmatprep.subr.bf16.mxu1 %v13983_v27 }
 0x794   : > { %13576 = vmatpush3.bf16.msra.mxu0 %v13984_v29 }
 0x795   : > { %13598 = vmatpush3.bf16.msra.mxu1 %v13985_v30  ;;  %13577 = vmatprep.subr.bf16.mxu0 %v13986_v33 }
 0x796   : > { %13599 = vmatprep.subr.bf16.mxu1 %v13987_v34 }
 0x798   : > { %13578 = vmatpush3.bf16.msra.mxu0 %v13988_v37 }
 0x799   : > { %13600 = vmatpush3.bf16.msra.mxu1 %v13989_v39  ;;  %13579 = vmatprep.subr.bf16.mxu0 %v13990_v36 }
 0x79a   : > { %13601 = vmatprep.subr.bf16.mxu1 %v13991_v41 }
 0x79c   : > { %13580 = vmatpush3.bf16.msra.mxu0 %v13992_v17 }
 0x79d   : > { %13602 = vmatpush3.bf16.msra.mxu1 %v13993_v28  ;;  %13581 = vmatprep.subr.bf16.mxu0 %v13994_v43 }
 0x79e   : > { %13603 = vmatprep.subr.bf16.mxu1 %v13995_v45 }
 0x7a0   : > { %13582 = vmatpush3.bf16.msra.mxu0 %v13996_v48 }
 0x7a1   : > { %13604 = vmatpush3.bf16.msra.mxu1 %v13997_v51  ;;  %13583 = vmatprep.subr.bf16.mxu0 %v13998_v52 }
 0x7a2   : > { %13605 = vmatprep.subr.bf16.mxu1 %v13999_v53 }
 0x7a4   : > { %13584 = vmatpush3.bf16.msra.mxu0 %v14000_v54 }
 0x7a5   : > { %13606 = vmatpush3.bf16.msra.mxu1 %v14001_v55  ;;  %13585 = vmatprep.subr.bf16.mxu0 %v14002_v56 }
 0x7a6   : > { %13607 = vmatprep.subr.bf16.mxu1 %v14003_v59 }
 0x7a8   : > { %13586 = vmatpush3.bf16.msra.mxu0 %v14004_v60 }
 0x7a9   : > { %13608 = vmatpush3.bf16.msra.mxu1 %v14005_v61 }
 0x83e   : > { %v10965_v63 = vpop.f32.mrb[4].mxu0  ;;  %v11137_v57 = vpop.f32.mrb[4].mxu1 }
 0x83f   : > { %v13719_v0 = vadd.f32 %v10965_v63, %v7877_v23  ;;  %v10967_v20 = vpop.f32.mrb[5].mxu0  ;;  %v13723_v49 = vadd.f32 %v11137_v57, %v7885_v46  ;;  %v11139_v1 = vpop.f32.mrb[5].mxu1 }
 0x840   : > { %v13720_v40 = vadd.f32 %v10967_v20, %v7881_v47  ;;  %v10969_v38 = vpop.f32.mrb[6].mxu0  ;;  %v13724_v2 = vadd.f32 %v11139_v1, %v7889_v62  ;;  %v11141_v19 = vpop.f32.mrb[6].mxu1 }
 0x841   : > { %v13721_v50 = vadd.f32 %v10969_v38, %v7877_v23  ;;  %v10971_v35 = vpop.f32.mrb[7].mxu0  ;;  %v13725_v3 = vadd.f32 %v11141_v19, %v7885_v46  ;;  %v11143_v58 = vpop.f32.mrb[7].mxu1  ;;  %v11150_v5 = vmax.f32 %v13719_v0, 0.0  ;;  %v11152_v31 = vmax.f32 %v13723_v49, 0.0 }
 0x842   : > { %v13722_v4 = vadd.f32 %v10971_v35, %v7881_v47  ;;  %v13726_v10 = vadd.f32 %v11143_v58, %v7889_v62  ;;  %v11151_v44 = vmax.f32 %v13720_v40, 0.0  ;;  %v11153_v9 = vmax.f32 %v13724_v2, 0.0 }
 0x843   : > { %v11158_v6 = vmax.f32 %v13721_v50, 0.0  ;;  %v11160_v42 = vmax.f32 %v13725_v3, 0.0 }
 0x844   : > { %v11159_v8 = vmax.f32 %v13722_v4, 0.0  ;;  %v11161_v12 = vmax.f32 %v13726_v10, 0.0 }
 0x845   : > { %v11166_v11 = vpack.c.bf16 %v11158_v6, %v11150_v5  ;;  %v11168_v13 = vpack.c.bf16 %v11160_v42, %v11152_v31 }
 0x846   : > { %v11167_v14 = vpack.c.bf16 %v11159_v8, %v11151_v44  ;;  %v11169_v15 = vpack.c.bf16 %v11161_v12, %v11153_v9 }
 0x848   : > { %11803 = vmatprep.mubr.bf16.mxu0 %v11167_v14  ;;  %11844 = vmatprep.mubr.bf16.mxu1 %v11169_v15 }
 0x849   : > { %11804 = vmatmul.mubr.bf16.vlgmr.msra.gmra.mrb[12].mxu0 %v11166_v11  ;;  %11845 = vmatmul.mubr.bf16.vlgmr.msra.gmra.mrb[12].mxu1 %v11168_v13 }
 0x85e   : > { %v13543_v16 = vpop.f32.mrb[8].mxu0 }
 0x85f   : > { %v13565_v18 = vpop.f32.mrb[8].mxu1  ;;  %v13544_v22 = vpop.f32.mrb[9].mxu0 }
 0x860   : > { %v13545_v24 = vadd.f32 %v13544_v22, %v13543_v16  ;;  %v13566_v32 = vpop.f32.mrb[9].mxu1  ;;  %v13546_v7 = vpop.f32.mrb[10].mxu0 }
 0x861   : > { %v13567_v25 = vadd.f32 %v13566_v32, %v13565_v18  ;;  %v13568_v26 = vpop.f32.mrb[10].mxu1  ;;  %v13547_v27 = vpop.f32.mrb[11].mxu0 }
 0x862   : > { %v11724_v29 = vadd.f32 %v13545_v24, %v13454_v21  ;;  %v13548_v30 = vadd.f32 %v13547_v27, %v13546_v7  ;;  %v13569_v33 = vpop.f32.mrb[11].mxu1 }
 0x863   : > { %v13570_v34 = vadd.f32 %v13569_v33, %v13568_v26 }
 0x864   : > { %v11765_v37 = vadd.f32 %v13567_v25, %v11724_v29  ;;  %v11727_v39 = vadd.f32 %v13548_v30, %v13454_v21 }
 0x866   : > { %v11768_v36 = vadd.f32 %v13570_v34, %v11727_v39 }
 0x91c   : > { %v13587_v41 = vpop.f32.mrb[12].mxu0  ;;  %v13609_v17 = vpop.f32.mrb[12].mxu1 }
 0x91d   : > { %v13588_v28 = vpop.f32.mrb[13].mxu0  ;;  %v13610_v45 = vpop.f32.mrb[13].mxu1 }
 0x91e   : > { %v13589_v43 = vadd.f32 %v13588_v28, %v13587_v41  ;;  %v13590_v48 = vpop.f32.mrb[14].mxu0  ;;  %v13611_v51 = vadd.f32 %v13610_v45, %v13609_v17  ;;  %v13612_v52 = vpop.f32.mrb[14].mxu1 }
 0x91f   : > { %v13591_v53 = vpop.f32.mrb[15].mxu0  ;;  %v13613_v56 = vpop.f32.mrb[15].mxu1 }
 0x920   : > { %v11806_v54 = vadd.f32 %v13589_v43, %v11765_v37  ;;  %v13592_v55 = vadd.f32 %v13591_v53, %v13590_v48  ;;  %v13614_v59 = vadd.f32 %v13613_v56, %v13612_v52 }
 0x922   : > { %v11847_v60 = vadd.f32 %v13611_v51, %v11806_v54  ;;  %v11809_v61 = vadd.f32 %v13592_v55, %v11768_v36 }
 0x924   : > { %11853 = vst [vmem:[%s15768_s8] sm:$0xff] %v11847_v60  ;;  %v11850_v23 = vadd.f32 %v13614_v59, %v11809_v61 }
 0x926   : > { %11854 = vst [vmem:[%s15768_s8 + $0x8] sm:$0xff] %v11850_v23 }
 0x927 PF: > { %s27_s10 = sadd.s32 1, %s14305_s10   ;;  %s15799_s27 = smov %s14289_s28 }
 0x928   : > { %p24_p13 = scmp.ge.s32.totalorder %s27_s10, 9   ;;  %s15800_s28 = smov %s14293_s29 }
 0x929   : > { %s15801_s29 = smov %s14572_s14  ;;  %s15802_s30 = smov %s14301_s9 }
 0x92a   : > { %s15803_s9 = smov %s15805_s26  ;;  %26 = sbr.rel (!%p24_p13) target bundleno = 16 (0x10), region = 137 }
 0x931   :  { %11877 = vsyncpa [#allocation4], 1 }
 0x932   :  { %11879 = vsyncpa [#allocation4 + $0x1], 1 }
 0x933   :  { %11880 = vsyncpa [#allocation6], 1 }
 0x934   :  { %11882 = vsyncpa [#allocation6 + $0x1], 1 }
 0x935   :  { %11883 = vsyncpa [#allocation9], 1 }
 0x936   :  { %11884 = vsyncpa [#allocation12], 1 }
 0x937   :  { %11885 = vsyncpa [#allocation15], 1 }

</bundles_post_ra>
